<compile_context>
chip_gen: v5e
topology: v5e:2x2
jax: 0.10.0
libtpu: 0.0.40
codegen_flags: <defaults>
</compile_context>

<pallas_src>
import functools
import math

import jax
import jax.numpy as jnp
import numpy as np
from jax import lax
from jax.experimental import pallas as pl
from jax.experimental.pallas import tpu as pltpu

EPS = 1e-5    # PyTorch BatchNorm2d default eps
LANE = 128    # TPU lane width; per-tap channel stride is padded to this


def _round_up(x, m):
    return ((x + m - 1) // m) * m


# ---------------------------------------------------------------------------
# ConvBlock kernel: Conv3x3(pad=1) -> folded (bias+BN) -> ReLU -> [AvgPool(k)]
# ---------------------------------------------------------------------------
def _conv_block_kernel(x_ref, w_ref, sc_ref, sh_ref, *rest, pool):
    if pool > 1:
        pw_ref, o_ref, pad_ref, patch_ref = rest
    else:
        pw_ref = None
        o_ref, pad_ref, patch_ref = rest

    _, H, W, Cp = x_ref.shape          # Cp = Cin padded to a multiple of 128

    # Zero only the halo of the padded-input scratch (interior fully
    # overwritten below).  The interior starts at column 2 so halo and
    # interior never share a packed bf16 sublane word.  Done every step:
    # with a "parallel" batch axis each TensorCore owns its scratch and only
    # one core ever sees program_id == 0.
    zrow = jnp.zeros((W + 4, Cp), jnp.bfloat16)
    pad_ref[0] = zrow
    pad_ref[H + 1] = zrow
    zcol = jnp.zeros((H + 2, 2, Cp), jnp.bfloat16)
    pad_ref[:, 0:2, :] = zcol
    pad_ref[:, W + 2:W + 4, :] = zcol
    pad_ref[1:H + 1, 2:W + 2, :] = x_ref[0]

    # im2col: pack the 9 shifted taps side by side.  Destination lane offsets
    # t*Cp are multiples of 128 -> full-width unmasked stores (bf16).
    for dy in range(3):
        for dx in range(3):
            t = dy * 3 + dx
            patch_ref[:, t * Cp:(t + 1) * Cp] = (
                pad_ref[dy:dy + H, 1 + dx:1 + dx + W, :].reshape(H * W, Cp))

    # One MXU matmul for the whole 3x3 conv: bf16 x bf16 -> f32 accumulator.
    acc = jnp.dot(patch_ref[...], w_ref[...],
                  preferred_element_type=jnp.float32)          # (H*W, C_pad)

    # Folded conv-bias + eval-mode BatchNorm + ReLU, in f32.
    h = jnp.maximum(acc * sc_ref[...] + sh_ref[...], 0.0)

    if pool > 1:
        # Fused AvgPool2d(pool): sum `pool` consecutive image rows with
        # leading-dim adds (layout no-op reshape + static indexing), then pool
        # and decimate along W with one tiny (Wo, W) matmul per output row.
        # No O((H*W)^2) pooling operator and no extra resident input.
        Ho, Wo = H // pool, W // pool
        hh = h.reshape(Ho, pool, W, -1)          # split of the leading dim only
        ph = hh[:, 0]
        for dy in range(1, pool):
            ph = ph + hh[:, dy]                   # (Ho, W, C_pad) f32
        pw = pw_ref[...]                          # (Wo, W), rows hold 1/k^2
        rows = [jnp.dot(pw, ph[ho], preferred_element_type=jnp.float32)
                for ho in range(Ho)]
        h = jnp.concatenate(rows, axis=0)         # (Ho*Wo, C_pad)

    o_ref[0] = h.astype(o_ref.dtype)              # lane-dense 2-D bf16 store


def conv_block_forward(x_pad, layer):
    """x_pad: (N, H, W, Cin_pad) bf16 with zero-padded channels.
    Returns ((N, Ho, Wo, C_pad) bf16 with zero-padded channels, C_true)."""
    N, H, W, Cin_pad = x_pad.shape
    w = jnp.asarray(layer["w"], jnp.float32)                  # (3, 3, Cin, C) HWIO
    Cin, C = int(w.shape[2]), int(w.shape[3])
    assert Cin_pad >= Cin and Cin_pad % LANE == 0
    C_pad = _round_up(C, LANE)
    pool = int(layer["pool"])
    assert H % pool == 0 and W % pool == 0, "AvgPool2d needs divisible spatial dims"
    Ho, Wo = H // pool, W // pool

    # im2col weight, zero-padded to the lane-aligned tap stride / channel count.
    w_p = jnp.zeros((3, 3, Cin_pad, C_pad), jnp.float32).at[:, :, :Cin, :C].set(w)
    w_mat = w_p.reshape(9 * Cin_pad, C_pad).astype(jnp.bfloat16)

    # Fold conv bias + eval-mode BatchNorm into per-channel scale/shift.
    # Padded output channels get scale=shift=0 -> exact zeros after ReLU.
    b = jnp.asarray(layer["b"], jnp.float32)
    if "bn_g" in layer:
        inv = jnp.asarray(layer["bn_g"], jnp.float32) * lax.rsqrt(
            jnp.asarray(layer["bn_v"], jnp.float32) + EPS)
        scale = inv
        shift = (b - jnp.asarray(layer["bn_m"], jnp.float32)) * inv \
            + jnp.asarray(layer["bn_b"], jnp.float32)
    else:
        scale = jnp.ones((C,), jnp.float32)
        shift = b
    scale_p = jnp.zeros((1, C_pad), jnp.float32).at[0, :C].set(scale)
    shift_p = jnp.zeros((1, C_pad), jnp.float32).at[0, :C].set(shift)

    args = [x_pad, w_mat, scale_p, shift_p]
    in_specs = [
        pl.BlockSpec((1, H, W, Cin_pad), lambda n: (n, 0, 0, 0)),
        pl.BlockSpec((9 * Cin_pad, C_pad), lambda n: (0, 0)),
        pl.BlockSpec((1, C_pad), lambda n: (0, 0)),
        pl.BlockSpec((1, C_pad), lambda n: (0, 0)),
    ]
    if pool > 1:
        pw = np.zeros((Wo, W), np.float32)
        for wo in range(Wo):
            pw[wo, wo * pool:(wo + 1) * pool] = 1.0 / (pool * pool)
        args.append(jnp.asarray(pw))
        in_specs.append(pl.BlockSpec((Wo, W), lambda n: (0, 0)))

    # VMEM budget (double-buffered blocks + scratch) and advisory cost.
    blk_in = H * W * Cin_pad * 2
    blk_out = Ho * Wo * C_pad * 2
    w_bytes = 9 * Cin_pad * C_pad * 2
    scratch_bytes = (H + 2) * (W + 4) * Cin_pad * 2 + H * W * 9 * Cin_pad * 2
    vmem = 2 * (blk_in + blk_out + w_bytes) + scratch_bytes + (2 << 20)
    flops = 2 * N * H * W * 9 * Cin_pad * C_pad
    bytes_acc = int(x_pad.size) * 2 + 9 * Cin_pad * C_pad * 2 + N * Ho * Wo * C_pad * 2

    out = pl.pallas_call(
        functools.partial(_conv_block_kernel, pool=pool),
        out_shape=jax.ShapeDtypeStruct((N, Ho * Wo, C_pad), jnp.bfloat16),
        grid_spec=pltpu.PrefetchScalarGridSpec(
            num_scalar_prefetch=0,
            grid=(N,),
            in_specs=in_specs,
            out_specs=pl.BlockSpec((1, Ho * Wo, C_pad), lambda n: (n, 0, 0)),
            scratch_shapes=[
                pltpu.VMEM((H + 2, W + 4, Cin_pad), jnp.bfloat16),   # padded input
                pltpu.VMEM((H * W, 9 * Cin_pad), jnp.bfloat16),      # im2col patches
            ],
        ),
        compiler_params=pltpu.CompilerParams(
            dimension_semantics=("parallel",),
            vmem_limit_bytes=int(min(64 << 20, max(16 << 20, vmem))),
        ),
        cost_estimate=pl.CostEstimate(flops=flops, transcendentals=0,
                                      bytes_accessed=bytes_acc),
    )(*args)

    return out.reshape(N, Ho, Wo, C_pad), C


# ---------------------------------------------------------------------------
# Tiled Linear (+bias, optional ReLU) kernel, used three times for the FC head.
# Dropout(0.5) layers are identities in eval mode.
# ---------------------------------------------------------------------------
def _linear_kernel(x_ref, w_ref, b_ref, o_ref, acc_ref, *, relu):
    @pl.when(pl.program_id(2) == 0)
    def _init():
        acc_ref[...] = jnp.zeros_like(acc_ref)

    acc_ref[...] += jnp.dot(x_ref[...], w_ref[...],
                            preferred_element_type=jnp.float32)

    @pl.when(pl.program_id(2) == pl.num_programs(2) - 1)
    def _finalize():
        r = acc_ref[...] + b_ref[...]
        if relu:
            r = jnp.maximum(r, 0.0)
        o_ref[...] = r.astype(o_ref.dtype)


def _pick_tile(dim, pref, align):
    """Largest multiple of `align` <= pref that divides dim, else the full dim."""
    if dim <= pref:
        return dim
    t = (pref // align) * align
    while t >= align:
        if dim % t == 0:
            return t
        t -= align
    return dim


def linear_forward(x, w, b, *, relu, out_dtype, tm=256, tn=512, tk=1024):
    M, K = x.shape
    Kw, Nf = w.shape
    assert K == Kw
    tm = _pick_tile(M, tm, 8)
    tn = _pick_tile(Nf, tn, LANE)
    tk = _pick_tile(K, tk, LANE)
    grid = (M // tm, Nf // tn, K // tk)
    b2d = jnp.asarray(b, jnp.float32).reshape(1, Nf)

    out_bytes = jnp.dtype(out_dtype).itemsize
    vmem = (2 * (tm * tk * 2 + tk * tn * 2 + tm * tn * out_bytes)
            + tm * tn * 4 + 2 * Nf * 4 + (2 << 20))
    flops = 2 * M * K * Nf
    bytes_acc = M * K * 2 + K * Nf * 2 + Nf * 4 + M * Nf * out_bytes

    return pl.pallas_call(
        functools.partial(_linear_kernel, relu=relu),
        out_shape=jax.ShapeDtypeStruct((M, Nf), out_dtype),
        grid_spec=pltpu.PrefetchScalarGridSpec(
            num_scalar_prefetch=0,
            grid=grid,
            in_specs=[
                pl.BlockSpec((tm, tk), lambda i, j, k: (i, k)),
                pl.BlockSpec((tk, tn), lambda i, j, k: (k, j)),
                pl.BlockSpec((1, tn), lambda i, j, k: (0, j)),
            ],
            out_specs=pl.BlockSpec((tm, tn), lambda i, j, k: (i, j)),
            scratch_shapes=[pltpu.VMEM((tm, tn), jnp.float32)],
        ),
        compiler_params=pltpu.CompilerParams(
            dimension_semantics=("parallel", "parallel", "arbitrary"),
            vmem_limit_bytes=int(min(64 << 20, max(16 << 20, vmem))),
        ),
        cost_estimate=pl.CostEstimate(flops=flops, transcendentals=0,
                                      bytes_accessed=bytes_acc),
    )(x.astype(jnp.bfloat16), w.astype(jnp.bfloat16), b2d)


# ---------------------------------------------------------------------------
# Full VGG forward (eval mode), NCHW input like PyTorch.
# ---------------------------------------------------------------------------
def vgg_forward(x_nchw, params):
    # init_conv is an empty nn.Sequential -> identity.
    x = jnp.transpose(x_nchw, (0, 2, 3, 1)).astype(jnp.bfloat16)     # NHWC bf16
    cin = x.shape[-1]
    cin_pad = _round_up(cin, LANE)
    x = jnp.pad(x, ((0, 0), (0, 0), (0, 0), (0, cin_pad - cin)))     # lane-align

    c_true = cin
    for layer in params["conv"]:
        x, c_true = conv_block_forward(x, layer)

    N, Ho, Wo, C_pad = x.shape
    # The PyTorch Flatten is channel-major (NCHW).  Instead of transposing the
    # activations, permute the fc1 weight rows on the host to the kernel's
    # NHWC+channel-padded flatten order (zero rows for padded channels).
    flat = x.reshape(N, Ho * Wo * C_pad)                             # bf16, no copy
    d1 = params["fc1_w"].shape[1]
    w1 = params["fc1_w"].reshape(c_true, Ho * Wo, d1).transpose(1, 0, 2)
    w1 = jnp.pad(w1, ((0, 0), (0, C_pad - c_true), (0, 0)))
    w1 = w1.reshape(Ho * Wo * C_pad, d1)

    # FcBlock: Linear -> ReLU -> Dropout(id);  end_layers: Linear -> Dropout(id) -> Linear
    h = linear_forward(flat, w1, params["fc1_b"], relu=True, out_dtype=jnp.bfloat16)
    h = linear_forward(h, params["fc2_w"], params["fc2_b"], relu=False,
                       out_dtype=jnp.bfloat16)
    out = linear_forward(h, params["fc3_w"], params["fc3_b"], relu=False,
                         out_dtype=jnp.float32)
    return out


# ---------------------------------------------------------------------------
# Synthetic parameters + pure-JAX reference (same numerics policy as kernels)
# ---------------------------------------------------------------------------
def init_params(key, cfg):
    f32 = jnp.float32
    keys = iter(jax.random.split(key, 128))
    params = {"conv": []}
    cin = 3
    size = cfg["input_size"]
    for c, pool in zip(cfg["conv_channels"], cfg["max_pool_sizes"]):
        layer = {
            "w": jax.random.normal(next(keys), (3, 3, cin, c), f32)
                 * math.sqrt(2.0 / (9 * c)),
            "b": 0.1 * jax.random.normal(next(keys), (c,), f32),
            "pool": pool,
        }
        if cfg["conv_batch_norm"]:
            layer["bn_g"] = jax.random.uniform(next(keys), (c,), f32, 0.5, 1.5)
            layer["bn_b"] = 0.1 * jax.random.normal(next(keys), (c,), f32)
            layer["bn_m"] = 0.1 * jax.random.normal(next(keys), (c,), f32)
            layer["bn_v"] = jax.random.uniform(next(keys), (c,), f32, 0.5, 1.5)
        params["conv"].append(layer)
        cin = c
        if pool == 2:
            size //= 2
    f_in = size * size * cfg["conv_channels"][-1]
    d1, d2 = cfg["fc_layers"]
    nc = cfg["num_classes"]
    params["fc1_w"] = jax.random.normal(next(keys), (f_in, d1), f32) / math.sqrt(f_in)
    params["fc1_b"] = 0.1 * jax.random.normal(next(keys), (d1,), f32)
    params["fc2_w"] = jax.random.normal(next(keys), (d1, d2), f32) / math.sqrt(d1)
    params["fc2_b"] = 0.1 * jax.random.normal(next(keys), (d2,), f32)
    params["fc3_w"] = jax.random.normal(next(keys), (d2, nc), f32) / math.sqrt(d2)
    params["fc3_b"] = 0.1 * jax.random.normal(next(keys), (nc,), f32)
    return params


def _round_bf16(x):
    return x.astype(jnp.bfloat16).astype(jnp.float32)


def ref_forward(x_nchw, params):
    """Pure-JAX reference (eval mode) with the kernels' numerics policy:
    bf16 matmul/conv operands, f32 accumulation, bf16 activation storage."""
    x = jnp.transpose(x_nchw, (0, 2, 3, 1)).astype(jnp.float32)     # NHWC
    dn = ("NHWC", "HWIO", "NHWC")
    for layer in params["conv"]:
        h = lax.conv_general_dilated(
            x.astype(jnp.bfloat16), jnp.asarray(layer["w"]).astype(jnp.bfloat16),
            (1, 1), "SAME", dimension_numbers=dn,
            preferred_element_type=jnp.float32)
        h = h + layer["b"]
        if "bn_g" in layer:
            inv = layer["bn_g"] / jnp.sqrt(layer["bn_v"] + EPS)
            h = (h - layer["bn_m"]) * inv + layer["bn_b"]
        h = jnp.maximum(h, 0.0)
        k = int(layer["pool"])
        if k > 1:
            n_, hh, ww, cc = h.shape
            h = h.reshape(n_, hh // k, k, ww // k, k, cc).mean(axis=(2, 4))
        x = _round_bf16(h)                           # bf16 inter-layer storage
    n = x.shape[0]
    flat = jnp.transpose(x, (0, 3, 1, 2)).reshape(n, -1)             # channel-major
    h = jnp.dot(flat.astype(jnp.bfloat16), params["fc1_w"].astype(jnp.bfloat16),
                preferred_element_type=jnp.float32) + params["fc1_b"]
    h = _round_bf16(jnp.maximum(h, 0.0))
    h = jnp.dot(h.astype(jnp.bfloat16), params["fc2_w"].astype(jnp.bfloat16),
                preferred_element_type=jnp.float32) + params["fc2_b"]
    h = _round_bf16(h)
    out = jnp.dot(h.astype(jnp.bfloat16), params["fc3_w"].astype(jnp.bfloat16),
                  preferred_element_type=jnp.float32) + params["fc3_b"]
    return out


if __name__ == "__main__":
    cfg = {
        "input_size": 16,
        "num_classes": 10,
        "conv_channels": [4, 8],
        "max_pool_sizes": [2, 2],
        "fc_layers": [32, 16],
        "conv_batch_norm": True,
    }

    key = jax.random.PRNGKey(0)
    kx, kp = jax.random.split(key)
    N = 2
    x = jax.random.normal(kx, (N, 3, cfg["input_size"], cfg["input_size"]), jnp.float32)
    params = init_params(kp, cfg)

    out = vgg_forward(x, params)
    out = jax.block_until_ready(out)

    ref = jax.block_until_ready(ref_forward(x, params))
    assert out.shape == (N, cfg["num_classes"]), out.shape
    # Tolerance accounts for the bf16-operand / f32-accumulator MXU policy and
    # bf16 inter-layer activation storage (same policy as the reference).
    np.testing.assert_allclose(np.asarray(out, np.float32), np.asarray(ref),
                               rtol=2e-2, atol=2e-2)

    print("KERNEL_OK")
</pallas_src>

<mosaic_0001>
module attributes {stable_mosaic.version = 11 : i64} {
  func.func @_conv_block_kernel(%arg0: i32, %arg1: memref<1x16x16x128xbf16, #tpu.memory_space<vmem>>, %arg2: memref<1152x128xbf16, #tpu.memory_space<vmem>>, %arg3: memref<1x128xf32, #tpu.memory_space<vmem>>, %arg4: memref<1x128xf32, #tpu.memory_space<vmem>>, %arg5: memref<8x16xf32, #tpu.memory_space<vmem>>, %arg6: memref<1x64x128xbf16, #tpu.memory_space<vmem>>, %arg7: memref<18x20x128xbf16, #tpu.memory_space<vmem>>, %arg8: memref<256x1152xbf16, #tpu.memory_space<vmem>>) attributes {dimension_semantics = [#tpu.dimension_semantics<parallel>], iteration_bounds = array<i64: 2>, scalar_prefetch = 0 : i64, scratch_operands = 2 : i64, tpu.core_type = #tpu.core_type<tc>, window_params = [{transform_indices = @transform_0, window_bounds = array<i64: 1, 16, 16, 128>}, {pipeline_mode = #tpu.pipeline_mode<synchronous>, transform_indices = @transform_1, window_bounds = array<i64: 1152, 128>}, {pipeline_mode = #tpu.pipeline_mode<synchronous>, transform_indices = @transform_2, window_bounds = array<i64: 1, 128>}, {pipeline_mode = #tpu.pipeline_mode<synchronous>, transform_indices = @transform_3, window_bounds = array<i64: 1, 128>}, {pipeline_mode = #tpu.pipeline_mode<synchronous>, transform_indices = @transform_4, window_bounds = array<i64: 8, 16>}, {transform_indices = @transform_5, window_bounds = array<i64: 1, 64, 128>}]} {
    %cst = arith.constant 0.000000e+00 : bf16
    %0 = vector.broadcast %cst : bf16 to vector<20x128xbf16>
    %c0 = arith.constant 0 : index
    %c0_0 = arith.constant 0 : index
    %c0_1 = arith.constant 0 : index
    %1 = vector.load %arg7[%c0, %c0_0, %c0_1] : memref<18x20x128xbf16, #tpu.memory_space<vmem>>, vector<1x20x128xbf16>
    %2 = vector.shape_cast %1 : vector<1x20x128xbf16> to vector<20x128xbf16>
    %3 = vector.shape_cast %0 : vector<20x128xbf16> to vector<1x20x128xbf16>
    tpu.vector_store %arg7[%c0, %c0_0, %c0_1], %3 {strides = array<i32>} : memref<18x20x128xbf16, #tpu.memory_space<vmem>>, vector<1x20x128xbf16>,
    %c17 = arith.constant 17 : index
    %c0_2 = arith.constant 0 : index
    %c0_3 = arith.constant 0 : index
    %4 = vector.load %arg7[%c17, %c0_2, %c0_3] : memref<18x20x128xbf16, #tpu.memory_space<vmem>>, vector<1x20x128xbf16>
    %5 = vector.shape_cast %4 : vector<1x20x128xbf16> to vector<20x128xbf16>
    %6 = vector.shape_cast %0 : vector<20x128xbf16> to vector<1x20x128xbf16>
    tpu.vector_store %arg7[%c17, %c0_2, %c0_3], %6 {strides = array<i32>} : memref<18x20x128xbf16, #tpu.memory_space<vmem>>, vector<1x20x128xbf16>,
    %cst_4 = arith.constant 0.000000e+00 : bf16
    %7 = vector.broadcast %cst_4 : bf16 to vector<18x2x128xbf16>
    %c0_5 = arith.constant 0 : index
    %c0_6 = arith.constant 0 : index
    %c0_7 = arith.constant 0 : index
    %8 = vector.load %arg7[%c0_5, %c0_6, %c0_7] : memref<18x20x128xbf16, #tpu.memory_space<vmem>>, vector<18x2x128xbf16>
    tpu.vector_store %arg7[%c0_5, %c0_6, %c0_7], %7 {strides = array<i32>} : memref<18x20x128xbf16, #tpu.memory_space<vmem>>, vector<18x2x128xbf16>,
    %c0_8 = arith.constant 0 : index
    %c18 = arith.constant 18 : index
    %c0_9 = arith.constant 0 : index
    %9 = vector.load %arg7[%c0_8, %c18, %c0_9] : memref<18x20x128xbf16, #tpu.memory_space<vmem>>, vector<18x2x128xbf16>
    tpu.vector_store %arg7[%c0_8, %c18, %c0_9], %7 {strides = array<i32>} : memref<18x20x128xbf16, #tpu.memory_space<vmem>>, vector<18x2x128xbf16>,
    %c0_10 = arith.constant 0 : index
    %c0_11 = arith.constant 0 : index
    %c0_12 = arith.constant 0 : index
    %c0_13 = arith.constant 0 : index
    %10 = vector.load %arg1[%c0_10, %c0_11, %c0_12, %c0_13] : memref<1x16x16x128xbf16, #tpu.memory_space<vmem>>, vector<1x16x16x128xbf16>
    %11 = vector.shape_cast %10 : vector<1x16x16x128xbf16> to vector<16x16x128xbf16>
    %c1 = arith.constant 1 : index
    %c2 = arith.constant 2 : index
    %c0_14 = arith.constant 0 : index
    %12 = vector.load %arg7[%c1, %c2, %c0_14] : memref<18x20x128xbf16, #tpu.memory_space<vmem>>, vector<16x16x128xbf16>
    tpu.vector_store %arg7[%c1, %c2, %c0_14], %11 {strides = array<i32>} : memref<18x20x128xbf16, #tpu.memory_space<vmem>>, vector<16x16x128xbf16>,
    %c0_15 = arith.constant 0 : index
    %c1_16 = arith.constant 1 : index
    %c0_17 = arith.constant 0 : index
    %13 = vector.load %arg7[%c0_15, %c1_16, %c0_17] : memref<18x20x128xbf16, #tpu.memory_space<vmem>>, vector<16x16x128xbf16>
    %14 = vector.shape_cast %13 : vector<16x16x128xbf16> to vector<256x128xbf16>
    %c0_18 = arith.constant 0 : index
    %c0_19 = arith.constant 0 : index
    %15 = vector.load %arg8[%c0_18, %c0_19] : memref<256x1152xbf16, #tpu.memory_space<vmem>>, vector<256x128xbf16>
    tpu.vector_store %arg8[%c0_18, %c0_19], %14 {strides = array<i32>} : memref<256x1152xbf16, #tpu.memory_space<vmem>>, vector<256x128xbf16>,
    %c0_20 = arith.constant 0 : index
    %c2_21 = arith.constant 2 : index
    %c0_22 = arith.constant 0 : index
    %16 = vector.load %arg7[%c0_20, %c2_21, %c0_22] : memref<18x20x128xbf16, #tpu.memory_space<vmem>>, vector<16x16x128xbf16>
    %17 = vector.shape_cast %16 : vector<16x16x128xbf16> to vector<256x128xbf16>
    %c0_23 = arith.constant 0 : index
    %c128 = arith.constant 128 : index
    %18 = vector.load %arg8[%c0_23, %c128] : memref<256x1152xbf16, #tpu.memory_space<vmem>>, vector<256x128xbf16>
    tpu.vector_store %arg8[%c0_23, %c128], %17 {strides = array<i32>} : memref<256x1152xbf16, #tpu.memory_space<vmem>>, vector<256x128xbf16>,
    %c0_24 = arith.constant 0 : index
    %c3 = arith.constant 3 : index
    %c0_25 = arith.constant 0 : index
    %19 = vector.load %arg7[%c0_24, %c3, %c0_25] : memref<18x20x128xbf16, #tpu.memory_space<vmem>>, vector<16x16x128xbf16>
    %20 = vector.shape_cast %19 : vector<16x16x128xbf16> to vector<256x128xbf16>
    %c0_26 = arith.constant 0 : index
    %c256 = arith.constant 256 : index
    %21 = vector.load %arg8[%c0_26, %c256] : memref<256x1152xbf16, #tpu.memory_space<vmem>>, vector<256x128xbf16>
    tpu.vector_store %arg8[%c0_26, %c256], %20 {strides = array<i32>} : memref<256x1152xbf16, #tpu.memory_space<vmem>>, vector<256x128xbf16>,
    %c1_27 = arith.constant 1 : index
    %c1_28 = arith.constant 1 : index
    %c0_29 = arith.constant 0 : index
    %22 = vector.load %arg7[%c1_27, %c1_28, %c0_29] : memref<18x20x128xbf16, #tpu.memory_space<vmem>>, vector<16x16x128xbf16>
    %23 = vector.shape_cast %22 : vector<16x16x128xbf16> to vector<256x128xbf16>
    %c0_30 = arith.constant 0 : index
    %c384 = arith.constant 384 : index
    %24 = vector.load %arg8[%c0_30, %c384] : memref<256x1152xbf16, #tpu.memory_space<vmem>>, vector<256x128xbf16>
    tpu.vector_store %arg8[%c0_30, %c384], %23 {strides = array<i32>} : memref<256x1152xbf16, #tpu.memory_space<vmem>>, vector<256x128xbf16>,
    %c1_31 = arith.constant 1 : index
    %c2_32 = arith.constant 2 : index
    %c0_33 = arith.constant 0 : index
    %25 = vector.load %arg7[%c1_31, %c2_32, %c0_33] : memref<18x20x128xbf16, #tpu.memory_space<vmem>>, vector<16x16x128xbf16>
    %26 = vector.shape_cast %25 : vector<16x16x128xbf16> to vector<256x128xbf16>
    %c0_34 = arith.constant 0 : index
    %c512 = arith.constant 512 : index
    %27 = vector.load %arg8[%c0_34, %c512] : memref<256x1152xbf16, #tpu.memory_space<vmem>>, vector<256x128xbf16>
    tpu.vector_store %arg8[%c0_34, %c512], %26 {strides = array<i32>} : memref<256x1152xbf16, #tpu.memory_space<vmem>>, vector<256x128xbf16>,
    %c1_35 = arith.constant 1 : index
    %c3_36 = arith.constant 3 : index
    %c0_37 = arith.constant 0 : index
    %28 = vector.load %arg7[%c1_35, %c3_36, %c0_37] : memref<18x20x128xbf16, #tpu.memory_space<vmem>>, vector<16x16x128xbf16>
    %29 = vector.shape_cast %28 : vector<16x16x128xbf16> to vector<256x128xbf16>
    %c0_38 = arith.constant 0 : index
    %c640 = arith.constant 640 : index
    %30 = vector.load %arg8[%c0_38, %c640] : memref<256x1152xbf16, #tpu.memory_space<vmem>>, vector<256x128xbf16>
    tpu.vector_store %arg8[%c0_38, %c640], %29 {strides = array<i32>} : memref<256x1152xbf16, #tpu.memory_space<vmem>>, vector<256x128xbf16>,
    %c2_39 = arith.constant 2 : index
    %c1_40 = arith.constant 1 : index
    %c0_41 = arith.constant 0 : index
    %31 = vector.load %arg7[%c2_39, %c1_40, %c0_41] : memref<18x20x128xbf16, #tpu.memory_space<vmem>>, vector<16x16x128xbf16>
    %32 = vector.shape_cast %31 : vector<16x16x128xbf16> to vector<256x128xbf16>
    %c0_42 = arith.constant 0 : index
    %c768 = arith.constant 768 : index
    %33 = vector.load %arg8[%c0_42, %c768] : memref<256x1152xbf16, #tpu.memory_space<vmem>>, vector<256x128xbf16>
    tpu.vector_store %arg8[%c0_42, %c768], %32 {strides = array<i32>} : memref<256x1152xbf16, #tpu.memory_space<vmem>>, vector<256x128xbf16>,
    %c2_43 = arith.constant 2 : index
    %c2_44 = arith.constant 2 : index
    %c0_45 = arith.constant 0 : index
    %34 = vector.load %arg7[%c2_43, %c2_44, %c0_45] : memref<18x20x128xbf16, #tpu.memory_space<vmem>>, vector<16x16x128xbf16>
    %35 = vector.shape_cast %34 : vector<16x16x128xbf16> to vector<256x128xbf16>
    %c0_46 = arith.constant 0 : index
    %c896 = arith.constant 896 : index
    %36 = vector.load %arg8[%c0_46, %c896] : memref<256x1152xbf16, #tpu.memory_space<vmem>>, vector<256x128xbf16>
    tpu.vector_store %arg8[%c0_46, %c896], %35 {strides = array<i32>} : memref<256x1152xbf16, #tpu.memory_space<vmem>>, vector<256x128xbf16>,
    %c2_47 = arith.constant 2 : index
    %c3_48 = arith.constant 3 : index
    %c0_49 = arith.constant 0 : index
    %37 = vector.load %arg7[%c2_47, %c3_48, %c0_49] : memref<18x20x128xbf16, #tpu.memory_space<vmem>>, vector<16x16x128xbf16>
    %38 = vector.shape_cast %37 : vector<16x16x128xbf16> to vector<256x128xbf16>
    %c0_50 = arith.constant 0 : index
    %c1024 = arith.constant 1024 : index
    %39 = vector.load %arg8[%c0_50, %c1024] : memref<256x1152xbf16, #tpu.memory_space<vmem>>, vector<256x128xbf16>
    tpu.vector_store %arg8[%c0_50, %c1024], %38 {strides = array<i32>} : memref<256x1152xbf16, #tpu.memory_space<vmem>>, vector<256x128xbf16>,
    %c0_51 = arith.constant 0 : index
    %c0_52 = arith.constant 0 : index
    %40 = vector.load %arg8[%c0_51, %c0_52] : memref<256x1152xbf16, #tpu.memory_space<vmem>>, vector<256x1152xbf16>
    %c0_53 = arith.constant 0 : index
    %c0_54 = arith.constant 0 : index
    %41 = vector.load %arg2[%c0_53, %c0_54] : memref<1152x128xbf16, #tpu.memory_space<vmem>>, vector<1152x128xbf16>
    %cst_55 = arith.constant dense<0.000000e+00> : vector<256x128xf32>
    %42 = tpu.matmul %40, %41, %cst_55 {dimension_numbers = #tpu.dot_dimension_numbers<[1], [0], [0], [1], [0, 0, 1, 1], [], []>} : vector<256x1152xbf16>, vector<1152x128xbf16>, vector<256x128xf32> -> vector<256x128xf32>
    %c0_56 = arith.constant 0 : index
    %c0_57 = arith.constant 0 : index
    %43 = vector.load %arg3[%c0_56, %c0_57] : memref<1x128xf32, #tpu.memory_space<vmem>>, vector<1x128xf32>
    %44 = vector.broadcast %43 : vector<1x128xf32> to vector<256x128xf32>
    %45 = arith.mulf %42, %44 : vector<256x128xf32>
    %c0_58 = arith.constant 0 : index
    %c0_59 = arith.constant 0 : index
    %46 = vector.load %arg4[%c0_58, %c0_59] : memref<1x128xf32, #tpu.memory_space<vmem>>, vector<1x128xf32>
    %47 = vector.broadcast %46 : vector<1x128xf32> to vector<256x128xf32>
    %48 = arith.addf %45, %47 : vector<256x128xf32>
    %cst_60 = arith.constant 0.000000e+00 : f32
    %49 = vector.broadcast %cst_60 : f32 to vector<256x128xf32>
    %50 = arith.maximumf %48, %49 : vector<256x128xf32>
    %51 = vector.shape_cast %50 : vector<256x128xf32> to vector<8x2x16x128xf32>
    %52 = vector.extract_strided_slice %51 {offsets = [0, 0, 0, 0], sizes = [8, 1, 16, 128], strides = [1, 1, 1, 1]} : vector<8x2x16x128xf32> to vector<8x1x16x128xf32>
    %53 = vector.shape_cast %52 : vector<8x1x16x128xf32> to vector<8x16x128xf32>
    %54 = vector.extract_strided_slice %51 {offsets = [0, 1, 0, 0], sizes = [8, 1, 16, 128], strides = [1, 1, 1, 1]} : vector<8x2x16x128xf32> to vector<8x1x16x128xf32>
    %55 = vector.shape_cast %54 : vector<8x1x16x128xf32> to vector<8x16x128xf32>
    %56 = arith.addf %53, %55 : vector<8x16x128xf32>
    %c0_61 = arith.constant 0 : index
    %c0_62 = arith.constant 0 : index
    %57 = vector.load %arg5[%c0_61, %c0_62] : memref<8x16xf32, #tpu.memory_space<vmem>>, vector<8x16xf32>
    %58 = vector.extract_strided_slice %56 {offsets = [0, 0, 0], sizes = [1, 16, 128], strides = [1, 1, 1]} : vector<8x16x128xf32> to vector<1x16x128xf32>
    %59 = vector.shape_cast %58 : vector<1x16x128xf32> to vector<16x128xf32>
    %cst_63 = arith.constant dense<0.000000e+00> : vector<8x128xf32>
    %60 = tpu.matmul %57, %59, %cst_63 {dimension_numbers = #tpu.dot_dimension_numbers<[1], [0], [0], [1], [0, 0, 1, 1], [], []>} : vector<8x16xf32>, vector<16x128xf32>, vector<8x128xf32> -> vector<8x128xf32>
    %61 = vector.extract_strided_slice %56 {offsets = [1, 0, 0], sizes = [1, 16, 128], strides = [1, 1, 1]} : vector<8x16x128xf32> to vector<1x16x128xf32>
    %62 = vector.shape_cast %61 : vector<1x16x128xf32> to vector<16x128xf32>
    %cst_64 = arith.constant dense<0.000000e+00> : vector<8x128xf32>
    %63 = tpu.matmul %57, %62, %cst_64 {dimension_numbers = #tpu.dot_dimension_numbers<[1], [0], [0], [1], [0, 0, 1, 1], [], []>} : vector<8x16xf32>, vector<16x128xf32>, vector<8x128xf32> -> vector<8x128xf32>
    %64 = vector.extract_strided_slice %56 {offsets = [2, 0, 0], sizes = [1, 16, 128], strides = [1, 1, 1]} : vector<8x16x128xf32> to vector<1x16x128xf32>
    %65 = vector.shape_cast %64 : vector<1x16x128xf32> to vector<16x128xf32>
    %cst_65 = arith.constant dense<0.000000e+00> : vector<8x128xf32>
    %66 = tpu.matmul %57, %65, %cst_65 {dimension_numbers = #tpu.dot_dimension_numbers<[1], [0], [0], [1], [0, 0, 1, 1], [], []>} : vector<8x16xf32>, vector<16x128xf32>, vector<8x128xf32> -> vector<8x128xf32>
    %67 = vector.extract_strided_slice %56 {offsets = [3, 0, 0], sizes = [1, 16, 128], strides = [1, 1, 1]} : vector<8x16x128xf32> to vector<1x16x128xf32>
    %68 = vector.shape_cast %67 : vector<1x16x128xf32> to vector<16x128xf32>
    %cst_66 = arith.constant dense<0.000000e+00> : vector<8x128xf32>
    %69 = tpu.matmul %57, %68, %cst_66 {dimension_numbers = #tpu.dot_dimension_numbers<[1], [0], [0], [1], [0, 0, 1, 1], [], []>} : vector<8x16xf32>, vector<16x128xf32>, vector<8x128xf32> -> vector<8x128xf32>
    %70 = vector.extract_strided_slice %56 {offsets = [4, 0, 0], sizes = [1, 16, 128], strides = [1, 1, 1]} : vector<8x16x128xf32> to vector<1x16x128xf32>
    %71 = vector.shape_cast %70 : vector<1x16x128xf32> to vector<16x128xf32>
    %cst_67 = arith.constant dense<0.000000e+00> : vector<8x128xf32>
    %72 = tpu.matmul %57, %71, %cst_67 {dimension_numbers = #tpu.dot_dimension_numbers<[1], [0], [0], [1], [0, 0, 1, 1], [], []>} : vector<8x16xf32>, vector<16x128xf32>, vector<8x128xf32> -> vector<8x128xf32>
    %73 = vector.extract_strided_slice %56 {offsets = [5, 0, 0], sizes = [1, 16, 128], strides = [1, 1, 1]} : vector<8x16x128xf32> to vector<1x16x128xf32>
    %74 = vector.shape_cast %73 : vector<1x16x128xf32> to vector<16x128xf32>
    %cst_68 = arith.constant dense<0.000000e+00> : vector<8x128xf32>
    %75 = tpu.matmul %57, %74, %cst_68 {dimension_numbers = #tpu.dot_dimension_numbers<[1], [0], [0], [1], [0, 0, 1, 1], [], []>} : vector<8x16xf32>, vector<16x128xf32>, vector<8x128xf32> -> vector<8x128xf32>
    %76 = vector.extract_strided_slice %56 {offsets = [6, 0, 0], sizes = [1, 16, 128], strides = [1, 1, 1]} : vector<8x16x128xf32> to vector<1x16x128xf32>
    %77 = vector.shape_cast %76 : vector<1x16x128xf32> to vector<16x128xf32>
    %cst_69 = arith.constant dense<0.000000e+00> : vector<8x128xf32>
    %78 = tpu.matmul %57, %77, %cst_69 {dimension_numbers = #tpu.dot_dimension_numbers<[1], [0], [0], [1], [0, 0, 1, 1], [], []>} : vector<8x16xf32>, vector<16x128xf32>, vector<8x128xf32> -> vector<8x128xf32>
    %79 = vector.extract_strided_slice %56 {offsets = [7, 0, 0], sizes = [1, 16, 128], strides = [1, 1, 1]} : vector<8x16x128xf32> to vector<1x16x128xf32>
    %80 = vector.shape_cast %79 : vector<1x16x128xf32> to vector<16x128xf32>
    %cst_70 = arith.constant dense<0.000000e+00> : vector<8x128xf32>
    %81 = tpu.matmul %57, %80, %cst_70 {dimension_numbers = #tpu.dot_dimension_numbers<[1], [0], [0], [1], [0, 0, 1, 1], [], []>} : vector<8x16xf32>, vector<16x128xf32>, vector<8x128xf32> -> vector<8x128xf32>
    %82 = tpu.concatenate %60, %63, %66, %69, %72, %75, %78, %81 in 0 : vector<8x128xf32>, vector<8x128xf32>, vector<8x128xf32>, vector<8x128xf32>, vector<8x128xf32>, vector<8x128xf32>, vector<8x128xf32>, vector<8x128xf32> -> vector<64x128xf32>
    %83 = arith.truncf %82 : vector<64x128xf32> to vector<64x128xbf16>
    %c0_71 = arith.constant 0 : index
    %c0_72 = arith.constant 0 : index
    %c0_73 = arith.constant 0 : index
    %84 = vector.load %arg6[%c0_71, %c0_72, %c0_73] : memref<1x64x128xbf16, #tpu.memory_space<vmem>>, vector<1x64x128xbf16>
    %85 = vector.shape_cast %84 : vector<1x64x128xbf16> to vector<64x128xbf16>
    %86 = vector.shape_cast %83 : vector<64x128xbf16> to vector<1x64x128xbf16>
    tpu.vector_store %arg6[%c0_71, %c0_72, %c0_73], %86 {strides = array<i32>} : memref<1x64x128xbf16, #tpu.memory_space<vmem>>, vector<1x64x128xbf16>,
    return
  }
  func.func @transform_0(%arg0: i32) -> (i32, i32, i32, i32) {
    %c0_i32 = arith.constant 0 : i32
    %c0_i32_0 = arith.constant 0 : i32
    %c0_i32_1 = arith.constant 0 : i32
    %c0_i32_2 = arith.constant 0 : i32
    return %arg0, %c0_i32, %c0_i32_0, %c0_i32_1 : i32, i32, i32, i32
  }
  func.func @transform_1(%arg0: i32) -> (i32, i32) {
    %c0_i32 = arith.constant 0 : i32
    %c0_i32_0 = arith.constant 0 : i32
    %c0_i32_1 = arith.constant 0 : i32
    return %c0_i32, %c0_i32_0 : i32, i32
  }
  func.func @transform_2(%arg0: i32) -> (i32, i32) {
    %c0_i32 = arith.constant 0 : i32
    %c0_i32_0 = arith.constant 0 : i32
    %c0_i32_1 = arith.constant 0 : i32
    return %c0_i32, %c0_i32_0 : i32, i32
  }
  func.func @transform_3(%arg0: i32) -> (i32, i32) {
    %c0_i32 = arith.constant 0 : i32
    %c0_i32_0 = arith.constant 0 : i32
    %c0_i32_1 = arith.constant 0 : i32
    return %c0_i32, %c0_i32_0 : i32, i32
  }
  func.func @transform_4(%arg0: i32) -> (i32, i32) {
    %c0_i32 = arith.constant 0 : i32
    %c0_i32_0 = arith.constant 0 : i32
    %c0_i32_1 = arith.constant 0 : i32
    return %c0_i32, %c0_i32_0 : i32, i32
  }
  func.func @transform_5(%arg0: i32) -> (i32, i32, i32) {
    %c0_i32 = arith.constant 0 : i32
    %c0_i32_0 = arith.constant 0 : i32
    %c0_i32_1 = arith.constant 0 : i32
    return %arg0, %c0_i32, %c0_i32_0 : i32, i32, i32
  }
}

</mosaic_0001>

<bundles_post_ra>
// kernel: tpu_custom_call.1
= control target key start
LH: loop header
LB: loop body
LE: loop exit
PB: predicated region body
PF: predicated region fallthrough
CT: control target
= control target key end

     0   :  { %10 = vsyncpa [#allocation5], 0  ;;  %s10200_s0 = inlined_call_operand.hbm [shape: bf16[2,16,16,128], index: 0, kind: input, shape index: {}]   ;;  %s10201_s1 = inlined_call_operand.hbm [shape: bf16[1152,128], index: 1, kind: input, shape index: {}]   ;;  %s10202_s2 = inlined_call_operand.vmem [shape: f32[1,128], index: 2, kind: input, shape index: {}]   ;;  %s10203_s3 = inlined_call_operand.vmem [shape: f32[1,128], index: 3, kind: input, shape index: {}]   ;;  %s10204_s4 = inlined_call_operand.hbm [shape: f32[8,16], index: 4, kind: input, shape index: {}]   ;;  %s10205_s5 = inlined_call_operand.hbm [shape: bf16[2,64,128], index: 5, kind: output, shape index: {}]  }
   0x1   :  { %12 = vsyncpa [#allocation5 + $0x1], 0 }
   0x2   :  { %13 = vsyncpa [#allocation8], 0 }
   0x3   :  { %14 = vsyncpa [#allocation6], 0 }
   0x4   :  { %16 = vsyncpa [#allocation6 + $0x1], 0  ;;  %s8720_s18 = smov 0   ;;  %s8722_s19 = smov 0  }
   0x5   :  { %s8724_s20 = smov 0   ;;  %s8726_s21 = smov 0  }
   0x6 LB: > { %s8741_s22 = sadd.s32 4294967295, %s8681_s21   ;;  %s7240_s23 = sadd.s32 4294967294, %s8681_s21   ;;  %s8681_s21 = sphi %s8726_s21, %s10303_s21   ;;  %s8677_s20 = sphi %s8724_s20, %s10302_s20   ;;  %s8673_s19 = sphi %s8722_s19, %s10301_s19   ;;  %s8669_s18 = sphi %s8720_s18, %s10300_s18  }
   0x7   : > { %p42_p0 = scmp.ne.s32.totalorder %s8673_s19, %s8669_s18  ;;  %p43_p1 = scmp.eq.s32.totalorder %s8741_s22, 0 }
   0x8   : > { %p150_p2 = scmp.eq.s32.totalorder %s8741_s22, 1  ;;  %p156_p3 = scmp.eq.s32.totalorder %s7240_s23, 1 }
   0x9   : > { %p8750_p4 = por %p43_p1, %p42_p0  ;;  %p7241_p5 = scmp.ge.s32.totalorder %s8681_s21, 1 }
   0xa   : > { %p8755_p6 = por %p156_p3, %p42_p0  ;;  %p163_p7 = scmp.lt.s32.totalorder %s8681_s21, 3 }
   0xb   : > { %s174_s28 = sshll.u32 %s10201_s1, 4  ;;  %s8683_s30 = smov [#allocation7]   ;;  %s175_s28 = int_to_ptr.hbm [resolvable:$true] %s174_s28 }
   0xc   : > { %p8763_p8 = pnand %p7241_p5, %p163_p7  ;;  %s176_s6 = sshll.u32 %s8683_s30, 4  ;;  %s177_s6 = int_to_ptr.vmem [resolvable:$true] %s176_s6 }
   0xd   : > { %s195_s9 = sshll.u32 %s10204_s4, 4  ;;  %s10206_s10 = smov 64   ;;  %s196_s9 = int_to_ptr.hbm [resolvable:$true] %s195_s9 }
   0xe   : > { %p8455_p9 = pneg %p8763_p8  ;;  %s8685_s11 = smov 4  }
   0xf   : > { %s8686_s12 = smov [#allocation9]   ;;  %s8779_s14 = sadd.s32 1, %s8681_s21  }
  0x10   : > { %p8456_p10 = pnand %p8455_p9, %p43_p1  ;;  %s197_s13 = sshll.u32 %s8686_s12, 4  ;;  %s198_s13 = int_to_ptr.vmem [resolvable:$true] %s197_s13 }
  0x11   : > { %s29_s15 = sadd.s32 1, %s8677_s20  ;;  %s26_s16 = ssub.s32 %s8681_s21, %s8779_s14 }
  0x12   : > { %8458 = dma.hbm_to_vmem [thread:$0]  (!%p8456_p10), %s175_s28, 9216, %s177_s6, [#allocation8], %s10206_s10, %s10206_s10, %s8685_s11  }
  0x13   : > { %8461 = dma.hbm_to_vmem [thread:$0]  (!%p8456_p10), %s196_s9, 128, %s198_s13, [#allocation8]  }
  0x14   : > { %p36_p12 = scmp.ne.s32.totalorder %s8677_s20, %s8673_s19  ;;  %p27_p13 = scmp.eq.s32.totalorder %s26_s16, 0 }
  0x15   : > { %p37_p0 = scmp.eq.s32.totalorder %s8681_s21, 0  ;;  %p8472_p5 = scmp.lt.s32.totalorder %s8681_s21, 2 }
  0x16   : > { %p8789_p3 = por %p150_p2, %p36_p12  ;;  %s208_s26 = sand.u32 1, %s8677_s20  }
  0x17   : > { %s8795_s23 = scalar_select %p27_p13, %s8677_s20, %s29_s15  }
  0x18   : > { %p38_p7 = por %p37_p0, %p36_p12  ;;  %s7245_s27 = sshll.u32 %s208_s26, 7 }
  0x19   : > { %s8178_s28 = sshll.u32 %s8681_s21, 7  ;;  %s212_s8 = scalar_lea.vmem [#allocation4], %s7245_s27 }
  0x1a   : > { %s217_s7 = scalar_lea.hbm %s10200_s0, %s8178_s28  ;;  %s220_s9 = sshll.u32 %s212_s8, 4  ;;  %s221_s9 = int_to_ptr.vmem [resolvable:$true] %s220_s9 }
  0x1b   : > { %s218_s12 = sshll.u32 %s217_s7, 4  ;;  %p8802_p2 = pnand %p8472_p5, %p38_p7  ;;  %s219_s12 = int_to_ptr.hbm [resolvable:$true] %s218_s12 }
  0x1c   : > { %s209_s15 = scalar_lea.sflag [#allocation5], %s208_s26  ;;  %s8581_s16 = sshra.s32 %s219_s12, 4  ;;  %s8582_s16 = int_to_ptr.hbm [resolvable:$true] %s8581_s16 }
  0x1d   : > { %s8583_s10 = scalar_lea.hbm %s8582_s16, 128  ;;  %p8585_p10 = pneg %p8802_p2 }
  0x1e   : > { %p8584_p9 = scmp.ne.s32.totalorder %s8582_s16, %s8583_s10  ;;  %s8588_s30 = scalar_lea.hbm %s10200_s0, 256 }
  0x1f   : > { %p8589_p0 = scmp.lt.s32.totalorder %s8582_s16, %s10200_s0  ;;  %p8590_p5 = scmp.lt.s32.totalorder %s8588_s30, %s8583_s10 }
  0x20   : > { %p8586_p12 = pnand %p8585_p10, %p8584_p9 }
  0x21   : > { %p8591_p7 = por %p8590_p5, %p8589_p0 }
  0x22   : > { %p8587_p13 = pneg %p8586_p12 }
  0x24   : > { %p8592_p11 = pnand %p8591_p7, %p8587_p13 }
  0x26   : > { %8595 = shalt.err (!%p8592_p11)
}
  0x27   : > { %s10212_s26 = smov 64   ;;  %232 = sbr.rel (%p8763_p8) target bundleno = 1070 (0x42e), region = 40 }
  0x28   : > { %8465 = dma.hbm_to_vmem [thread:$0]  (!%p8802_p2), %s219_s12, 2048, %s221_s9, %s209_s15, %s10212_s26, %s10212_s26, %s8685_s11  }
  0x2c   : > { %s8822_s8 = sand.u32 1, %s8673_s19  }
  0x2d   : > { %s7249_s16 = sshll.u32 %s8822_s8, 7  ;;  %s235_s10 = scalar_lea.sflag [#allocation5], %s8822_s8 }
  0x2e   : > { %s8826_s28 = scalar_lea.vmem [#allocation4], %s7249_s16 }
  0x2f   : > { %8656 = dma.done.wait (%p8750_p4), %s235_s10, 2048  }
  0x30   : > { %8658 = vsyncadd (%p8750_p4), %s235_s10, 4294965248 }
  0x31   : > { %8660 = dma.done.wait (%p43_p1), [#allocation8], 9344  }
  0x32   : > { %8662 = vsyncadd (%p43_p1), [#allocation8], 4294957952  ;;  %v8687_v0 = vmov 0   ;;  %v8330_v1 = vld [vmem:[#allocation7 + $0x38] sm:$0xff]  ;;  %vm612_vm0 = vsmask.f32 3328 }
  0x33   : > { %277 = vst [vmem:[#allocation2] sm:$0xf] %v8687_v0  ;;  %vm613_vm1 = vsmask.f32 7440  ;;  %6030 = vmatpush.bf16.msra.mxu0 %v8330_v1  ;;  %8419 = vmatpush.bf16.msra.mxu1 %v8330_v1  ;;  %v8329_v2 = vld [vmem:[#allocation7 + $0x30] sm:$0xff]  ;;  %v8328_v13 = vld [vmem:[#allocation7 + $0x28] sm:$0xff] }
  0x34   : > { %278 = vst [vmem:[#allocation2 + $0x4] sm:$0xf] %v8687_v0  ;;  %8421 = vmatpush.bf16.msra.mxu3 %v8330_v1  ;;  %8420 = vmatpush.bf16.msra.mxu2 %v8330_v1  ;;  %vm8852_vm2 = vmor %vm612_vm0, %vm613_vm1  ;;  %v8327_v21 = vld [vmem:[#allocation7 + $0x20] sm:$0xff]  ;;  %v8326_v25 = vld [vmem:[#allocation7 + $0x18] sm:$0xff]  ;;  %vm384_vm3 = vcmask 1040384   ;;  %vm385_vm4 = vcmask 1044484  }
  0x35   : > { %279 = vst [vmem:[#allocation2 + $0x8] sm:$0x3] %v8687_v0  ;;  %v8325_v26 = vld [vmem:[#allocation7 + $0x10] sm:$0xff]  ;;  %v8324_v27 = vld [vmem:[#allocation7 + $0x8] sm:$0xff]  ;;  %v328_v28 = vld [vmem:[%s8826_s28 + $0x20] sm:$0xf] }
  0x36   : > { %284 = vst [vmem:[#allocation2] sm:$0x1] %v8687_v0  ;;  %v8323_v29 = vld [vmem:[#allocation7] sm:$0xff]  ;;  %v407_v30 = vrot.slane %v328_v28, 7  ;;  %v342_v34 = vld [vmem:[%s8826_s28 + $0x58] sm:$0xf]  ;;  %vm8886_vm5 = vmor %vm384_vm3, %vm385_vm4 }
  0x37   : > { %302 = vst [vmem:[#allocation2 + $0x8] sm:$0x2] %v8687_v0  ;;  %6031 = vmatpush.bf16.msra.mxu0 %v8329_v2  ;;  %8422 = vmatpush.bf16.msra.mxu1 %v8329_v2  ;;  %v329_v33 = vld [vmem:[%s8826_s28 + $0x24] sm:$0xf]  ;;  %v336_v38 = vld [vmem:[%s8826_s28 + $0x40] sm:$0xf] }
  0x38   : > { %281 = vst [vmem:[#allocation2 + $0xcc] sm:$0xf] %v8687_v0  ;;  %8424 = vmatpush.bf16.msra.mxu3 %v8329_v2  ;;  %8423 = vmatpush.bf16.msra.mxu2 %v8329_v2  ;;  %v408_v36 = vrot.slane %v407_v30, 4  ;;  %v409_v37 = vrot.slane %v329_v33, 7  ;;  %v442_v40 = vrot.slane %v342_v34, 7  ;;  %v427_v44 = vrot.slane %v336_v38, 7 }
  0x39   : > { %282 = vst [vmem:[#allocation2 + $0xd0] sm:$0xf] %v8687_v0  ;;  %v343_v41 = vld [vmem:[%s8826_s28 + $0x5c] sm:$0xf]  ;;  %v337_v43 = vld [vmem:[%s8826_s28 + $0x44] sm:$0xf] }
  0x3a   : > { %283 = vst [vmem:[#allocation2 + $0xd4] sm:$0x3] %v8687_v0  ;;  %v411_v42 = vrot.slane %v409_v37, 4  ;;  %v410_v45 = vsel %vm8886_vm5, %v408_v36, %v409_v37  ;;  %v320_v46 = vld [vmem:[%s8826_s28] sm:$0xf]  ;;  %v443_v48 = vrot.slane %v442_v40, 4 }
  0x3b   : > { %v565_v3 = vld [vmem:[#allocation2 + $0x4] sm:$0xf]  ;;  %285 = vst [vmem:[#allocation2 + $0xc] sm:$0x1] %v8687_v0  ;;  %6032 = vmatpush.bf16.msra.mxu0 %v8328_v13  ;;  %8425 = vmatpush.bf16.msra.mxu1 %v8328_v13  ;;  %v8899_v47 = vld [vmem:[%s8826_s28 + $0x28] sm:$0xf] }
  0x3c   : > { %v566_v4 = vld [vmem:[#allocation2 + $0x8] sm:$0x1]  ;;  %v625_v5 = vshll.u32 %v565_v3, 16  ;;  %v629_v6 = vshrl.u32 %v565_v3, 16  ;;  %286 = vst [vmem:[#allocation2 + $0x18] sm:$0x1] %v8687_v0  ;;  %8427 = vmatpush.bf16.msra.mxu3 %v8328_v13  ;;  %8426 = vmatpush.bf16.msra.mxu2 %v8328_v13 }
  0x3d   : > { %v564_v7 = vld [vmem:[#allocation2] sm:$0xf]  ;;  %v635_v8 = vshll.u32 %v566_v4, 16  ;;  %287 = vst [vmem:[#allocation2 + $0x24] sm:$0x1] %v8687_v0  ;;  %v444_v49 = vrot.slane %v343_v41, 7 }
  0x3e   : > { %v616_v9 = vshrl.u32 %v564_v7, 16  ;;  %v619_v10 = vshll.u32 %v564_v7, 16  ;;  %v627_v11 = vrot.slane %v625_v5, 5  ;;  %v631_v12 = vrot.slane %v629_v6, 4  ;;  %288 = vst [vmem:[#allocation2 + $0x30] sm:$0x1] %v8687_v0 }
  0x3f   : > { %289 = vst [vmem:[#allocation2 + $0x3c] sm:$0x1] %v8687_v0  ;;  %v637_v17 = vrot.slane %v635_v8, 5  ;;  %6033 = vmatpush.bf16.msra.mxu0 %v8327_v21  ;;  %8428 = vmatpush.bf16.msra.mxu1 %v8327_v21  ;;  %v8903_v50 = vld [vmem:[%s8826_s28 + $0x60] sm:$0xf]  ;;  %v428_v51 = vrot.slane %v427_v44, 4  ;;  %v445_v57 = vsel %vm8886_vm5, %v443_v48, %v444_v49 }
  0x40   : > { %v618_v14 = vrot.slane %v616_v9, 4  ;;  %v621_v15 = vrot.slane %v619_v10, 5  ;;  %v632_v16 = vor.u32 %v631_v12, %v627_v11  ;;  %290 = vst [vmem:[#allocation2 + $0x48] sm:$0x1] %v8687_v0  ;;  %8430 = vmatpush.bf16.msra.mxu3 %v8327_v21  ;;  %8429 = vmatpush.bf16.msra.mxu2 %v8327_v21  ;;  %v429_v52 = vrot.slane %v337_v43, 7  ;;  %s7252_s16 = sshll.u32 %s8822_s8, 5 }
  0x41   : > { %291 = vst [vmem:[#allocation2 + $0x54] sm:$0x1] %v8687_v0  ;;  %v387_v53 = vrot.slane %v320_v46, 7  ;;  %v412_v54 = vrot.slane %v8899_v47, 7  ;;  %v321_v55 = vld [vmem:[%s8826_s28 + $0x4] sm:$0xf] }
  0x42   : > { %v622_v19 = vor.u32 %v621_v15, %v618_v14  ;;  %v633_v20 = vrot.slane %v632_v16, 4  ;;  %292 = vst [vmem:[#allocation2 + $0x60] sm:$0x1] %v8687_v0  ;;  %v331_v56 = vld [vmem:[%s8826_s28 + $0x2c] sm:$0xf]  ;;  %v446_v58 = vrot.slane %v444_v49, 4  ;;  %v430_v61 = vsel %vm8886_vm5, %v428_v51, %v429_v52 }
  0x43   : > { %293 = vst [vmem:[#allocation2 + $0x6c] sm:$0x1] %v8687_v0  ;;  %6034 = vmatpush.bf16.msra.mxu0 %v8326_v25  ;;  %8431 = vmatpush.bf16.msra.mxu1 %v8326_v25  ;;  %v8912_v59 = vld [vmem:[%s8826_s28 + $0x64] sm:$0xf]  ;;  %v447_v60 = vrot.slane %v8903_v50, 7  ;;  %v388_v62 = vrot.slane %v387_v53, 4 }
  0x44   : > { %v623_v22 = vrot.slane %v622_v19, 4  ;;  %v638_v23 = vsel %vm8852_vm2, %v633_v20, %v637_v17  ;;  %294 = vst [vmem:[#allocation2 + $0x78] sm:$0x1] %v8687_v0  ;;  %8433 = vmatpush.bf16.msra.mxu3 %v8326_v25  ;;  %8432 = vmatpush.bf16.msra.mxu2 %v8326_v25  ;;  %v389_v63 = vrot.slane %v321_v55, 7  ;;  %v431_v1 = vrot.slane %v429_v52, 4  ;;  %s275_s10 = scalar_lea.vmem [#allocation10], %s7252_s16 }
  0x45   : > { %1032 = vst [vmem:[#allocation3 + $0x24] sm:$0xf] %v638_v23  ;;  %v413_v2 = vrot.slane %v412_v54, 4  ;;  %v414_v3 = vrot.slane %v331_v56, 7  ;;  %v449_v4 = vrot.slane %v8912_v59, 7  ;;  %vm1159_vm9 = vcmask 1042432  }
  0x46   : > { %v628_v24 = vsel %vm8852_vm2, %v623_v22, %v627_v11  ;;  %295 = vst [vmem:[#allocation2 + $0x84] sm:$0x1] %v8687_v0  ;;  %v391_v6 = vrot.slane %v389_v63, 4  ;;  %v390_v13 = vsel %vm8886_vm5, %v388_v62, %v389_v63  ;;  %v8930_v21 = vld [vmem:[%s8826_s28 + $0x48] sm:$0xf]  ;;  %vm1160_vm10 = vcmask 1046532  }
  0x47   : > { %1031 = vst [vmem:[#allocation3] sm:$0xf] %v628_v24  ;;  %6035 = vmatpush.bf16.msra.mxu0 %v8325_v26  ;;  %8434 = vmatpush.bf16.msra.mxu1 %v8325_v26  ;;  %v8927_v17 = vrot.slane %v414_v3, 4  ;;  %v8934_v25 = vrot.slane %v449_v4, 4  ;;  %v432_v36 = vrot.slane %v8930_v21, 7  ;;  %vm9071_vm11 = vmor %vm1159_vm9, %vm1160_vm10  ;;  %vm6952_vm12 = vcmask 130048  }
  0x48   : > { %296 = vst [vmem:[#allocation2 + $0x90] sm:$0x1] %v8687_v0  ;;  %8436 = vmatpush.bf16.msra.mxu3 %v8325_v26  ;;  %8435 = vmatpush.bf16.msra.mxu2 %v8325_v26  ;;  %vm1386_vm6 = vsmask.f32 2304  ;;  %vm1387_vm7 = vsmask.f32 6416 }
  0x49   : > { %297 = vst [vmem:[#allocation2 + $0x9c] sm:$0x1] %v8687_v0  ;;  %vm9062_vm8 = vmor %vm1386_vm6, %vm1387_vm7  ;;  %s7145_s9 = sshll.u32 %s275_s10, 4  ;;  %s7133_s13 = scalar_lea.sflag [#allocation6], %s8822_s8  ;;  %s7146_s9 = int_to_ptr.vmem [resolvable:$true] %s7145_s9 }
  0x4a   : > { %298 = vst [vmem:[#allocation2 + $0xa8] sm:$0x1] %v8687_v0  ;;  %s8631_s6 = scalar_lea.hbm %s10205_s5, 64 }
  0x4b   : > { %299 = vst [vmem:[#allocation2 + $0xb4] sm:$0x1] %v8687_v0  ;;  %6036 = vmatpush.bf16.msra.mxu0 %v8324_v27  ;;  %8437 = vmatpush.bf16.msra.mxu1 %v8324_v27 }
  0x4c   : > { %300 = vst [vmem:[#allocation2 + $0xc0] sm:$0x1] %v8687_v0  ;;  %v8183_v32 = vld [vmem:[#allocation3 + $0x20] sm:$0xf0]  ;;  %8439 = vmatpush.bf16.msra.mxu3 %v8324_v27  ;;  %8438 = vmatpush.bf16.msra.mxu2 %v8324_v27 }
  0x4d   : > { %303 = vst [vmem:[#allocation2 + $0x14] sm:$0x2] %v8687_v0 }
  0x4e   : > { %304 = vst [vmem:[#allocation2 + $0x20] sm:$0x2] %v8687_v0  ;;  %v7303_v31 = vld [vmem:[#allocation3] sm:$0xf] }
  0x4f   : > { %305 = vst [vmem:[#allocation2 + $0x2c] sm:$0x2] %v8687_v0  ;;  %v7304_v35 = vor.u32 %v8183_v32, %v7303_v31  ;;  %6037 = vmatpush.bf16.msra.mxu0 %v8323_v29  ;;  %8440 = vmatpush.bf16.msra.mxu1 %v8323_v29 }
  0x50   : > { %306 = vst [vmem:[#allocation2 + $0x38] sm:$0x2] %v8687_v0  ;;  %8442 = vmatpush.bf16.msra.mxu3 %v8323_v29  ;;  %8441 = vmatpush.bf16.msra.mxu2 %v8323_v29 }
  0x51   : > { %307 = vst [vmem:[#allocation2 + $0x44] sm:$0x2] %v8687_v0 }
  0x52   : > { %308 = vst [vmem:[#allocation2 + $0x50] sm:$0x2] %v8687_v0  ;;  %6038 = vmatmul.bf16.vlgmr.msra.gmra.mxu0 %v7304_v35  ;;  %v8939_v35 = vld [vmem:[%s8826_s28 + $0x4c] sm:$0xf] }
  0x53   : > { %309 = vst [vmem:[#allocation2 + $0x5c] sm:$0x2] %v8687_v0 }
  0x54   : > { %310 = vst [vmem:[#allocation2 + $0x68] sm:$0x2] %v8687_v0 }
  0x55   : > { %311 = vst [vmem:[#allocation2 + $0x74] sm:$0x2] %v8687_v0 }
  0x56   : > { %312 = vst [vmem:[#allocation2 + $0x80] sm:$0x2] %v8687_v0 }
  0x57   : > { %313 = vst [vmem:[#allocation2 + $0x8c] sm:$0x2] %v8687_v0 }
  0x58   : > { %314 = vst [vmem:[#allocation2 + $0x98] sm:$0x2] %v8687_v0 }
  0x59   : > { %315 = vst [vmem:[#allocation2 + $0xa4] sm:$0x2] %v8687_v0 }
  0x5a   : > { %316 = vst [vmem:[#allocation2 + $0xb0] sm:$0x2] %v8687_v0 }
  0x5b   : > { %317 = vst [vmem:[#allocation2 + $0xbc] sm:$0x2] %v8687_v0 }
  0x5c   : > { %318 = vst [vmem:[#allocation2 + $0xc8] sm:$0x2] %v8687_v0 }
  0x5d   : > { %528 = vst [vmem:[#allocation2 + $0x3c] sm:$0xe] %v407_v30  ;;  %v415_v30 = vsel %vm8886_vm5, %v413_v2, %v414_v3  ;;  %v434_v3 = vrot.slane %v8939_v35, 7 }
  0x5e   : > { %529 = vst [vmem:[#allocation2 + $0x40] sm:$0xf] %v410_v45 }
  0x5f   : > { %530 = vst [vmem:[#allocation2 + $0x44] sm:$0x1] %v411_v42 }
  0x60   : > { %301 = vst [vmem:[#allocation2 + $0xcc] sm:$0x1] %v8687_v0 }
  0x61   : > { %319 = vst [vmem:[#allocation2 + $0xd4] sm:$0x2] %v8687_v0  ;;  %v8923_v0 = vrot.slane %v447_v60, 4 }
  0x62   : > { %549 = vst [vmem:[#allocation2 + $0x90] sm:$0xe] %v442_v40 }
  0x63   : > { %550 = vst [vmem:[#allocation2 + $0x94] sm:$0xf] %v445_v57 }
  0x64   : > { %v579_v5 = vld [vmem:[#allocation2 + $0x3c] sm:$0xf]  ;;  %551 = vst [vmem:[#allocation2 + $0x98] sm:$0x1] %v446_v58 }
  0x65   : > { %v580_v7 = vld [vmem:[#allocation2 + $0x40] sm:$0xf]  ;;  %v736_v8 = vshrl.u32 %v579_v5, 16  ;;  %v739_v9 = vshll.u32 %v579_v5, 16  ;;  %540 = vst [vmem:[#allocation2 + $0x6c] sm:$0xe] %v427_v44 }
  0x66   : > { %v581_v10 = vld [vmem:[#allocation2 + $0x44] sm:$0x1]  ;;  %v745_v11 = vshll.u32 %v580_v7, 16  ;;  %v749_v12 = vshrl.u32 %v580_v7, 16  ;;  %541 = vst [vmem:[#allocation2 + $0x70] sm:$0xf] %v430_v61 }
  0x67   : > { %v738_v14 = vrot.slane %v736_v8, 4  ;;  %v741_v15 = vrot.slane %v739_v9, 5  ;;  %v755_v16 = vshll.u32 %v581_v10, 16  ;;  %542 = vst [vmem:[#allocation2 + $0x74] sm:$0x1] %v431_v1 }
  0x68   : > { %v747_v19 = vrot.slane %v745_v11, 5  ;;  %v751_v20 = vrot.slane %v749_v12, 4  ;;  %516 = vst [vmem:[#allocation2 + $0xc] sm:$0xe] %v387_v53 }
  0x69   : > { %v742_v22 = vor.u32 %v741_v15, %v738_v14  ;;  %v757_v23 = vrot.slane %v755_v16, 5  ;;  %v600_v24 = vld [vmem:[#allocation2 + $0x90] sm:$0xf]  ;;  %517 = vst [vmem:[#allocation2 + $0x10] sm:$0xf] %v390_v13 }
  0x6a   : > { %v752_v26 = vor.u32 %v751_v20, %v747_v19  ;;  %v601_v27 = vld [vmem:[#allocation2 + $0x94] sm:$0xf]  ;;  %v904_v28 = vshrl.u32 %v600_v24, 16  ;;  %v907_v29 = vshll.u32 %v600_v24, 16  ;;  %518 = vst [vmem:[#allocation2 + $0x14] sm:$0x1] %v391_v6 }
  0x6b   : > { %v743_v31 = vrot.slane %v742_v22, 4  ;;  %v602_v32 = vld [vmem:[#allocation2 + $0x98] sm:$0x1]  ;;  %v913_v33 = vshll.u32 %v601_v27, 16  ;;  %v917_v34 = vshrl.u32 %v601_v27, 16 }
  0x6c   : > { %v753_v37 = vrot.slane %v752_v26, 4  ;;  %v906_v38 = vrot.slane %v904_v28, 4  ;;  %v909_v40 = vrot.slane %v907_v29, 5  ;;  %v923_v41 = vshll.u32 %v602_v32, 16  ;;  %v591_v42 = vld [vmem:[#allocation2 + $0x6c] sm:$0xf] }
  0x6d   : > { %v748_v43 = vsel %vm8852_vm2, %v743_v31, %v747_v19  ;;  %v915_v44 = vrot.slane %v913_v33, 5  ;;  %v919_v45 = vrot.slane %v917_v34, 4  ;;  %v592_v46 = vld [vmem:[#allocation2 + $0x70] sm:$0xf]  ;;  %v832_v48 = vshrl.u32 %v591_v42, 16 }
  0x6e   : > { %v758_v49 = vsel %vm8852_vm2, %v753_v37, %v757_v23  ;;  %1041 = vst [vmem:[#allocation3 + $0x168] sm:$0xf] %v748_v43  ;;  %v910_v51 = vor.u32 %v909_v40, %v906_v38  ;;  %v925_v52 = vrot.slane %v923_v41, 5  ;;  %v593_v53 = vld [vmem:[#allocation2 + $0x74] sm:$0x1]  ;;  %v835_v55 = vshll.u32 %v591_v42, 16 }
  0x6f   : > { %1042 = vst [vmem:[#allocation3 + $0x18c] sm:$0xf] %v758_v49  ;;  %v920_v56 = vor.u32 %v919_v45, %v915_v44  ;;  %v834_v57 = vrot.slane %v832_v48, 4  ;;  %v841_v58 = vshll.u32 %v592_v46, 16  ;;  %v845_v61 = vshrl.u32 %v592_v46, 16 }
  0x70   : > { %v911_v62 = vrot.slane %v910_v51, 4  ;;  %v837_v63 = vrot.slane %v835_v55, 5  ;;  %v851_v1 = vshll.u32 %v593_v53, 16  ;;  %v567_v2 = vld [vmem:[#allocation2 + $0xc] sm:$0xf]  ;;  %v433_v34 = vrot.slane %v432_v36, 4 }
  0x71   : > { %v921_v5 = vrot.slane %v920_v56, 4  ;;  %v843_v6 = vrot.slane %v841_v58, 5  ;;  %v847_v7 = vrot.slane %v845_v61, 4  ;;  %v568_v8 = vld [vmem:[#allocation2 + $0x10] sm:$0xf]  ;;  %v640_v9 = vshrl.u32 %v567_v2, 16 }
  0x72   : > { %v916_v10 = vsel %vm8852_vm2, %v911_v62, %v915_v44  ;;  %v838_v11 = vor.u32 %v837_v63, %v834_v57  ;;  %v853_v12 = vrot.slane %v851_v1, 5  ;;  %v569_v13 = vld [vmem:[#allocation2 + $0x14] sm:$0x1]  ;;  %v643_v14 = vshll.u32 %v567_v2, 16  ;;  %531 = vst [vmem:[#allocation2 + $0x48] sm:$0xe] %v412_v54 }
  0x73   : > { %v926_v15 = vsel %vm8852_vm2, %v921_v5, %v925_v52  ;;  %1055 = vst [vmem:[#allocation3 + $0x360] sm:$0xf] %v916_v10  ;;  %v848_v16 = vor.u32 %v847_v7, %v843_v6  ;;  %v642_v19 = vrot.slane %v640_v9, 4  ;;  %v649_v20 = vshll.u32 %v568_v8, 16  ;;  %v8954_v22 = vld [vmem:[%s8826_s28 + $0x8] sm:$0xf] }
  0x74   : > { %1056 = vst [vmem:[#allocation3 + $0x384] sm:$0xf] %v926_v15  ;;  %v839_v23 = vrot.slane %v838_v11, 4  ;;  %v645_v24 = vrot.slane %v643_v14, 5  ;;  %v653_v26 = vshrl.u32 %v568_v8, 16  ;;  %v659_v27 = vshll.u32 %v569_v13, 16 }
  0x75   : > { %v7483_v28 = vld [vmem:[#allocation3 + $0x168] sm:$0xf]  ;;  %v849_v29 = vrot.slane %v848_v16, 4  ;;  %v651_v31 = vrot.slane %v649_v20, 5  ;;  %532 = vst [vmem:[#allocation2 + $0x4c] sm:$0xf] %v415_v30  ;;  %v450_v46 = vsel %vm8886_vm5, %v8923_v0, %v449_v4  ;;  %v435_v2 = vsel %vm8886_vm5, %v433_v34, %v434_v3 }
  0x76   : > { %v8228_v47 = vld [vmem:[#allocation3 + $0x188] sm:$0xf0]  ;;  %v844_v54 = vsel %vm8852_vm2, %v839_v23, %v843_v6  ;;  %v646_v32 = vor.u32 %v645_v24, %v642_v19  ;;  %v655_v33 = vrot.slane %v653_v26, 4  ;;  %533 = vst [vmem:[#allocation2 + $0x50] sm:$0x1] %v8927_v17  ;;  %v436_v30 = vrot.slane %v434_v3, 4 }
  0x77   : > { %v7484_v37 = vor.u32 %v8228_v47, %v7483_v28  ;;  %v854_v38 = vsel %vm8852_vm2, %v849_v29, %v853_v12  ;;  %1049 = vst [vmem:[#allocation3 + $0x288] sm:$0xf] %v844_v54  ;;  %v323_v40 = vld [vmem:[%s8826_s28 + $0xc] sm:$0xf]  ;;  %v392_v41 = vrot.slane %v8954_v22, 7  ;;  %v661_v44 = vrot.slane %v659_v27, 5 }
  0x78   : > { %1050 = vst [vmem:[#allocation3 + $0x2ac] sm:$0xf] %v854_v38  ;;  %v647_v42 = vrot.slane %v646_v32, 4  ;;  %v656_v43 = vor.u32 %v655_v33, %v651_v31  ;;  %v8968_v45 = vld [vmem:[%s8826_s28 + $0x30] sm:$0xf]  ;;  %v394_v49 = vrot.slane %v323_v40, 7 }
  0x79   : > { %6063 = vmatmul.bf16.vlgmr.msra.gmra.mxu1 %v7484_v37  ;;  %v582_v17 = vld [vmem:[#allocation2 + $0x48] sm:$0xf]  ;;  %552 = vst [vmem:[#allocation2 + $0x9c] sm:$0xe] %v447_v60  ;;  %v393_v48 = vrot.slane %v392_v41, 4  ;;  %v417_v59 = vrot.slane %v8968_v45, 7 }
  0x7a   : > { %v7735_v51 = vld [vmem:[#allocation3 + $0x360] sm:$0xf]  ;;  %v652_v52 = vsel %vm8852_vm2, %v647_v42, %v651_v31  ;;  %v657_v53 = vrot.slane %v656_v43, 4  ;;  %v760_v55 = vshrl.u32 %v582_v17, 16  ;;  %v763_v56 = vshll.u32 %v582_v17, 16  ;;  %v8346_v8 = vld [vmem:[#allocation7 + $0xb8] sm:$0xff] }
  0x7b   : > { %v8291_v57 = vld [vmem:[#allocation3 + $0x380] sm:$0xf0]  ;;  %1033 = vst [vmem:[#allocation3 + $0x48] sm:$0xf] %v652_v52  ;;  %v396_v58 = vrot.slane %v394_v49, 4  ;;  %6208 = vmatpush.bf16.msrb.mxu2 %v8346_v8  ;;  %v395_v21 = vsel %vm8886_vm5, %v393_v48, %v394_v49 }
  0x7c   : > { %v7736_v61 = vor.u32 %v8291_v57, %v7735_v51  ;;  %v662_v4 = vsel %vm8852_vm2, %v657_v53, %v661_v44  ;;  %v583_v50 = vld [vmem:[#allocation2 + $0x4c] sm:$0xf]  ;;  %v762_v60 = vrot.slane %v760_v55, 4  ;;  %v765_v0 = vrot.slane %v763_v56, 5  ;;  %553 = vst [vmem:[#allocation2 + $0xa0] sm:$0xf] %v450_v46 }
  0x7d   : > { %1034 = vst [vmem:[#allocation3 + $0x6c] sm:$0xf] %v662_v4  ;;  %v584_v62 = vld [vmem:[#allocation2 + $0x50] sm:$0x1]  ;;  %v769_v63 = vshll.u32 %v583_v50, 16  ;;  %v773_v1 = vshrl.u32 %v583_v50, 16 }
  0x7e   : > { %6098 = vmatmul.bf16.vlgmr.msra.gmra.mxu3 %v7736_v61  ;;  %v7627_v5 = vld [vmem:[#allocation3 + $0x288] sm:$0xf]  ;;  %v766_v6 = vor.u32 %v765_v0, %v762_v60  ;;  %v779_v7 = vshll.u32 %v584_v62, 16  ;;  %554 = vst [vmem:[#allocation2 + $0xa4] sm:$0x1] %v8934_v25 }
  0x7f   : > { %v8264_v9 = vld [vmem:[#allocation3 + $0x2a8] sm:$0xf0]  ;;  %v771_v10 = vrot.slane %v769_v63, 5  ;;  %v775_v11 = vrot.slane %v773_v1, 4  ;;  %543 = vst [vmem:[#allocation2 + $0x78] sm:$0xe] %v432_v36 }
  0x80   : > { %v7628_v12 = vor.u32 %v8264_v9, %v7627_v5  ;;  %v767_v13 = vrot.slane %v766_v6, 4  ;;  %v781_v35 = vrot.slane %v779_v7, 5  ;;  %v603_v14 = vld [vmem:[#allocation2 + $0x9c] sm:$0xf]  ;;  %544 = vst [vmem:[#allocation2 + $0x7c] sm:$0xf] %v435_v2 }
  0x81   : > { %v776_v3 = vor.u32 %v775_v11, %v771_v10  ;;  %v928_v15 = vshrl.u32 %v603_v14, 16  ;;  %v931_v16 = vshll.u32 %v603_v14, 16  ;;  %545 = vst [vmem:[#allocation2 + $0x80] sm:$0x1] %v436_v30  ;;  %v333_v19 = vld [vmem:[%s8826_s28 + $0x34] sm:$0xf] }
  0x82   : > { %6083 = vmatmul.bf16.vlgmr.msra.gmra.mxu2 %v7628_v12  ;;  %v7339_v25 = vld [vmem:[#allocation3 + $0x48] sm:$0xf]  ;;  %v772_v20 = vsel %vm8852_vm2, %v767_v13, %v771_v10  ;;  %519 = vst [vmem:[#allocation2 + $0x18] sm:$0xe] %v392_v41  ;;  %v418_v36 = vrot.slane %v417_v59, 4  ;;  %v419_v22 = vrot.slane %v333_v19, 7 }
  0x83   : > { %v777_v23 = vrot.slane %v776_v3, 4  ;;  %1043 = vst [vmem:[#allocation3 + $0x1b0] sm:$0xf] %v772_v20  ;;  %v604_v24 = vld [vmem:[#allocation2 + $0xa0] sm:$0xf]  ;;  %v930_v26 = vrot.slane %v928_v15, 4 }
  0x84   : > { %v8192_v27 = vld [vmem:[#allocation3 + $0x68] sm:$0xf0]  ;;  %v933_v28 = vrot.slane %v931_v16, 5  ;;  %v937_v29 = vshll.u32 %v604_v24, 16  ;;  %v941_v31 = vshrl.u32 %v604_v24, 16  ;;  %v421_v33 = vrot.slane %v419_v22, 4 }
  0x85   : > { %v7340_v47 = vor.u32 %v8192_v27, %v7339_v25  ;;  %v782_v54 = vsel %vm8852_vm2, %v777_v23, %v781_v35  ;;  %v605_v32 = vld [vmem:[#allocation2 + $0xa4] sm:$0x1]  ;;  %520 = vst [vmem:[#allocation2 + $0x1c] sm:$0xf] %v395_v21  ;;  %v420_v42 = vsel %vm8886_vm5, %v418_v36, %v419_v22  ;;  %v346_v16 = vld [vmem:[%s8826_s28 + $0x68] sm:$0xf] }
  0x86   : > { %1044 = vst [vmem:[#allocation3 + $0x1d4] sm:$0xf] %v782_v54  ;;  %v934_v34 = vor.u32 %v933_v28, %v930_v26  ;;  %v939_v37 = vrot.slane %v937_v29, 5  ;;  %v943_v38 = vrot.slane %v941_v31, 4  ;;  %v947_v30 = vshll.u32 %v605_v32, 16 }
  0x87   : > { %6043 = vmatmul.bf16.gmra.mxu0 %v7340_v47  ;;  %v594_v40 = vld [vmem:[#allocation2 + $0x78] sm:$0xf]  ;;  %v595_v41 = vld [vmem:[#allocation2 + $0x7c] sm:$0xf]  ;;  %521 = vst [vmem:[#allocation2 + $0x20] sm:$0x1] %v396_v58 }
  0x88   : > { %v935_v43 = vrot.slane %v934_v34, 4  ;;  %v944_v44 = vor.u32 %v943_v38, %v939_v37  ;;  %v949_v17 = vrot.slane %v947_v30, 5  ;;  %v596_v46 = vld [vmem:[#allocation2 + $0x80] sm:$0x1]  ;;  %v856_v48 = vshrl.u32 %v594_v40, 16  ;;  %v8338_v34 = vld [vmem:[#allocation7 + $0x78] sm:$0xff] }
  0x89   : > { %v859_v49 = vshll.u32 %v594_v40, 16  ;;  %v865_v51 = vshll.u32 %v595_v41, 16  ;;  %v869_v52 = vshrl.u32 %v595_v41, 16  ;;  %v875_v53 = vshll.u32 %v596_v46, 16  ;;  %v570_v55 = vld [vmem:[#allocation2 + $0x18] sm:$0xf]  ;;  %6119 = vmatpush.bf16.msrb.mxu1 %v8338_v34 }
  0x8a   : > { %v7519_v56 = vld [vmem:[#allocation3 + $0x1b0] sm:$0xf]  ;;  %v940_v57 = vsel %vm8852_vm2, %v935_v43, %v939_v37  ;;  %v945_v61 = vrot.slane %v944_v44, 4  ;;  %v858_v4 = vrot.slane %v856_v48, 4  ;;  %v664_v58 = vshrl.u32 %v570_v55, 16  ;;  %v8354_v41 = vld [vmem:[#allocation7 + $0xf8] sm:$0xff] }
  0x8b   : > { %1057 = vst [vmem:[#allocation3 + $0x3a8] sm:$0xf] %v940_v57  ;;  %v861_v50 = vrot.slane %v859_v49, 5  ;;  %v867_v60 = vrot.slane %v865_v51, 5  ;;  %v871_v0 = vrot.slane %v869_v52, 4  ;;  %v877_v62 = vrot.slane %v875_v53, 5  ;;  %6297 = vmatpush.bf16.msrb.mxu3 %v8354_v41 }
  0x8c   : > { %v950_v63 = vsel %vm8852_vm2, %v945_v61, %v949_v17  ;;  %v571_v1 = vld [vmem:[#allocation2 + $0x1c] sm:$0xf]  ;;  %v666_v2 = vrot.slane %v664_v58, 4  ;;  %v667_v5 = vshll.u32 %v570_v55, 16  ;;  %534 = vst [vmem:[#allocation2 + $0x54] sm:$0xe] %v417_v59 }
  0x8d   : > { %v8237_v6 = vld [vmem:[#allocation3 + $0x1d0] sm:$0xf0]  ;;  %1058 = vst [vmem:[#allocation3 + $0x3cc] sm:$0xf] %v950_v63  ;;  %v862_v7 = vor.u32 %v861_v50, %v858_v4  ;;  %v872_v8 = vor.u32 %v871_v0, %v867_v60  ;;  %v673_v9 = vshll.u32 %v571_v1, 16  ;;  %v677_v10 = vshrl.u32 %v571_v1, 16 }
  0x8e   : > { %v7520_v11 = vor.u32 %v8237_v6, %v7519_v56  ;;  %v572_v12 = vld [vmem:[#allocation2 + $0x20] sm:$0x1]  ;;  %v669_v13 = vrot.slane %v667_v5, 5  ;;  %535 = vst [vmem:[#allocation2 + $0x58] sm:$0xf] %v420_v42  ;;  %v452_v36 = vrot.slane %v346_v16, 7 }
  0x8f   : > { %v863_v35 = vrot.slane %v862_v7, 4  ;;  %v873_v14 = vrot.slane %v872_v8, 4  ;;  %v675_v3 = vrot.slane %v673_v9, 5  ;;  %v679_v15 = vrot.slane %v677_v10, 4  ;;  %536 = vst [vmem:[#allocation2 + $0x5c] sm:$0x1] %v421_v33 }
  0x90   : > { %6068 = vmatmul.bf16.gmra.mxu1 %v7520_v11  ;;  %v670_v45 = vor.u32 %v669_v13, %v666_v2  ;;  %v683_v59 = vshll.u32 %v572_v12, 16  ;;  %v347_v21 = vld [vmem:[%s8826_s28 + $0x6c] sm:$0xf]  ;;  %v453_v28 = vrot.slane %v452_v36, 4  ;;  %v340_v29 = vld [vmem:[%s8826_s28 + $0x50] sm:$0xf] }
  0x91   : > { %v868_v19 = vsel %vm8852_vm2, %v863_v35, %v867_v60  ;;  %v878_v25 = vsel %vm8852_vm2, %v873_v14, %v877_v62  ;;  %v680_v20 = vor.u32 %v679_v15, %v675_v3  ;;  %v454_v33 = vrot.slane %v347_v21, 7  ;;  %v8345_v40 = vld [vmem:[#allocation7 + $0xb0] sm:$0xff]  ;;  %555 = vst [vmem:[#allocation2 + $0xa8] sm:$0xe] %v452_v36  ;;  %v8344_v56 = vld [vmem:[#allocation7 + $0xa8] sm:$0xff]  ;;  %v8343_v5 = vld [vmem:[#allocation7 + $0xa0] sm:$0xff] }
  0x92   : > { %v7771_v22 = vld [vmem:[#allocation3 + $0x3a8] sm:$0xf]  ;;  %1051 = vst [vmem:[#allocation3 + $0x2d0] sm:$0xf] %v868_v19  ;;  %v671_v23 = vrot.slane %v670_v45, 4  ;;  %v685_v24 = vrot.slane %v683_v59, 5  ;;  %6209 = vmatpush.bf16.msrb.mxu2 %v8345_v40 }
  0x93   : > { %1052 = vst [vmem:[#allocation3 + $0x2f4] sm:$0xf] %v878_v25  ;;  %v681_v26 = vrot.slane %v680_v20, 4  ;;  %v585_v27 = vld [vmem:[#allocation2 + $0x54] sm:$0xf]  ;;  %v455_v17 = vsel %vm8886_vm5, %v453_v28, %v454_v33  ;;  %v456_v52 = vrot.slane %v454_v33, 4 }
  0x94   : > { %v8300_v31 = vld [vmem:[#allocation3 + $0x3c8] sm:$0xf0]  ;;  %v676_v47 = vsel %vm8852_vm2, %v671_v23, %v675_v3  ;;  %v784_v54 = vshrl.u32 %v585_v27, 16  ;;  %v787_v32 = vshll.u32 %v585_v27, 16  ;;  %v341_v46 = vld [vmem:[%s8826_s28 + $0x54] sm:$0xf] }
  0x95   : > { %v7772_v37 = vor.u32 %v8300_v31, %v7771_v22  ;;  %v686_v38 = vsel %vm8852_vm2, %v681_v26, %v685_v24  ;;  %1035 = vst [vmem:[#allocation3 + $0x90] sm:$0xf] %v676_v47  ;;  %v586_v30 = vld [vmem:[#allocation2 + $0x58] sm:$0xf]  ;;  %v8337_v55 = vld [vmem:[#allocation7 + $0x70] sm:$0xff]  ;;  %v437_v61 = vrot.slane %v340_v29, 7 }
  0x96   : > { %1036 = vst [vmem:[#allocation3 + $0xb4] sm:$0xf] %v686_v38  ;;  %v587_v42 = vld [vmem:[#allocation2 + $0x5c] sm:$0x1]  ;;  %v786_v43 = vrot.slane %v784_v54, 4  ;;  %v789_v44 = vrot.slane %v787_v32, 5  ;;  %6120 = vmatpush.bf16.msrb.mxu1 %v8337_v55  ;;  %6210 = vmatpush.bf16.msrb.mxu2 %v8344_v56 }
  0x97   : > { %6103 = vmatmul.bf16.gmra.mxu3 %v7772_v37  ;;  %v793_v48 = vshll.u32 %v586_v30, 16  ;;  %v797_v49 = vshrl.u32 %v586_v30, 16  ;;  %v803_v51 = vshll.u32 %v587_v42, 16  ;;  %556 = vst [vmem:[#allocation2 + $0xac] sm:$0xf] %v455_v17  ;;  %v8353_v57 = vld [vmem:[#allocation7 + $0xf0] sm:$0xff] }
  0x98   : > { %v790_v53 = vor.u32 %v789_v44, %v786_v43  ;;  %557 = vst [vmem:[#allocation2 + $0xb0] sm:$0x1] %v456_v52  ;;  %v8336_v63 = vld [vmem:[#allocation7 + $0x68] sm:$0xff]  ;;  %v438_v6 = vrot.slane %v437_v61, 4  ;;  %v439_v7 = vrot.slane %v341_v46, 7  ;;  %6298 = vmatpush.bf16.msrb.mxu3 %v8353_v57  ;;  %v8335_v11 = vld [vmem:[#allocation7 + $0x60] sm:$0xff] }
  0x99   : > { %v7663_v4 = vld [vmem:[#allocation3 + $0x2d0] sm:$0xf]  ;;  %v795_v58 = vrot.slane %v793_v48, 5  ;;  %v799_v50 = vrot.slane %v797_v49, 4  ;;  %v805_v60 = vrot.slane %v803_v51, 5  ;;  %v8352_v10 = vld [vmem:[#allocation7 + $0xe8] sm:$0xff] }
  0x9a   : > { %v8273_v0 = vld [vmem:[#allocation3 + $0x2f0] sm:$0xf0]  ;;  %v791_v62 = vrot.slane %v790_v53, 4  ;;  %546 = vst [vmem:[#allocation2 + $0x84] sm:$0xe] %v437_v61  ;;  %v440_v35 = vsel %vm8886_vm5, %v438_v6, %v439_v7  ;;  %v441_v14 = vrot.slane %v439_v7, 4  ;;  %6121 = vmatpush.bf16.msrb.mxu1 %v8336_v63  ;;  %6211 = vmatpush.bf16.msrb.mxu2 %v8343_v5 }
  0x9b   : > { %v7664_v1 = vor.u32 %v8273_v0, %v7663_v4  ;;  %v800_v2 = vor.u32 %v799_v50, %v795_v58  ;;  %v8342_v3 = vld [vmem:[#allocation7 + $0x98] sm:$0xff]  ;;  %v606_v45 = vld [vmem:[#allocation2 + $0xa8] sm:$0xf]  ;;  %547 = vst [vmem:[#allocation2 + $0x88] sm:$0xf] %v440_v35  ;;  %v8351_v59 = vld [vmem:[#allocation7 + $0xe0] sm:$0xff] }
  0x9c   : > { %v7375_v8 = vld [vmem:[#allocation3 + $0x90] sm:$0xf]  ;;  %v796_v9 = vsel %vm8852_vm2, %v791_v62, %v795_v58  ;;  %v952_v20 = vshrl.u32 %v606_v45, 16  ;;  %v955_v21 = vshll.u32 %v606_v45, 16  ;;  %548 = vst [vmem:[#allocation2 + $0x8c] sm:$0x1] %v441_v14  ;;  %6299 = vmatpush.bf16.msrb.mxu3 %v8352_v10 }
  0x9d   : > { %6088 = vmatmul.bf16.gmra.mxu2 %v7664_v1  ;;  %v8201_v12 = vld [vmem:[#allocation3 + $0xb0] sm:$0xf0]  ;;  %v801_v13 = vrot.slane %v800_v2, 4  ;;  %1045 = vst [vmem:[#allocation3 + $0x1f8] sm:$0xf] %v796_v9 }
  0x9e   : > { %v7376_v15 = vor.u32 %v8201_v12, %v7375_v8  ;;  %v324_v16 = vld [vmem:[%s8826_s28 + $0x10] sm:$0xf]  ;;  %v607_v25 = vld [vmem:[#allocation2 + $0xac] sm:$0xf]  ;;  %v954_v26 = vrot.slane %v952_v20, 4  ;;  %v957_v27 = vrot.slane %v955_v21, 5  ;;  %6122 = vmatpush.bf16.msrb.mxu1 %v8335_v11  ;;  %6212 = vmatpush.bf16.msrb.mxu2 %v8342_v3 }
  0x9f   : > { %v806_v19 = vsel %vm8852_vm2, %v801_v13, %v805_v60  ;;  %v961_v36 = vshll.u32 %v607_v25, 16  ;;  %v965_v22 = vshrl.u32 %v607_v25, 16  ;;  %v325_v23 = vld [vmem:[%s8826_s28 + $0x14] sm:$0xf]  ;;  %v608_v24 = vld [vmem:[#allocation2 + $0xb0] sm:$0x1] }
  0xa0   : > { %6048 = vmatmul.bf16.gmra.mxu0 %v7376_v15  ;;  %1046 = vst [vmem:[#allocation3 + $0x21c] sm:$0xf] %v806_v19  ;;  %v397_v28 = vrot.slane %v324_v16, 7  ;;  %v399_v29 = vrot.slane %v325_v23, 7  ;;  %v971_v54 = vshll.u32 %v608_v24, 16  ;;  %v958_v33 = vor.u32 %v957_v27, %v954_v26  ;;  %6300 = vmatpush.bf16.msrb.mxu3 %v8351_v59  ;;  %v8334_v19 = vld [vmem:[#allocation7 + $0x58] sm:$0xff] }
  0xa1   : > { %v963_v31 = vrot.slane %v961_v36, 5  ;;  %v967_v47 = vrot.slane %v965_v22, 4  ;;  %v597_v32 = vld [vmem:[#allocation2 + $0x84] sm:$0xf]  ;;  %v334_v43 = vld [vmem:[%s8826_s28 + $0x38] sm:$0xf] }
  0xa2   : > { %v880_v34 = vshrl.u32 %v597_v32, 16  ;;  %v883_v37 = vshll.u32 %v597_v32, 16  ;;  %v398_v38 = vrot.slane %v397_v28, 4  ;;  %522 = vst [vmem:[#allocation2 + $0x24] sm:$0xe] %v397_v28  ;;  %v973_v41 = vrot.slane %v971_v54, 5  ;;  %6123 = vmatpush.bf16.msrb.mxu1 %v8334_v19 }
  0xa3   : > { %v968_v40 = vor.u32 %v967_v47, %v963_v31  ;;  %v401_v42 = vrot.slane %v399_v29, 4  ;;  %v959_v44 = vrot.slane %v958_v33, 4  ;;  %v598_v17 = vld [vmem:[#allocation2 + $0x88] sm:$0xf]  ;;  %v599_v52 = vld [vmem:[#allocation2 + $0x8c] sm:$0x1] }
  0xa4   : > { %v7555_v30 = vld [vmem:[#allocation3 + $0x1f8] sm:$0xf]  ;;  %v882_v46 = vrot.slane %v880_v34, 4  ;;  %v885_v48 = vrot.slane %v883_v37, 5  ;;  %v400_v49 = vsel %vm8886_vm5, %v398_v38, %v399_v29  ;;  %v889_v53 = vshll.u32 %v598_v17, 16  ;;  %v8341_v25 = vld [vmem:[#allocation7 + $0x90] sm:$0xff] }
  0xa5   : > { %v969_v51 = vrot.slane %v968_v40, 4  ;;  %v893_v55 = vshrl.u32 %v598_v17, 16  ;;  %v422_v56 = vrot.slane %v334_v43, 7  ;;  %v964_v61 = vsel %vm8852_vm2, %v959_v44, %v963_v31  ;;  %523 = vst [vmem:[#allocation2 + $0x28] sm:$0xf] %v400_v49  ;;  %6213 = vmatpush.bf16.msrb.mxu2 %v8341_v25  ;;  %v8350_v31 = vld [vmem:[#allocation7 + $0xd8] sm:$0xff] }
  0xa6   : > { %v886_v4 = vor.u32 %v885_v48, %v882_v46  ;;  %v899_v58 = vshll.u32 %v599_v52, 16  ;;  %1059 = vst [vmem:[#allocation3 + $0x3f0] sm:$0xf] %v964_v61  ;;  %v891_v0 = vrot.slane %v889_v53, 5  ;;  %v335_v63 = vld [vmem:[%s8826_s28 + $0x3c] sm:$0xf]  ;;  %6301 = vmatpush.bf16.msrb.mxu3 %v8350_v31 }
  0xa7   : > { %v8246_v57 = vld [vmem:[#allocation3 + $0x218] sm:$0xf0]  ;;  %v974_v60 = vsel %vm8852_vm2, %v969_v51, %v973_v41  ;;  %v895_v62 = vrot.slane %v893_v55, 4  ;;  %v423_v5 = vrot.slane %v422_v56, 4  ;;  %v424_v6 = vrot.slane %v335_v63, 7  ;;  %v8333_v38 = vld [vmem:[#allocation7 + $0x50] sm:$0xff] }
  0xa8   : > { %v7556_v50 = vor.u32 %v8246_v57, %v7555_v30  ;;  %1060 = vst [vmem:[#allocation3 + $0x414] sm:$0xf] %v974_v60  ;;  %v887_v1 = vrot.slane %v886_v4, 4  ;;  %v901_v2 = vrot.slane %v899_v58, 5  ;;  %v348_v9 = vld [vmem:[%s8826_s28 + $0x70] sm:$0xf]  ;;  %6124 = vmatpush.bf16.msrb.mxu1 %v8333_v38 }
  0xa9   : > { %v896_v7 = vor.u32 %v895_v62, %v891_v0  ;;  %524 = vst [vmem:[#allocation2 + $0x2c] sm:$0x1] %v401_v42  ;;  %v573_v8 = vld [vmem:[#allocation2 + $0x24] sm:$0xf]  ;;  %v425_v13 = vsel %vm8886_vm5, %v423_v5, %v424_v6  ;;  %v349_v35 = vld [vmem:[%s8826_s28 + $0x74] sm:$0xf] }
  0xaa   : > { %6073 = vmatmul.bf16.gmra.mxu1 %v7556_v50  ;;  %v892_v10 = vsel %vm8852_vm2, %v887_v1, %v891_v0  ;;  %v688_v11 = vshrl.u32 %v573_v8, 16  ;;  %v691_v12 = vshll.u32 %v573_v8, 16  ;;  %537 = vst [vmem:[#allocation2 + $0x60] sm:$0xe] %v422_v56  ;;  %v426_v3 = vrot.slane %v424_v6, 4  ;;  %v8362_v47 = vld [vmem:[#allocation7 + $0x138] sm:$0xff] }
  0xab   : > { %v897_v14 = vrot.slane %v896_v7, 4  ;;  %1053 = vst [vmem:[#allocation3 + $0x318] sm:$0xf] %v892_v10  ;;  %v457_v15 = vrot.slane %v348_v9, 7  ;;  %v459_v45 = vrot.slane %v349_v35, 7  ;;  %6386 = vmatpush.bf16.msrb.mxu0 %v8362_v47  ;;  %v8340_v41 = vld [vmem:[#allocation7 + $0x88] sm:$0xff] }
  0xac   : > { %v690_v59 = vrot.slane %v688_v11, 4  ;;  %v693_v16 = vrot.slane %v691_v12, 5  ;;  %538 = vst [vmem:[#allocation2 + $0x64] sm:$0xf] %v425_v13  ;;  %v574_v21 = vld [vmem:[#allocation2 + $0x28] sm:$0xf]  ;;  %6214 = vmatpush.bf16.msrb.mxu2 %v8340_v41 }
  0xad   : > { %v902_v20 = vsel %vm8852_vm2, %v897_v14, %v901_v2  ;;  %539 = vst [vmem:[#allocation2 + $0x68] sm:$0x1] %v426_v3  ;;  %v458_v36 = vrot.slane %v457_v15, 4  ;;  %v461_v22 = vrot.slane %v459_v45, 4  ;;  %v7807_v23 = vld [vmem:[#allocation3 + $0x3f0] sm:$0xf] }
  0xae   : > { %1054 = vst [vmem:[#allocation3 + $0x33c] sm:$0xf] %v902_v20  ;;  %v694_v24 = vor.u32 %v693_v16, %v690_v59  ;;  %v697_v26 = vshll.u32 %v574_v21, 16  ;;  %v701_v27 = vshrl.u32 %v574_v21, 16  ;;  %v8349_v51 = vld [vmem:[#allocation7 + $0xd0] sm:$0xff]  ;;  %v8332_v60 = vld [vmem:[#allocation7 + $0x48] sm:$0xff] }
  0xaf   : > { %v8309_v28 = vld [vmem:[#allocation3 + $0x410] sm:$0xf0]  ;;  %v460_v29 = vsel %vm8886_vm5, %v458_v36, %v459_v45  ;;  %558 = vst [vmem:[#allocation2 + $0xb4] sm:$0xe] %v457_v15  ;;  %6302 = vmatpush.bf16.msrb.mxu3 %v8349_v51  ;;  %v8339_v5 = vld [vmem:[#allocation7 + $0x80] sm:$0xff]  ;;  %v8348_v6 = vld [vmem:[#allocation7 + $0xc8] sm:$0xff]  ;;  %6125 = vmatpush.bf16.msrb.mxu1 %v8332_v60 }
  0xb0   : > { %v7808_v54 = vor.u32 %v8309_v28, %v7807_v23  ;;  %v575_v32 = vld [vmem:[#allocation2 + $0x2c] sm:$0x1]  ;;  %v695_v33 = vrot.slane %v694_v24, 4  ;;  %v699_v34 = vrot.slane %v697_v26, 5  ;;  %v703_v37 = vrot.slane %v701_v27, 4  ;;  %v8360_v13 = vld [vmem:[#allocation7 + $0x128] sm:$0xff]  ;;  %6215 = vmatpush.bf16.msrb.mxu2 %v8339_v5 }
  0xb1   : > { %v707_v30 = vshll.u32 %v575_v32, 16  ;;  %v588_v40 = vld [vmem:[#allocation2 + $0x60] sm:$0xf]  ;;  %559 = vst [vmem:[#allocation2 + $0xb8] sm:$0xf] %v460_v29  ;;  %v8361_v50 = vld [vmem:[#allocation7 + $0x130] sm:$0xff] }
  0xb2   : > { %6108 = vmatmul.bf16.gmra.mxu3 %v7808_v54  ;;  %v7699_v42 = vld [vmem:[#allocation3 + $0x318] sm:$0xf]  ;;  %v700_v43 = vsel %vm8852_vm2, %v695_v33, %v699_v34  ;;  %v704_v44 = vor.u32 %v703_v37, %v699_v34  ;;  %v808_v17 = vshrl.u32 %v588_v40, 16  ;;  %v811_v46 = vshll.u32 %v588_v40, 16  ;;  %560 = vst [vmem:[#allocation2 + $0xbc] sm:$0x1] %v461_v22  ;;  %6387 = vmatpush.bf16.msrb.mxu0 %v8361_v50 }
  0xb3   : > { %v709_v48 = vrot.slane %v707_v30, 5  ;;  %1037 = vst [vmem:[#allocation3 + $0xd8] sm:$0xf] %v700_v43  ;;  %v589_v49 = vld [vmem:[#allocation2 + $0x64] sm:$0xf]  ;;  %6303 = vmatpush.bf16.msrb.mxu3 %v8348_v6  ;;  %v8331_v16 = vld [vmem:[#allocation7 + $0x40] sm:$0xff] }
  0xb4   : > { %v705_v52 = vrot.slane %v704_v44, 4  ;;  %v590_v53 = vld [vmem:[#allocation2 + $0x68] sm:$0x1]  ;;  %v810_v55 = vrot.slane %v808_v17, 4  ;;  %v813_v56 = vrot.slane %v811_v46, 5  ;;  %v817_v57 = vshll.u32 %v589_v49, 16  ;;  %6126 = vmatpush.bf16.msrb.mxu1 %v8331_v16 }
  0xb5   : > { %v8282_v61 = vld [vmem:[#allocation3 + $0x338] sm:$0xf0]  ;;  %v821_v4 = vshrl.u32 %v589_v49, 16  ;;  %v827_v58 = vshll.u32 %v590_v53, 16  ;;  %v1338_v35 = vld [vmem:[#allocation2] sm:$0xe] }
  0xb6   : > { %v7700_v0 = vor.u32 %v8282_v61, %v7699_v42  ;;  %v710_v62 = vsel %vm8852_vm2, %v705_v52, %v709_v48  ;;  %v814_v63 = vor.u32 %v813_v56, %v810_v55  ;;  %v819_v1 = vrot.slane %v817_v57, 5  ;;  %v609_v2 = vld [vmem:[#allocation2 + $0xb4] sm:$0xf]  ;;  %v1339_v36 = vld [vmem:[#allocation2 + $0x4] sm:$0xf]  ;;  %6388 = vmatpush.bf16.msrb.mxu0 %v8360_v13  ;;  %v8347_v32 = vld [vmem:[#allocation7 + $0xc0] sm:$0xff] }
  0xb7   : > { %1038 = vst [vmem:[#allocation3 + $0xfc] sm:$0xf] %v710_v62  ;;  %v823_v7 = vrot.slane %v821_v4, 4  ;;  %v829_v8 = vrot.slane %v827_v58, 5  ;;  %v976_v9 = vshrl.u32 %v609_v2, 16  ;;  %v979_v10 = vshll.u32 %v609_v2, 16  ;;  %6304 = vmatpush.bf16.msrb.mxu3 %v8347_v32 }
  0xb8   : > { %6093 = vmatmul.bf16.gmra.mxu2 %v7700_v0  ;;  %v815_v11 = vrot.slane %v814_v63, 4  ;;  %v610_v12 = vld [vmem:[#allocation2 + $0xb8] sm:$0xf]  ;;  %v1340_v26 = vld [vmem:[#allocation2 + $0x8] sm:$0x3]  ;;  %v1390_v47 = vshrl.u32 %v1338_v35, 16 }
  0xb9   : > { %v824_v14 = vor.u32 %v823_v7, %v819_v1  ;;  %v611_v3 = vld [vmem:[#allocation2 + $0xbc] sm:$0x1]  ;;  %v978_v15 = vrot.slane %v976_v9, 4  ;;  %v981_v45 = vrot.slane %v979_v10, 5  ;;  %v985_v59 = vshll.u32 %v610_v12, 16  ;;  %v8358_v61 = vld [vmem:[#allocation7 + $0x118] sm:$0xff] }
  0xba   : > { %v7411_v19 = vld [vmem:[#allocation3 + $0xd8] sm:$0xf]  ;;  %v820_v25 = vsel %vm8852_vm2, %v815_v11, %v819_v1  ;;  %v989_v20 = vshrl.u32 %v610_v12, 16  ;;  %v995_v21 = vshll.u32 %v611_v3, 16  ;;  %v1393_v54 = vshll.u32 %v1338_v35, 16  ;;  %v8359_v33 = vld [vmem:[#allocation7 + $0x120] sm:$0xff] }
  0xbb   : > { %v825_v22 = vrot.slane %v824_v14, 4  ;;  %1047 = vst [vmem:[#allocation3 + $0x240] sm:$0xf] %v820_v25  ;;  %v982_v23 = vor.u32 %v981_v45, %v978_v15  ;;  %v987_v24 = vrot.slane %v985_v59, 5  ;;  %v1399_v38 = vshrl.u32 %v1339_v36, 16  ;;  %6389 = vmatpush.bf16.msrb.mxu0 %v8359_v33  ;;  %v8357_v35 = vld [vmem:[#allocation7 + $0x110] sm:$0xff] }
  0xbc   : > { %v991_v27 = vrot.slane %v989_v20, 4  ;;  %v997_v28 = vrot.slane %v995_v21, 5  ;;  %v1402_v30 = vshll.u32 %v1339_v36, 16  ;;  %v1392_v42 = vrot.slane %v1390_v47, 5  ;;  %v326_v44 = vld [vmem:[%s8826_s28 + $0x18] sm:$0xf] }
  0xbd   : > { %v830_v29 = vsel %vm8852_vm2, %v825_v22, %v829_v8  ;;  %v983_v31 = vrot.slane %v982_v23, 4  ;;  %v1395_v43 = vrot.slane %v1393_v54, 6  ;;  %v327_v17 = vld [vmem:[%s8826_s28 + $0x1c] sm:$0xf]  ;;  %v1401_v48 = vrot.slane %v1399_v38, 5 }
  0xbe   : > { %v8210_v34 = vld [vmem:[#allocation3 + $0xf8] sm:$0xf0]  ;;  %1048 = vst [vmem:[#allocation3 + $0x264] sm:$0xf] %v830_v29  ;;  %v992_v37 = vor.u32 %v991_v27, %v987_v24  ;;  %v1404_v49 = vrot.slane %v1402_v30, 6  ;;  %v1409_v51 = vshrl.u32 %v1340_v26, 16 }
  0xbf   : > { %v7412_v40 = vor.u32 %v8210_v34, %v7411_v19  ;;  %v988_v41 = vsel %vm8852_vm2, %v983_v31, %v987_v24  ;;  %v1396_v52 = vor.u32 %v1395_v43, %v1392_v42  ;;  %v1412_v53 = vshll.u32 %v1340_v26, 16  ;;  %v1063_v57 = vld [vmem:[#allocation2] sm:$0xe]  ;;  %v1064_v62 = vld [vmem:[#allocation2 + $0x4] sm:$0xf]  ;;  %6390 = vmatpush.bf16.msrb.mxu0 %v8358_v61 }
  0xc0   : > { %v993_v46 = vrot.slane %v992_v37, 4  ;;  %1061 = vst [vmem:[#allocation3 + $0x438] sm:$0xf] %v988_v41  ;;  %v402_v55 = vrot.slane %v326_v44, 7  ;;  %v404_v56 = vrot.slane %v327_v17, 7  ;;  %v1405_v60 = vor.u32 %v1404_v49, %v1401_v48  ;;  %v8356_v31 = vld [vmem:[#allocation7 + $0x108] sm:$0xff] }
  0xc1   : > { %6053 = vmatmul.bf16.gmra.mxu0 %v7412_v40  ;;  %v1411_v0 = vrot.slane %v1409_v51, 5  ;;  %v1397_v63 = vrot.slane %v1396_v52, 4  ;;  %v1414_v1 = vrot.slane %v1412_v53, 6  ;;  %v1065_v7 = vld [vmem:[#allocation2 + $0x8] sm:$0x1]  ;;  %v7253_v13 = vrot.slane %v1063_v57, 9 }
  0xc2   : > { %v7591_v4 = vld [vmem:[#allocation3 + $0x240] sm:$0xf]  ;;  %v998_v58 = vsel %vm8852_vm2, %v993_v46, %v997_v28  ;;  %v403_v2 = vrot.slane %v402_v55, 4  ;;  %v406_v5 = vrot.slane %v404_v56, 4  ;;  %v1407_v6 = vrot.slane %v1405_v60, 4 }
  0xc3   : > { %1062 = vst [vmem:[#allocation3 + $0x45c] sm:$0xf] %v998_v58  ;;  %v1406_v9 = vsel %vm9062_vm8, %v1397_v63, %v1405_v60  ;;  %v1415_v10 = vor.u32 %v1414_v1, %v1411_v0  ;;  %v1164_v3 = vrot.slane %v1064_v62, 5  ;;  %v1167_v15 = vrot.slane %v1065_v7, 5  ;;  %v1901_v45 = vld [vmem:[#allocation2 + $0xc] sm:$0xf]  ;;  %6391 = vmatpush.bf16.msrb.mxu0 %v8357_v35 }
  0xc4   : > { %525 = vst [vmem:[#allocation2 + $0x30] sm:$0xe] %v402_v55  ;;  %v405_v11 = vsel %vm8886_vm5, %v403_v2, %v404_v56  ;;  %v1902_v19 = vld [vmem:[#allocation2 + $0x10] sm:$0xf]  ;;  %v1903_v21 = vld [vmem:[#allocation2 + $0x14] sm:$0x1] }
  0xc5   : > { %v8255_v8 = vld [vmem:[#allocation3 + $0x260] sm:$0xf0]  ;;  %527 = vst [vmem:[#allocation2 + $0x38] sm:$0x1] %v406_v5  ;;  %v1416_v16 = vsel %vm9062_vm8, %v1407_v6, %v1415_v10  ;;  %v1165_v25 = vsel %vm9071_vm11, %v7253_v13, %v1164_v3  ;;  %v1166_v20 = vrot.slane %v1164_v3, 4  ;;  %v1950_v36 = vshrl.u32 %v1901_v45, 16 }
  0xc6   : > { %v7592_v14 = vor.u32 %v8255_v8, %v7591_v4  ;;  %1869 = vst [vmem:[#allocation3 + $0x8] sm:$0xf] %v1406_v9  ;;  %v1953_v22 = vshll.u32 %v1901_v45, 16  ;;  %v1959_v23 = vshll.u32 %v1902_v19, 16  ;;  %v1963_v24 = vshrl.u32 %v1902_v19, 16  ;;  %v8355_v1 = vld [vmem:[#allocation7 + $0x100] sm:$0xff] }
  0xc7   : > { %v7843_v59 = vld [vmem:[#allocation3 + $0x438] sm:$0xf]  ;;  %526 = vst [vmem:[#allocation2 + $0x34] sm:$0xf] %v405_v11  ;;  %v1969_v26 = vshll.u32 %v1903_v21, 16  ;;  %v1168_v28 = vsel %vm9071_vm11, %v1166_v20, %v1167_v15  ;;  %v1952_v29 = vrot.slane %v1950_v36, 4  ;;  %6392 = vmatpush.bf16.msrb.mxu0 %v8356_v31 }
  0xc8   : > { %6078 = vmatmul.bf16.gmra.mxu1 %v7592_v14  ;;  %1870 = vst [vmem:[#allocation3 + $0x2c] sm:$0xf] %v1416_v16  ;;  %v1341_v47 = vld [vmem:[#allocation2 + $0xc] sm:$0xe]  ;;  %v1955_v33 = vrot.slane %v1953_v22, 5  ;;  %v1961_v34 = vrot.slane %v1959_v23, 5 }
  0xc9   : > { %1306 = vst [vmem:[#allocation3 + $0x4] sm:$0xf] %v1165_v25  ;;  %v1965_v40 = vrot.slane %v1963_v24, 4  ;;  %v1971_v44 = vrot.slane %v1969_v26, 5  ;;  %v1418_v17 = vshrl.u32 %v1341_v47, 16  ;;  %v1421_v7 = vshll.u32 %v1341_v47, 16 }
  0xca   : > { %v8318_v27 = vld [vmem:[#allocation3 + $0x458] sm:$0xf0]  ;;  %1307 = vst [vmem:[#allocation3 + $0x28] sm:$0xf] %v1168_v28  ;;  %v1956_v43 = vor.u32 %v1955_v33, %v1952_v29  ;;  %v1342_v52 = vld [vmem:[#allocation2 + $0x10] sm:$0xf] }
  0xcb   : > { %v7844_v54 = vor.u32 %v8318_v27, %v7843_v59  ;;  %v576_v32 = vld [vmem:[#allocation2 + $0x30] sm:$0xf]  ;;  %v1966_v51 = vor.u32 %v1965_v40, %v1961_v34  ;;  %v1343_v4 = vld [vmem:[#allocation2 + $0x14] sm:$0x3]  ;;  %v1420_v63 = vrot.slane %v1418_v17, 5  ;;  %v1427_v13 = vshrl.u32 %v1342_v52, 16  ;;  %6393 = vmatpush.bf16.msrb.mxu0 %v8355_v1 }
  0xcc   : > { %v578_v37 = vld [vmem:[#allocation2 + $0x38] sm:$0x1]  ;;  %v712_v38 = vshrl.u32 %v576_v32, 16  ;;  %v715_v30 = vshll.u32 %v576_v32, 16  ;;  %v1957_v61 = vrot.slane %v1956_v43, 4  ;;  %v1423_v3 = vrot.slane %v1421_v7, 6 }
  0xcd   : > { %6113 = vmatmul.bf16.gmra.mxu3 %v7844_v54  ;;  %v7311_v41 = vld [vmem:[#allocation3 + $0x8] sm:$0xf]  ;;  %v731_v42 = vshll.u32 %v578_v37, 16  ;;  %v1967_v62 = vrot.slane %v1966_v51, 4  ;;  %v1066_v8 = vld [vmem:[#allocation2 + $0xc] sm:$0xe] }
  0xce   : > { %v577_v46 = vld [vmem:[#allocation2 + $0x34] sm:$0xf]  ;;  %v714_v48 = vrot.slane %v712_v38, 4  ;;  %v717_v49 = vrot.slane %v715_v30, 5  ;;  %v1962_v6 = vsel %vm8852_vm2, %v1957_v61, %v1961_v34  ;;  %v1430_v15 = vshll.u32 %v1342_v52, 16 }
  0xcf   : > { %v8184_v53 = vld [vmem:[#allocation3 + $0x28] sm:$0xf0]  ;;  %v721_v55 = vshll.u32 %v577_v46, 16  ;;  %v725_v56 = vshrl.u32 %v577_v46, 16  ;;  %v733_v57 = vrot.slane %v731_v42, 5  ;;  %v1972_v11 = vsel %vm8852_vm2, %v1967_v62, %v1971_v44 }
  0xd0   : > { %v7312_v58 = vor.u32 %v8184_v53, %v7311_v41  ;;  %v718_v60 = vor.u32 %v717_v49, %v714_v48  ;;  %v8179_v0 = vld [vmem:[#allocation3 + $0x4] sm:$0xf]  ;;  %2365 = vst [vmem:[#allocation3 + $0xc] sm:$0xf] %v1962_v6  ;;  %v1067_v45 = vld [vmem:[#allocation2 + $0x10] sm:$0xf]  ;;  %v1424_v36 = vor.u32 %v1423_v3, %v1420_v63 }
  0xd1   : > { %v723_v2 = vrot.slane %v721_v55, 5  ;;  %v727_v5 = vrot.slane %v725_v56, 4  ;;  %v7305_v10 = vld [vmem:[#allocation3 + $0x24] sm:$0xf0]  ;;  %2366 = vst [vmem:[#allocation3 + $0x30] sm:$0xf] %v1972_v11 }
  0xd2   : > { %6216 = vmatmul.bf16.vlgmr.msrb.gmra.mxu2 %v7312_v58  ;;  %v719_v9 = vrot.slane %v718_v60, 4  ;;  %v7308_v14 = vor.u32 %v8179_v0, %v7305_v10  ;;  %v1429_v16 = vrot.slane %v1427_v13, 5  ;;  %v1437_v19 = vshrl.u32 %v1343_v4, 16  ;;  %v1068_v20 = vld [vmem:[#allocation2 + $0x14] sm:$0x1] }
  0xd3   : > { %v728_v35 = vor.u32 %v727_v5, %v723_v2  ;;  %v1440_v25 = vshll.u32 %v1343_v4, 16  ;;  %v1432_v22 = vrot.slane %v1430_v15, 6  ;;  %v7254_v23 = vrot.slane %v1066_v8, 9  ;;  %v1904_v29 = vld [vmem:[#allocation2 + $0x18] sm:$0xf] }
  0xd4   : > { %v724_v59 = vsel %vm8852_vm2, %v719_v9, %v723_v2  ;;  %v1439_v24 = vrot.slane %v1437_v19, 5  ;;  %v1171_v27 = vrot.slane %v1067_v45, 5  ;;  %v1174_v28 = vrot.slane %v1068_v20, 5  ;;  %v1905_v32 = vld [vmem:[#allocation2 + $0x1c] sm:$0xf] }
  0xd5   : > { %v729_v21 = vrot.slane %v728_v35, 4  ;;  %1039 = vst [vmem:[#allocation3 + $0x120] sm:$0xf] %v724_v59  ;;  %v1442_v26 = vrot.slane %v1440_v25, 6  ;;  %v1425_v47 = vrot.slane %v1424_v36, 4  ;;  %v1433_v54 = vor.u32 %v1432_v22, %v1429_v16 }
  0xd6   : > { %v1906_v33 = vld [vmem:[#allocation2 + $0x20] sm:$0x1]  ;;  %v1974_v34 = vshrl.u32 %v1904_v29, 16  ;;  %v1172_v38 = vsel %vm9071_vm11, %v7254_v23, %v1171_v27  ;;  %v1173_v30 = vrot.slane %v1171_v27, 4  ;;  %v1977_v40 = vshll.u32 %v1904_v29, 16 }
  0xd7   : > { %v734_v31 = vsel %vm8852_vm2, %v729_v21, %v733_v57  ;;  %v1443_v37 = vor.u32 %v1442_v26, %v1439_v24  ;;  %v2397_v41 = vld [vmem:[#allocation2 + $0xc] sm:$0xe]  ;;  %v8180_v42 = vld [vmem:[#allocation3 + $0xc] sm:$0xf]  ;;  %v1434_v43 = vsel %vm9062_vm8, %v1425_v47, %v1433_v54  ;;  %v1435_v44 = vrot.slane %v1433_v54, 4 }
  0xd8   : > { %1040 = vst [vmem:[#allocation3 + $0x144] sm:$0xf] %v734_v31  ;;  %6127 = vmatmul.bf16.vlgmr.msrb.gmra.mxu1 %v7308_v14  ;;  %v1976_v17 = vrot.slane %v1974_v34, 4  ;;  %v7313_v46 = vld [vmem:[#allocation3 + $0x2c] sm:$0xf0]  ;;  %v1175_v48 = vsel %vm9071_vm11, %v1173_v30, %v1174_v28  ;;  %v1979_v49 = vrot.slane %v1977_v40, 5 }
  0xd9   : > { %1308 = vst [vmem:[#allocation3 + $0x4c] sm:$0xf] %v1172_v38  ;;  %v1983_v51 = vshll.u32 %v1905_v32, 16  ;;  %v7316_v52 = vor.u32 %v8180_v42, %v7313_v46  ;;  %v1444_v53 = vsel %vm9062_vm8, %v1435_v44, %v1443_v37  ;;  %v1987_v55 = vshrl.u32 %v1905_v32, 16  ;;  %v2398_v57 = vld [vmem:[#allocation2 + $0x10] sm:$0xf] }
  0xda   : > { %1871 = vst [vmem:[#allocation3 + $0x50] sm:$0xf] %v1434_v43  ;;  %v1993_v56 = vshll.u32 %v1906_v33, 16  ;;  %v1980_v4 = vor.u32 %v1979_v49, %v1976_v17  ;;  %v7269_v60 = vrot.slane %v2397_v41, 9  ;;  %v2399_v63 = vld [vmem:[#allocation2 + $0x14] sm:$0x1] }
  0xdb   : > { %1309 = vst [vmem:[#allocation3 + $0x70] sm:$0xf] %v1175_v48  ;;  %v1985_v58 = vrot.slane %v1983_v51, 5  ;;  %v1989_v0 = vrot.slane %v1987_v55, 4  ;;  %v2495_v1 = vrot.slane %v2398_v57, 5  ;;  %v2498_v5 = vrot.slane %v2399_v63, 5 }
  0xdc   : > { %v7447_v61 = vld [vmem:[#allocation3 + $0x120] sm:$0xf]  ;;  %1872 = vst [vmem:[#allocation3 + $0x74] sm:$0xf] %v1444_v53  ;;  %v1995_v62 = vrot.slane %v1993_v56, 5  ;;  %v1981_v2 = vrot.slane %v1980_v4, 4 }
  0xdd   : > { %6305 = vmatmul.bf16.vlgmr.msrb.gmra.mxu3 %v7316_v52  ;;  %v1344_v6 = vld [vmem:[#allocation2 + $0x18] sm:$0xe]  ;;  %v1345_v7 = vld [vmem:[#allocation2 + $0x1c] sm:$0xf]  ;;  %v1990_v9 = vor.u32 %v1989_v0, %v1985_v58  ;;  %v2496_v10 = vsel %vm9071_vm11, %v7269_v60, %v2495_v1  ;;  %v2497_v11 = vrot.slane %v2495_v1, 4 }
  0xde   : > { %v1346_v13 = vld [vmem:[#allocation2 + $0x20] sm:$0x3]  ;;  %v1446_v35 = vshrl.u32 %v1344_v6, 16  ;;  %v1986_v15 = vsel %vm8852_vm2, %v1981_v2, %v1985_v58  ;;  %2637 = vst [vmem:[#allocation3 + $0x10] sm:$0xf] %v2496_v10  ;;  %v1449_v45 = vshll.u32 %v1344_v6, 16 }
  0xdf   : > { %v8219_v8 = vld [vmem:[#allocation3 + $0x140] sm:$0xf0]  ;;  %v1455_v59 = vshrl.u32 %v1345_v7, 16  ;;  %v1991_v19 = vrot.slane %v1990_v9, 4  ;;  %2367 = vst [vmem:[#allocation3 + $0x54] sm:$0xf] %v1986_v15  ;;  %v2499_v25 = vsel %vm9071_vm11, %v2497_v11, %v2498_v5 }
  0xe0   : > { %v7448_v14 = vor.u32 %v8219_v8, %v7447_v61  ;;  %v8188_v3 = vld [vmem:[#allocation3 + $0x4c] sm:$0xf]  ;;  %v1448_v20 = vrot.slane %v1446_v35, 5  ;;  %2638 = vst [vmem:[#allocation3 + $0x34] sm:$0xf] %v2499_v25  ;;  %v1451_v36 = vrot.slane %v1449_v45, 6 }
  0xe1   : > { %v7347_v16 = vld [vmem:[#allocation3 + $0x50] sm:$0xf]  ;;  %v1457_v22 = vrot.slane %v1455_v59, 5  ;;  %v1996_v26 = vsel %vm8852_vm2, %v1991_v19, %v1995_v62  ;;  %v1458_v27 = vshll.u32 %v1345_v7, 16  ;;  %v1465_v28 = vshrl.u32 %v1346_v13, 16 }
  0xe2   : > { %6058 = vmatmul.bf16.gmra.mxu0 %v7448_v14  ;;  %v7341_v21 = vld [vmem:[#allocation3 + $0x6c] sm:$0xf0]  ;;  %v1069_v29 = vld [vmem:[#allocation2 + $0x18] sm:$0xe]  ;;  %2368 = vst [vmem:[#allocation3 + $0x78] sm:$0xf] %v1996_v26  ;;  %v1452_v47 = vor.u32 %v1451_v36, %v1448_v20 }
  0xe3   : > { %v8193_v23 = vld [vmem:[#allocation3 + $0x70] sm:$0xf0]  ;;  %v7344_v24 = vor.u32 %v8188_v3, %v7341_v21  ;;  %v1468_v54 = vshll.u32 %v1346_v13, 16  ;;  %v1070_v32 = vld [vmem:[#allocation2 + $0x1c] sm:$0xf]  ;;  %v7255_v33 = vrot.slane %v1069_v29, 9 }
  0xe4   : > { %v7348_v31 = vor.u32 %v8193_v23, %v7347_v16  ;;  %v1460_v34 = vrot.slane %v1458_v27, 6  ;;  %v1467_v37 = vrot.slane %v1465_v28, 5  ;;  %v1071_v38 = vld [vmem:[#allocation2 + $0x20] sm:$0x1]  ;;  %v1178_v30 = vrot.slane %v1070_v32, 5 }
  0xe5   : > { %v1453_v40 = vrot.slane %v1452_v47, 4  ;;  %v1470_v41 = vrot.slane %v1468_v54, 6  ;;  %v1181_v42 = vrot.slane %v1071_v38, 5  ;;  %v1907_v43 = vld [vmem:[#allocation2 + $0x24] sm:$0xf] }
  0xe6   : > { %6221 = vmatmul.bf16.gmra.mxu2 %v7348_v31  ;;  %v1461_v44 = vor.u32 %v1460_v34, %v1457_v22  ;;  %v1179_v17 = vsel %vm9071_vm11, %v7255_v33, %v1178_v30  ;;  %v1180_v46 = vrot.slane %v1178_v30, 4  ;;  %v1908_v48 = vld [vmem:[#allocation2 + $0x28] sm:$0xf]  ;;  %v1998_v49 = vshrl.u32 %v1907_v43, 16  ;;  %v8189_v51 = vld [vmem:[#allocation3 + $0x54] sm:$0xf] }
  0xe7   : > { %v7319_v52 = vld [vmem:[#allocation3 + $0x10] sm:$0xf]  ;;  %v1471_v53 = vor.u32 %v1470_v41, %v1467_v37  ;;  %1310 = vst [vmem:[#allocation3 + $0x94] sm:$0xf] %v1179_v17  ;;  %v1909_v55 = vld [vmem:[#allocation2 + $0x2c] sm:$0x1] }
  0xe8   : > { %6132 = vmatmul.bf16.gmra.mxu1 %v7344_v24  ;;  %v8185_v56 = vld [vmem:[#allocation3 + $0x30] sm:$0xf0]  ;;  %v1462_v57 = vsel %vm9062_vm8, %v1453_v40, %v1461_v44  ;;  %v1463_v61 = vrot.slane %v1461_v44, 4  ;;  %v1182_v4 = vsel %vm9071_vm11, %v1180_v46, %v1181_v42  ;;  %v2400_v58 = vld [vmem:[#allocation2 + $0x18] sm:$0xe]  ;;  %v2000_v60 = vrot.slane %v1998_v49, 4 }
  0xe9   : > { %1873 = vst [vmem:[#allocation3 + $0x98] sm:$0xf] %v1462_v57  ;;  %v2001_v0 = vshll.u32 %v1907_v43, 16  ;;  %v2007_v62 = vshll.u32 %v1908_v48, 16  ;;  %v2011_v63 = vshrl.u32 %v1908_v48, 16  ;;  %v2017_v5 = vshll.u32 %v1909_v55, 16 }
  0xea   : > { %v7349_v1 = vld [vmem:[#allocation3 + $0x74] sm:$0xf0]  ;;  %v1472_v2 = vsel %vm9062_vm8, %v1463_v61, %v1471_v53  ;;  %1311 = vst [vmem:[#allocation3 + $0xb8] sm:$0xf] %v1182_v4  ;;  %v7270_v6 = vrot.slane %v2400_v58, 9  ;;  %v7320_v11 = vor.u32 %v8185_v56, %v7319_v52 }
  0xeb   : > { %v7352_v7 = vor.u32 %v8189_v51, %v7349_v1  ;;  %1874 = vst [vmem:[#allocation3 + $0xbc] sm:$0xf] %v1472_v2  ;;  %v2003_v8 = vrot.slane %v2001_v0, 5  ;;  %v2009_v9 = vrot.slane %v2007_v62, 5  ;;  %v2013_v10 = vrot.slane %v2011_v63, 4 }
  0xec   : > { %v2019_v13 = vrot.slane %v2017_v5, 5  ;;  %v2401_v35 = vld [vmem:[#allocation2 + $0x1c] sm:$0xf]  ;;  %v2402_v14 = vld [vmem:[#allocation2 + $0x20] sm:$0x1] }
  0xed   : > { %6310 = vmatmul.bf16.gmra.mxu3 %v7352_v7  ;;  %v2004_v3 = vor.u32 %v2003_v8, %v2000_v60  ;;  %v2014_v15 = vor.u32 %v2013_v10, %v2009_v9  ;;  %v2502_v45 = vrot.slane %v2401_v35, 5  ;;  %v2505_v59 = vrot.slane %v2402_v14, 5  ;;  %v1347_v16 = vld [vmem:[#allocation2 + $0x24] sm:$0xe]  ;;  %v1348_v19 = vld [vmem:[#allocation2 + $0x28] sm:$0xf] }
  0xee   : > { %v8197_v25 = vld [vmem:[#allocation3 + $0x94] sm:$0xf]  ;;  %v1474_v21 = vshrl.u32 %v1347_v16, 16  ;;  %v1477_v36 = vshll.u32 %v1347_v16, 16  ;;  %v1072_v27 = vld [vmem:[#allocation2 + $0x24] sm:$0xe] }
  0xef   : > { %v1349_v20 = vld [vmem:[#allocation2 + $0x2c] sm:$0x3]  ;;  %v2005_v22 = vrot.slane %v2004_v3, 4  ;;  %v2015_v23 = vrot.slane %v2014_v15, 4  ;;  %v2503_v24 = vsel %vm9071_vm11, %v7270_v6, %v2502_v45  ;;  %v2504_v26 = vrot.slane %v2502_v45, 4 }
  0xf0   : > { %v7383_v28 = vld [vmem:[#allocation3 + $0x98] sm:$0xf]  ;;  %2639 = vst [vmem:[#allocation3 + $0x58] sm:$0xf] %v2503_v24  ;;  %v1476_v29 = vrot.slane %v1474_v21, 5  ;;  %v1479_v31 = vrot.slane %v1477_v36, 6 }
  0xf1   : > { %v7377_v47 = vld [vmem:[#allocation3 + $0xb4] sm:$0xf0]  ;;  %v2010_v54 = vsel %vm8852_vm2, %v2005_v22, %v2009_v9  ;;  %v2020_v32 = vsel %vm8852_vm2, %v2015_v23, %v2019_v13  ;;  %v2506_v33 = vsel %vm9071_vm11, %v2504_v26, %v2505_v59  ;;  %v1483_v34 = vshrl.u32 %v1348_v19, 16  ;;  %v1073_v37 = vld [vmem:[#allocation2 + $0x28] sm:$0xf] }
  0xf2   : > { %6394 = vmatmul.bf16.vlgmr.msrb.gmra.mxu0 %v7320_v11  ;;  %v8202_v38 = vld [vmem:[#allocation3 + $0xb8] sm:$0xf0]  ;;  %2369 = vst [vmem:[#allocation3 + $0x9c] sm:$0xf] %v2010_v54  ;;  %v1480_v30 = vor.u32 %v1479_v31, %v1476_v29  ;;  %v1486_v40 = vshll.u32 %v1348_v19, 16  ;;  %v1493_v41 = vshrl.u32 %v1349_v20, 16  ;;  %v7380_v43 = vor.u32 %v8197_v25, %v7377_v47 }
  0xf3   : > { %v7384_v42 = vor.u32 %v8202_v38, %v7383_v28  ;;  %2370 = vst [vmem:[#allocation3 + $0xc0] sm:$0xf] %v2020_v32  ;;  %v1485_v44 = vrot.slane %v1483_v34, 5  ;;  %v1496_v17 = vshll.u32 %v1349_v20, 16  ;;  %v1074_v46 = vld [vmem:[#allocation2 + $0x2c] sm:$0x1] }
  0xf4   : > { %2640 = vst [vmem:[#allocation3 + $0x7c] sm:$0xf] %v2506_v33  ;;  %v1481_v48 = vrot.slane %v1480_v30, 4  ;;  %v1488_v49 = vrot.slane %v1486_v40, 6  ;;  %v1495_v51 = vrot.slane %v1493_v41, 5  ;;  %v7256_v52 = vrot.slane %v1072_v27, 9 }
  0xf5   : > { %v1498_v53 = vrot.slane %v1496_v17, 6  ;;  %v1185_v55 = vrot.slane %v1073_v37, 5  ;;  %v1188_v56 = vrot.slane %v1074_v46, 5  ;;  %v1910_v57 = vld [vmem:[#allocation2 + $0x30] sm:$0xf] }
  0xf6   : > { %6226 = vmatmul.bf16.gmra.mxu2 %v7384_v42  ;;  %v1489_v61 = vor.u32 %v1488_v49, %v1485_v44  ;;  %v1911_v4 = vld [vmem:[#allocation2 + $0x34] sm:$0xf]  ;;  %v2022_v58 = vshrl.u32 %v1910_v57, 16  ;;  %v2025_v60 = vshll.u32 %v1910_v57, 16  ;;  %v1912_v1 = vld [vmem:[#allocation2 + $0x38] sm:$0x1] }
  0xf7   : > { %v1499_v0 = vor.u32 %v1498_v53, %v1495_v51  ;;  %v1186_v62 = vsel %vm9071_vm11, %v7256_v52, %v1185_v55  ;;  %v1187_v63 = vrot.slane %v1185_v55, 4  ;;  %v2031_v2 = vshll.u32 %v1911_v4, 16  ;;  %v2403_v5 = vld [vmem:[#allocation2 + $0x24] sm:$0xe]  ;;  %v7355_v6 = vld [vmem:[#allocation3 + $0x58] sm:$0xf] }
  0xf8   : > { %6137 = vmatmul.bf16.gmra.mxu1 %v7380_v43  ;;  %v1490_v7 = vsel %vm9062_vm8, %v1481_v48, %v1489_v61  ;;  %v1491_v8 = vrot.slane %v1489_v61, 4  ;;  %1312 = vst [vmem:[#allocation3 + $0xdc] sm:$0xf] %v1186_v62  ;;  %v2024_v9 = vrot.slane %v2022_v58, 4  ;;  %v2027_v10 = vrot.slane %v2025_v60, 5 }
  0xf9   : > { %v8198_v11 = vld [vmem:[#allocation3 + $0x9c] sm:$0xf]  ;;  %1875 = vst [vmem:[#allocation3 + $0xe0] sm:$0xf] %v1490_v7  ;;  %v1189_v13 = vsel %vm9071_vm11, %v1187_v63, %v1188_v56  ;;  %v2033_v35 = vrot.slane %v2031_v2, 5  ;;  %v2035_v14 = vshrl.u32 %v1911_v4, 16 }
  0xfa   : > { %v7385_v3 = vld [vmem:[#allocation3 + $0xbc] sm:$0xf0]  ;;  %v1500_v15 = vsel %vm9062_vm8, %v1491_v8, %v1499_v0  ;;  %1313 = vst [vmem:[#allocation3 + $0x100] sm:$0xf] %v1189_v13  ;;  %v2028_v45 = vor.u32 %v2027_v10, %v2024_v9  ;;  %v2041_v59 = vshll.u32 %v1912_v1, 16  ;;  %v7271_v20 = vrot.slane %v2403_v5, 9 }
  0xfb   : > { %v7388_v16 = vor.u32 %v8198_v11, %v7385_v3  ;;  %v8194_v19 = vld [vmem:[#allocation3 + $0x78] sm:$0xf0]  ;;  %1876 = vst [vmem:[#allocation3 + $0x104] sm:$0xf] %v1500_v15  ;;  %v2037_v25 = vrot.slane %v2035_v14, 4 }
  0xfc   : > { %v2029_v21 = vrot.slane %v2028_v45, 4  ;;  %v2043_v36 = vrot.slane %v2041_v59, 5  ;;  %v2404_v22 = vld [vmem:[#allocation2 + $0x28] sm:$0xf]  ;;  %v2405_v23 = vld [vmem:[#allocation2 + $0x2c] sm:$0x1]  ;;  %v7356_v24 = vor.u32 %v8194_v19, %v7355_v6 }
  0xfd   : > { %6315 = vmatmul.bf16.gmra.mxu3 %v7388_v16  ;;  %v2038_v26 = vor.u32 %v2037_v25, %v2033_v35  ;;  %v2509_v27 = vrot.slane %v2404_v22, 5  ;;  %v2512_v28 = vrot.slane %v2405_v23, 5  ;;  %v1350_v29 = vld [vmem:[#allocation2 + $0x30] sm:$0xe]  ;;  %v1351_v31 = vld [vmem:[#allocation2 + $0x34] sm:$0xf]  ;;  %v9141_v16 = vpop.f32.mrf.mxu1 }
  0xfe   : > { %v2034_v47 = vsel %vm8852_vm2, %v2029_v21, %v2033_v35  ;;  %v1352_v54 = vld [vmem:[#allocation2 + $0x38] sm:$0x3]  ;;  %v1502_v32 = vshrl.u32 %v1350_v29, 16  ;;  %v1505_v33 = vshll.u32 %v1350_v29, 16  ;;  %v1511_v34 = vshrl.u32 %v1351_v31, 16 }
  0xff   : > { %v8206_v37 = vld [vmem:[#allocation3 + $0xdc] sm:$0xf]  ;;  %v2039_v38 = vrot.slane %v2038_v26, 4  ;;  %2371 = vst [vmem:[#allocation3 + $0xe4] sm:$0xf] %v2034_v47  ;;  %v2510_v30 = vsel %vm9071_vm11, %v7271_v20, %v2509_v27  ;;  %v2511_v40 = vrot.slane %v2509_v27, 4 }
 0x100   : > { %v7419_v41 = vld [vmem:[#allocation3 + $0xe0] sm:$0xf]  ;;  %2641 = vst [vmem:[#allocation3 + $0xa0] sm:$0xf] %v2510_v30  ;;  %v1504_v42 = vrot.slane %v1502_v32, 5  ;;  %v1507_v43 = vrot.slane %v1505_v33, 6 }
 0x101   : > { %v7413_v44 = vld [vmem:[#allocation3 + $0xfc] sm:$0xf0]  ;;  %v2044_v17 = vsel %vm8852_vm2, %v2039_v38, %v2043_v36  ;;  %v2513_v46 = vsel %vm9071_vm11, %v2511_v40, %v2512_v28  ;;  %v1513_v48 = vrot.slane %v1511_v34, 5  ;;  %v1514_v49 = vshll.u32 %v1351_v31, 16  ;;  %v1075_v51 = vld [vmem:[#allocation2 + $0x30] sm:$0xe] }
 0x102   : > { %6399 = vmatmul.bf16.gmra.mxu0 %v7356_v24  ;;  %v8211_v52 = vld [vmem:[#allocation3 + $0x100] sm:$0xf0]  ;;  %2372 = vst [vmem:[#allocation3 + $0x108] sm:$0xf] %v2044_v17  ;;  %v1508_v53 = vor.u32 %v1507_v43, %v1504_v42  ;;  %v1521_v55 = vshrl.u32 %v1352_v54, 16  ;;  %v1524_v56 = vshll.u32 %v1352_v54, 16  ;;  %v7416_v61 = vor.u32 %v8206_v37, %v7413_v44 }
 0x103   : > { %v7420_v57 = vor.u32 %v8211_v52, %v7419_v41  ;;  %2642 = vst [vmem:[#allocation3 + $0xc4] sm:$0xf] %v2513_v46  ;;  %v1516_v4 = vrot.slane %v1514_v49, 6  ;;  %v1076_v58 = vld [vmem:[#allocation2 + $0x34] sm:$0xf]  ;;  %v7257_v60 = vrot.slane %v1075_v51, 9  ;;  %v9147_v41 = vpop.f32.mrf.mxu0 }
 0x104   : > { %v1509_v0 = vrot.slane %v1508_v53, 4  ;;  %v1523_v62 = vrot.slane %v1521_v55, 5  ;;  %v1526_v63 = vrot.slane %v1524_v56, 6  ;;  %v1077_v1 = vld [vmem:[#allocation2 + $0x38] sm:$0x1]  ;;  %v1192_v2 = vrot.slane %v1076_v58, 5 }
 0x105   : > { %v1517_v5 = vor.u32 %v1516_v4, %v1513_v48  ;;  %v1195_v6 = vrot.slane %v1077_v1, 5  ;;  %v1913_v7 = vld [vmem:[#allocation2 + $0x3c] sm:$0xf]  ;;  %v1914_v8 = vld [vmem:[#allocation2 + $0x40] sm:$0xf] }
 0x106   : > { %6231 = vmatmul.bf16.gmra.mxu2 %v7420_v57  ;;  %v1527_v9 = vor.u32 %v1526_v63, %v1523_v62  ;;  %v1193_v10 = vsel %vm9071_vm11, %v7257_v60, %v1192_v2  ;;  %v1194_v11 = vrot.slane %v1192_v2, 4  ;;  %v1915_v13 = vld [vmem:[#allocation2 + $0x44] sm:$0x1]  ;;  %v2046_v35 = vshrl.u32 %v1913_v7, 16  ;;  %v8207_v14 = vld [vmem:[#allocation3 + $0xe4] sm:$0xf] }
 0x107   : > { %v1518_v3 = vsel %vm9062_vm8, %v1509_v0, %v1517_v5  ;;  %v1519_v15 = vrot.slane %v1517_v5, 4  ;;  %1314 = vst [vmem:[#allocation3 + $0x124] sm:$0xf] %v1193_v10  ;;  %v2049_v45 = vshll.u32 %v1913_v7, 16  ;;  %v7391_v59 = vld [vmem:[#allocation3 + $0xa0] sm:$0xf]  ;;  %v9157_v5 = vpop.f32.mrf.mxu1  ;;  %v9159_v10 = vpop.f32.mrf.mxu3 }
 0x108   : > { %6142 = vmatmul.bf16.gmra.mxu1 %v7416_v61  ;;  %1877 = vst [vmem:[#allocation3 + $0x128] sm:$0xf] %v1518_v3  ;;  %v1196_v19 = vsel %vm9071_vm11, %v1194_v11, %v1195_v6  ;;  %v2048_v25 = vrot.slane %v2046_v35, 4  ;;  %v2055_v20 = vshll.u32 %v1914_v8, 16  ;;  %v2059_v21 = vshrl.u32 %v1914_v8, 16 }
 0x109   : > { %v7421_v36 = vld [vmem:[#allocation3 + $0x104] sm:$0xf0]  ;;  %v1528_v22 = vsel %vm9062_vm8, %v1519_v15, %v1527_v9  ;;  %1315 = vst [vmem:[#allocation3 + $0x148] sm:$0xf] %v1196_v19  ;;  %v2051_v23 = vrot.slane %v2049_v45, 5  ;;  %v2065_v24 = vshll.u32 %v1915_v13, 16 }
 0x10a   : > { %v7424_v26 = vor.u32 %v8207_v14, %v7421_v36  ;;  %v8203_v27 = vld [vmem:[#allocation3 + $0xc0] sm:$0xf0]  ;;  %1878 = vst [vmem:[#allocation3 + $0x14c] sm:$0xf] %v1528_v22  ;;  %v2057_v28 = vrot.slane %v2055_v20, 5  ;;  %v2061_v29 = vrot.slane %v2059_v21, 4 }
 0x10b   : > { %v2052_v31 = vor.u32 %v2051_v23, %v2048_v25  ;;  %v2067_v47 = vrot.slane %v2065_v24, 5  ;;  %v2406_v54 = vld [vmem:[#allocation2 + $0x30] sm:$0xe]  ;;  %v2407_v32 = vld [vmem:[#allocation2 + $0x34] sm:$0xf]  ;;  %v7392_v40 = vor.u32 %v8203_v27, %v7391_v59 }
 0x10c   : > { %v2062_v33 = vor.u32 %v2061_v29, %v2057_v28  ;;  %v2408_v34 = vld [vmem:[#allocation2 + $0x38] sm:$0x1]  ;;  %v7272_v37 = vrot.slane %v2406_v54, 9  ;;  %v2516_v38 = vrot.slane %v2407_v32, 5  ;;  %v1353_v30 = vld [vmem:[#allocation2 + $0x3c] sm:$0xe]  ;;  %v9161_v29 = vpop.f32.mrf.mxu0 }
 0x10d   : > { %6320 = vmatmul.bf16.gmra.mxu3 %v7424_v26  ;;  %v2053_v42 = vrot.slane %v2052_v31, 4  ;;  %v2519_v43 = vrot.slane %v2408_v34, 5  ;;  %v1354_v44 = vld [vmem:[#allocation2 + $0x40] sm:$0xf]  ;;  %v1355_v17 = vld [vmem:[#allocation2 + $0x44] sm:$0x3] }
 0x10e   : > { %v8215_v46 = vld [vmem:[#allocation3 + $0x124] sm:$0xf]  ;;  %v2063_v48 = vrot.slane %v2062_v33, 4  ;;  %v2517_v49 = vsel %vm9071_vm11, %v7272_v37, %v2516_v38  ;;  %v2518_v51 = vrot.slane %v2516_v38, 4  ;;  %v1530_v52 = vshrl.u32 %v1353_v30, 16 }
 0x10f   : > { %v7455_v53 = vld [vmem:[#allocation3 + $0x128] sm:$0xf]  ;;  %v2058_v55 = vsel %vm8852_vm2, %v2053_v42, %v2057_v28  ;;  %2643 = vst [vmem:[#allocation3 + $0xe8] sm:$0xf] %v2517_v49  ;;  %v1533_v56 = vshll.u32 %v1353_v30, 16  ;;  %v1539_v57 = vshrl.u32 %v1354_v44, 16  ;;  %v9169_v30 = vpop.f32.mrf.mxu2 }
 0x110   : > { %v7449_v61 = vld [vmem:[#allocation3 + $0x144] sm:$0xf0]  ;;  %v2068_v4 = vsel %vm8852_vm2, %v2063_v48, %v2067_v47  ;;  %2373 = vst [vmem:[#allocation3 + $0x12c] sm:$0xf] %v2058_v55  ;;  %v2520_v58 = vsel %vm9071_vm11, %v2518_v51, %v2519_v43  ;;  %v1532_v60 = vrot.slane %v1530_v52, 5  ;;  %v1542_v0 = vshll.u32 %v1354_v44, 16 }
 0x111   : > { %v8220_v62 = vld [vmem:[#allocation3 + $0x148] sm:$0xf0]  ;;  %2374 = vst [vmem:[#allocation3 + $0x150] sm:$0xf] %v2068_v4  ;;  %v1535_v63 = vrot.slane %v1533_v56, 6  ;;  %v1541_v1 = vrot.slane %v1539_v57, 5  ;;  %v7452_v9 = vor.u32 %v8215_v46, %v7449_v61  ;;  %v9173_v57 = vpop.f32.mrf.mxu1 }
 0x112   : > { %6404 = vmatmul.bf16.gmra.mxu0 %v7392_v40  ;;  %v7456_v2 = vor.u32 %v8220_v62, %v7455_v53  ;;  %2644 = vst [vmem:[#allocation3 + $0x10c] sm:$0xf] %v2520_v58  ;;  %v1544_v6 = vrot.slane %v1542_v0, 6  ;;  %v1549_v7 = vshrl.u32 %v1355_v17, 16  ;;  %v1552_v8 = vshll.u32 %v1355_v17, 16 }
 0x113   : > { %v1536_v11 = vor.u32 %v1535_v63, %v1532_v60  ;;  %v1078_v13 = vld [vmem:[#allocation2 + $0x3c] sm:$0xe]  ;;  %v1079_v35 = vld [vmem:[#allocation2 + $0x40] sm:$0xf]  ;;  %v1080_v14 = vld [vmem:[#allocation2 + $0x44] sm:$0x1]  ;;  %v9175_v63 = vpop.f32.mrf.mxu3 }
 0x114   : > { %v1545_v3 = vor.u32 %v1544_v6, %v1541_v1  ;;  %v1551_v15 = vrot.slane %v1549_v7, 5  ;;  %v1554_v45 = vrot.slane %v1552_v8, 6  ;;  %v7258_v59 = vrot.slane %v1078_v13, 9  ;;  %v1916_v19 = vld [vmem:[#allocation2 + $0x48] sm:$0xf]  ;;  %10221 = vst [vmem:[#allocation14_spill] sm:$0xff] %v9175_v63 }
 0x115   : > { %v1537_v25 = vrot.slane %v1536_v11, 4  ;;  %v1199_v20 = vrot.slane %v1079_v35, 5  ;;  %v1202_v21 = vrot.slane %v1080_v14, 5  ;;  %v1917_v36 = vld [vmem:[#allocation2 + $0x4c] sm:$0xf]  ;;  %v2070_v22 = vshrl.u32 %v1916_v19, 16 }
 0x116   : > { %6236 = vmatmul.bf16.gmra.mxu2 %v7456_v2  ;;  %v1547_v23 = vrot.slane %v1545_v3, 4  ;;  %v1555_v24 = vor.u32 %v1554_v45, %v1551_v15  ;;  %v1918_v26 = vld [vmem:[#allocation2 + $0x50] sm:$0x1]  ;;  %v2073_v27 = vshll.u32 %v1916_v19, 16  ;;  %v2409_v33 = vld [vmem:[#allocation2 + $0x3c] sm:$0xe] }
 0x117   : > { %v8216_v28 = vld [vmem:[#allocation3 + $0x12c] sm:$0xf]  ;;  %v1546_v31 = vsel %vm9062_vm8, %v1537_v25, %v1545_v3  ;;  %v1200_v47 = vsel %vm9071_vm11, %v7258_v59, %v1199_v20  ;;  %v1201_v54 = vrot.slane %v1199_v20, 4  ;;  %v2072_v32 = vrot.slane %v2070_v22, 4  ;;  %v7427_v37 = vld [vmem:[#allocation3 + $0xe8] sm:$0xf]  ;;  %v9183_v22 = vpop.f32.mrf.mxu0 }
 0x118   : > { %6147 = vmatmul.bf16.gmra.mxu1 %v7452_v9  ;;  %v7457_v34 = vld [vmem:[#allocation3 + $0x14c] sm:$0xf0]  ;;  %v1556_v38 = vsel %vm9062_vm8, %v1547_v23, %v1555_v24  ;;  %1879 = vst [vmem:[#allocation3 + $0x170] sm:$0xf] %v1546_v31  ;;  %v2075_v40 = vrot.slane %v2073_v27, 5  ;;  %v2079_v42 = vshll.u32 %v1917_v36, 16  ;;  %v9187_v31 = vpop.f32.mrf.mxu2 }
 0x119   : > { %v7460_v43 = vor.u32 %v8216_v28, %v7457_v34  ;;  %v8212_v44 = vld [vmem:[#allocation3 + $0x108] sm:$0xf0]  ;;  %1880 = vst [vmem:[#allocation3 + $0x194] sm:$0xf] %v1556_v38  ;;  %v1203_v17 = vsel %vm9071_vm11, %v1201_v54, %v1202_v21  ;;  %v2083_v46 = vshrl.u32 %v1917_v36, 16  ;;  %v2089_v48 = vshll.u32 %v1918_v26, 16 }
 0x11a   : > { %1316 = vst [vmem:[#allocation3 + $0x16c] sm:$0xf] %v1200_v47  ;;  %v2076_v49 = vor.u32 %v2075_v40, %v2072_v32  ;;  %v2081_v51 = vrot.slane %v2079_v42, 5  ;;  %v2410_v52 = vld [vmem:[#allocation2 + $0x40] sm:$0xf]  ;;  %v7273_v53 = vrot.slane %v2409_v33, 9  ;;  %v7428_v62 = vor.u32 %v8212_v44, %v7427_v37 }
 0x11b   : > { %1317 = vst [vmem:[#allocation3 + $0x190] sm:$0xf] %v1203_v17  ;;  %v2085_v55 = vrot.slane %v2083_v46, 4  ;;  %v2411_v56 = vld [vmem:[#allocation2 + $0x44] sm:$0x1]  ;;  %v2091_v4 = vrot.slane %v2089_v48, 5 }
 0x11c   : > { %v2077_v61 = vrot.slane %v2076_v49, 4  ;;  %v2523_v58 = vrot.slane %v2410_v52, 5  ;;  %v2526_v60 = vrot.slane %v2411_v56, 5  ;;  %v1356_v0 = vld [vmem:[#allocation2 + $0x48] sm:$0xe]  ;;  %v9191_v56 = vpop.f32.mrf.mxu1 }
 0x11d   : > { %6325 = vmatmul.bf16.gmra.mxu3 %v7460_v43  ;;  %v2086_v1 = vor.u32 %v2085_v55, %v2081_v51  ;;  %v1357_v2 = vld [vmem:[#allocation2 + $0x4c] sm:$0xf]  ;;  %v1358_v6 = vld [vmem:[#allocation2 + $0x50] sm:$0x3]  ;;  %v1558_v7 = vshrl.u32 %v1356_v0, 16  ;;  %v1561_v8 = vshll.u32 %v1356_v0, 16  ;;  %v9193_v0 = vpop.f32.mrf.mxu3 }
 0x11e   : > { %v2082_v9 = vsel %vm8852_vm2, %v2077_v61, %v2081_v51  ;;  %v2524_v11 = vsel %vm9071_vm11, %v7273_v53, %v2523_v58  ;;  %v2525_v13 = vrot.slane %v2523_v58, 4  ;;  %v1567_v35 = vshrl.u32 %v1357_v2, 16  ;;  %v1081_v14 = vld [vmem:[#allocation2 + $0x48] sm:$0xe]  ;;  %v1082_v3 = vld [vmem:[#allocation2 + $0x4c] sm:$0xf] }
 0x11f   : > { %v7491_v15 = vld [vmem:[#allocation3 + $0x170] sm:$0xf]  ;;  %v2087_v45 = vrot.slane %v2086_v1, 4  ;;  %2375 = vst [vmem:[#allocation3 + $0x174] sm:$0xf] %v2082_v9  ;;  %v1560_v59 = vrot.slane %v1558_v7, 5 }
 0x120   : > { %v8229_v19 = vld [vmem:[#allocation3 + $0x190] sm:$0xf0]  ;;  %v2527_v25 = vsel %vm9071_vm11, %v2525_v13, %v2526_v60  ;;  %2645 = vst [vmem:[#allocation3 + $0x130] sm:$0xf] %v2524_v11  ;;  %v1563_v20 = vrot.slane %v1561_v8, 6  ;;  %v1569_v21 = vrot.slane %v1567_v35, 5 }
 0x121   : > { %v7492_v36 = vor.u32 %v8229_v19, %v7491_v15  ;;  %v8224_v23 = vld [vmem:[#allocation3 + $0x16c] sm:$0xf]  ;;  %v2092_v24 = vsel %vm8852_vm2, %v2087_v45, %v2091_v4  ;;  %2646 = vst [vmem:[#allocation3 + $0x154] sm:$0xf] %v2527_v25  ;;  %v1570_v26 = vshll.u32 %v1357_v2, 16  ;;  %v1577_v27 = vshrl.u32 %v1358_v6, 16  ;;  %v9201_v25 = vpop.f32.mrf.mxu0 }
 0x122   : > { %6409 = vmatmul.bf16.gmra.mxu0 %v7428_v62  ;;  %v7485_v28 = vld [vmem:[#allocation3 + $0x18c] sm:$0xf0]  ;;  %2376 = vst [vmem:[#allocation3 + $0x198] sm:$0xf] %v2092_v24  ;;  %v1564_v47 = vor.u32 %v1563_v20, %v1560_v59  ;;  %v1580_v54 = vshll.u32 %v1358_v6, 16  ;;  %v7259_v32 = vrot.slane %v1081_v14, 9 }
 0x123   : > { %v7488_v33 = vor.u32 %v8224_v23, %v7485_v28  ;;  %v1572_v34 = vrot.slane %v1570_v26, 6  ;;  %v1579_v37 = vrot.slane %v1577_v27, 5  ;;  %v1083_v38 = vld [vmem:[#allocation2 + $0x50] sm:$0x1]  ;;  %v1206_v40 = vrot.slane %v1082_v3, 5  ;;  %v9203_v27 = vpop.f32.mrf.mxu2 }
 0x124   : > { %v1565_v42 = vrot.slane %v1564_v47, 4  ;;  %v1582_v43 = vrot.slane %v1580_v54, 6  ;;  %v1209_v44 = vrot.slane %v1083_v38, 5  ;;  %v1919_v17 = vld [vmem:[#allocation2 + $0x54] sm:$0xf] }
 0x125   : > { %v1573_v46 = vor.u32 %v1572_v34, %v1569_v21  ;;  %v1207_v48 = vsel %vm9071_vm11, %v7259_v32, %v1206_v40  ;;  %v1208_v49 = vrot.slane %v1206_v40, 4  ;;  %v1920_v51 = vld [vmem:[#allocation2 + $0x58] sm:$0xf]  ;;  %v1921_v52 = vld [vmem:[#allocation2 + $0x5c] sm:$0x1]  ;;  %v2094_v53 = vshrl.u32 %v1919_v17, 16 }
 0x126   : > { %6241 = vmatmul.bf16.gmra.mxu2 %v7492_v36  ;;  %v8225_v55 = vld [vmem:[#allocation3 + $0x174] sm:$0xf]  ;;  %v1583_v61 = vor.u32 %v1582_v43, %v1579_v37  ;;  %1318 = vst [vmem:[#allocation3 + $0x1b4] sm:$0xf] %v1207_v48  ;;  %v2097_v4 = vshll.u32 %v1919_v17, 16  ;;  %v2103_v58 = vshll.u32 %v1920_v51, 16 }
 0x127   : > { %v7463_v60 = vld [vmem:[#allocation3 + $0x130] sm:$0xf]  ;;  %v1574_v62 = vsel %vm9062_vm8, %v1565_v42, %v1573_v46  ;;  %v1575_v1 = vrot.slane %v1573_v46, 4  ;;  %v1210_v2 = vsel %vm9071_vm11, %v1208_v49, %v1209_v44  ;;  %v2096_v6 = vrot.slane %v2094_v53, 4  ;;  %v2413_v59 = vld [vmem:[#allocation2 + $0x4c] sm:$0xf]  ;;  %v9211_v53 = vpop.f32.mrf.mxu1 }
 0x128   : > { %6152 = vmatmul.bf16.gmra.mxu1 %v7488_v33  ;;  %v2412_v7 = vld [vmem:[#allocation2 + $0x48] sm:$0xe]  ;;  %v8221_v8 = vld [vmem:[#allocation3 + $0x150] sm:$0xf0]  ;;  %1881 = vst [vmem:[#allocation3 + $0x1b8] sm:$0xf] %v1574_v62 }
 0x129   : > { %v2099_v9 = vrot.slane %v2097_v4, 5  ;;  %v2105_v11 = vrot.slane %v2103_v58, 5  ;;  %v7493_v13 = vld [vmem:[#allocation3 + $0x194] sm:$0xf0]  ;;  %v1584_v35 = vsel %vm9062_vm8, %v1575_v1, %v1583_v61  ;;  %1319 = vst [vmem:[#allocation3 + $0x1d8] sm:$0xf] %v1210_v2  ;;  %v7464_v26 = vor.u32 %v8221_v8, %v7463_v60  ;;  %v9213_v58 = vpop.f32.mrf.mxu3 }
 0x12a   : > { %v2107_v14 = vshrl.u32 %v1920_v51, 16  ;;  %v2113_v3 = vshll.u32 %v1921_v52, 16  ;;  %v7496_v15 = vor.u32 %v8225_v55, %v7493_v13  ;;  %1882 = vst [vmem:[#allocation3 + $0x1dc] sm:$0xf] %v1584_v35  ;;  %v2414_v19 = vld [vmem:[#allocation2 + $0x50] sm:$0x1] }
 0x12b   : > { %v2100_v45 = vor.u32 %v2099_v9, %v2096_v6  ;;  %v7274_v36 = vrot.slane %v2412_v7, 9  ;;  %v2530_v23 = vrot.slane %v2413_v59, 5  ;;  %v1359_v24 = vld [vmem:[#allocation2 + $0x54] sm:$0xe]  ;;  %v2533_v47 = vrot.slane %v2414_v19, 5  ;;  %10222 = vst [vmem:[#allocation15_spill] sm:$0xff] %v9213_v58 }
 0x12c   : > { %v2109_v20 = vrot.slane %v2107_v14, 4  ;;  %v2115_v21 = vrot.slane %v2113_v3, 5  ;;  %v1360_v54 = vld [vmem:[#allocation2 + $0x58] sm:$0xf]  ;;  %v1361_v32 = vld [vmem:[#allocation2 + $0x5c] sm:$0x3] }
 0x12d   : > { %v2101_v28 = vrot.slane %v2100_v45, 4  ;;  %6330 = vmatmul.bf16.gmra.mxu3 %v7496_v15  ;;  %v8233_v33 = vld [vmem:[#allocation3 + $0x1b4] sm:$0xf]  ;;  %v2531_v37 = vsel %vm9071_vm11, %v7274_v36, %v2530_v23  ;;  %v2532_v38 = vrot.slane %v2530_v23, 4  ;;  %v1586_v40 = vshrl.u32 %v1359_v24, 16  ;;  %v9217_v23 = vpop.f32.mrf.mxu0 }
 0x12e   : > { %v2110_v34 = vor.u32 %v2109_v20, %v2105_v11  ;;  %v1084_v42 = vld [vmem:[#allocation2 + $0x54] sm:$0xe]  ;;  %2647 = vst [vmem:[#allocation3 + $0x178] sm:$0xf] %v2531_v37  ;;  %v1589_v44 = vshll.u32 %v1359_v24, 16  ;;  %v1595_v17 = vshrl.u32 %v1360_v54, 16 }
 0x12f   : > { %v2106_v43 = vsel %vm8852_vm2, %v2101_v28, %v2105_v11  ;;  %v1598_v46 = vshll.u32 %v1360_v54, 16  ;;  %v7527_v48 = vld [vmem:[#allocation3 + $0x1b8] sm:$0xf]  ;;  %v2534_v51 = vsel %vm9071_vm11, %v2532_v38, %v2533_v47  ;;  %v1588_v52 = vrot.slane %v1586_v40, 5  ;;  %v1085_v7 = vld [vmem:[#allocation2 + $0x58] sm:$0xf] }
 0x130   : > { %v2111_v49 = vrot.slane %v2110_v34, 4  ;;  %2377 = vst [vmem:[#allocation3 + $0x1bc] sm:$0xf] %v2106_v43  ;;  %v7521_v55 = vld [vmem:[#allocation3 + $0x1d4] sm:$0xf0]  ;;  %v1591_v61 = vrot.slane %v1589_v44, 6 }
 0x131   : > { %2648 = vst [vmem:[#allocation3 + $0x19c] sm:$0xf] %v2534_v51  ;;  %v1597_v4 = vrot.slane %v1595_v17, 5  ;;  %v8238_v60 = vld [vmem:[#allocation3 + $0x1d8] sm:$0xf0]  ;;  %v7524_v62 = vor.u32 %v8233_v33, %v7521_v55  ;;  %v1600_v2 = vrot.slane %v1598_v46, 6 }
 0x132   : > { %6414 = vmatmul.bf16.gmra.mxu0 %v7464_v26  ;;  %v2116_v1 = vsel %vm8852_vm2, %v2111_v49, %v2115_v21  ;;  %v1605_v6 = vshrl.u32 %v1361_v32, 16  ;;  %v7528_v8 = vor.u32 %v8238_v60, %v7527_v48  ;;  %v1592_v9 = vor.u32 %v1591_v61, %v1588_v52  ;;  %v1086_v13 = vld [vmem:[#allocation2 + $0x5c] sm:$0x1]  ;;  %v1922_v59 = vld [vmem:[#allocation2 + $0x60] sm:$0xf]  ;;  %v9229_v60 = vpop.f32.mrf.mxu1 }
 0x133   : > { %2378 = vst [vmem:[#allocation3 + $0x1e0] sm:$0xf] %v2116_v1  ;;  %v1608_v11 = vshll.u32 %v1361_v32, 16  ;;  %v7260_v35 = vrot.slane %v1084_v42, 9  ;;  %v1601_v14 = vor.u32 %v1600_v2, %v1597_v4  ;;  %v1213_v15 = vrot.slane %v1085_v7, 5  ;;  %v9221_v32 = vpop.f32.mrf.mxu2 }
 0x134   : > { %v1607_v3 = vrot.slane %v1605_v6, 5  ;;  %v1216_v45 = vrot.slane %v1086_v13, 5  ;;  %v1593_v19 = vrot.slane %v1592_v9, 4  ;;  %v1923_v36 = vld [vmem:[#allocation2 + $0x64] sm:$0xf]  ;;  %v2118_v47 = vshrl.u32 %v1922_v59, 16 }
 0x135   : > { %v1610_v20 = vrot.slane %v1608_v11, 6  ;;  %v1603_v21 = vrot.slane %v1601_v14, 4  ;;  %v1214_v24 = vsel %vm9071_vm11, %v7260_v35, %v1213_v15  ;;  %v1215_v26 = vrot.slane %v1213_v15, 4  ;;  %v1924_v28 = vld [vmem:[#allocation2 + $0x68] sm:$0x1]  ;;  %10223 = vst [vmem:[#allocation16_spill] sm:$0xff] %v9221_v32  ;;  %v9231_v7 = vpop.f32.mrf.mxu3 }
 0x136   : > { %6246 = vmatmul.bf16.gmra.mxu2 %v7528_v8  ;;  %v1602_v33 = vsel %vm9062_vm8, %v1593_v19, %v1601_v14  ;;  %1320 = vst [vmem:[#allocation3 + $0x1fc] sm:$0xf] %v1214_v24  ;;  %v2121_v37 = vshll.u32 %v1922_v59, 16  ;;  %v2127_v38 = vshll.u32 %v1923_v36, 16  ;;  %v7499_v40 = vld [vmem:[#allocation3 + $0x178] sm:$0xf] }
 0x137   : > { %v8234_v54 = vld [vmem:[#allocation3 + $0x1bc] sm:$0xf]  ;;  %v1611_v34 = vor.u32 %v1610_v20, %v1607_v3  ;;  %1883 = vst [vmem:[#allocation3 + $0x200] sm:$0xf] %v1602_v33  ;;  %v1217_v43 = vsel %vm9071_vm11, %v1215_v26, %v1216_v45  ;;  %v2120_v44 = vrot.slane %v2118_v47, 4  ;;  %v2131_v17 = vshrl.u32 %v1923_v36, 16  ;;  %v9237_v33 = vpop.f32.mrf.mxu0 }
 0x138   : > { %6157 = vmatmul.bf16.gmra.mxu1 %v7524_v62  ;;  %v8230_v42 = vld [vmem:[#allocation3 + $0x198] sm:$0xf0]  ;;  %1321 = vst [vmem:[#allocation3 + $0x220] sm:$0xf] %v1217_v43  ;;  %v2123_v48 = vrot.slane %v2121_v37, 5  ;;  %v2129_v49 = vrot.slane %v2127_v38, 5 }
 0x139   : > { %v1612_v46 = vsel %vm9062_vm8, %v1603_v21, %v1611_v34  ;;  %v2415_v51 = vld [vmem:[#allocation2 + $0x54] sm:$0xe]  ;;  %v2133_v55 = vrot.slane %v2131_v17, 4  ;;  %v2137_v61 = vshll.u32 %v1924_v28, 16  ;;  %v2416_v1 = vld [vmem:[#allocation2 + $0x58] sm:$0xf]  ;;  %v7500_v14 = vor.u32 %v8230_v42, %v7499_v40 }
 0x13a   : > { %v7529_v52 = vld [vmem:[#allocation3 + $0x1dc] sm:$0xf0]  ;;  %1884 = vst [vmem:[#allocation3 + $0x224] sm:$0xf] %v1612_v46  ;;  %v2124_v62 = vor.u32 %v2123_v48, %v2120_v44  ;;  %v2417_v2 = vld [vmem:[#allocation2 + $0x5c] sm:$0x1] }
 0x13b   : > { %v7532_v4 = vor.u32 %v8234_v54, %v7529_v52  ;;  %v7275_v6 = vrot.slane %v2415_v51, 9  ;;  %v2134_v8 = vor.u32 %v2133_v55, %v2129_v49  ;;  %v2139_v9 = vrot.slane %v2137_v61, 5  ;;  %v1362_v35 = vld [vmem:[#allocation2 + $0x60] sm:$0xe]  ;;  %v1363_v15 = vld [vmem:[#allocation2 + $0x64] sm:$0xf]  ;;  %v9243_v44 = vpop.f32.mrf.mxu2 }
 0x13c   : > { %v2537_v11 = vrot.slane %v2416_v1, 5  ;;  %v2540_v13 = vrot.slane %v2417_v2, 5  ;;  %v2125_v3 = vrot.slane %v2124_v62, 4  ;;  %v1364_v45 = vld [vmem:[#allocation2 + $0x68] sm:$0x3]  ;;  %v1614_v59 = vshrl.u32 %v1362_v35, 16 }
 0x13d   : > { %6335 = vmatmul.bf16.gmra.mxu3 %v7532_v4  ;;  %v8242_v19 = vld [vmem:[#allocation3 + $0x1fc] sm:$0xf]  ;;  %v2135_v20 = vrot.slane %v2134_v8, 4  ;;  %v1617_v24 = vshll.u32 %v1362_v35, 16  ;;  %v1623_v54 = vshrl.u32 %v1363_v15, 16  ;;  %v1626_v42 = vshll.u32 %v1363_v15, 16 }
 0x13e   : > { %v2538_v36 = vsel %vm9071_vm11, %v7275_v6, %v2537_v11  ;;  %v2539_v21 = vrot.slane %v2537_v11, 4  ;;  %v7563_v26 = vld [vmem:[#allocation3 + $0x200] sm:$0xf]  ;;  %v2130_v28 = vsel %vm8852_vm2, %v2125_v3, %v2129_v49  ;;  %v1616_v47 = vrot.slane %v1614_v59, 5  ;;  %v1087_v55 = vld [vmem:[#allocation2 + $0x60] sm:$0xe]  ;;  %v9247_v59 = vpop.f32.mrf.mxu3 }
 0x13f   : > { %2649 = vst [vmem:[#allocation3 + $0x1c0] sm:$0xf] %v2538_v36  ;;  %v7557_v34 = vld [vmem:[#allocation3 + $0x21c] sm:$0xf0]  ;;  %v2140_v37 = vsel %vm8852_vm2, %v2135_v20, %v2139_v9  ;;  %v1619_v40 = vrot.slane %v1617_v24, 6  ;;  %v1625_v17 = vrot.slane %v1623_v54, 5 }
 0x140   : > { %2379 = vst [vmem:[#allocation3 + $0x204] sm:$0xf] %v2130_v28  ;;  %v2541_v38 = vsel %vm9071_vm11, %v2539_v21, %v2540_v13  ;;  %v1633_v46 = vshrl.u32 %v1364_v45, 16  ;;  %v1628_v51 = vrot.slane %v1626_v42, 6  ;;  %v1636_v52 = vshll.u32 %v1364_v45, 16 }
 0x141   : > { %v8247_v43 = vld [vmem:[#allocation3 + $0x220] sm:$0xf0]  ;;  %2380 = vst [vmem:[#allocation3 + $0x228] sm:$0xf] %v2140_v37  ;;  %v1620_v49 = vor.u32 %v1619_v40, %v1616_v47  ;;  %v7560_v61 = vor.u32 %v8242_v19, %v7557_v34  ;;  %v1088_v62 = vld [vmem:[#allocation2 + $0x64] sm:$0xf] }
 0x142   : > { %6419 = vmatmul.bf16.gmra.mxu0 %v7500_v14  ;;  %v7564_v48 = vor.u32 %v8247_v43, %v7563_v26  ;;  %2650 = vst [vmem:[#allocation3 + $0x1e4] sm:$0xf] %v2541_v38  ;;  %v1635_v4 = vrot.slane %v1633_v46, 5  ;;  %v1089_v1 = vld [vmem:[#allocation2 + $0x68] sm:$0x1]  ;;  %v7261_v2 = vrot.slane %v1087_v55, 9  ;;  %v1629_v8 = vor.u32 %v1628_v51, %v1625_v17 }
 0x143   : > { %v1621_v6 = vrot.slane %v1620_v49, 4  ;;  %v1638_v9 = vrot.slane %v1636_v52, 6  ;;  %v1220_v11 = vrot.slane %v1088_v62, 5  ;;  %v1925_v13 = vld [vmem:[#allocation2 + $0x6c] sm:$0xf]  ;;  %v1223_v3 = vrot.slane %v1089_v1, 5 }
 0x144   : > { %v1926_v14 = vld [vmem:[#allocation2 + $0x70] sm:$0xf]  ;;  %v2142_v15 = vshrl.u32 %v1925_v13, 16  ;;  %10224 = vst [vmem:[#allocation17_spill] sm:$0xff] %v9247_v59  ;;  %v1631_v19 = vrot.slane %v1629_v8, 4  ;;  %v2145_v37 = vshll.u32 %v1925_v13, 16 }
 0x145   : > { %v9245_v35 = vpop.f32.mrf.mxu1  ;;  %v1630_v45 = vsel %vm9062_vm8, %v1621_v6, %v1629_v8  ;;  %v1639_v20 = vor.u32 %v1638_v9, %v1635_v4  ;;  %v1221_v36 = vsel %vm9071_vm11, %v7261_v2, %v1220_v11  ;;  %v1927_v21 = vld [vmem:[#allocation2 + $0x74] sm:$0x1]  ;;  %v2418_v24 = vld [vmem:[#allocation2 + $0x60] sm:$0xe]  ;;  %v1222_v28 = vrot.slane %v1220_v11, 4 }
 0x146   : > { %6251 = vmatmul.bf16.gmra.mxu2 %v7564_v48  ;;  %1885 = vst [vmem:[#allocation3 + $0x248] sm:$0xf] %v1630_v45  ;;  %v2144_v47 = vrot.slane %v2142_v15, 4  ;;  %v2151_v38 = vshll.u32 %v1926_v14, 16  ;;  %v7535_v40 = vld [vmem:[#allocation3 + $0x1c0] sm:$0xf]  ;;  %v9257_v48 = vpop.f32.mrf.mxu0 }
 0x147   : > { %v8243_v26 = vld [vmem:[#allocation3 + $0x204] sm:$0xf]  ;;  %v1640_v34 = vsel %vm9062_vm8, %v1631_v19, %v1639_v20  ;;  %1322 = vst [vmem:[#allocation3 + $0x244] sm:$0xf] %v1221_v36  ;;  %v1224_v43 = vsel %vm9071_vm11, %v1222_v28, %v1223_v3  ;;  %v2155_v17 = vshrl.u32 %v1926_v14, 16  ;;  %v2161_v46 = vshll.u32 %v1927_v21, 16 }
 0x148   : > { %6162 = vmatmul.bf16.gmra.mxu1 %v7560_v61  ;;  %v7565_v54 = vld [vmem:[#allocation3 + $0x224] sm:$0xf0]  ;;  %1886 = vst [vmem:[#allocation3 + $0x26c] sm:$0xf] %v1640_v34  ;;  %v2147_v51 = vrot.slane %v2145_v37, 5  ;;  %v2153_v52 = vrot.slane %v2151_v38, 5  ;;  %v9259_v61 = vpop.f32.mrf.mxu2 }
 0x149   : > { %v8239_v42 = vld [vmem:[#allocation3 + $0x1e0] sm:$0xf0]  ;;  %v7568_v49 = vor.u32 %v8243_v26, %v7565_v54  ;;  %1323 = vst [vmem:[#allocation3 + $0x268] sm:$0xf] %v1224_v43  ;;  %v2419_v55 = vld [vmem:[#allocation2 + $0x64] sm:$0xf] }
 0x14a   : > { %10225 = vst [vmem:[#allocation18_spill] sm:$0xff] %v9259_v61  ;;  %v2157_v4 = vrot.slane %v2155_v17, 4  ;;  %v2420_v62 = vld [vmem:[#allocation2 + $0x68] sm:$0x1]  ;;  %v7276_v1 = vrot.slane %v2418_v24, 9  ;;  %v2544_v2 = vrot.slane %v2419_v55, 5  ;;  %v2148_v6 = vor.u32 %v2147_v51, %v2144_v47 }
 0x14b   : > { %v2547_v8 = vrot.slane %v2420_v62, 5  ;;  %v8378_v9 = vld [vmem:[#allocation7 + $0x1b8] sm:$0xff]  ;;  %v2163_v15 = vrot.slane %v2161_v46, 5  ;;  %v1365_v20 = vld [vmem:[#allocation2 + $0x6c] sm:$0xe]  ;;  %v7536_v21 = vor.u32 %v8239_v42, %v7535_v40 }
 0x14c   : > { %v8386_v11 = vld [vmem:[#allocation7 + $0x1f8] sm:$0xff]  ;;  %v2158_v14 = vor.u32 %v2157_v4, %v2153_v52  ;;  %v2545_v45 = vsel %vm9071_vm11, %v7276_v1, %v2544_v2  ;;  %v2546_v19 = vrot.slane %v2544_v2, 4  ;;  %v2149_v24 = vrot.slane %v2148_v6, 4  ;;  %6564 = vmatpush.bf16.msra.mxu2 %v8378_v9  ;;  %v3999_v61 = vld [vmem:[#allocation2 + $0x1c] sm:$0xf] }
 0x14d   : > { %v8370_v13 = vld [vmem:[#allocation7 + $0x178] sm:$0xff]  ;;  %v9261_v3 = vpop.f32.mrf.mxu1  ;;  %6340 = vmatmul.bf16.gmra.mxu3 %v7568_v49  ;;  %v7599_v26 = vld [vmem:[#allocation3 + $0x248] sm:$0xf]  ;;  %2651 = vst [vmem:[#allocation3 + $0x208] sm:$0xf] %v2545_v45  ;;  %v1642_v28 = vshrl.u32 %v1365_v20, 16 }
 0x14e   : > { %v1366_v36 = vld [vmem:[#allocation2 + $0x70] sm:$0xf]  ;;  %v8251_v47 = vld [vmem:[#allocation3 + $0x244] sm:$0xf]  ;;  %v2159_v54 = vrot.slane %v2158_v14, 4  ;;  %v2548_v34 = vsel %vm9071_vm11, %v2546_v19, %v2547_v8  ;;  %6653 = vmatpush.bf16.msra.mxu3 %v8386_v11  ;;  %6475 = vmatpush.bf16.msra.mxu1 %v8370_v13  ;;  %v1645_v38 = vshll.u32 %v1365_v20, 16  ;;  %v2154_v40 = vsel %vm8852_vm2, %v2149_v24, %v2153_v52  ;;  %v9273_v45 = vpop.f32.mrf.mxu0 }
 0x14f   : > { %v1367_v37 = vld [vmem:[#allocation2 + $0x74] sm:$0x3]  ;;  %v8256_v17 = vld [vmem:[#allocation3 + $0x268] sm:$0xf0]  ;;  %2652 = vst [vmem:[#allocation3 + $0x22c] sm:$0xf] %v2548_v34 }
 0x150   : > { %v9267_v43 = vpop.f32.mrf.mxu3  ;;  %v1644_v42 = vrot.slane %v1642_v28, 5  ;;  %v1651_v46 = vshrl.u32 %v1366_v36, 16  ;;  %v7593_v49 = vld [vmem:[#allocation3 + $0x264] sm:$0xf0]  ;;  %v2164_v51 = vsel %vm8852_vm2, %v2159_v54, %v2163_v15  ;;  %2381 = vst [vmem:[#allocation3 + $0x24c] sm:$0xf] %v2154_v40  ;;  %v7600_v62 = vor.u32 %v8256_v17, %v7599_v26 }
 0x151   : > { %v1647_v55 = vrot.slane %v1645_v38, 6  ;;  %v1654_v4 = vshll.u32 %v1366_v36, 16  ;;  %2382 = vst [vmem:[#allocation3 + $0x270] sm:$0xf] %v2164_v51  ;;  %v1661_v2 = vshrl.u32 %v1367_v37, 16  ;;  %v1664_v6 = vshll.u32 %v1367_v37, 16 }
 0x152   : > { %6424 = vmatmul.bf16.gmra.mxu0 %v7536_v21  ;;  %v1653_v1 = vrot.slane %v1651_v46, 5  ;;  %v8394_v8 = vld [vmem:[#allocation7 + $0x238] sm:$0xff]  ;;  %v7596_v9 = vor.u32 %v8251_v47, %v7593_v49  ;;  %v1090_v13 = vld [vmem:[#allocation2 + $0x6c] sm:$0xe]  ;;  %v1928_v37 = vld [vmem:[#allocation2 + $0x78] sm:$0xf] }
 0x153   : > { %v1648_v11 = vor.u32 %v1647_v55, %v1644_v42  ;;  %v1656_v52 = vrot.slane %v1654_v4, 6  ;;  %v1091_v14 = vld [vmem:[#allocation2 + $0x70] sm:$0xf]  ;;  %v1663_v19 = vrot.slane %v1661_v2, 5  ;;  %v1666_v20 = vrot.slane %v1664_v6, 6  ;;  %6742 = vmatpush.bf16.msra.mxu0 %v8394_v8 }
 0x154   : > { %v1092_v15 = vld [vmem:[#allocation2 + $0x74] sm:$0x1]  ;;  %v7262_v24 = vrot.slane %v1090_v13, 9  ;;  %v1227_v36 = vrot.slane %v1091_v14, 5  ;;  %v1929_v42 = vld [vmem:[#allocation2 + $0x7c] sm:$0xf] }
 0x155   : > { %v6128_v21 = vpop.f32.mrf.mxu1  ;;  %v6217_v26 = vpop.f32.mrf.mxu2  ;;  %v1649_v28 = vrot.slane %v1648_v11, 4  ;;  %v1657_v54 = vor.u32 %v1656_v52, %v1653_v1  ;;  %v1230_v34 = vrot.slane %v1092_v15, 5  ;;  %v1667_v38 = vor.u32 %v1666_v20, %v1663_v19  ;;  %v1930_v51 = vld [vmem:[#allocation2 + $0x80] sm:$0x1] }
 0x156   : > { %6256 = vmatmul.bf16.gmra.mxu2 %v7600_v62  ;;  %v6129_v47 = vadd.f32 %v6128_v21, %v9147_v41  ;;  %v1228_v17 = vsel %vm9071_vm11, %v7262_v24, %v1227_v36  ;;  %v1229_v40 = vrot.slane %v1227_v36, 4  ;;  %v2166_v55 = vshrl.u32 %v1928_v37, 16  ;;  %v7571_v2 = vld [vmem:[#allocation3 + $0x208] sm:$0xf]  ;;  %v8248_v41 = vld [vmem:[#allocation3 + $0x228] sm:$0xf0] }
 0x157   : > { %v1658_v46 = vsel %vm9062_vm8, %v1649_v28, %v1657_v54  ;;  %v1659_v49 = vrot.slane %v1657_v54, 4  ;;  %1324 = vst [vmem:[#allocation3 + $0x28c] sm:$0xf] %v1228_v17  ;;  %v8252_v62 = vld [vmem:[#allocation3 + $0x24c] sm:$0xf]  ;;  %v2169_v8 = vshll.u32 %v1928_v37, 16 }
 0x158   : > { %v9280_v4 = vpop.f32.mrf.mxu3  ;;  %v6218_v1 = vadd.f32 %v6217_v26, %v6129_v47  ;;  %6167 = vmatmul.bf16.gmra.mxu1 %v7596_v9  ;;  %1887 = vst [vmem:[#allocation3 + $0x290] sm:$0xf] %v1658_v46  ;;  %v1231_v6 = vsel %vm9071_vm11, %v1229_v40, %v1230_v34  ;;  %v7601_v11 = vld [vmem:[#allocation3 + $0x26c] sm:$0xf0]  ;;  %v2168_v13 = vrot.slane %v2166_v55, 4  ;;  %v2175_v14 = vshll.u32 %v1929_v42, 16 }
 0x159   : > { %10226 = vst [vmem:[#allocation19_spill] sm:$0xff] %v9280_v4  ;;  %v1668_v52 = vsel %vm9062_vm8, %v1659_v49, %v1667_v38  ;;  %v7604_v19 = vor.u32 %v8252_v62, %v7601_v11  ;;  %v2171_v20 = vrot.slane %v2169_v8, 5  ;;  %v2179_v15 = vshrl.u32 %v1929_v42, 16  ;;  %v2421_v36 = vld [vmem:[#allocation2 + $0x6c] sm:$0xe] }
 0x15a   : > { %1325 = vst [vmem:[#allocation3 + $0x2b0] sm:$0xf] %v1231_v6  ;;  %v2185_v9 = vshll.u32 %v1930_v51, 16  ;;  %v2177_v24 = vrot.slane %v2175_v14, 5  ;;  %v2422_v21 = vld [vmem:[#allocation2 + $0x70] sm:$0xf]  ;;  %v7572_v47 = vor.u32 %v8248_v41, %v7571_v2 }
 0x15b   : > { %1888 = vst [vmem:[#allocation3 + $0x2b4] sm:$0xf] %v1668_v52  ;;  %v2172_v26 = vor.u32 %v2171_v20, %v2168_v13  ;;  %v2181_v28 = vrot.slane %v2179_v15, 4  ;;  %v2423_v34 = vld [vmem:[#allocation2 + $0x74] sm:$0x1]  ;;  %v7277_v37 = vrot.slane %v2421_v36, 9 }
 0x15c   : > { %v2187_v54 = vrot.slane %v2185_v9, 5  ;;  %v2551_v38 = vrot.slane %v2422_v21, 5  ;;  %v2554_v46 = vrot.slane %v2423_v34, 5  ;;  %v1368_v49 = vld [vmem:[#allocation2 + $0x78] sm:$0xe] }
 0x15d   : > { %v6130_v17 = vpop.f32.mrf.mxu1  ;;  %v6219_v40 = vpop.f32.mrf.mxu2  ;;  %v1369_v55 = vld [vmem:[#allocation2 + $0x7c] sm:$0xf]  ;;  %6345 = vmatmul.bf16.gmra.mxu3 %v7604_v19  ;;  %v2173_v42 = vrot.slane %v2172_v26, 4  ;;  %v2182_v51 = vor.u32 %v2181_v28, %v2177_v24  ;;  %v1370_v6 = vld [vmem:[#allocation2 + $0x80] sm:$0x3]  ;;  %v1670_v8 = vshrl.u32 %v1368_v49, 16 }
 0x15e   : > { %v6131_v62 = vadd.f32 %v6130_v17, %v9161_v29  ;;  %v8260_v13 = vld [vmem:[#allocation3 + $0x28c] sm:$0xf]  ;;  %v2552_v2 = vsel %vm9071_vm11, %v7277_v37, %v2551_v38  ;;  %v2553_v41 = vrot.slane %v2551_v38, 4  ;;  %v1673_v14 = vshll.u32 %v1368_v49, 16 }
 0x15f   : > { %v9287_v11 = vpop.f32.mrf.mxu0  ;;  %v7635_v52 = vld [vmem:[#allocation3 + $0x290] sm:$0xf]  ;;  %v1679_v20 = vshrl.u32 %v1369_v55, 16  ;;  %v2178_v29 = vsel %vm8852_vm2, %v2173_v42, %v2177_v24  ;;  %v2183_v19 = vrot.slane %v2182_v51, 4  ;;  %2653 = vst [vmem:[#allocation3 + $0x250] sm:$0xf] %v2552_v2 }
 0x160   : > { %v6306_v15 = vpop.f32.mrf.mxu3  ;;  %v6220_v9 = vadd.f32 %v6219_v40, %v6131_v62  ;;  %v1672_v21 = vrot.slane %v1670_v8, 5  ;;  %2383 = vst [vmem:[#allocation3 + $0x294] sm:$0xf] %v2178_v29  ;;  %v2555_v34 = vsel %vm9071_vm11, %v2553_v41, %v2554_v46  ;;  %v1675_v37 = vrot.slane %v1673_v14, 6  ;;  %v1093_v24 = vld [vmem:[#allocation2 + $0x78] sm:$0xe] }
 0x161   : > { %v7629_v36 = vld [vmem:[#allocation3 + $0x2ac] sm:$0xf0]  ;;  %v9293_v26 = vadd.f32 %v6306_v15, %v6218_v1  ;;  %v2188_v40 = vsel %vm8852_vm2, %v2183_v19, %v2187_v54  ;;  %2654 = vst [vmem:[#allocation3 + $0x274] sm:$0xf] %v2555_v34  ;;  %v1681_v38 = vrot.slane %v1679_v20, 5  ;;  %v1682_v49 = vshll.u32 %v1369_v55, 16 }
 0x162   : > { %v8265_v28 = vld [vmem:[#allocation3 + $0x2b0] sm:$0xf0]  ;;  %6429 = vmatmul.bf16.gmra.mxu0 %v7572_v47  ;;  %2384 = vst [vmem:[#allocation3 + $0x2b8] sm:$0xf] %v2188_v40  ;;  %v1676_v62 = vor.u32 %v1675_v37, %v1672_v21  ;;  %v1689_v42 = vshrl.u32 %v1370_v6, 16  ;;  %v1692_v1 = vshll.u32 %v1370_v6, 16  ;;  %v7632_v8 = vor.u32 %v8260_v13, %v7629_v36 }
 0x163   : > { %v7636_v17 = vor.u32 %v8265_v28, %v7635_v52  ;;  %v1094_v51 = vld [vmem:[#allocation2 + $0x7c] sm:$0xf]  ;;  %v1684_v2 = vrot.slane %v1682_v49, 6  ;;  %v1095_v15 = vld [vmem:[#allocation2 + $0x80] sm:$0x1]  ;;  %v7263_v29 = vrot.slane %v1093_v24, 9 }
 0x164   : > { %v1234_v46 = vrot.slane %v1094_v51, 5  ;;  %v1677_v47 = vrot.slane %v1676_v62, 4  ;;  %v1691_v52 = vrot.slane %v1689_v42, 5  ;;  %v1694_v14 = vrot.slane %v1692_v1, 6  ;;  %v1931_v54 = vld [vmem:[#allocation2 + $0x84] sm:$0xf] }
 0x165   : > { %v6133_v41 = vpop.f32.mrf.mxu1  ;;  %v1237_v28 = vrot.slane %v1095_v15, 5  ;;  %v1685_v20 = vor.u32 %v1684_v2, %v1681_v38  ;;  %v1932_v21 = vld [vmem:[#allocation2 + $0x88] sm:$0xf]  ;;  %v1933_v13 = vld [vmem:[#allocation2 + $0x8c] sm:$0x1]  ;;  %v2190_v40 = vshrl.u32 %v1931_v54, 16 }
 0x166   : > { %6261 = vmatmul.bf16.gmra.mxu2 %v7636_v17  ;;  %v6134_v55 = vadd.f32 %v6133_v41, %v9183_v22  ;;  %v1235_v19 = vsel %vm9071_vm11, %v7263_v29, %v1234_v46  ;;  %v1236_v6 = vrot.slane %v1234_v46, 4  ;;  %v9304_v34 = vld [vmem:[#allocation3 + $0x250] sm:$0xf]  ;;  %v1695_v37 = vor.u32 %v1694_v14, %v1691_v52  ;;  %v2424_v1 = vld [vmem:[#allocation2 + $0x78] sm:$0xe] }
 0x167   : > { %v9302_v36 = vpop.f32.mrf.mxu0  ;;  %1326 = vst [vmem:[#allocation3 + $0x2d4] sm:$0xf] %v1235_v19  ;;  %v2193_v49 = vshll.u32 %v1931_v54, 16  ;;  %v8261_v17 = vld [vmem:[#allocation3 + $0x294] sm:$0xf]  ;;  %v1686_v22 = vsel %vm9062_vm8, %v1677_v47, %v1685_v20  ;;  %v1687_v38 = vrot.slane %v1685_v20, 4 }
 0x168   : > { %v6308_v24 = vpop.f32.mrf.mxu3  ;;  %6172 = vmatmul.bf16.gmra.mxu1 %v7632_v8  ;;  %v1238_v62 = vsel %vm9071_vm11, %v1236_v6, %v1237_v28  ;;  %v2199_v42 = vshll.u32 %v1932_v21, 16  ;;  %v8257_v15 = vld [vmem:[#allocation3 + $0x270] sm:$0xf0]  ;;  %1889 = vst [vmem:[#allocation3 + $0x2d8] sm:$0xf] %v1686_v22  ;;  %v2192_v29 = vrot.slane %v2190_v40, 4 }
 0x169   : > { %v9310_v51 = vadd.f32 %v6308_v24, %v6220_v9  ;;  %v6222_v2 = vpop.f32.mrf.mxu2  ;;  %v2195_v46 = vrot.slane %v2193_v49, 5  ;;  %v7637_v52 = vld [vmem:[#allocation3 + $0x2b4] sm:$0xf0]  ;;  %v1696_v8 = vsel %vm9062_vm8, %v1687_v38, %v1695_v37  ;;  %1327 = vst [vmem:[#allocation3 + $0x2f8] sm:$0xf] %v1238_v62  ;;  %v8377_v14 = vld [vmem:[#allocation7 + $0x1b0] sm:$0xff]  ;;  %v7608_v6 = vor.u32 %v8257_v15, %v9304_v34 }
 0x16a   : > { %v6223_v41 = vadd.f32 %v6222_v2, %v6134_v55  ;;  %v2201_v47 = vrot.slane %v2199_v42, 5  ;;  %v7640_v54 = vor.u32 %v8261_v17, %v7637_v52  ;;  %1890 = vst [vmem:[#allocation3 + $0x2fc] sm:$0xf] %v1696_v8  ;;  %v2203_v20 = vshrl.u32 %v1932_v21, 16  ;;  %v2425_v9 = vld [vmem:[#allocation2 + $0x7c] sm:$0xf]  ;;  %6565 = vmatpush.bf16.msra.mxu2 %v8377_v14 }
 0x16b   : > { %v2196_v28 = vor.u32 %v2195_v46, %v2192_v29  ;;  %v2209_v19 = vshll.u32 %v1933_v13, 16  ;;  %v2426_v24 = vld [vmem:[#allocation2 + $0x80] sm:$0x1]  ;;  %v7278_v22 = vrot.slane %v2424_v1, 9  ;;  %v2558_v40 = vrot.slane %v2425_v9, 5  ;;  %v8385_v55 = vld [vmem:[#allocation7 + $0x1f0] sm:$0xff] }
 0x16c   : > { %v8369_v49 = vld [vmem:[#allocation7 + $0x170] sm:$0xff]  ;;  %v2205_v37 = vrot.slane %v2203_v20, 4  ;;  %v2561_v62 = vrot.slane %v2426_v24, 5  ;;  %v1371_v42 = vld [vmem:[#allocation2 + $0x84] sm:$0xe]  ;;  %6654 = vmatpush.bf16.msra.mxu3 %v8385_v55 }
 0x16d   : > { %v6135_v2 = vpop.f32.mrf.mxu1  ;;  %v2197_v4 = vrot.slane %v2196_v28, 4  ;;  %v2211_v38 = vrot.slane %v2209_v19, 5  ;;  %6350 = vmatmul.bf16.gmra.mxu3 %v7640_v54  ;;  %v2559_v13 = vsel %vm9071_vm11, %v7278_v22, %v2558_v40  ;;  %v2560_v34 = vrot.slane %v2558_v40, 4  ;;  %6476 = vmatpush.bf16.msra.mxu1 %v8369_v49  ;;  %v1372_v1 = vld [vmem:[#allocation2 + $0x88] sm:$0xf] }
 0x16e   : > { %v6136_v17 = vadd.f32 %v6135_v2, %v9201_v25  ;;  %v9316_v21 = vld [vmem:[#allocation3 + $0x2d4] sm:$0xf]  ;;  %v1698_v15 = vshrl.u32 %v1371_v42, 16  ;;  %v2206_v52 = vor.u32 %v2205_v37, %v2201_v47  ;;  %2655 = vst [vmem:[#allocation3 + $0x298] sm:$0xf] %v2559_v13  ;;  %v1701_v14 = vshll.u32 %v1371_v42, 16 }
 0x16f   : > { %v6395_v29 = vpop.f32.mrf.mxu0  ;;  %v2202_v46 = vsel %vm8852_vm2, %v2197_v4, %v2201_v47  ;;  %v1373_v8 = vld [vmem:[#allocation2 + $0x8c] sm:$0x3]  ;;  %v1707_v54 = vshrl.u32 %v1372_v1, 16  ;;  %v7671_v28 = vld [vmem:[#allocation3 + $0x2d8] sm:$0xf]  ;;  %v2562_v20 = vsel %vm9071_vm11, %v2560_v34, %v2561_v62  ;;  %v1710_v9 = vshll.u32 %v1372_v1, 16 }
 0x170   : > { %v9323_v25 = vadd.f32 %v6395_v29, %v9293_v26  ;;  %2385 = vst [vmem:[#allocation3 + $0x2dc] sm:$0xf] %v2202_v46  ;;  %v1700_v19 = vrot.slane %v1698_v15, 5  ;;  %v6311_v24 = vpop.f32.mrf.mxu3  ;;  %v7665_v40 = vld [vmem:[#allocation3 + $0x2f4] sm:$0xf0]  ;;  %v2207_v4 = vrot.slane %v2206_v52, 4 }
 0x171   : > { %v6224_v22 = vpop.f32.mrf.mxu2  ;;  %2656 = vst [vmem:[#allocation3 + $0x2bc] sm:$0xf] %v2562_v20  ;;  %v1703_v47 = vrot.slane %v1701_v14, 6  ;;  %v9327_v55 = vadd.f32 %v6311_v24, %v6223_v41  ;;  %v8274_v2 = vld [vmem:[#allocation3 + $0x2f8] sm:$0xf0]  ;;  %v7668_v26 = vor.u32 %v9316_v21, %v7665_v40  ;;  %v1709_v37 = vrot.slane %v1707_v54, 5 }
 0x172   : > { %6434 = vmatmul.bf16.gmra.mxu0 %v7608_v6  ;;  %v6225_v49 = vadd.f32 %v6224_v22, %v6136_v17  ;;  %v8393_v42 = vld [vmem:[#allocation7 + $0x230] sm:$0xff]  ;;  %v1096_v13 = vld [vmem:[#allocation2 + $0x84] sm:$0xe]  ;;  %v7672_v29 = vor.u32 %v8274_v2, %v7671_v28  ;;  %v2212_v62 = vsel %vm8852_vm2, %v2207_v4, %v2211_v38  ;;  %v1712_v1 = vrot.slane %v1710_v9, 6  ;;  %v1934_v24 = vld [vmem:[#allocation2 + $0x90] sm:$0xf] }
 0x173   : > { %v1704_v34 = vor.u32 %v1703_v47, %v1700_v19  ;;  %v1097_v15 = vld [vmem:[#allocation2 + $0x88] sm:$0xf]  ;;  %v1098_v46 = vld [vmem:[#allocation2 + $0x8c] sm:$0x1]  ;;  %2386 = vst [vmem:[#allocation3 + $0x300] sm:$0xf] %v2212_v62  ;;  %6743 = vmatpush.bf16.msra.mxu0 %v8393_v42 }
 0x174   : > { %v1717_v52 = vshrl.u32 %v1373_v8, 16  ;;  %v1720_v6 = vshll.u32 %v1373_v8, 16  ;;  %v7264_v41 = vrot.slane %v1096_v13, 9  ;;  %v1241_v17 = vrot.slane %v1097_v15, 5  ;;  %v1935_v9 = vld [vmem:[#allocation2 + $0x94] sm:$0xf] }
 0x175   : > { %v6138_v14 = vpop.f32.mrf.mxu1  ;;  %v1705_v20 = vrot.slane %v1704_v34, 4  ;;  %v1713_v21 = vor.u32 %v1712_v1, %v1709_v37  ;;  %v1244_v54 = vrot.slane %v1098_v46, 5  ;;  %v1936_v37 = vld [vmem:[#allocation2 + $0x98] sm:$0x1]  ;;  %v2214_v62 = vshrl.u32 %v1934_v24, 16 }
 0x176   : > { %6266 = vmatmul.bf16.gmra.mxu2 %v7672_v29  ;;  %v6139_v28 = vadd.f32 %v6138_v14, %v9217_v23  ;;  %v1719_v22 = vrot.slane %v1717_v52, 5  ;;  %v1722_v38 = vrot.slane %v1720_v6, 6  ;;  %v1242_v19 = vsel %vm9071_vm11, %v7264_v41, %v1241_v17  ;;  %v7643_v23 = vld [vmem:[#allocation3 + $0x298] sm:$0xf]  ;;  %v2427_v41 = vld [vmem:[#allocation2 + $0x84] sm:$0xe] }
 0x177   : > { %v6397_v40 = vpop.f32.mrf.mxu0  ;;  %v8270_v4 = vld [vmem:[#allocation3 + $0x2dc] sm:$0xf]  ;;  %v1714_v8 = vsel %vm9062_vm8, %v1705_v20, %v1713_v21  ;;  %v1715_v47 = vrot.slane %v1713_v21, 4  ;;  %v1243_v2 = vrot.slane %v1241_v17, 4  ;;  %1328 = vst [vmem:[#allocation3 + $0x31c] sm:$0xf] %v1242_v19 }
 0x178   : > { %v9338_v42 = vadd.f32 %v6397_v40, %v9310_v51  ;;  %6177 = vmatmul.bf16.gmra.mxu1 %v7668_v26  ;;  %v8266_v13 = vld [vmem:[#allocation3 + $0x2b8] sm:$0xf0]  ;;  %v1723_v29 = vor.u32 %v1722_v38, %v1719_v22  ;;  %1891 = vst [vmem:[#allocation3 + $0x320] sm:$0xf] %v1714_v8  ;;  %v2217_v34 = vshll.u32 %v1934_v24, 16  ;;  %v6313_v1 = vpop.f32.mrf.mxu3  ;;  %v2223_v52 = vshll.u32 %v1935_v9, 16 }
 0x179   : > { %v6227_v15 = vpop.f32.mrf.mxu2  ;;  %v1245_v46 = vsel %vm9071_vm11, %v1243_v2, %v1244_v54  ;;  %v2227_v6 = vshrl.u32 %v1935_v9, 16  ;;  %v2428_v17 = vld [vmem:[#allocation2 + $0x88] sm:$0xf]  ;;  %v9342_v14 = vadd.f32 %v6313_v1, %v6225_v49  ;;  %v2216_v20 = vrot.slane %v2214_v62, 4  ;;  %v2429_v21 = vld [vmem:[#allocation2 + $0x8c] sm:$0x1] }
 0x17a   : > { %v6228_v51 = vadd.f32 %v6227_v15, %v6139_v28  ;;  %v1724_v26 = vsel %vm9062_vm8, %v1715_v47, %v1723_v29  ;;  %1329 = vst [vmem:[#allocation3 + $0x340] sm:$0xf] %v1245_v46  ;;  %v7673_v22 = vld [vmem:[#allocation3 + $0x2fc] sm:$0xf0]  ;;  %v2219_v24 = vrot.slane %v2217_v34, 5  ;;  %v2225_v38 = vrot.slane %v2223_v52, 5 }
 0x17b   : > { %1892 = vst [vmem:[#allocation3 + $0x344] sm:$0xf] %v1724_v26  ;;  %v7676_v19 = vor.u32 %v8270_v4, %v7673_v22  ;;  %v2229_v40 = vrot.slane %v2227_v6, 4  ;;  %v2233_v54 = vshll.u32 %v1936_v37, 16  ;;  %v7279_v8 = vrot.slane %v2427_v41, 9 }
 0x17c   : > { %v1374_v9 = vld [vmem:[#allocation2 + $0x90] sm:$0xe]  ;;  %v7644_v2 = vor.u32 %v8266_v13, %v7643_v23  ;;  %v2220_v49 = vor.u32 %v2219_v24, %v2216_v20  ;;  %v2565_v1 = vrot.slane %v2428_v17, 5  ;;  %v2568_v28 = vrot.slane %v2429_v21, 5  ;;  %v1375_v15 = vld [vmem:[#allocation2 + $0x94] sm:$0xf] }
 0x17d   : > { %v6140_v59 = vpop.f32.mrf.mxu1  ;;  %6355 = vmatmul.bf16.gmra.mxu3 %v7676_v19  ;;  %v2230_v62 = vor.u32 %v2229_v40, %v2225_v38  ;;  %v2235_v46 = vrot.slane %v2233_v54, 5  ;;  %v1726_v26 = vshrl.u32 %v1374_v9, 16  ;;  %v1376_v23 = vld [vmem:[#allocation2 + $0x98] sm:$0x3]  ;;  %v1729_v13 = vshll.u32 %v1374_v9, 16 }
 0x17e   : > { %v6141_v47 = vadd.f32 %v6140_v59, %v9237_v33  ;;  %v8278_v29 = vld [vmem:[#allocation3 + $0x31c] sm:$0xf]  ;;  %v2221_v4 = vrot.slane %v2220_v49, 4  ;;  %v2566_v37 = vsel %vm9071_vm11, %v7279_v8, %v2565_v1  ;;  %v2567_v6 = vrot.slane %v2565_v1, 4  ;;  %v1099_v41 = vld [vmem:[#allocation2 + $0x90] sm:$0xe] }
 0x17f   : > { %v6400_v34 = vpop.f32.mrf.mxu0  ;;  %v7707_v52 = vld [vmem:[#allocation3 + $0x320] sm:$0xf]  ;;  %v2231_v20 = vrot.slane %v2230_v62, 4  ;;  %2657 = vst [vmem:[#allocation3 + $0x2e0] sm:$0xf] %v2566_v37  ;;  %v1728_v33 = vrot.slane %v1726_v26, 5 }
 0x180   : > { %v9350_v17 = vadd.f32 %v6400_v34, %v9327_v55  ;;  %v1735_v59 = vshrl.u32 %v1375_v15, 16  ;;  %v6316_v21 = vpop.f32.mrf.mxu3  ;;  %v2226_v19 = vsel %vm8852_vm2, %v2221_v4, %v2225_v38  ;;  %v2569_v40 = vsel %vm9071_vm11, %v2567_v6, %v2568_v28  ;;  %v1100_v9 = vld [vmem:[#allocation2 + $0x94] sm:$0xf]  ;;  %v1101_v34 = vld [vmem:[#allocation2 + $0x98] sm:$0x1] }
 0x181   : > { %v6229_v22 = vpop.f32.mrf.mxu2  ;;  %v7701_v24 = vld [vmem:[#allocation3 + $0x33c] sm:$0xf0]  ;;  %v1731_v54 = vrot.slane %v1729_v13, 6  ;;  %v1738_v8 = vshll.u32 %v1375_v15, 16  ;;  %v9356_v49 = vadd.f32 %v6316_v21, %v6228_v51  ;;  %v2236_v26 = vsel %vm8852_vm2, %v2231_v20, %v2235_v46  ;;  %2387 = vst [vmem:[#allocation3 + $0x324] sm:$0xf] %v2226_v19 }
 0x182   : > { %6439 = vmatmul.bf16.gmra.mxu0 %v7644_v2  ;;  %v6230_v55 = vadd.f32 %v6229_v22, %v6141_v47  ;;  %v8283_v1 = vld [vmem:[#allocation3 + $0x340] sm:$0xf0]  ;;  %v7704_v62 = vor.u32 %v8278_v29, %v7701_v24  ;;  %v1737_v38 = vrot.slane %v1735_v59, 5  ;;  %2388 = vst [vmem:[#allocation3 + $0x348] sm:$0xf] %v2236_v26  ;;  %v1745_v28 = vshrl.u32 %v1376_v23, 16 }
 0x183   : > { %v7708_v37 = vor.u32 %v8283_v1, %v7707_v52  ;;  %v1732_v58 = vor.u32 %v1731_v54, %v1728_v33  ;;  %v1740_v4 = vrot.slane %v1738_v8, 6  ;;  %v1748_v6 = vshll.u32 %v1376_v23, 16  ;;  %2658 = vst [vmem:[#allocation3 + $0x304] sm:$0xf] %v2569_v40  ;;  %v1937_v29 = vld [vmem:[#allocation2 + $0x9c] sm:$0xf] }
 0x184   : > { %v7265_v15 = vrot.slane %v1099_v41, 9  ;;  %v1248_v13 = vrot.slane %v1100_v9, 5  ;;  %v1251_v21 = vrot.slane %v1101_v34, 5  ;;  %v1747_v20 = vrot.slane %v1745_v28, 5  ;;  %v1938_v59 = vld [vmem:[#allocation2 + $0xa0] sm:$0xf] }
 0x185   : > { %v6143_v2 = vpop.f32.mrf.mxu1  ;;  %v1733_v51 = vrot.slane %v1732_v58, 4  ;;  %v1741_v47 = vor.u32 %v1740_v4, %v1737_v38  ;;  %v1750_v52 = vrot.slane %v1748_v6, 6  ;;  %v1939_v22 = vld [vmem:[#allocation2 + $0xa4] sm:$0x1]  ;;  %v2430_v58 = vld [vmem:[#allocation2 + $0x90] sm:$0xe] }
 0x186   : > { %6271 = vmatmul.bf16.gmra.mxu2 %v7708_v37  ;;  %v6144_v46 = vadd.f32 %v6143_v2, %v9257_v48  ;;  %v1249_v33 = vsel %vm9071_vm11, %v7265_v15, %v1248_v13  ;;  %v1250_v19 = vrot.slane %v1248_v13, 4  ;;  %v9368_v48 = vld [vmem:[#allocation3 + $0x2e0] sm:$0xf]  ;;  %v2238_v8 = vshrl.u32 %v1937_v29, 16  ;;  %v2431_v1 = vld [vmem:[#allocation2 + $0x94] sm:$0xf] }
 0x187   : > { %v6402_v24 = vpop.f32.mrf.mxu0  ;;  %v1742_v23 = vsel %vm9062_vm8, %v1733_v51, %v1741_v47  ;;  %v1743_v41 = vrot.slane %v1741_v47, 4  ;;  %1330 = vst [vmem:[#allocation3 + $0x364] sm:$0xf] %v1249_v33  ;;  %v1751_v54 = vor.u32 %v1750_v52, %v1747_v20  ;;  %v2241_v9 = vshll.u32 %v1937_v29, 16  ;;  %v2432_v26 = vld [vmem:[#allocation2 + $0x98] sm:$0x1] }
 0x188   : > { %v9366_v40 = vadd.f32 %v6402_v24, %v9342_v14  ;;  %6182 = vmatmul.bf16.gmra.mxu1 %v7704_v62  ;;  %1893 = vst [vmem:[#allocation3 + $0x368] sm:$0xf] %v1742_v23  ;;  %v6318_v34 = vpop.f32.mrf.mxu3  ;;  %v1252_v38 = vsel %vm9071_vm11, %v1250_v19, %v1251_v21  ;;  %v2247_v4 = vshll.u32 %v1938_v59, 16  ;;  %v2251_v28 = vshrl.u32 %v1938_v59, 16  ;;  %v8376_v15 = vld [vmem:[#allocation7 + $0x1a8] sm:$0xff] }
 0x189   : > { %v6232_v37 = vpop.f32.mrf.mxu2  ;;  %v2257_v6 = vshll.u32 %v1939_v22, 16  ;;  %v8384_v14 = vld [vmem:[#allocation7 + $0x1e8] sm:$0xff]  ;;  %v9372_v62 = vadd.f32 %v6318_v34, %v6230_v55  ;;  %v8279_v51 = vld [vmem:[#allocation3 + $0x324] sm:$0xf]  ;;  %v1752_v47 = vsel %vm9062_vm8, %v1743_v41, %v1751_v54  ;;  %1331 = vst [vmem:[#allocation3 + $0x388] sm:$0xf] %v1252_v38  ;;  %6566 = vmatpush.bf16.msra.mxu2 %v8376_v15 }
 0x18a   : > { %v8368_v13 = vld [vmem:[#allocation7 + $0x168] sm:$0xff]  ;;  %v6233_v2 = vadd.f32 %v6232_v37, %v6144_v46  ;;  %v2240_v29 = vrot.slane %v2238_v8, 4  ;;  %1894 = vst [vmem:[#allocation3 + $0x38c] sm:$0xf] %v1752_v47  ;;  %v2243_v52 = vrot.slane %v2241_v9, 5  ;;  %v2249_v33 = vrot.slane %v2247_v4, 5  ;;  %6655 = vmatpush.bf16.msra.mxu3 %v8384_v14 }
 0x18b   : > { %v7709_v20 = vld [vmem:[#allocation3 + $0x344] sm:$0xf0]  ;;  %v8275_v59 = vld [vmem:[#allocation3 + $0x300] sm:$0xf0]  ;;  %v2253_v22 = vrot.slane %v2251_v28, 4  ;;  %v2259_v24 = vrot.slane %v2257_v6, 5  ;;  %6477 = vmatpush.bf16.msra.mxu1 %v8368_v13 }
 0x18c   : > { %v7712_v21 = vor.u32 %v8279_v51, %v7709_v20  ;;  %v7280_v23 = vrot.slane %v2430_v58, 9  ;;  %v7680_v55 = vor.u32 %v8275_v59, %v9368_v48  ;;  %v2244_v19 = vor.u32 %v2243_v52, %v2240_v29  ;;  %v1377_v54 = vld [vmem:[#allocation2 + $0x9c] sm:$0xe]  ;;  %v1378_v8 = vld [vmem:[#allocation2 + $0xa0] sm:$0xf] }
 0x18d   : > { %v6145_v46 = vpop.f32.mrf.mxu1  ;;  %v2572_v34 = vrot.slane %v2431_v1, 5  ;;  %v2575_v41 = vrot.slane %v2432_v26, 5  ;;  %v2254_v38 = vor.u32 %v2253_v22, %v2249_v33  ;;  %v1379_v4 = vld [vmem:[#allocation2 + $0xa4] sm:$0x3]  ;;  %v1754_v15 = vshrl.u32 %v1377_v54, 16 }
 0x18e   : > { %6360 = vmatmul.bf16.gmra.mxu3 %v7712_v21  ;;  %v6146_v9 = vadd.f32 %v6145_v46, %v9273_v45  ;;  %v9378_v37 = vld [vmem:[#allocation3 + $0x364] sm:$0xf]  ;;  %v1757_v28 = vshll.u32 %v1377_v54, 16  ;;  %v2245_v14 = vrot.slane %v2244_v19, 4  ;;  %v1763_v1 = vshrl.u32 %v1378_v8, 16  ;;  %v8392_v29 = vld [vmem:[#allocation7 + $0x228] sm:$0xff] }
 0x18f   : > { %v6405_v6 = vpop.f32.mrf.mxu0  ;;  %v7743_v58 = vld [vmem:[#allocation3 + $0x368] sm:$0xf]  ;;  %v2573_v48 = vsel %vm9071_vm11, %v7280_v23, %v2572_v34  ;;  %v2574_v13 = vrot.slane %v2572_v34, 4  ;;  %v2255_v51 = vrot.slane %v2254_v38, 4  ;;  %v1756_v45 = vrot.slane %v1754_v15, 5  ;;  %6744 = vmatpush.bf16.msra.mxu0 %v8392_v29 }
 0x190   : > { %v9383_v26 = vadd.f32 %v6405_v6, %v9356_v49  ;;  %2659 = vst [vmem:[#allocation3 + $0x328] sm:$0xf] %v2573_v48  ;;  %v1759_v47 = vrot.slane %v1757_v28, 6  ;;  %v6321_v20 = vpop.f32.mrf.mxu3  ;;  %v7737_v21 = vld [vmem:[#allocation3 + $0x384] sm:$0xf0]  ;;  %v2250_v59 = vsel %vm8852_vm2, %v2245_v14, %v2249_v33  ;;  %v1765_v23 = vrot.slane %v1763_v1, 5 }
 0x191   : > { %v6234_v52 = vpop.f32.mrf.mxu2  ;;  %v2576_v22 = vsel %vm9071_vm11, %v2574_v13, %v2575_v41  ;;  %v1766_v46 = vshll.u32 %v1378_v8, 16  ;;  %v1102_v19 = vld [vmem:[#allocation2 + $0x9c] sm:$0xe]  ;;  %v9389_v49 = vadd.f32 %v6321_v20, %v6233_v2  ;;  %v8292_v54 = vld [vmem:[#allocation3 + $0x388] sm:$0xf0]  ;;  %v7740_v38 = vor.u32 %v9378_v37, %v7737_v21 }
 0x192   : > { %6444 = vmatmul.bf16.gmra.mxu0 %v7680_v55  ;;  %v6235_v34 = vadd.f32 %v6234_v52, %v6146_v9  ;;  %v2260_v15 = vsel %vm8852_vm2, %v2255_v51, %v2259_v24  ;;  %v1103_v28 = vld [vmem:[#allocation2 + $0xa0] sm:$0xf]  ;;  %v1104_v6 = vld [vmem:[#allocation2 + $0xa4] sm:$0x1]  ;;  %v7744_v48 = vor.u32 %v8292_v54, %v7743_v58  ;;  %2389 = vst [vmem:[#allocation3 + $0x36c] sm:$0xf] %v2250_v59 }
 0x193   : > { %v1760_v33 = vor.u32 %v1759_v47, %v1756_v45  ;;  %v1768_v14 = vrot.slane %v1766_v46, 6  ;;  %v1773_v41 = vshrl.u32 %v1379_v4, 16  ;;  %v1940_v8 = vld [vmem:[#allocation2 + $0xa8] sm:$0xf]  ;;  %2390 = vst [vmem:[#allocation3 + $0x390] sm:$0xf] %v2260_v15 }
 0x194   : > { %v1776_v55 = vshll.u32 %v1379_v4, 16  ;;  %v7266_v2 = vrot.slane %v1102_v19, 9  ;;  %v1255_v13 = vrot.slane %v1103_v28, 5  ;;  %v1258_v9 = vrot.slane %v1104_v6, 5  ;;  %2660 = vst [vmem:[#allocation3 + $0x34c] sm:$0xf] %v2576_v22 }
 0x195   : > { %v6148_v1 = vpop.f32.mrf.mxu1  ;;  %v1761_v37 = vrot.slane %v1760_v33, 4  ;;  %v1769_v20 = vor.u32 %v1768_v14, %v1765_v23  ;;  %v1775_v52 = vrot.slane %v1773_v41, 5  ;;  %v1941_v47 = vld [vmem:[#allocation2 + $0xac] sm:$0xf]  ;;  %v1942_v29 = vld [vmem:[#allocation2 + $0xb0] sm:$0x1] }
 0x196   : > { %6276 = vmatmul.bf16.gmra.mxu2 %v7744_v48  ;;  %v6149_v24 = vadd.f32 %v6148_v1, %v9287_v11  ;;  %v1778_v58 = vrot.slane %v1776_v55, 6  ;;  %v1256_v51 = vsel %vm9071_vm11, %v7266_v2, %v1255_v13  ;;  %v1257_v45 = vrot.slane %v1255_v13, 4  ;;  %v2433_v46 = vld [vmem:[#allocation2 + $0x9c] sm:$0xe]  ;;  %v2434_v28 = vld [vmem:[#allocation2 + $0xa0] sm:$0xf] }
 0x197   : > { %v6407_v21 = vpop.f32.mrf.mxu0  ;;  %v1770_v4 = vsel %vm9062_vm8, %v1761_v37, %v1769_v20  ;;  %v1771_v59 = vrot.slane %v1769_v20, 4  ;;  %1332 = vst [vmem:[#allocation3 + $0x3ac] sm:$0xf] %v1256_v51  ;;  %v2262_v22 = vshrl.u32 %v1940_v8, 16  ;;  %v7715_v11 = vld [vmem:[#allocation3 + $0x328] sm:$0xf] }
 0x198   : > { %v9400_v23 = vadd.f32 %v6407_v21, %v9372_v62  ;;  %6187 = vmatmul.bf16.gmra.mxu1 %v7740_v38  ;;  %v1779_v19 = vor.u32 %v1778_v58, %v1775_v52  ;;  %1895 = vst [vmem:[#allocation3 + $0x3b0] sm:$0xf] %v1770_v4  ;;  %v1259_v54 = vsel %vm9071_vm11, %v1257_v45, %v1258_v9  ;;  %v2265_v15 = vshll.u32 %v1940_v8, 16  ;;  %v6323_v6 = vpop.f32.mrf.mxu3  ;;  %v2435_v37 = vld [vmem:[#allocation2 + $0xa4] sm:$0x1] }
 0x199   : > { %v6237_v48 = vpop.f32.mrf.mxu2  ;;  %1333 = vst [vmem:[#allocation3 + $0x3d0] sm:$0xf] %v1259_v54  ;;  %v2264_v33 = vrot.slane %v2262_v22, 4  ;;  %v2271_v14 = vshll.u32 %v1941_v47, 16  ;;  %v2275_v41 = vshrl.u32 %v1941_v47, 16  ;;  %v2281_v55 = vshll.u32 %v1942_v29, 16 }
 0x19a   : > { %v9404_v2 = vadd.f32 %v6323_v6, %v6235_v34  ;;  %v6238_v62 = vadd.f32 %v6237_v48, %v6149_v24  ;;  %v8288_v13 = vld [vmem:[#allocation3 + $0x36c] sm:$0xf]  ;;  %v1780_v38 = vsel %vm9062_vm8, %v1771_v59, %v1779_v19  ;;  %v2267_v1 = vrot.slane %v2265_v15, 5  ;;  %v7745_v20 = vld [vmem:[#allocation3 + $0x38c] sm:$0xf0] }
 0x19b   : > { %1896 = vst [vmem:[#allocation3 + $0x3d4] sm:$0xf] %v1780_v38  ;;  %v2273_v8 = vrot.slane %v2271_v14, 5  ;;  %v2277_v9 = vrot.slane %v2275_v41, 4  ;;  %v7748_v52 = vor.u32 %v8288_v13, %v7745_v20  ;;  %v8284_v58 = vld [vmem:[#allocation3 + $0x348] sm:$0xf0] }
 0x19c   : > { %v2268_v51 = vor.u32 %v2267_v1, %v2264_v33  ;;  %v2283_v45 = vrot.slane %v2281_v55, 5  ;;  %v7281_v21 = vrot.slane %v2433_v46, 9  ;;  %v1380_v47 = vld [vmem:[#allocation2 + $0xa8] sm:$0xe]  ;;  %v7716_v29 = vor.u32 %v8284_v58, %v7715_v11  ;;  %v1381_v54 = vld [vmem:[#allocation2 + $0xac] sm:$0xf] }
 0x19d   : > { %v6150_v34 = vpop.f32.mrf.mxu1  ;;  %v2278_v4 = vor.u32 %v2277_v9, %v2273_v8  ;;  %v2579_v24 = vrot.slane %v2434_v28, 5  ;;  %v2582_v22 = vrot.slane %v2435_v37, 5  ;;  %v1382_v6 = vld [vmem:[#allocation2 + $0xb0] sm:$0x3]  ;;  %v1782_v48 = vshrl.u32 %v1380_v47, 16 }
 0x19e   : > { %6365 = vmatmul.bf16.gmra.mxu3 %v7748_v52  ;;  %v6151_v59 = vadd.f32 %v6150_v34, %v9302_v36  ;;  %v8296_v19 = vld [vmem:[#allocation3 + $0x3ac] sm:$0xf]  ;;  %v2269_v15 = vrot.slane %v2268_v51, 4  ;;  %v1785_v14 = vshll.u32 %v1380_v47, 16  ;;  %v1791_v55 = vshrl.u32 %v1381_v54, 16 }
 0x19f   : > { %v6410_v41 = vpop.f32.mrf.mxu0  ;;  %v7779_v13 = vld [vmem:[#allocation3 + $0x3b0] sm:$0xf]  ;;  %v2279_v33 = vrot.slane %v2278_v4, 4  ;;  %v2580_v46 = vsel %vm9071_vm11, %v7281_v21, %v2579_v24  ;;  %v2581_v11 = vrot.slane %v2579_v24, 4  ;;  %v1784_v1 = vrot.slane %v1782_v48, 5 }
 0x1a0   : > { %v9412_v28 = vadd.f32 %v6410_v41, %v9389_v49  ;;  %v7773_v38 = vld [vmem:[#allocation3 + $0x3cc] sm:$0xf0]  ;;  %v2274_v36 = vsel %vm8852_vm2, %v2269_v15, %v2273_v8  ;;  %2661 = vst [vmem:[#allocation3 + $0x370] sm:$0xf] %v2580_v46  ;;  %v1787_v37 = vrot.slane %v1785_v14, 6  ;;  %v6326_v20 = vpop.f32.mrf.mxu3  ;;  %v1793_v51 = vrot.slane %v1791_v55, 5 }
 0x1a1   : > { %v6239_v9 = vpop.f32.mrf.mxu2  ;;  %v2284_v52 = vsel %vm8852_vm2, %v2279_v33, %v2283_v45  ;;  %2391 = vst [vmem:[#allocation3 + $0x3b4] sm:$0xf] %v2274_v36  ;;  %v2583_v58 = vsel %vm9071_vm11, %v2581_v11, %v2582_v22  ;;  %v1105_v21 = vld [vmem:[#allocation2 + $0xa8] sm:$0xe]  ;;  %v9420_v49 = vadd.f32 %v6326_v20, %v6238_v62  ;;  %v1794_v4 = vshll.u32 %v1381_v54, 16 }
 0x1a2   : > { %6449 = vmatmul.bf16.gmra.mxu0 %v7716_v29  ;;  %v6240_v47 = vadd.f32 %v6239_v9, %v6151_v59  ;;  %v8301_v34 = vld [vmem:[#allocation3 + $0x3d0] sm:$0xf0]  ;;  %2392 = vst [vmem:[#allocation3 + $0x3d8] sm:$0xf] %v2284_v52  ;;  %v1788_v8 = vor.u32 %v1787_v37, %v1784_v1  ;;  %v7776_v15 = vor.u32 %v8296_v19, %v7773_v38  ;;  %v1801_v48 = vshrl.u32 %v1382_v6, 16 }
 0x1a3   : > { %v7780_v24 = vor.u32 %v8301_v34, %v7779_v13  ;;  %2662 = vst [vmem:[#allocation3 + $0x394] sm:$0xf] %v2583_v58  ;;  %v1804_v14 = vshll.u32 %v1382_v6, 16  ;;  %v1106_v45 = vld [vmem:[#allocation2 + $0xac] sm:$0xf]  ;;  %v1796_v33 = vrot.slane %v1794_v4, 6 }
 0x1a4   : > { %v1789_v41 = vrot.slane %v1788_v8, 4  ;;  %v1107_v46 = vld [vmem:[#allocation2 + $0xb0] sm:$0x1]  ;;  %v7267_v22 = vrot.slane %v1105_v21, 9  ;;  %v1262_v11 = vrot.slane %v1106_v45, 5  ;;  %v1803_v29 = vrot.slane %v1801_v48, 5 }
 0x1a5   : > { %v6153_v55 = vpop.f32.mrf.mxu1  ;;  %v1806_v62 = vrot.slane %v1804_v14, 6  ;;  %v1265_v36 = vrot.slane %v1107_v46, 5  ;;  %v1943_v59 = vld [vmem:[#allocation2 + $0xb4] sm:$0xf]  ;;  %v1797_v54 = vor.u32 %v1796_v33, %v1793_v51  ;;  %v1944_v6 = vld [vmem:[#allocation2 + $0xb8] sm:$0xf] }
 0x1a6   : > { %6281 = vmatmul.bf16.gmra.mxu2 %v7780_v24  ;;  %v6154_v1 = vadd.f32 %v6153_v55, %v9141_v16  ;;  %v1263_v19 = vsel %vm9071_vm11, %v7267_v22, %v1262_v11  ;;  %v1264_v13 = vrot.slane %v1262_v11, 4  ;;  %v1945_v20 = vld [vmem:[#allocation2 + $0xbc] sm:$0x1]  ;;  %v2286_v9 = vshrl.u32 %v1943_v59, 16  ;;  %v2436_v8 = vld [vmem:[#allocation2 + $0xa8] sm:$0xe] }
 0x1a7   : > { %v6412_v38 = vpop.f32.mrf.mxu0  ;;  %v1807_v37 = vor.u32 %v1806_v62, %v1803_v29  ;;  %1334 = vst [vmem:[#allocation3 + $0x3f4] sm:$0xf] %v1263_v19  ;;  %v2289_v52 = vshll.u32 %v1943_v59, 16  ;;  %v1798_v16 = vsel %vm9062_vm8, %v1789_v41, %v1797_v54  ;;  %v1799_v51 = vrot.slane %v1797_v54, 4  ;;  %v8375_v4 = vld [vmem:[#allocation7 + $0x1a0] sm:$0xff] }
 0x1a8   : > { %v9426_v58 = vadd.f32 %v6412_v38, %v9404_v2  ;;  %6192 = vmatmul.bf16.gmra.mxu1 %v7776_v15  ;;  %v8297_v21 = vld [vmem:[#allocation3 + $0x3b4] sm:$0xf]  ;;  %v1266_v34 = vsel %vm9071_vm11, %v1264_v13, %v1265_v36  ;;  %v6328_v24 = vpop.f32.mrf.mxu3  ;;  %v7751_v45 = vld [vmem:[#allocation3 + $0x370] sm:$0xf]  ;;  %1897 = vst [vmem:[#allocation3 + $0x3f8] sm:$0xf] %v1798_v16  ;;  %6567 = vmatpush.bf16.msra.mxu2 %v8375_v4 }
 0x1a9   : > { %v6242_v48 = vpop.f32.mrf.mxu2  ;;  %v7781_v14 = vld [vmem:[#allocation3 + $0x3d4] sm:$0xf0]  ;;  %v2288_v33 = vrot.slane %v2286_v9, 4  ;;  %v2291_v46 = vrot.slane %v2289_v52, 5  ;;  %v9432_v2 = vadd.f32 %v6328_v24, %v6240_v47  ;;  %v1808_v41 = vsel %vm9062_vm8, %v1799_v51, %v1807_v37  ;;  %1335 = vst [vmem:[#allocation3 + $0x418] sm:$0xf] %v1266_v34 }
 0x1aa   : > { %v6243_v15 = vadd.f32 %v6242_v48, %v6154_v1  ;;  %v7784_v22 = vor.u32 %v8297_v21, %v7781_v14  ;;  %v8293_v11 = vld [vmem:[#allocation3 + $0x390] sm:$0xf0]  ;;  %1898 = vst [vmem:[#allocation3 + $0x41c] sm:$0xf] %v1808_v41  ;;  %v2295_v62 = vshll.u32 %v1944_v6, 16  ;;  %v2299_v36 = vshrl.u32 %v1944_v6, 16 }
 0x1ab   : > { %v2437_v55 = vld [vmem:[#allocation2 + $0xac] sm:$0xf]  ;;  %v2292_v29 = vor.u32 %v2291_v46, %v2288_v33  ;;  %v2438_v59 = vld [vmem:[#allocation2 + $0xb0] sm:$0x1]  ;;  %v2305_v54 = vshll.u32 %v1945_v20, 16  ;;  %v7282_v19 = vrot.slane %v2436_v8, 9  ;;  %v7752_v51 = vor.u32 %v8293_v11, %v7751_v45 }
 0x1ac   : > { %v2586_v13 = vrot.slane %v2437_v55, 5  ;;  %v2589_v38 = vrot.slane %v2438_v59, 5  ;;  %v8383_v47 = vld [vmem:[#allocation7 + $0x1e0] sm:$0xff]  ;;  %v2297_v21 = vrot.slane %v2295_v62, 5  ;;  %v2301_v16 = vrot.slane %v2299_v36, 4  ;;  %v8374_v37 = vld [vmem:[#allocation7 + $0x198] sm:$0xff] }
 0x1ad   : > { %v8367_v9 = vld [vmem:[#allocation7 + $0x160] sm:$0xff]  ;;  %v6155_v1 = vpop.f32.mrf.mxu1  ;;  %v2293_v52 = vrot.slane %v2292_v29, 4  ;;  %v1383_v24 = vld [vmem:[#allocation2 + $0xb4] sm:$0xe]  ;;  %v2307_v48 = vrot.slane %v2305_v54, 5  ;;  %6656 = vmatpush.bf16.msra.mxu3 %v8383_v47  ;;  %6568 = vmatpush.bf16.msra.mxu2 %v8374_v37 }
 0x1ae   : > { %6370 = vmatmul.bf16.gmra.mxu3 %v7784_v22  ;;  %v9436_v34 = vld [vmem:[#allocation3 + $0x3f4] sm:$0xf]  ;;  %v2587_v6 = vsel %vm9071_vm11, %v7282_v19, %v2586_v13  ;;  %v2588_v20 = vrot.slane %v2586_v13, 4  ;;  %6478 = vmatpush.bf16.msra.mxu1 %v8367_v9  ;;  %v1384_v8 = vld [vmem:[#allocation2 + $0xb8] sm:$0xf]  ;;  %v2302_v33 = vor.u32 %v2301_v16, %v2297_v21  ;;  %v1810_v41 = vshrl.u32 %v1383_v24, 16 }
 0x1af   : > { %v6415_v4 = vpop.f32.mrf.mxu0  ;;  %v2298_v14 = vsel %vm8852_vm2, %v2293_v52, %v2297_v21  ;;  %2663 = vst [vmem:[#allocation3 + $0x3b8] sm:$0xf] %v2587_v6  ;;  %v1385_v46 = vld [vmem:[#allocation2 + $0xbc] sm:$0x3]  ;;  %v1813_v22 = vshll.u32 %v1383_v24, 16  ;;  %v1819_v29 = vshrl.u32 %v1384_v8, 16  ;;  %v6156_v59 = vadd.f32 %v6155_v1, %v9157_v5 }
 0x1b0   : > { %v9443_v45 = vadd.f32 %v6415_v4, %v9420_v49  ;;  %v7815_v11 = vld [vmem:[#allocation3 + $0x3f8] sm:$0xf]  ;;  %2393 = vst [vmem:[#allocation3 + $0x3fc] sm:$0xf] %v2298_v14  ;;  %v2590_v55 = vsel %vm9071_vm11, %v2588_v20, %v2589_v38  ;;  %v1822_v62 = vshll.u32 %v1384_v8, 16  ;;  %v6331_v36 = vpop.f32.mrf.mxu3  ;;  %v2303_v13 = vrot.slane %v2302_v33, 4 }
 0x1b1   : > { %v6244_v54 = vpop.f32.mrf.mxu2  ;;  %v7809_v19 = vld [vmem:[#allocation3 + $0x414] sm:$0xf0]  ;;  %2664 = vst [vmem:[#allocation3 + $0x3dc] sm:$0xf] %v2590_v55  ;;  %v1812_v47 = vrot.slane %v1810_v41, 5  ;;  %v9448_v9 = vadd.f32 %v6331_v36, %v6243_v15  ;;  %v1815_v21 = vrot.slane %v1813_v22, 6 }
 0x1b2   : > { %6454 = vmatmul.bf16.gmra.mxu0 %v7752_v51  ;;  %v8310_v49 = vld [vmem:[#allocation3 + $0x418] sm:$0xf0]  ;;  %v7812_v52 = vor.u32 %v9436_v34, %v7809_v19  ;;  %v8391_v16 = vld [vmem:[#allocation7 + $0x220] sm:$0xff]  ;;  %v2308_v37 = vsel %vm8852_vm2, %v2303_v13, %v2307_v48  ;;  %v1821_v5 = vrot.slane %v1819_v29, 5  ;;  %v1824_v1 = vrot.slane %v1822_v62, 6 }
 0x1b3   : > { %v1108_v24 = vld [vmem:[#allocation2 + $0xb4] sm:$0xe]  ;;  %v7816_v38 = vor.u32 %v8310_v49, %v7815_v11  ;;  %v1109_v6 = vld [vmem:[#allocation2 + $0xb8] sm:$0xf]  ;;  %v1110_v20 = vld [vmem:[#allocation2 + $0xbc] sm:$0x1]  ;;  %v1816_v51 = vor.u32 %v1815_v21, %v1812_v47  ;;  %6745 = vmatpush.bf16.msra.mxu0 %v8391_v16  ;;  %v6245_v34 = vadd.f32 %v6244_v54, %v6156_v59 }
 0x1b4   : > { %2394 = vst [vmem:[#allocation3 + $0x420] sm:$0xf] %v2308_v37  ;;  %v1829_v15 = vshrl.u32 %v1385_v46, 16  ;;  %v1832_v8 = vshll.u32 %v1385_v46, 16  ;;  %v7268_v4 = vrot.slane %v1108_v24, 9  ;;  %v1825_v33 = vor.u32 %v1824_v1, %v1821_v5  ;;  %v8366_v59 = vld [vmem:[#allocation7 + $0x158] sm:$0xff] }
 0x1b5   : > { %v6158_v14 = vpop.f32.mrf.mxu1  ;;  %v1269_v41 = vrot.slane %v1109_v6, 5  ;;  %v1272_v22 = vrot.slane %v1110_v20, 5  ;;  %v350_v11 = vld [vmem:[%s8826_s28 + $0x78] sm:$0xf]  ;;  %v351_v55 = vld [vmem:[%s8826_s28 + $0x7c] sm:$0xf]  ;;  %6479 = vmatpush.bf16.msra.mxu1 %v8366_v59 }
 0x1b6   : > { %6286 = vmatmul.bf16.gmra.mxu2 %v7816_v38  ;;  %v6159_v48 = vadd.f32 %v6158_v14, %v9173_v57  ;;  %v1817_v29 = vrot.slane %v1816_v51, 4  ;;  %v1831_v62 = vrot.slane %v1829_v15, 5  ;;  %v1834_v36 = vrot.slane %v1832_v8, 6  ;;  %v8373_v38 = vld [vmem:[#allocation7 + $0x190] sm:$0xff]  ;;  %v7787_v1 = vld [vmem:[#allocation3 + $0x3b8] sm:$0xf] }
 0x1b7   : > { %v6417_v19 = vpop.f32.mrf.mxu0  ;;  %v1827_v13 = vrot.slane %v1825_v33, 4  ;;  %v1270_v46 = vsel %vm9071_vm11, %v7268_v4, %v1269_v41  ;;  %v1271_v47 = vrot.slane %v1269_v41, 4  ;;  %v462_v49 = vrot.slane %v350_v11, 7  ;;  %v8306_v21 = vld [vmem:[#allocation3 + $0x3fc] sm:$0xf]  ;;  %6569 = vmatpush.bf16.msra.mxu2 %v8373_v38  ;;  %v8365_v41 = vld [vmem:[#allocation7 + $0x150] sm:$0xff] }
 0x1b8   : > { %v9459_v54 = vadd.f32 %v6417_v19, %v9432_v2  ;;  %6197 = vmatmul.bf16.gmra.mxu1 %v7812_v52  ;;  %v1826_v16 = vsel %vm9062_vm8, %v1817_v29, %v1825_v33  ;;  %v1835_v57 = vor.u32 %v1834_v36, %v1831_v62  ;;  %1336 = vst [vmem:[#allocation3 + $0x43c] sm:$0xf] %v1270_v46  ;;  %v464_v24 = vrot.slane %v351_v55, 7  ;;  %v6333_v37 = vpop.f32.mrf.mxu3  ;;  %v8302_v6 = vld [vmem:[#allocation3 + $0x3d8] sm:$0xf0]  ;;  %v8372_v36 = vld [vmem:[#allocation7 + $0x188] sm:$0xff] }
 0x1b9   : > { %v6247_v5 = vpop.f32.mrf.mxu2  ;;  %1899 = vst [vmem:[#allocation3 + $0x440] sm:$0xf] %v1826_v16  ;;  %v1273_v20 = vsel %vm9071_vm11, %v1271_v47, %v1272_v22  ;;  %v463_v51 = vrot.slane %v462_v49, 4  ;;  %v2439_v2 = vld [vmem:[#allocation2 + $0xb4] sm:$0xe]  ;;  %v9465_v15 = vadd.f32 %v6333_v37, %v6245_v34  ;;  %6480 = vmatpush.bf16.msra.mxu1 %v8365_v41  ;;  %v8364_v46 = vld [vmem:[#allocation7 + $0x148] sm:$0xff]  ;;  %v7788_v59 = vor.u32 %v8302_v6, %v7787_v1 }
 0x1ba   : > { %v8382_v52 = vld [vmem:[#allocation7 + $0x1d8] sm:$0xff]  ;;  %v6248_v8 = vadd.f32 %v6247_v5, %v6159_v48  ;;  %v1836_v4 = vsel %vm9062_vm8, %v1827_v13, %v1835_v57  ;;  %1337 = vst [vmem:[#allocation3 + $0x460] sm:$0xf] %v1273_v20  ;;  %v466_v14 = vrot.slane %v464_v24, 4  ;;  %v2440_v33 = vld [vmem:[#allocation2 + $0xb8] sm:$0xf] }
 0x1bb   : > { %v7817_v11 = vld [vmem:[#allocation3 + $0x41c] sm:$0xf0]  ;;  %1900 = vst [vmem:[#allocation3 + $0x464] sm:$0xf] %v1836_v4  ;;  %v465_v22 = vsel %vm8886_vm5, %v463_v51, %v464_v24  ;;  %v2441_v55 = vld [vmem:[#allocation2 + $0xbc] sm:$0x1]  ;;  %6657 = vmatpush.bf16.msra.mxu3 %v8382_v52  ;;  %6570 = vmatpush.bf16.msra.mxu2 %v8372_v36 }
 0x1bc   : > { %v7820_v29 = vor.u32 %v8306_v21, %v7817_v11  ;;  %561 = vst [vmem:[#allocation2 + $0xc0] sm:$0xe] %v462_v49  ;;  %v7283_v34 = vrot.slane %v2439_v2, 9  ;;  %v2593_v62 = vrot.slane %v2440_v33, 5  ;;  %v2596_v48 = vrot.slane %v2441_v55, 5  ;;  %v8381_v13 = vld [vmem:[#allocation7 + $0x1d0] sm:$0xff] }
 0x1bd   : > { %v6160_v19 = vpop.f32.mrf.mxu1  ;;  %562 = vst [vmem:[#allocation2 + $0xc4] sm:$0xf] %v465_v22  ;;  %v8371_v47 = vld [vmem:[#allocation7 + $0x180] sm:$0xff]  ;;  %v8380_v21 = vld [vmem:[#allocation7 + $0x1c8] sm:$0xff]  ;;  %6481 = vmatpush.bf16.msra.mxu1 %v8364_v46  ;;  %s8395_s28 = sshll.u32 %s8741_s22, 5 }
 0x1be   : > { %6375 = vmatmul.bf16.gmra.mxu3 %v7820_v29  ;;  %563 = vst [vmem:[#allocation2 + $0xc8] sm:$0x1] %v466_v14  ;;  %v2594_v39 = vsel %vm9071_vm11, %v7283_v34, %v2593_v62  ;;  %v2595_v16 = vrot.slane %v2593_v62, 4  ;;  %v3230_v49 = vld [vmem:[#allocation2 + $0x18] sm:$0xf]  ;;  %s7144_s11 = scalar_lea.hbm %s10205_s5, %s8395_s28 }
 0x1bf   : > { %v6420_v57 = vpop.f32.mrf.mxu0  ;;  %v8314_v24 = vld [vmem:[#allocation3 + $0x43c] sm:$0xf]  ;;  %2665 = vst [vmem:[#allocation3 + $0x400] sm:$0xf] %v2594_v39  ;;  %6658 = vmatpush.bf16.msra.mxu3 %v8381_v13  ;;  %v3231_v38 = vld [vmem:[#allocation2 + $0x1c] sm:$0xf]  ;;  %6571 = vmatpush.bf16.msra.mxu2 %v8371_v47 }
 0x1c0   : > { %v9474_v37 = vadd.f32 %v6420_v57, %v9448_v9  ;;  %v7851_v5 = vld [vmem:[#allocation3 + $0x440] sm:$0xf]  ;;  %v2597_v1 = vsel %vm9071_vm11, %v2595_v16, %v2596_v48  ;;  %v3232_v6 = vld [vmem:[#allocation2 + $0x20] sm:$0x1]  ;;  %v3279_v20 = vshrl.u32 %v3230_v49, 16  ;;  %v3282_v51 = vshll.u32 %v3230_v49, 16  ;;  %v6336_v2 = vpop.f32.mrf.mxu3 }
 0x1c1   : > { %v6249_v52 = vpop.f32.mrf.mxu2  ;;  %v7845_v4 = vld [vmem:[#allocation3 + $0x45c] sm:$0xf0]  ;;  %2666 = vst [vmem:[#allocation3 + $0x424] sm:$0xf] %v2597_v1  ;;  %v3288_v14 = vshll.u32 %v3231_v38, 16  ;;  %v3292_v33 = vshrl.u32 %v3231_v38, 16  ;;  %v9478_v41 = vadd.f32 %v6336_v2, %v6248_v8  ;;  %v6161_v9 = vadd.f32 %v6160_v19, %v9191_v56 }
 0x1c2   : > { %6459 = vmatmul.bf16.gmra.mxu0 %v7788_v59  ;;  %v8319_v11 = vld [vmem:[#allocation3 + $0x460] sm:$0xf0]  ;;  %v3281_v22 = vrot.slane %v3279_v20, 4  ;;  %v3284_v62 = vrot.slane %v3282_v51, 5  ;;  %v7848_v39 = vor.u32 %v8314_v24, %v7845_v4  ;;  %v3298_v59 = vshll.u32 %v3232_v6, 16  ;;  %s7147_s12 = sshll.u32 %s7144_s11, 4  ;;  %s7148_s12 = int_to_ptr.hbm [resolvable:$true] %s7147_s12 }
 0x1c3   : > { %v8363_v55 = vld [vmem:[#allocation7 + $0x140] sm:$0xff]  ;;  %v7852_v29 = vor.u32 %v8319_v11, %v7851_v5  ;;  %v1946_v34 = vld [vmem:[#allocation2 + $0xc0] sm:$0xf]  ;;  %6659 = vmatpush.bf16.msra.mxu3 %v8380_v21  ;;  %v3290_v48 = vrot.slane %v3288_v14, 5  ;;  %v3294_v36 = vrot.slane %v3292_v33, 4  ;;  %v6250_v33 = vadd.f32 %v6249_v52, %v6161_v9  ;;  %s8625_s15 = sshra.s32 %s7148_s12, 4  ;;  %s8626_s15 = int_to_ptr.hbm [resolvable:$true] %s8625_s15 }
 0x1c4   : > { %v8379_v13 = vld [vmem:[#allocation7 + $0x1c0] sm:$0xff]  ;;  %v1947_v46 = vld [vmem:[#allocation2 + $0xc4] sm:$0xf]  ;;  %v2310_v16 = vshrl.u32 %v1946_v34, 16  ;;  %v2313_v49 = vshll.u32 %v1946_v34, 16  ;;  %v3285_v19 = vor.u32 %v3284_v62, %v3281_v22  ;;  %6482 = vmatpush.bf16.msra.mxu1 %v8363_v55  ;;  %v3300_v34 = vrot.slane %v3298_v59, 5  ;;  %p8632_p11 = scmp.lt.s32.totalorder %s8626_s15, %s10205_s5 }
 0x1c5   : > { %v6163_v8 = vpop.f32.mrf.mxu1  ;;  %v1948_v57 = vld [vmem:[#allocation2 + $0xc8] sm:$0x1]  ;;  %v2319_v38 = vshll.u32 %v1947_v46, 16  ;;  %v2323_v56 = vshrl.u32 %v1947_v46, 16  ;;  %v3295_v47 = vor.u32 %v3294_v36, %v3290_v48  ;;  %v2442_v51 = vld [vmem:[#allocation2 + $0xc0] sm:$0xe] }
 0x1c6   : > { %6291 = vmatmul.bf16.gmra.mxu2 %v7852_v29  ;;  %v6164_v5 = vadd.f32 %v6163_v8, %v9211_v53  ;;  %v2312_v21 = vrot.slane %v2310_v16, 4  ;;  %v2315_v1 = vrot.slane %v2313_v49, 5  ;;  %v2329_v20 = vshll.u32 %v1948_v57, 16  ;;  %v2443_v55 = vld [vmem:[#allocation2 + $0xc4] sm:$0xf]  ;;  %s8627_s27 = scalar_lea.hbm %s8626_s15, 32 }
 0x1c7   : > { %v9482_v2 = vpop.f32.mrf.mxu0  ;;  %v2321_v24 = vrot.slane %v2319_v38, 5  ;;  %v2325_v4 = vrot.slane %v2323_v56, 4  ;;  %v3286_v14 = vrot.slane %v3285_v19, 4  ;;  %v3296_v6 = vrot.slane %v3295_v47, 4  ;;  %6660 = vmatpush.bf16.msra.mxu3 %v8379_v13  ;;  %v2444_v29 = vld [vmem:[#allocation2 + $0xc8] sm:$0x1]  ;;  %p8628_p1 = scmp.ne.s32.totalorder %s8626_s15, %s8627_s27  ;;  %p8633_p2 = scmp.lt.s32.totalorder %s8631_s6, %s8627_s27 }
 0x1c8   : > { %6202 = vmatmul.bf16.gmra.mxu1 %v7848_v39  ;;  %v2316_v11 = vor.u32 %v2315_v1, %v2312_v21  ;;  %v2331_v22 = vrot.slane %v2329_v20, 5  ;;  %v6338_v62 = vpop.f32.mrf.mxu3  ;;  %v7823_v46 = vld [vmem:[#allocation3 + $0x400] sm:$0xf]  ;;  %v8311_v16 = vld [vmem:[#allocation3 + $0x420] sm:$0xf0]  ;;  %v7284_v8 = vrot.slane %v2442_v51, 9 }
 0x1c9   : > { %v6252_v53 = vpop.f32.mrf.mxu2  ;;  %v2326_v36 = vor.u32 %v2325_v4, %v2321_v24  ;;  %v3291_v49 = vsel %vm8852_vm2, %v3286_v14, %v3290_v48  ;;  %v2669_v57 = vld [vmem:[#allocation2 + $0xc] sm:$0xe]  ;;  %v2670_v38 = vld [vmem:[#allocation2 + $0x10] sm:$0xf]  ;;  %v9486_v13 = vadd.f32 %v6338_v62, %v6250_v33  ;;  %v3301_v39 = vsel %vm8852_vm2, %v3296_v6, %v3300_v34  ;;  %v2671_v59 = vld [vmem:[#allocation2 + $0x14] sm:$0x3]  ;;  %p8629_p4 = pnand %p8628_p1, %p8789_p3  ;;  %p8634_p9 = por %p8633_p2, %p8632_p11 }
 0x1ca   : > { %v8390_v56 = vld [vmem:[#allocation7 + $0x218] sm:$0xff]  ;;  %v6253_v52 = vadd.f32 %v6252_v53, %v6164_v5  ;;  %v2317_v9 = vrot.slane %v2316_v11, 4  ;;  %3694 = vst [vmem:[#allocation3 + $0x18] sm:$0xf] %v3291_v49  ;;  %v8389_v19 = vld [vmem:[#allocation7 + $0x210] sm:$0xff]  ;;  %v2600_v21 = vrot.slane %v2443_v55, 5  ;;  %v7824_v62 = vor.u32 %v8311_v16, %v7823_v46 }
 0x1cb   : > { %v2327_v47 = vrot.slane %v2326_v36, 4  ;;  %3695 = vst [vmem:[#allocation3 + $0x3c] sm:$0xf] %v3301_v39  ;;  %v2603_v1 = vrot.slane %v2444_v29, 5  ;;  %v2718_v20 = vshrl.u32 %v2669_v57, 16  ;;  %6746 = vmatpush.bf16.msra.mxu0 %v8390_v56  ;;  %v2721_v51 = vshll.u32 %v2669_v57, 16  ;;  %p8630_p8 = pneg %p8629_p4 }
 0x1cc   : > { %v2322_v48 = vsel %vm8852_vm2, %v2317_v9, %v2321_v24  ;;  %v2727_v4 = vshrl.u32 %v2670_v38, 16  ;;  %v2730_v14 = vshll.u32 %v2670_v38, 16  ;;  %v3726_v5 = vld [vmem:[#allocation2 + $0x18] sm:$0xe]  ;;  %v2601_v11 = vsel %vm9071_vm11, %v7284_v8, %v2600_v21  ;;  %v3727_v29 = vld [vmem:[#allocation2 + $0x1c] sm:$0xf] }
 0x1cd   : > { %v2332_v33 = vsel %vm8852_vm2, %v2327_v47, %v2331_v22  ;;  %2395 = vst [vmem:[#allocation3 + $0x444] sm:$0xf] %v2322_v48  ;;  %v6165_v6 = vpop.f32.mrf.mxu1  ;;  %v2602_v34 = vrot.slane %v2600_v21, 4  ;;  %v2720_v55 = vrot.slane %v2718_v20, 5  ;;  %v2723_v53 = vrot.slane %v2721_v51, 6  ;;  %v8388_v49 = vld [vmem:[#allocation7 + $0x208] sm:$0xff]  ;;  %p8635_p10 = pnand %p8634_p9, %p8630_p8 }
 0x1ce   : > { %2396 = vst [vmem:[#allocation3 + $0x468] sm:$0xf] %v2332_v33  ;;  %v2729_v36 = vrot.slane %v2727_v4, 5  ;;  %v2732_v24 = vrot.slane %v2730_v14, 6  ;;  %v2737_v22 = vshrl.u32 %v2671_v59, 16  ;;  %v2740_v56 = vshll.u32 %v2671_v59, 16 }
 0x1cf   : > { %v6425_v57 = vpop.f32.mrf.mxu0  ;;  %v2604_v38 = vsel %vm9071_vm11, %v2602_v34, %v2603_v1  ;;  %2667 = vst [vmem:[#allocation3 + $0x448] sm:$0xf] %v2601_v11  ;;  %v3728_v9 = vld [vmem:[#allocation2 + $0x20] sm:$0x1]  ;;  %6747 = vmatpush.bf16.msra.mxu0 %v8389_v19  ;;  %v2724_v39 = vor.u32 %v2723_v53, %v2720_v55  ;;  %v7285_v46 = vrot.slane %v3726_v5, 9  ;;  %v3824_v14 = vrot.slane %v3727_v29, 5 }
 0x1d0   : > { %v9499_v8 = vadd.f32 %v6425_v57, %v9478_v41  ;;  %2668 = vst [vmem:[#allocation3 + $0x46c] sm:$0xf] %v2604_v38  ;;  %v2733_v47 = vor.u32 %v2732_v24, %v2729_v36  ;;  %v3233_v16 = vld [vmem:[#allocation2 + $0x24] sm:$0xf]  ;;  %v6341_v21 = vpop.f32.mrf.mxu3  ;;  %v2739_v51 = vrot.slane %v2737_v22, 5  ;;  %v2742_v4 = vrot.slane %v2740_v56, 6 }
 0x1d1   : > { %v6254_v20 = vpop.f32.mrf.mxu2  ;;  %v7327_v48 = vld [vmem:[#allocation3 + $0x18] sm:$0xf]  ;;  %v3827_v1 = vrot.slane %v3728_v9, 5  ;;  %v9501_v33 = vadd.f32 %v6341_v21, %v6253_v52  ;;  %v2725_v19 = vrot.slane %v2724_v39, 4  ;;  %v3234_v41 = vld [vmem:[#allocation2 + $0x28] sm:$0xf]  ;;  %v3825_v5 = vsel %vm9071_vm11, %v7285_v46, %v3824_v14 }
 0x1d2   : > { %6464 = vmatmul.bf16.gmra.mxu0 %v7824_v62  ;;  %v8186_v59 = vld [vmem:[#allocation3 + $0x38] sm:$0xf0]  ;;  %v2735_v11 = vrot.slane %v2733_v47, 4  ;;  %v2743_v57 = vor.u32 %v2742_v4, %v2739_v51  ;;  %v3826_v55 = vrot.slane %v3824_v14, 4  ;;  %v3235_v53 = vld [vmem:[#allocation2 + $0x2c] sm:$0x1]  ;;  %v6166_v29 = vadd.f32 %v6165_v6, %v9229_v60 }
 0x1d3   : > { %v7328_v34 = vor.u32 %v8186_v59, %v7327_v48  ;;  %6748 = vmatpush.bf16.msra.mxu0 %v8388_v49  ;;  %v8387_v36 = vld [vmem:[#allocation7 + $0x200] sm:$0xff]  ;;  %v2734_v52 = vsel %vm9062_vm8, %v2725_v19, %v2733_v47  ;;  %3966 = vst [vmem:[#allocation3 + $0x1c] sm:$0xf] %v3825_v5  ;;  %v3303_v62 = vshrl.u32 %v3233_v16, 16  ;;  %v3306_v38 = vshll.u32 %v3233_v16, 16 }
 0x1d4   : > { %v8315_v24 = vld [vmem:[#allocation3 + $0x444] sm:$0xf]  ;;  %v2744_v9 = vsel %vm9062_vm8, %v2735_v11, %v2743_v57  ;;  %3197 = vst [vmem:[#allocation3 + $0x14] sm:$0xf] %v2734_v52  ;;  %v3828_v49 = vsel %vm9071_vm11, %v3826_v55, %v3827_v1  ;;  %v3312_v39 = vshll.u32 %v3234_v41, 16  ;;  %v3316_v46 = vshrl.u32 %v3234_v41, 16 }
 0x1d5   : > { %v7853_v22 = vld [vmem:[#allocation3 + $0x464] sm:$0xf0]  ;;  %v6168_v56 = vpop.f32.mrf.mxu1  ;;  %3198 = vst [vmem:[#allocation3 + $0x38] sm:$0xf] %v2744_v9  ;;  %v3305_v6 = vrot.slane %v3303_v62, 4  ;;  %v3308_v47 = vrot.slane %v3306_v38, 5  ;;  %v6255_v14 = vadd.f32 %v6254_v20, %v6166_v29 }
 0x1d6   : > { %v7856_v21 = vor.u32 %v8315_v24, %v7853_v22  ;;  %6572 = vmatmul.bf16.vlgmr.msra.gmra.mxu2 %v7328_v34  ;;  %v6169_v60 = vadd.f32 %v6168_v56, %v9245_v35  ;;  %v2672_v48 = vld [vmem:[#allocation2 + $0x18] sm:$0xe]  ;;  %3967 = vst [vmem:[#allocation3 + $0x40] sm:$0xf] %v3828_v49  ;;  %v3314_v51 = vrot.slane %v3312_v39, 5  ;;  %v3318_v4 = vrot.slane %v3316_v46, 4 }
 0x1d7   : > { %v9513_v16 = vpop.f32.mrf.mxu0  ;;  %6749 = vmatpush.bf16.msra.mxu0 %v8387_v36  ;;  %v3309_v59 = vor.u32 %v3308_v47, %v3305_v6  ;;  %v3322_v1 = vshll.u32 %v3235_v53, 16  ;;  %v2673_v19 = vld [vmem:[#allocation2 + $0x1c] sm:$0xf]  ;;  %v7859_v34 = vld [vmem:[#allocation3 + $0x448] sm:$0xf]  ;;  %v2746_v55 = vshrl.u32 %v2672_v48, 16 }
 0x1d8   : > { %6380 = vmatmul.bf16.gmra.mxu3 %v7856_v21  ;;  %v6343_v11 = vpop.f32.mrf.mxu3  ;;  %v8320_v57 = vld [vmem:[#allocation3 + $0x468] sm:$0xf0]  ;;  %v3319_v35 = vor.u32 %v3318_v4, %v3314_v51  ;;  %v2674_v5 = vld [vmem:[#allocation2 + $0x20] sm:$0x3]  ;;  %v2749_v24 = vshll.u32 %v2672_v48, 16  ;;  %v2755_v52 = vshrl.u32 %v2673_v19, 16 }
 0x1d9   : > { %v6257_v41 = vpop.f32.mrf.mxu2  ;;  %v9515_v62 = vadd.f32 %v6343_v11, %v6255_v14  ;;  %v3310_v22 = vrot.slane %v3309_v59, 4  ;;  %v3324_v56 = vrot.slane %v3322_v1, 5  ;;  %v3729_v36 = vld [vmem:[#allocation2 + $0x24] sm:$0xe]  ;;  %v3730_v9 = vld [vmem:[#allocation2 + $0x28] sm:$0xf] }
 0x1da   : > { %v6258_v38 = vadd.f32 %v6257_v41, %v6169_v60  ;;  %v3320_v20 = vrot.slane %v3319_v35, 4  ;;  %v2748_v29 = vrot.slane %v2746_v55, 5  ;;  %v2751_v53 = vrot.slane %v2749_v24, 6  ;;  %v3731_v39 = vld [vmem:[#allocation2 + $0x2c] sm:$0x1] }
 0x1db   : > { %v2757_v49 = vrot.slane %v2755_v52, 5  ;;  %v8181_v46 = vld [vmem:[#allocation3 + $0x14] sm:$0xf]  ;;  %v3315_v21 = vsel %vm8852_vm2, %v3310_v22, %v3314_v51  ;;  %v2758_v6 = vshll.u32 %v2673_v19, 16  ;;  %v2765_v47 = vshrl.u32 %v2674_v5, 16 }
 0x1dc   : > { %v2768_v48 = vshll.u32 %v2674_v5, 16  ;;  %v7321_v4 = vld [vmem:[#allocation3 + $0x34] sm:$0xf0]  ;;  %v3325_v60 = vsel %vm8852_vm2, %v3320_v20, %v3324_v56  ;;  %3696 = vst [vmem:[#allocation3 + $0x60] sm:$0xf] %v3315_v21  ;;  %v2752_v59 = vor.u32 %v2751_v53, %v2748_v29  ;;  %v7286_v1 = vrot.slane %v3729_v36, 9 }
 0x1dd   : > { %v6170_v14 = vpop.f32.mrf.mxu1  ;;  %v3831_v11 = vrot.slane %v3730_v9, 5  ;;  %v7860_v41 = vor.u32 %v8320_v57, %v7859_v34  ;;  %v7324_v35 = vor.u32 %v8181_v46, %v7321_v4  ;;  %3697 = vst [vmem:[#allocation3 + $0x84] sm:$0xf] %v3325_v60  ;;  %v2760_v55 = vrot.slane %v2758_v6, 6  ;;  %v8182_v63 = vld [vmem:[#allocation3 + $0x1c] sm:$0xf] }
 0x1de   : > { %v2767_v24 = vrot.slane %v2765_v47, 5  ;;  %v2753_v51 = vrot.slane %v2752_v59, 4  ;;  %v2770_v19 = vrot.slane %v2768_v48, 6  ;;  %v3998_v22 = vld [vmem:[#allocation2 + $0x18] sm:$0xe]  ;;  %v3834_v57 = vrot.slane %v3731_v39, 5 }
 0x1df   : > { %v6430_v52 = vpop.f32.mrf.mxu0  ;;  %v3832_v5 = vsel %vm9071_vm11, %v7286_v1, %v3831_v11  ;;  %6483 = vmatmul.bf16.vlgmr.msra.gmra.mxu1 %v7324_v35  ;;  %v7329_v36 = vld [vmem:[#allocation3 + $0x3c] sm:$0xf0]  ;;  %v2761_v9 = vor.u32 %v2760_v55, %v2757_v49  ;;  %v3833_v34 = vrot.slane %v3831_v11, 4  ;;  %v4000_v46 = vld [vmem:[#allocation2 + $0x20] sm:$0x3]  ;;  %v4047_v21 = vshrl.u32 %v3998_v22, 16 }
 0x1e0   : > { %v9524_v56 = vadd.f32 %v6430_v52, %v9501_v33  ;;  %3968 = vst [vmem:[#allocation3 + $0x64] sm:$0xf] %v3832_v5  ;;  %v6346_v20 = vpop.f32.mrf.mxu3  ;;  %v2771_v53 = vor.u32 %v2770_v19, %v2767_v24  ;;  %v4050_v6 = vshll.u32 %v3998_v22, 16  ;;  %v4056_v47 = vshrl.u32 %v3999_v61, 16  ;;  %v3236_v49 = vld [vmem:[#allocation2 + $0x30] sm:$0xf] }
 0x1e1   : > { %v6259_v29 = vpop.f32.mrf.mxu2  ;;  %v9526_v48 = vadd.f32 %v6346_v20, %v6258_v38  ;;  %v6171_v4 = vadd.f32 %v6170_v14, %v9261_v3  ;;  %v2762_v33 = vsel %vm9062_vm8, %v2753_v51, %v2761_v9  ;;  %v2763_v60 = vrot.slane %v2761_v9, 4  ;;  %v3237_v35 = vld [vmem:[#allocation2 + $0x34] sm:$0xf]  ;;  %v3238_v20 = vld [vmem:[#allocation2 + $0x38] sm:$0x1] }
 0x1e2   : > { %6469 = vmatmul.bf16.gmra.mxu0 %v7860_v41  ;;  %3199 = vst [vmem:[#allocation3 + $0x5c] sm:$0xf] %v2762_v33  ;;  %v3835_v39 = vsel %vm9071_vm11, %v3833_v34, %v3834_v57  ;;  %v4049_v59 = vrot.slane %v4047_v21, 5  ;;  %v4052_v1 = vrot.slane %v4050_v6, 6  ;;  %v4058_v11 = vrot.slane %v4056_v47, 5 }
 0x1e3   : > { %v7332_v55 = vor.u32 %v8182_v63, %v7329_v36  ;;  %v7363_v24 = vld [vmem:[#allocation3 + $0x60] sm:$0xf]  ;;  %v2772_v38 = vsel %vm9062_vm8, %v2763_v60, %v2771_v53  ;;  %3969 = vst [vmem:[#allocation3 + $0x88] sm:$0xf] %v3835_v39  ;;  %v4059_v3 = vshll.u32 %v3999_v61, 16  ;;  %v4066_v14 = vshrl.u32 %v4000_v46, 16 }
 0x1e4   : > { %v8195_v41 = vld [vmem:[#allocation3 + $0x80] sm:$0xf0]  ;;  %3200 = vst [vmem:[#allocation3 + $0x80] sm:$0xf] %v2772_v38  ;;  %v4053_v51 = vor.u32 %v4052_v1, %v4049_v59  ;;  %v4069_v19 = vshll.u32 %v4000_v46, 16  ;;  %v3327_v5 = vshrl.u32 %v3236_v49, 16  ;;  %v6260_v47 = vadd.f32 %v6259_v29, %v6171_v4 }
 0x1e5   : > { %v6173_v52 = vpop.f32.mrf.mxu1  ;;  %v7364_v22 = vor.u32 %v8195_v41, %v7363_v24  ;;  %v4061_v34 = vrot.slane %v4059_v3, 6  ;;  %v4068_v57 = vrot.slane %v4066_v14, 5  ;;  %v2675_v63 = vld [vmem:[#allocation2 + $0x24] sm:$0xe]  ;;  %v3330_v61 = vshll.u32 %v3236_v49, 16 }
 0x1e6   : > { %v6174_v9 = vadd.f32 %v6173_v52, %v9169_v30  ;;  %v4054_v21 = vrot.slane %v4053_v51, 4  ;;  %v4071_v53 = vrot.slane %v4069_v19, 6  ;;  %v3329_v6 = vrot.slane %v3327_v5, 4 }
 0x1e7   : > { %v9536_v36 = vpop.f32.mrf.mxu0  ;;  %6577 = vmatmul.bf16.gmra.mxu2 %v7364_v22  ;;  %v4062_v33 = vor.u32 %v4061_v34, %v4058_v11  ;;  %v3336_v60 = vshll.u32 %v3237_v35, 16  ;;  %v3340_v46 = vshrl.u32 %v3237_v35, 16  ;;  %v3332_v30 = vrot.slane %v3330_v61, 5  ;;  %v2677_v35 = vld [vmem:[#allocation2 + $0x2c] sm:$0x3] }
 0x1e8   : > { %6661 = vmatmul.bf16.vlgmr.msra.gmra.mxu3 %v7332_v55  ;;  %v6348_v39 = vpop.f32.mrf.mxu3  ;;  %v4072_v1 = vor.u32 %v4071_v53, %v4068_v57  ;;  %v3346_v24 = vshll.u32 %v3238_v20, 16  ;;  %v2774_v38 = vshrl.u32 %v2675_v63, 16  ;;  %v2676_v55 = vld [vmem:[#allocation2 + $0x28] sm:$0xf]  ;;  %v3732_v34 = vld [vmem:[#allocation2 + $0x30] sm:$0xe] }
 0x1e9   : > { %v6262_v59 = vpop.f32.mrf.mxu2  ;;  %v9538_v3 = vadd.f32 %v6348_v39, %v6260_v47  ;;  %v8190_v41 = vld [vmem:[#allocation3 + $0x5c] sm:$0xf]  ;;  %v4063_v52 = vsel %vm9062_vm8, %v4054_v21, %v4062_v33  ;;  %v4064_v49 = vrot.slane %v4062_v33, 4  ;;  %v3333_v29 = vor.u32 %v3332_v30, %v3329_v6  ;;  %v3734_v39 = vld [vmem:[#allocation2 + $0x38] sm:$0x1] }
 0x1ea   : > { %v6263_v14 = vadd.f32 %v6262_v59, %v6174_v9  ;;  %4526 = vst [vmem:[#allocation3 + $0x20] sm:$0xf] %v4063_v52  ;;  %v3338_v4 = vrot.slane %v3336_v60, 5  ;;  %v3342_v11 = vrot.slane %v3340_v46, 4  ;;  %v3348_v5 = vrot.slane %v3346_v24, 5 }
 0x1eb   : > { %10227 = vst [vmem:[#allocation20_spill] sm:$0xff] %v9538_v3  ;;  %v7357_v51 = vld [vmem:[#allocation3 + $0x7c] sm:$0xf0]  ;;  %v4073_v19 = vsel %vm9062_vm8, %v4064_v49, %v4072_v1  ;;  %v2776_v22 = vrot.slane %v2774_v38, 5  ;;  %v9544_v9 = vld [vmem:[#allocation3 + $0x64] sm:$0xf] }
 0x1ec   : > { %v7360_v57 = vor.u32 %v8190_v41, %v7357_v51  ;;  %4527 = vst [vmem:[#allocation3 + $0x44] sm:$0xf] %v4073_v19  ;;  %v3334_v21 = vrot.slane %v3333_v29, 4  ;;  %v3343_v53 = vor.u32 %v3342_v11, %v3338_v4  ;;  %v2777_v61 = vshll.u32 %v2675_v63, 16  ;;  %v3733_v6 = vld [vmem:[#allocation2 + $0x34] sm:$0xf] }
 0x1ed   : > { %v9546_v20 = vpop.f32.mrf.mxu1  ;;  %v7365_v47 = vld [vmem:[#allocation3 + $0x84] sm:$0xf0]  ;;  %v2783_v33 = vshrl.u32 %v2676_v55, 16  ;;  %v2786_v60 = vshll.u32 %v2676_v55, 16  ;;  %v2793_v46 = vshrl.u32 %v2677_v35, 16  ;;  %v2796_v38 = vshll.u32 %v2677_v35, 16 }
 0x1ee   : > { %v3339_v1 = vsel %vm8852_vm2, %v3334_v21, %v3338_v4  ;;  %v3344_v30 = vrot.slane %v3343_v53, 4  ;;  %v2779_v24 = vrot.slane %v2777_v61, 6  ;;  %v4001_v41 = vld [vmem:[#allocation2 + $0x24] sm:$0xe]  ;;  %v7287_v21 = vrot.slane %v3732_v34, 9 }
 0x1ef   : > { %v6435_v59 = vpop.f32.mrf.mxu0  ;;  %6488 = vmatmul.bf16.gmra.mxu1 %v7360_v57  ;;  %3698 = vst [vmem:[#allocation3 + $0xa8] sm:$0xf] %v3339_v1  ;;  %v2785_v63 = vrot.slane %v2783_v33, 5  ;;  %v2788_v49 = vrot.slane %v2786_v60, 6  ;;  %v2795_v29 = vrot.slane %v2793_v46, 5  ;;  %v2798_v4 = vrot.slane %v2796_v38, 6 }
 0x1f0   : > { %v9551_v52 = vadd.f32 %v6435_v59, %v9526_v48  ;;  %v6351_v11 = vpop.f32.mrf.mxu3  ;;  %v3349_v51 = vsel %vm8852_vm2, %v3344_v30, %v3348_v5  ;;  %v2780_v19 = vor.u32 %v2779_v24, %v2776_v22  ;;  %v4002_v53 = vld [vmem:[#allocation2 + $0x28] sm:$0xf]  ;;  %v7368_v35 = vor.u32 %v9544_v9, %v7365_v47  ;;  %v4003_v1 = vld [vmem:[#allocation2 + $0x2c] sm:$0x3]  ;;  %v3239_v24 = vld [vmem:[#allocation2 + $0x3c] sm:$0xf] }
 0x1f1   : > { %v9553_v55 = vpop.f32.mrf.mxu2  ;;  %v7335_v61 = vld [vmem:[#allocation3 + $0x20] sm:$0xf]  ;;  %v9558_v48 = vadd.f32 %v6351_v11, %v6263_v14  ;;  %3699 = vst [vmem:[#allocation3 + $0xcc] sm:$0xf] %v3349_v51  ;;  %v2789_v57 = vor.u32 %v2788_v49, %v2785_v63  ;;  %v3838_v33 = vrot.slane %v3733_v6, 5  ;;  %v2799_v46 = vor.u32 %v2798_v4, %v2795_v29 }
 0x1f2   : > { %10228 = vst [vmem:[#allocation21_spill] sm:$0xff] %v9553_v55  ;;  %v2781_v60 = vrot.slane %v2780_v19, 4  ;;  %v3841_v59 = vrot.slane %v3734_v39, 5  ;;  %v4075_v32 = vshrl.u32 %v4001_v41, 16  ;;  %v4078_v34 = vshll.u32 %v4001_v41, 16 }
 0x1f3   : > { %v8187_v55 = vld [vmem:[#allocation3 + $0x40] sm:$0xf0]  ;;  %v2791_v3 = vrot.slane %v2789_v57, 4  ;;  %v3839_v5 = vsel %vm9071_vm11, %v7287_v21, %v3838_v33  ;;  %v3840_v22 = vrot.slane %v3838_v33, 4  ;;  %v4084_v6 = vshrl.u32 %v4002_v53, 16 }
 0x1f4   : > { %v7336_v30 = vor.u32 %v8187_v55, %v7335_v61  ;;  %v2790_v14 = vsel %vm9062_vm8, %v2781_v60, %v2789_v57  ;;  %3970 = vst [vmem:[#allocation3 + $0xac] sm:$0xf] %v3839_v5  ;;  %v4077_v47 = vrot.slane %v4075_v32, 5  ;;  %v4080_v49 = vrot.slane %v4078_v34, 6  ;;  %v3240_v41 = vld [vmem:[#allocation2 + $0x40] sm:$0xf] }
 0x1f5   : > { %v6178_v9 = vpop.f32.mrf.mxu1  ;;  %v2800_v38 = vsel %vm9062_vm8, %v2791_v3, %v2799_v46  ;;  %3201 = vst [vmem:[#allocation3 + $0xa4] sm:$0xf] %v2790_v14  ;;  %v3842_v63 = vsel %vm9071_vm11, %v3840_v22, %v3841_v59  ;;  %v4086_v55 = vrot.slane %v4084_v6, 5  ;;  %v4087_v32 = vshll.u32 %v4002_v53, 16  ;;  %v3241_v4 = vld [vmem:[#allocation2 + $0x44] sm:$0x1] }
 0x1f6   : > { %v6179_v39 = vadd.f32 %v6178_v9, %v9203_v27  ;;  %6750 = vmatmul.bf16.vlgmr.msra.gmra.mxu0 %v7336_v30  ;;  %v7399_v11 = vld [vmem:[#allocation3 + $0xa8] sm:$0xf]  ;;  %3202 = vst [vmem:[#allocation3 + $0xc8] sm:$0xf] %v2800_v38  ;;  %v4081_v51 = vor.u32 %v4080_v49, %v4077_v47  ;;  %v4094_v27 = vshrl.u32 %v4003_v1, 16  ;;  %v4097_v19 = vshll.u32 %v4003_v1, 16 }
 0x1f7   : > { %v9569_v29 = vpop.f32.mrf.mxu0  ;;  %3971 = vst [vmem:[#allocation3 + $0xd0] sm:$0xf] %v3842_v63  ;;  %v4089_v57 = vrot.slane %v4087_v32, 6  ;;  %v3351_v33 = vshrl.u32 %v3239_v24, 16  ;;  %v3354_v60 = vshll.u32 %v3239_v24, 16  ;;  %v3360_v46 = vshll.u32 %v3240_v41, 16 }
 0x1f8   : > { %6666 = vmatmul.bf16.gmra.mxu3 %v7368_v35  ;;  %v9571_v3 = vpop.f32.mrf.mxu3  ;;  %v8204_v21 = vld [vmem:[#allocation3 + $0xc8] sm:$0xf0]  ;;  %v4082_v22 = vrot.slane %v4081_v51, 4  ;;  %v2678_v34 = vld [vmem:[#allocation2 + $0x30] sm:$0xe]  ;;  %v4096_v53 = vrot.slane %v4094_v27, 5 }
 0x1f9   : > { %10229 = vst [vmem:[#allocation22_spill] sm:$0xff] %v9571_v3  ;;  %v6267_v61 = vpop.f32.mrf.mxu2  ;;  %v7400_v59 = vor.u32 %v8204_v21, %v7399_v11  ;;  %v4090_v30 = vor.u32 %v4089_v57, %v4086_v55  ;;  %v4099_v35 = vrot.slane %v4097_v19, 6  ;;  %v3353_v9 = vrot.slane %v3351_v33, 4  ;;  %v2679_v38 = vld [vmem:[#allocation2 + $0x34] sm:$0xf] }
 0x1fa   : > { %v6268_v5 = vadd.f32 %v6267_v61, %v6179_v39  ;;  %v3356_v14 = vrot.slane %v3354_v60, 5  ;;  %v3362_v1 = vrot.slane %v3360_v46, 5  ;;  %v3364_v47 = vshrl.u32 %v3240_v41, 16  ;;  %v2680_v39 = vld [vmem:[#allocation2 + $0x38] sm:$0x3] }
 0x1fb   : > { %6582 = vmatmul.bf16.gmra.mxu2 %v7400_v59  ;;  %v3370_v6 = vshll.u32 %v3241_v4, 16  ;;  %v4091_v49 = vsel %vm9062_vm8, %v4082_v22, %v4090_v30  ;;  %v4092_v24 = vrot.slane %v4090_v30, 4  ;;  %v4100_v32 = vor.u32 %v4099_v35, %v4096_v53  ;;  %v8200_v57 = vld [vmem:[#allocation3 + $0xac] sm:$0xf]  ;;  %v3735_v53 = vld [vmem:[#allocation2 + $0x3c] sm:$0xe] }
 0x1fc   : > { %v8199_v63 = vld [vmem:[#allocation3 + $0xa4] sm:$0xf]  ;;  %v2802_v51 = vshrl.u32 %v2678_v34, 16  ;;  %4528 = vst [vmem:[#allocation3 + $0x68] sm:$0xf] %v4091_v49  ;;  %v3357_v27 = vor.u32 %v3356_v14, %v3353_v9  ;;  %v3366_v19 = vrot.slane %v3364_v47, 4 }
 0x1fd   : > { %v9575_v11 = vpop.f32.mrf.mxu1  ;;  %v7393_v55 = vld [vmem:[#allocation3 + $0xc4] sm:$0xf0]  ;;  %v4101_v4 = vsel %vm9062_vm8, %v4092_v24, %v4100_v32  ;;  %v2805_v60 = vshll.u32 %v2678_v34, 16  ;;  %v3372_v30 = vrot.slane %v3370_v6, 5  ;;  %v2811_v47 = vshrl.u32 %v2679_v38, 16 }
 0x1fe   : > { %10230 = vst [vmem:[#allocation23_spill] sm:$0xff] %v9575_v11  ;;  %v7396_v61 = vor.u32 %v8199_v63, %v7393_v55  ;;  %v7401_v41 = vld [vmem:[#allocation3 + $0xcc] sm:$0xf0]  ;;  %v2804_v33 = vrot.slane %v2802_v51, 5  ;;  %v3358_v59 = vrot.slane %v3357_v27, 4  ;;  %v3367_v22 = vor.u32 %v3366_v19, %v3362_v1 }
 0x1ff   : > { %v6440_v21 = vpop.f32.mrf.mxu0  ;;  %4529 = vst [vmem:[#allocation3 + $0x8c] sm:$0xf] %v4101_v4  ;;  %v2807_v14 = vrot.slane %v2805_v60, 6  ;;  %v2814_v63 = vshll.u32 %v2679_v38, 16  ;;  %v2821_v49 = vshrl.u32 %v2680_v39, 16  ;;  %v7404_v24 = vor.u32 %v8200_v57, %v7401_v41 }
 0x200   : > { %v9580_v46 = vadd.f32 %v6440_v21, %v9558_v48  ;;  %6493 = vmatmul.bf16.gmra.mxu1 %v7396_v61  ;;  %v6356_v35 = vpop.f32.mrf.mxu3  ;;  %v3736_v55 = vld [vmem:[#allocation2 + $0x40] sm:$0xf]  ;;  %v3363_v48 = vsel %vm8852_vm2, %v3358_v59, %v3362_v1  ;;  %v3368_v34 = vrot.slane %v3367_v22, 4  ;;  %v3737_v51 = vld [vmem:[#allocation2 + $0x44] sm:$0x1]  ;;  %v2813_v27 = vrot.slane %v2811_v47, 5 }
 0x201   : > { %v9582_v9 = vpop.f32.mrf.mxu2  ;;  %v9584_v32 = vadd.f32 %v6356_v35, %v6268_v5  ;;  %3700 = vst [vmem:[#allocation3 + $0xf0] sm:$0xf] %v3363_v48  ;;  %v2808_v6 = vor.u32 %v2807_v14, %v2804_v33  ;;  %v2816_v19 = vrot.slane %v2814_v63, 6  ;;  %v2823_v21 = vrot.slane %v2821_v49, 5  ;;  %v4005_v47 = vld [vmem:[#allocation2 + $0x34] sm:$0xf] }
 0x202   : > { %10231 = vst [vmem:[#allocation24_spill] sm:$0xff] %v9582_v9  ;;  %v3373_v61 = vsel %vm8852_vm2, %v3368_v34, %v3372_v30  ;;  %v2824_v4 = vshll.u32 %v2680_v39, 16  ;;  %v7288_v38 = vrot.slane %v3735_v53, 9  ;;  %v3845_v60 = vrot.slane %v3736_v55, 5  ;;  %v4004_v9 = vld [vmem:[#allocation2 + $0x30] sm:$0xe] }
 0x203   : > { %v7371_v57 = vld [vmem:[#allocation3 + $0x68] sm:$0xf]  ;;  %3701 = vst [vmem:[#allocation3 + $0x114] sm:$0xf] %v3373_v61  ;;  %v2809_v41 = vrot.slane %v2808_v6, 4  ;;  %v2817_v35 = vor.u32 %v2816_v19, %v2813_v27  ;;  %v3848_v1 = vrot.slane %v3737_v51, 5 }
 0x204   : > { %v2826_v22 = vrot.slane %v2824_v4, 6  ;;  %v3846_v33 = vsel %vm9071_vm11, %v7288_v38, %v3845_v60  ;;  %v3847_v14 = vrot.slane %v3845_v60, 4  ;;  %v4006_v63 = vld [vmem:[#allocation2 + $0x38] sm:$0x3]  ;;  %v4103_v55 = vshrl.u32 %v4004_v9, 16 }
 0x205   : > { %v6183_v5 = vpop.f32.mrf.mxu1  ;;  %v2818_v53 = vsel %vm9062_vm8, %v2809_v41, %v2817_v35  ;;  %v2819_v49 = vrot.slane %v2817_v35, 4  ;;  %3972 = vst [vmem:[#allocation3 + $0xf4] sm:$0xf] %v3846_v33  ;;  %v3242_v51 = vld [vmem:[#allocation2 + $0x48] sm:$0xf]  ;;  %v4112_v4 = vshrl.u32 %v4005_v47, 16 }
 0x206   : > { %v6184_v59 = vadd.f32 %v6183_v5, %v9243_v44  ;;  %v8196_v30 = vld [vmem:[#allocation3 + $0x88] sm:$0xf0]  ;;  %v2827_v34 = vor.u32 %v2826_v22, %v2823_v21  ;;  %3203 = vst [vmem:[#allocation3 + $0xec] sm:$0xf] %v2818_v53  ;;  %v4106_v44 = vshll.u32 %v4004_v9, 16  ;;  %v3849_v19 = vsel %vm9071_vm11, %v3847_v14, %v3848_v1 }
 0x207   : > { %v9593_v39 = vpop.f32.mrf.mxu0  ;;  %v7372_v48 = vor.u32 %v8196_v30, %v7371_v57  ;;  %v4105_v61 = vrot.slane %v4103_v55, 5  ;;  %v4115_v38 = vshll.u32 %v4005_v47, 16  ;;  %v3243_v60 = vld [vmem:[#allocation2 + $0x4c] sm:$0xf]  ;;  %3973 = vst [vmem:[#allocation3 + $0x118] sm:$0xf] %v3849_v19 }
 0x208   : > { %10232 = vst [vmem:[#allocation25_spill] sm:$0xff] %v9593_v39  ;;  %6671 = vmatmul.bf16.gmra.mxu3 %v7404_v24  ;;  %v9597_v6 = vpop.f32.mrf.mxu3  ;;  %v7435_v5 = vld [vmem:[#allocation3 + $0xf0] sm:$0xf]  ;;  %v2828_v24 = vsel %vm9062_vm8, %v2819_v49, %v2827_v34  ;;  %v4108_v21 = vrot.slane %v4106_v44, 6  ;;  %v4114_v9 = vrot.slane %v4112_v4, 5  ;;  %v4122_v35 = vshrl.u32 %v4006_v63, 16 }
 0x209   : > { %10233 = vst [vmem:[#allocation26_spill] sm:$0xff] %v9597_v6  ;;  %v6272_v27 = vpop.f32.mrf.mxu2  ;;  %6755 = vmatmul.bf16.gmra.mxu0 %v7372_v48  ;;  %v4117_v57 = vrot.slane %v4115_v38, 6  ;;  %v4125_v22 = vshll.u32 %v4006_v63, 16  ;;  %v3375_v1 = vshrl.u32 %v3242_v51, 16  ;;  %v3378_v14 = vshll.u32 %v3242_v51, 16 }
 0x20a   : > { %v6273_v41 = vadd.f32 %v6272_v27, %v6184_v59  ;;  %3204 = vst [vmem:[#allocation3 + $0x110] sm:$0xf] %v2828_v24  ;;  %v8213_v33 = vld [vmem:[#allocation3 + $0x110] sm:$0xf0]  ;;  %v4109_v30 = vor.u32 %v4108_v21, %v4105_v61  ;;  %v3384_v53 = vshll.u32 %v3243_v60, 16  ;;  %v4124_v48 = vrot.slane %v4122_v35, 5 }
 0x20b   : > { %v7436_v47 = vor.u32 %v8213_v33, %v7435_v5  ;;  %v4118_v55 = vor.u32 %v4117_v57, %v4114_v9  ;;  %v4127_v6 = vrot.slane %v4125_v22, 6  ;;  %v3244_v27 = vld [vmem:[#allocation2 + $0x50] sm:$0x1]  ;;  %v3377_v34 = vrot.slane %v3375_v1, 4  ;;  %v2681_v19 = vld [vmem:[#allocation2 + $0x3c] sm:$0xe] }
 0x20c   : > { %v4110_v49 = vrot.slane %v4109_v30, 4  ;;  %v3380_v44 = vrot.slane %v3378_v14, 5  ;;  %v8209_v38 = vld [vmem:[#allocation3 + $0xf4] sm:$0xf]  ;;  %v3386_v61 = vrot.slane %v3384_v53, 5  ;;  %v3388_v21 = vshrl.u32 %v3243_v60, 16 }
 0x20d   : > { %v9603_v59 = vpop.f32.mrf.mxu1  ;;  %6587 = vmatmul.bf16.gmra.mxu2 %v7436_v47  ;;  %v4120_v63 = vrot.slane %v4118_v55, 4  ;;  %v4128_v24 = vor.u32 %v4127_v6, %v4124_v48  ;;  %v2682_v51 = vld [vmem:[#allocation2 + $0x40] sm:$0xf]  ;;  %v8208_v9 = vld [vmem:[#allocation3 + $0xec] sm:$0xf]  ;;  %v3394_v22 = vshll.u32 %v3244_v27, 16 }
 0x20e   : > { %10234 = vst [vmem:[#allocation27_spill] sm:$0xff] %v9603_v59  ;;  %v4119_v57 = vsel %vm9062_vm8, %v4110_v49, %v4118_v55  ;;  %v3381_v35 = vor.u32 %v3380_v44, %v3377_v34  ;;  %v2683_v33 = vld [vmem:[#allocation2 + $0x44] sm:$0x3]  ;;  %v3738_v30 = vld [vmem:[#allocation2 + $0x48] sm:$0xe]  ;;  %v3390_v60 = vrot.slane %v3388_v21, 4 }
 0x20f   : > { %v6445_v4 = vpop.f32.mrf.mxu0  ;;  %v7437_v1 = vld [vmem:[#allocation3 + $0x114] sm:$0xf0]  ;;  %v4129_v14 = vsel %vm9062_vm8, %v4120_v63, %v4128_v24  ;;  %4530 = vst [vmem:[#allocation3 + $0xb0] sm:$0xf] %v4119_v57  ;;  %v2830_v47 = vshrl.u32 %v2681_v19, 16  ;;  %v3396_v34 = vrot.slane %v3394_v22, 5 }
 0x210   : > { %v9606_v5 = vadd.f32 %v6445_v4, %v9584_v32  ;;  %v7440_v48 = vor.u32 %v8209_v38, %v7437_v1  ;;  %4531 = vst [vmem:[#allocation3 + $0xd4] sm:$0xf] %v4129_v14  ;;  %v3382_v55 = vrot.slane %v3381_v35, 4  ;;  %v3391_v27 = vor.u32 %v3390_v60, %v3386_v61  ;;  %v3739_v59 = vld [vmem:[#allocation2 + $0x4c] sm:$0xf] }
 0x211   : > { %v6361_v6 = vpop.f32.mrf.mxu3  ;;  %v9612_v53 = vpop.f32.mrf.mxu2  ;;  %v7429_v32 = vld [vmem:[#allocation3 + $0x10c] sm:$0xf0]  ;;  %v2832_v44 = vrot.slane %v2830_v47, 5  ;;  %v2833_v24 = vshll.u32 %v2681_v19, 16  ;;  %v2839_v57 = vshrl.u32 %v2682_v51, 16  ;;  %v2849_v1 = vshrl.u32 %v2683_v33, 16 }
 0x212   : > { %10235 = vst [vmem:[#allocation28_spill] sm:$0xff] %v9606_v5  ;;  %v9614_v4 = vadd.f32 %v6361_v6, %v6273_v41  ;;  %v7432_v49 = vor.u32 %v8208_v9, %v7429_v32  ;;  %v3387_v63 = vsel %vm8852_vm2, %v3382_v55, %v3386_v61  ;;  %v2842_v5 = vshll.u32 %v2682_v51, 16  ;;  %v4007_v60 = vld [vmem:[#allocation2 + $0x3c] sm:$0xe]  ;;  %v4012_v3 = vld [vmem:[#allocation2 + $0x50] sm:$0x3] }
 0x213   : > { %10236 = vst [vmem:[#allocation29_spill] sm:$0xff] %v9612_v53  ;;  %v3740_v53 = vld [vmem:[#allocation2 + $0x50] sm:$0x1]  ;;  %v3392_v21 = vrot.slane %v3391_v27, 4  ;;  %v2852_v41 = vshll.u32 %v2683_v33, 16  ;;  %v7289_v14 = vrot.slane %v3738_v30, 9 }
 0x214   : > { %6498 = vmatmul.bf16.gmra.mxu1 %v7432_v49  ;;  %3702 = vst [vmem:[#allocation3 + $0x138] sm:$0xf] %v3387_v63  ;;  %v2835_v35 = vrot.slane %v2833_v24, 6  ;;  %v2841_v22 = vrot.slane %v2839_v57, 5  ;;  %v2844_v6 = vrot.slane %v2842_v5, 6  ;;  %v2851_v61 = vrot.slane %v2849_v1, 5 }
 0x215   : > { %v6188_v38 = vpop.f32.mrf.mxu1  ;;  %v3397_v19 = vsel %vm8852_vm2, %v3392_v21, %v3396_v34  ;;  %v2854_v51 = vrot.slane %v2852_v41, 6  ;;  %v3852_v32 = vrot.slane %v3739_v59, 5  ;;  %v3855_v30 = vrot.slane %v3740_v53, 5 }
 0x216   : > { %v6189_v9 = vadd.f32 %v6188_v38, %v9159_v10  ;;  %v7407_v55 = vld [vmem:[#allocation3 + $0xb0] sm:$0xf]  ;;  %3703 = vst [vmem:[#allocation3 + $0x15c] sm:$0xf] %v3397_v19  ;;  %v2836_v49 = vor.u32 %v2835_v35, %v2832_v44  ;;  %v2845_v33 = vor.u32 %v2844_v6, %v2841_v22  ;;  %v4008_v38 = vld [vmem:[#allocation2 + $0x40] sm:$0xf] }
 0x217   : > { %v9619_v47 = vpop.f32.mrf.mxu0  ;;  %v8205_v27 = vld [vmem:[#allocation3 + $0xd0] sm:$0xf0]  ;;  %v2855_v5 = vor.u32 %v2854_v51, %v2851_v61  ;;  %v3853_v24 = vsel %vm9071_vm11, %v7289_v14, %v3852_v32  ;;  %v3854_v57 = vrot.slane %v3852_v32, 4  ;;  %v4131_v34 = vshrl.u32 %v4007_v60, 16  ;;  %v3245_v22 = vld [vmem:[#allocation2 + $0x54] sm:$0xf] }
 0x218   : > { %10237 = vst [vmem:[#allocation30_spill] sm:$0xff] %v9619_v47  ;;  %6676 = vmatmul.bf16.gmra.mxu3 %v7440_v48  ;;  %v7408_v21 = vor.u32 %v8205_v27, %v7407_v55  ;;  %v2837_v59 = vrot.slane %v2836_v49, 4  ;;  %v4009_v48 = vld [vmem:[#allocation2 + $0x44] sm:$0x3]  ;;  %v2847_v41 = vrot.slane %v2845_v33, 4  ;;  %v4134_v35 = vshll.u32 %v4007_v60, 16 }
 0x219   : > { %v9623_v10 = vpop.f32.mrf.mxu3  ;;  %v6277_v63 = vpop.f32.mrf.mxu2  ;;  %3974 = vst [vmem:[#allocation3 + $0x13c] sm:$0xf] %v3853_v24  ;;  %v3856_v53 = vsel %vm9071_vm11, %v3854_v57, %v3855_v30  ;;  %v4133_v44 = vrot.slane %v4131_v34, 5  ;;  %v4140_v19 = vshrl.u32 %v4008_v38, 16  ;;  %v4143_v61 = vshll.u32 %v4008_v38, 16 }
 0x21a   : > { %10238 = vst [vmem:[#allocation31_spill] sm:$0xff] %v9623_v10  ;;  %v6278_v1 = vadd.f32 %v6277_v63, %v6189_v9  ;;  %6760 = vmatmul.bf16.gmra.mxu0 %v7408_v21  ;;  %v2846_v14 = vsel %vm9062_vm8, %v2837_v59, %v2845_v33  ;;  %v3246_v51 = vld [vmem:[#allocation2 + $0x58] sm:$0xf]  ;;  %v2856_v9 = vsel %vm9062_vm8, %v2847_v41, %v2855_v5  ;;  %v4136_v32 = vrot.slane %v4134_v35, 6  ;;  %v3247_v41 = vld [vmem:[#allocation2 + $0x5c] sm:$0x1] }
 0x21b   : > { %v7471_v6 = vld [vmem:[#allocation3 + $0x138] sm:$0xf]  ;;  %3975 = vst [vmem:[#allocation3 + $0x160] sm:$0xf] %v3856_v53  ;;  %v4150_v55 = vshrl.u32 %v4009_v48, 16  ;;  %v4153_v49 = vshll.u32 %v4009_v48, 16 }
 0x21c   : > { %3205 = vst [vmem:[#allocation3 + $0x134] sm:$0xf] %v2846_v14  ;;  %v4142_v60 = vrot.slane %v4140_v19, 5  ;;  %v4145_v27 = vrot.slane %v4143_v61, 6  ;;  %v3399_v63 = vshrl.u32 %v3245_v22, 16  ;;  %v4137_v33 = vor.u32 %v4136_v32, %v4133_v44 }
 0x21d   : > { %v9633_v30 = vpop.f32.mrf.mxu1  ;;  %3206 = vst [vmem:[#allocation3 + $0x158] sm:$0xf] %v2856_v9  ;;  %v8222_v24 = vld [vmem:[#allocation3 + $0x158] sm:$0xf0]  ;;  %v4152_v34 = vrot.slane %v4150_v55, 5  ;;  %v4155_v21 = vrot.slane %v4153_v49, 6 }
 0x21e   : > { %10239 = vst [vmem:[#allocation32_spill] sm:$0xff] %v9633_v30  ;;  %v3402_v38 = vshll.u32 %v3245_v22, 16  ;;  %v7472_v59 = vor.u32 %v8222_v24, %v7471_v6  ;;  %v4146_v5 = vor.u32 %v4145_v27, %v4142_v60  ;;  %v3401_v35 = vrot.slane %v3399_v63, 4  ;;  %v2684_v48 = vld [vmem:[#allocation2 + $0x48] sm:$0xe] }
 0x21f   : > { %v6450_v57 = vpop.f32.mrf.mxu0  ;;  %v4138_v30 = vrot.slane %v4137_v33, 4  ;;  %v4156_v9 = vor.u32 %v4155_v21, %v4152_v34  ;;  %v3408_v47 = vshll.u32 %v3246_v51, 16  ;;  %v3412_v22 = vshrl.u32 %v3246_v51, 16  ;;  %v2685_v6 = vld [vmem:[#allocation2 + $0x4c] sm:$0xf] }
 0x220   : > { %v9636_v53 = vadd.f32 %v6450_v57, %v9614_v4  ;;  %v8218_v14 = vld [vmem:[#allocation3 + $0x13c] sm:$0xf]  ;;  %v3404_v10 = vrot.slane %v3402_v38, 5  ;;  %6592 = vmatmul.bf16.gmra.mxu2 %v7472_v59  ;;  %v4148_v44 = vrot.slane %v4146_v5, 4  ;;  %v3418_v27 = vshll.u32 %v3247_v41, 16 }
 0x221   : > { %v6366_v19 = vpop.f32.mrf.mxu3  ;;  %v9638_v61 = vpop.f32.mrf.mxu2  ;;  %v4147_v55 = vsel %vm9062_vm8, %v4138_v30, %v4146_v5  ;;  %v3410_v60 = vrot.slane %v3408_v47, 5  ;;  %v2686_v63 = vld [vmem:[#allocation2 + $0x50] sm:$0x3]  ;;  %v3414_v34 = vrot.slane %v3412_v22, 4  ;;  %v2858_v21 = vshrl.u32 %v2684_v48, 16 }
 0x222   : > { %10240 = vst [vmem:[#allocation33_spill] sm:$0xff] %v9636_v53  ;;  %v9640_v32 = vadd.f32 %v6366_v19, %v6278_v1  ;;  %v7473_v4 = vld [vmem:[#allocation3 + $0x15c] sm:$0xf0]  ;;  %v3405_v49 = vor.u32 %v3404_v10, %v3401_v35  ;;  %v4157_v33 = vsel %vm9062_vm8, %v4148_v44, %v4156_v9  ;;  %v3420_v38 = vrot.slane %v3418_v27, 5  ;;  %v3741_v30 = vld [vmem:[#allocation2 + $0x54] sm:$0xe] }
 0x223   : > { %10241 = vst [vmem:[#allocation34_spill] sm:$0xff] %v9638_v61  ;;  %v8217_v24 = vld [vmem:[#allocation3 + $0x134] sm:$0xf]  ;;  %v7476_v57 = vor.u32 %v8218_v14, %v7473_v4  ;;  %v3415_v61 = vor.u32 %v3414_v34, %v3410_v60  ;;  %v2860_v47 = vrot.slane %v2858_v21, 5  ;;  %v3742_v5 = vld [vmem:[#allocation2 + $0x58] sm:$0xf] }
 0x224   : > { %4532 = vst [vmem:[#allocation3 + $0xf8] sm:$0xf] %v4147_v55  ;;  %v7465_v1 = vld [vmem:[#allocation3 + $0x154] sm:$0xf0]  ;;  %v3406_v51 = vrot.slane %v3405_v49, 4  ;;  %v2861_v14 = vshll.u32 %v2684_v48, 16 }
 0x225   : > { %4533 = vst [vmem:[#allocation3 + $0x11c] sm:$0xf] %v4157_v33  ;;  %v6193_v59 = vpop.f32.mrf.mxu1  ;;  %v7468_v19 = vor.u32 %v8217_v24, %v7465_v1  ;;  %v2867_v9 = vshrl.u32 %v2685_v6, 16  ;;  %v2870_v44 = vshll.u32 %v2685_v6, 16  ;;  %v3743_v22 = vld [vmem:[#allocation2 + $0x5c] sm:$0x1] }
 0x226   : > { %v6194_v10 = vadd.f32 %v6193_v59, %v9193_v0  ;;  %v3411_v35 = vsel %vm8852_vm2, %v3406_v51, %v3410_v60  ;;  %v4010_v4 = vld [vmem:[#allocation2 + $0x48] sm:$0xe]  ;;  %v3416_v55 = vrot.slane %v3415_v61, 4  ;;  %v2877_v49 = vshrl.u32 %v2686_v63, 16  ;;  %v4011_v1 = vld [vmem:[#allocation2 + $0x4c] sm:$0xf] }
 0x227   : > { %v9647_v41 = vpop.f32.mrf.mxu0  ;;  %6503 = vmatmul.bf16.gmra.mxu1 %v7468_v19  ;;  %3704 = vst [vmem:[#allocation3 + $0x180] sm:$0xf] %v3411_v35  ;;  %v2880_v27 = vshll.u32 %v2686_v63, 16  ;;  %v2863_v33 = vrot.slane %v2861_v14, 6  ;;  %v2869_v34 = vrot.slane %v2867_v9, 5  ;;  %v2872_v21 = vrot.slane %v2870_v44, 6 }
 0x228   : > { %10242 = vst [vmem:[#allocation35_spill] sm:$0xff] %v9647_v41  ;;  %6681 = vmatmul.bf16.gmra.mxu3 %v7476_v57  ;;  %v3421_v48 = vsel %vm8852_vm2, %v3416_v55, %v3420_v38  ;;  %v2879_v6 = vrot.slane %v2877_v49, 5  ;;  %v7290_v51 = vrot.slane %v3741_v30, 9  ;;  %v3859_v35 = vrot.slane %v3742_v5, 5  ;;  %v3248_v49 = vld [vmem:[#allocation2 + $0x60] sm:$0xf] }
 0x229   : > { %v9651_v0 = vpop.f32.mrf.mxu3  ;;  %v6282_v24 = vpop.f32.mrf.mxu2  ;;  %3705 = vst [vmem:[#allocation3 + $0x1a4] sm:$0xf] %v3421_v48  ;;  %v2864_v57 = vor.u32 %v2863_v33, %v2860_v47  ;;  %v2873_v61 = vor.u32 %v2872_v21, %v2869_v34  ;;  %v2882_v19 = vrot.slane %v2880_v27, 6  ;;  %v3862_v41 = vrot.slane %v3743_v22, 5  ;;  %v3249_v33 = vld [vmem:[#allocation2 + $0x64] sm:$0xf] }
 0x22a   : > { %10243 = vst [vmem:[#allocation36_spill] sm:$0xff] %v9651_v0  ;;  %v6283_v60 = vadd.f32 %v6282_v24, %v6194_v10  ;;  %v4159_v0 = vshrl.u32 %v4010_v4, 16  ;;  %v4162_v53 = vshll.u32 %v4010_v4, 16  ;;  %v4168_v14 = vshrl.u32 %v4011_v1, 16 }
 0x22b   : > { %v7443_v59 = vld [vmem:[#allocation3 + $0xf8] sm:$0xf]  ;;  %v2865_v44 = vrot.slane %v2864_v57, 4  ;;  %v2875_v11 = vrot.slane %v2873_v61, 4  ;;  %v2883_v39 = vor.u32 %v2882_v19, %v2879_v6  ;;  %v3860_v10 = vsel %vm9071_vm11, %v7290_v51, %v3859_v35  ;;  %v3250_v6 = vld [vmem:[#allocation2 + $0x68] sm:$0x1] }
 0x22c   : > { %v8214_v63 = vld [vmem:[#allocation3 + $0x118] sm:$0xf0]  ;;  %v3861_v30 = vrot.slane %v3859_v35, 4  ;;  %v4161_v47 = vrot.slane %v4159_v0, 5  ;;  %v4164_v55 = vrot.slane %v4162_v53, 6  ;;  %v4170_v27 = vrot.slane %v4168_v14, 5 }
 0x22d   : > { %v7444_v9 = vor.u32 %v8214_v63, %v7443_v59  ;;  %v9655_v38 = vpop.f32.mrf.mxu1  ;;  %v2874_v22 = vsel %vm9062_vm8, %v2865_v44, %v2873_v61  ;;  %v2884_v4 = vsel %vm9062_vm8, %v2875_v11, %v2883_v39  ;;  %3976 = vst [vmem:[#allocation3 + $0x184] sm:$0xf] %v3860_v10  ;;  %v4171_v24 = vshll.u32 %v4011_v1, 16 }
 0x22e   : > { %v7507_v34 = vld [vmem:[#allocation3 + $0x180] sm:$0xf]  ;;  %3207 = vst [vmem:[#allocation3 + $0x17c] sm:$0xf] %v2874_v22  ;;  %v3863_v53 = vsel %vm9071_vm11, %v3861_v30, %v3862_v41  ;;  %v4165_v0 = vor.u32 %v4164_v55, %v4161_v47  ;;  %v4178_v48 = vshrl.u32 %v4012_v3, 16  ;;  %v4181_v59 = vshll.u32 %v4012_v3, 16 }
 0x22f   : > { %6765 = vmatmul.bf16.gmra.mxu0 %v7444_v9  ;;  %v6455_v5 = vpop.f32.mrf.mxu0  ;;  %3208 = vst [vmem:[#allocation3 + $0x1a0] sm:$0xf] %v2884_v4  ;;  %v4173_v51 = vrot.slane %v4171_v24, 6  ;;  %v3423_v39 = vshrl.u32 %v3248_v49, 16  ;;  %v3426_v9 = vshll.u32 %v3248_v49, 16  ;;  %v3432_v44 = vshll.u32 %v3249_v33, 16 }
 0x230   : > { %v9664_v21 = vadd.f32 %v6455_v5, %v9640_v32  ;;  %v8231_v1 = vld [vmem:[#allocation3 + $0x1a0] sm:$0xf0]  ;;  %3977 = vst [vmem:[#allocation3 + $0x1a8] sm:$0xf] %v3863_v53  ;;  %v4166_v61 = vrot.slane %v4165_v0, 4  ;;  %v4180_v19 = vrot.slane %v4178_v48, 5 }
 0x231   : > { %v6371_v57 = vpop.f32.mrf.mxu3  ;;  %v9668_v11 = vpop.f32.mrf.mxu2  ;;  %v7508_v35 = vor.u32 %v8231_v1, %v7507_v34  ;;  %v4174_v63 = vor.u32 %v4173_v51, %v4170_v27  ;;  %v4183_v14 = vrot.slane %v4181_v59, 6  ;;  %v3425_v41 = vrot.slane %v3423_v39, 4  ;;  %v2687_v30 = vld [vmem:[#allocation2 + $0x54] sm:$0xe]  ;;  %v2688_v4 = vld [vmem:[#allocation2 + $0x58] sm:$0xf] }
 0x232   : > { %10244 = vst [vmem:[#allocation37_spill] sm:$0xff] %v9668_v11  ;;  %v9670_v32 = vadd.f32 %v6371_v57, %v6283_v60  ;;  %v3436_v10 = vshrl.u32 %v3249_v33, 16  ;;  %v3442_v5 = vshll.u32 %v3250_v6, 16  ;;  %v3428_v60 = vrot.slane %v3426_v9, 5  ;;  %v2689_v51 = vld [vmem:[#allocation2 + $0x5c] sm:$0x3] }
 0x233   : > { %6597 = vmatmul.bf16.gmra.mxu2 %v7508_v35  ;;  %v4175_v3 = vsel %vm9062_vm8, %v4166_v61, %v4174_v63  ;;  %v4176_v47 = vrot.slane %v4174_v63, 4  ;;  %v4184_v55 = vor.u32 %v4183_v14, %v4180_v19  ;;  %v3434_v34 = vrot.slane %v3432_v44, 5  ;;  %v3744_v44 = vld [vmem:[#allocation2 + $0x60] sm:$0xe] }
 0x234   : > { %v8227_v24 = vld [vmem:[#allocation3 + $0x184] sm:$0xf]  ;;  %4534 = vst [vmem:[#allocation3 + $0x140] sm:$0xf] %v4175_v3  ;;  %v3438_v0 = vrot.slane %v3436_v10, 4  ;;  %v3444_v48 = vrot.slane %v3442_v5, 5  ;;  %v3429_v6 = vor.u32 %v3428_v60, %v3425_v41 }
 0x235   : > { %v6198_v22 = vpop.f32.mrf.mxu1  ;;  %v8226_v53 = vld [vmem:[#allocation3 + $0x17c] sm:$0xf]  ;;  %v4185_v49 = vsel %vm9062_vm8, %v4176_v47, %v4184_v55  ;;  %v2886_v59 = vshrl.u32 %v2687_v30, 16  ;;  %v2889_v39 = vshll.u32 %v2687_v30, 16  ;;  %v2895_v1 = vshrl.u32 %v2688_v4, 16 }
 0x236   : > { %v6199_v27 = vadd.f32 %v6198_v22, %v9231_v7  ;;  %v7501_v57 = vld [vmem:[#allocation3 + $0x19c] sm:$0xf0]  ;;  %4535 = vst [vmem:[#allocation3 + $0x164] sm:$0xf] %v4185_v49  ;;  %v3439_v7 = vor.u32 %v3438_v0, %v3434_v34  ;;  %v2898_v9 = vshll.u32 %v2688_v4, 16  ;;  %v3430_v47 = vrot.slane %v3429_v6, 4 }
 0x237   : > { %v9677_v33 = vpop.f32.mrf.mxu0  ;;  %v7504_v61 = vor.u32 %v8226_v53, %v7501_v57  ;;  %v7509_v19 = vld [vmem:[#allocation3 + $0x1a4] sm:$0xf0]  ;;  %v2888_v14 = vrot.slane %v2886_v59, 5  ;;  %v3745_v55 = vld [vmem:[#allocation2 + $0x64] sm:$0xf]  ;;  %v2891_v49 = vrot.slane %v2889_v39, 6 }
 0x238   : > { %10245 = vst [vmem:[#allocation38_spill] sm:$0xff] %v9677_v33  ;;  %v7512_v3 = vor.u32 %v8227_v24, %v7509_v19  ;;  %v3746_v5 = vld [vmem:[#allocation2 + $0x68] sm:$0x1]  ;;  %v3440_v22 = vrot.slane %v3439_v7, 4  ;;  %v2897_v41 = vrot.slane %v2895_v1, 5  ;;  %v2900_v30 = vrot.slane %v2898_v9, 6 }
 0x239   : > { %v9679_v35 = vpop.f32.mrf.mxu3  ;;  %v6287_v63 = vpop.f32.mrf.mxu2  ;;  %6508 = vmatmul.bf16.gmra.mxu1 %v7504_v61  ;;  %v4013_v60 = vld [vmem:[#allocation2 + $0x54] sm:$0xe]  ;;  %v3435_v53 = vsel %vm8852_vm2, %v3430_v47, %v3434_v34  ;;  %v2905_v0 = vshrl.u32 %v2689_v51, 16  ;;  %v2908_v57 = vshll.u32 %v2689_v51, 16  ;;  %v7291_v59 = vrot.slane %v3744_v44, 9 }
 0x23a   : > { %10246 = vst [vmem:[#allocation39_spill] sm:$0xff] %v9679_v35  ;;  %v6288_v10 = vadd.f32 %v6287_v63, %v6199_v27  ;;  %6686 = vmatmul.bf16.gmra.mxu3 %v7512_v3  ;;  %v4014_v4 = vld [vmem:[#allocation2 + $0x58] sm:$0xf]  ;;  %v3445_v24 = vsel %vm8852_vm2, %v3440_v22, %v3444_v48  ;;  %v2892_v27 = vor.u32 %v2891_v49, %v2888_v14  ;;  %v3866_v61 = vrot.slane %v3745_v55, 5  ;;  %v4015_v39 = vld [vmem:[#allocation2 + $0x5c] sm:$0x3] }
 0x23b   : > { %v7479_v35 = vld [vmem:[#allocation3 + $0x140] sm:$0xf]  ;;  %3706 = vst [vmem:[#allocation3 + $0x1c8] sm:$0xf] %v3435_v53  ;;  %v2901_v6 = vor.u32 %v2900_v30, %v2897_v41  ;;  %v2907_v19 = vrot.slane %v2905_v0, 5  ;;  %v2910_v7 = vrot.slane %v2908_v57, 6 }
 0x23c   : > { %3707 = vst [vmem:[#allocation3 + $0x1ec] sm:$0xf] %v3445_v24  ;;  %v3869_v63 = vrot.slane %v3746_v5, 5  ;;  %v4187_v34 = vshrl.u32 %v4013_v60, 16  ;;  %v2893_v44 = vrot.slane %v2892_v27, 4  ;;  %v3867_v47 = vsel %vm9071_vm11, %v7291_v59, %v3866_v61 }
 0x23d   : > { %v9685_v1 = vpop.f32.mrf.mxu1  ;;  %v8223_v9 = vld [vmem:[#allocation3 + $0x160] sm:$0xf0]  ;;  %v2903_v3 = vrot.slane %v2901_v6, 4  ;;  %v3868_v48 = vrot.slane %v3866_v61, 4  ;;  %v2911_v55 = vor.u32 %v2910_v7, %v2907_v19  ;;  %3978 = vst [vmem:[#allocation3 + $0x1cc] sm:$0xf] %v3867_v47 }
 0x23e   : > { %10247 = vst [vmem:[#allocation40_spill] sm:$0xff] %v9685_v1  ;;  %v7480_v22 = vor.u32 %v8223_v9, %v7479_v35  ;;  %v4189_v49 = vrot.slane %v4187_v34, 5  ;;  %v2902_v41 = vsel %vm9062_vm8, %v2893_v44, %v2901_v6  ;;  %v4190_v30 = vshll.u32 %v4013_v60, 16  ;;  %v3251_v59 = vld [vmem:[#allocation2 + $0x6c] sm:$0xf] }
 0x23f   : > { %v6460_v51 = vpop.f32.mrf.mxu0  ;;  %v3870_v5 = vsel %vm9071_vm11, %v3868_v48, %v3869_v63  ;;  %v4196_v53 = vshrl.u32 %v4014_v4, 16  ;;  %3209 = vst [vmem:[#allocation3 + $0x1c4] sm:$0xf] %v2902_v41  ;;  %v4199_v35 = vshll.u32 %v4014_v4, 16  ;;  %v4206_v24 = vshrl.u32 %v4015_v39, 16 }
 0x240   : > { %v9690_v14 = vadd.f32 %v6460_v51, %v9670_v32  ;;  %6770 = vmatmul.bf16.gmra.mxu0 %v7480_v22  ;;  %v2912_v32 = vsel %vm9062_vm8, %v2903_v3, %v2911_v55  ;;  %v4209_v27 = vshll.u32 %v4015_v39, 16  ;;  %v4192_v61 = vrot.slane %v4190_v30, 6  ;;  %v3252_v7 = vld [vmem:[#allocation2 + $0x70] sm:$0xf]  ;;  %3979 = vst [vmem:[#allocation3 + $0x1f0] sm:$0xf] %v3870_v5 }
 0x241   : > { %v6376_v0 = vpop.f32.mrf.mxu3  ;;  %v9696_v57 = vpop.f32.mrf.mxu2  ;;  %3210 = vst [vmem:[#allocation3 + $0x1e8] sm:$0xf] %v2912_v32  ;;  %v4198_v6 = vrot.slane %v4196_v53, 5  ;;  %v4201_v63 = vrot.slane %v4199_v35, 6  ;;  %v4208_v34 = vrot.slane %v4206_v24, 5  ;;  %v3447_v47 = vshrl.u32 %v3251_v59, 16 }
 0x242   : > { %10248 = vst [vmem:[#allocation41_spill] sm:$0xff] %v9690_v14  ;;  %v9700_v19 = vadd.f32 %v6376_v0, %v6288_v10  ;;  %v7543_v60 = vld [vmem:[#allocation3 + $0x1c8] sm:$0xf]  ;;  %v4193_v51 = vor.u32 %v4192_v61, %v4189_v49  ;;  %v4211_v44 = vrot.slane %v4209_v27, 6  ;;  %v3253_v22 = vld [vmem:[#allocation2 + $0x74] sm:$0x1] }
 0x243   : > { %10249 = vst [vmem:[#allocation42_spill] sm:$0xff] %v9696_v57  ;;  %v8240_v9 = vld [vmem:[#allocation3 + $0x1e8] sm:$0xf0]  ;;  %v4202_v3 = vor.u32 %v4201_v63, %v4198_v6  ;;  %v3450_v4 = vshll.u32 %v3251_v59, 16  ;;  %v3456_v55 = vshll.u32 %v3252_v7, 16  ;;  %v3449_v10 = vrot.slane %v3447_v47, 4 }
 0x244   : > { %v7544_v48 = vor.u32 %v8240_v9, %v7543_v60  ;;  %v4194_v41 = vrot.slane %v4193_v51, 4  ;;  %v4212_v30 = vor.u32 %v4211_v44, %v4208_v34  ;;  %v3460_v0 = vshrl.u32 %v3252_v7, 16  ;;  %v2690_v32 = vld [vmem:[#allocation2 + $0x60] sm:$0xe]  ;;  %v2691_v49 = vld [vmem:[#allocation2 + $0x64] sm:$0xf] }
 0x245   : > { %v6203_v39 = vpop.f32.mrf.mxu1  ;;  %v4204_v5 = vrot.slane %v4202_v3, 4  ;;  %v3452_v35 = vrot.slane %v3450_v4, 5  ;;  %v3458_v24 = vrot.slane %v3456_v55, 5  ;;  %v2692_v27 = vld [vmem:[#allocation2 + $0x68] sm:$0x3]  ;;  %v3466_v63 = vshll.u32 %v3253_v22, 16 }
 0x246   : > { %6602 = vmatmul.bf16.gmra.mxu2 %v7544_v48  ;;  %v8235_v61 = vld [vmem:[#allocation3 + $0x1c4] sm:$0xf]  ;;  %v8236_v60 = vld [vmem:[#allocation3 + $0x1cc] sm:$0xf]  ;;  %v4203_v59 = vsel %vm9062_vm8, %v4194_v41, %v4202_v3  ;;  %v3462_v6 = vrot.slane %v3460_v0, 4  ;;  %v6204_v34 = vadd.f32 %v6203_v39, %v9267_v43  ;;  %v2914_v48 = vshrl.u32 %v2690_v32, 16 }
 0x247   : > { %v9702_v53 = vpop.f32.mrf.mxu0  ;;  %v3747_v51 = vld [vmem:[#allocation2 + $0x6c] sm:$0xe]  ;;  %v4213_v7 = vsel %vm9062_vm8, %v4204_v5, %v4212_v30  ;;  %4536 = vst [vmem:[#allocation3 + $0x188] sm:$0xf] %v4203_v59  ;;  %v3453_v47 = vor.u32 %v3452_v35, %v3449_v10  ;;  %v7545_v55 = vld [vmem:[#allocation3 + $0x1ec] sm:$0xf0] }
 0x248   : > { %10250 = vst [vmem:[#allocation43_spill] sm:$0xff] %v9702_v53  ;;  %v7537_v44 = vld [vmem:[#allocation3 + $0x1e4] sm:$0xf0]  ;;  %v3463_v57 = vor.u32 %v3462_v6, %v3458_v24  ;;  %v3468_v1 = vrot.slane %v3466_v63, 5  ;;  %v7548_v3 = vor.u32 %v8236_v60, %v7545_v55  ;;  %v2916_v41 = vrot.slane %v2914_v48, 5 }
 0x249   : > { %v6292_v9 = vpop.f32.mrf.mxu2  ;;  %v7540_v4 = vor.u32 %v8235_v61, %v7537_v44  ;;  %4537 = vst [vmem:[#allocation3 + $0x1ac] sm:$0xf] %v4213_v7  ;;  %v3454_v22 = vrot.slane %v3453_v47, 4  ;;  %v2917_v43 = vshll.u32 %v2690_v32, 16  ;;  %v3748_v39 = vld [vmem:[#allocation2 + $0x70] sm:$0xf] }
 0x24a   : > { %v9709_v53 = vadd.f32 %v6292_v9, %v6204_v34  ;;  %v3464_v0 = vrot.slane %v3463_v57, 4  ;;  %v2923_v11 = vshrl.u32 %v2691_v49, 16  ;;  %v2926_v14 = vshll.u32 %v2691_v49, 16  ;;  %v3749_v5 = vld [vmem:[#allocation2 + $0x74] sm:$0x1]  ;;  %6691 = vmatmul.bf16.gmra.mxu3 %v7548_v3 }
 0x24b   : > { %6513 = vmatmul.bf16.gmra.mxu1 %v7540_v4  ;;  %v2933_v30 = vshrl.u32 %v2692_v27, 16  ;;  %v3459_v10 = vsel %vm8852_vm2, %v3454_v22, %v3458_v24  ;;  %v2919_v35 = vrot.slane %v2917_v43, 6  ;;  %v2936_v61 = vshll.u32 %v2692_v27, 16  ;;  %v4016_v6 = vld [vmem:[#allocation2 + $0x60] sm:$0xe]  ;;  %v9718_v27 = vpop.f32.mrf.mxu3 }
 0x24c   : > { %v7292_v59 = vrot.slane %v3747_v51, 9  ;;  %v3469_v60 = vsel %vm8852_vm2, %v3464_v0, %v3468_v1  ;;  %3708 = vst [vmem:[#allocation3 + $0x210] sm:$0xf] %v3459_v10  ;;  %v2925_v63 = vrot.slane %v2923_v11, 5  ;;  %v2928_v34 = vrot.slane %v2926_v14, 6 }
 0x24d   : > { %v2935_v57 = vrot.slane %v2933_v30, 5  ;;  %3709 = vst [vmem:[#allocation3 + $0x234] sm:$0xf] %v3469_v60  ;;  %v2920_v9 = vor.u32 %v2919_v35, %v2916_v41  ;;  %v2938_v44 = vrot.slane %v2936_v61, 6  ;;  %v3873_v7 = vrot.slane %v3748_v39, 5  ;;  %v9722_v30 = vpop.f32.mrf.mxu1 }
 0x24e   : > { %v4017_v24 = vld [vmem:[#allocation2 + $0x64] sm:$0xf]  ;;  %v7515_v47 = vld [vmem:[#allocation3 + $0x188] sm:$0xf]  ;;  %10252 = vst [vmem:[#allocation45_spill] sm:$0xff] %v9718_v27  ;;  %v2929_v51 = vor.u32 %v2928_v34, %v2925_v63  ;;  %v3876_v48 = vrot.slane %v3749_v5, 5 }
 0x24f   : > { %v6465_v32 = vpop.f32.mrf.mxu0  ;;  %v4215_v4 = vshrl.u32 %v4016_v6, 16  ;;  %v4218_v1 = vshll.u32 %v4016_v6, 16  ;;  %v2921_v3 = vrot.slane %v2920_v9, 4  ;;  %v2939_v11 = vor.u32 %v2938_v44, %v2935_v57  ;;  %10253 = vst [vmem:[#allocation46_spill] sm:$0xff] %v9722_v30  ;;  %v3255_v57 = vld [vmem:[#allocation2 + $0x7c] sm:$0xf] }
 0x250   : > { %v9716_v49 = vadd.f32 %v6465_v32, %v9700_v19  ;;  %v8232_v55 = vld [vmem:[#allocation3 + $0x1a8] sm:$0xf0]  ;;  %v3874_v14 = vsel %vm9071_vm11, %v7292_v59, %v3873_v7  ;;  %v3875_v22 = vrot.slane %v3873_v7, 4  ;;  %v4018_v19 = vld [vmem:[#allocation2 + $0x68] sm:$0x3]  ;;  %v2931_v41 = vrot.slane %v2929_v51, 4 }
 0x251   : > { %v7516_v43 = vor.u32 %v8232_v55, %v7515_v47  ;;  %3980 = vst [vmem:[#allocation3 + $0x214] sm:$0xf] %v3874_v14  ;;  %v4217_v39 = vrot.slane %v4215_v4, 5  ;;  %v4220_v0 = vrot.slane %v4218_v1, 6  ;;  %v9724_v10 = vpop.f32.mrf.mxu2  ;;  %v2930_v5 = vsel %vm9062_vm8, %v2921_v3, %v2929_v51  ;;  %v3254_v59 = vld [vmem:[#allocation2 + $0x78] sm:$0xf] }
 0x252   : > { %10251 = vst [vmem:[#allocation44_spill] sm:$0xff] %v9716_v49  ;;  %v3877_v35 = vsel %vm9071_vm11, %v3875_v22, %v3876_v48  ;;  %v4224_v61 = vshrl.u32 %v4017_v24, 16  ;;  %v4227_v6 = vshll.u32 %v4017_v24, 16  ;;  %v2940_v60 = vsel %vm9062_vm8, %v2931_v41, %v2939_v11  ;;  %v3256_v3 = vld [vmem:[#allocation2 + $0x80] sm:$0x1] }
 0x253   : > { %10254 = vst [vmem:[#allocation47_spill] sm:$0xff] %v9724_v10  ;;  %6775 = vmatmul.bf16.gmra.mxu0 %v7516_v43  ;;  %v4221_v32 = vor.u32 %v4220_v0, %v4217_v39  ;;  %v4234_v63 = vshrl.u32 %v4018_v19, 16  ;;  %v4237_v34 = vshll.u32 %v4018_v19, 16  ;;  %v7579_v9 = vld [vmem:[#allocation3 + $0x210] sm:$0xf]  ;;  %v3471_v11 = vshrl.u32 %v3254_v59, 16 }
 0x254   : > { %3211 = vst [vmem:[#allocation3 + $0x20c] sm:$0xf] %v2930_v5  ;;  %v4226_v44 = vrot.slane %v4224_v61, 5  ;;  %v4229_v7 = vrot.slane %v4227_v6, 6  ;;  %v8249_v47 = vld [vmem:[#allocation3 + $0x230] sm:$0xf0] }
 0x255   : > { %3212 = vst [vmem:[#allocation3 + $0x230] sm:$0xf] %v2940_v60  ;;  %v4222_v51 = vrot.slane %v4221_v32, 4  ;;  %v4236_v48 = vrot.slane %v4234_v63, 5  ;;  %v7580_v24 = vor.u32 %v8249_v47, %v7579_v9  ;;  %v4239_v55 = vrot.slane %v4237_v34, 6 }
 0x256   : > { %3981 = vst [vmem:[#allocation3 + $0x238] sm:$0xf] %v3877_v35  ;;  %v4230_v1 = vor.u32 %v4229_v7, %v4226_v44  ;;  %v3474_v14 = vshll.u32 %v3254_v59, 16  ;;  %v3480_v22 = vshll.u32 %v3255_v57, 16  ;;  %v2693_v43 = vld [vmem:[#allocation2 + $0x6c] sm:$0xe] }
 0x257   : > { %v9732_v4 = vpop.f32.mrf.mxu0  ;;  %6607 = vmatmul.bf16.gmra.mxu2 %v7580_v24  ;;  %v4240_v39 = vor.u32 %v4239_v55, %v4236_v48  ;;  %v3484_v0 = vshrl.u32 %v3255_v57, 16  ;;  %v2694_v5 = vld [vmem:[#allocation2 + $0x70] sm:$0xf]  ;;  %v3473_v61 = vrot.slane %v3471_v11, 4  ;;  %v3490_v32 = vshll.u32 %v3256_v3, 16 }
 0x258   : > { %10255 = vst [vmem:[#allocation48_spill] sm:$0xff] %v9732_v4  ;;  %v4231_v19 = vsel %vm9062_vm8, %v4222_v51, %v4230_v1  ;;  %v4232_v41 = vrot.slane %v4230_v1, 4  ;;  %v3476_v6 = vrot.slane %v3474_v14, 5  ;;  %v3482_v60 = vrot.slane %v3480_v22, 5  ;;  %v8245_v34 = vld [vmem:[#allocation3 + $0x214] sm:$0xf] }
 0x259   : > { %4538 = vst [vmem:[#allocation3 + $0x1d0] sm:$0xf] %v4231_v19  ;;  %v3486_v44 = vrot.slane %v3484_v0, 4  ;;  %v2942_v7 = vshrl.u32 %v2693_v43, 16  ;;  %v9741_v48 = vpop.f32.mrf.mxu2  ;;  %v2945_v24 = vshll.u32 %v2693_v43, 16  ;;  %v3492_v11 = vrot.slane %v3490_v32, 5 }
 0x25a   : > { %v4241_v59 = vsel %vm9062_vm8, %v4232_v41, %v4240_v39  ;;  %v3477_v51 = vor.u32 %v3476_v6, %v3473_v61  ;;  %v2695_v14 = vld [vmem:[#allocation2 + $0x74] sm:$0x3]  ;;  %v2951_v0 = vshrl.u32 %v2694_v5, 16  ;;  %v2954_v61 = vshll.u32 %v2694_v5, 16  ;;  %v3750_v6 = vld [vmem:[#allocation2 + $0x78] sm:$0xe] }
 0x25b   : > { %v6381_v35 = vpop.f32.mrf.mxu3  ;;  %v8244_v63 = vld [vmem:[#allocation3 + $0x20c] sm:$0xf]  ;;  %4539 = vst [vmem:[#allocation3 + $0x1f4] sm:$0xf] %v4241_v59  ;;  %v3487_v3 = vor.u32 %v3486_v44, %v3482_v60  ;;  %v2944_v22 = vrot.slane %v2942_v7, 5  ;;  %v2961_v44 = vshrl.u32 %v2695_v14, 16 }
 0x25c   : > { %v6382_v9 = vadd.f32 %v6381_v35, %v9709_v53  ;;  %v7573_v47 = vld [vmem:[#allocation3 + $0x22c] sm:$0xf0]  ;;  %v9739_v57 = vpop.f32.mrf.mxu1  ;;  %v3478_v41 = vrot.slane %v3477_v51, 4  ;;  %v2947_v53 = vrot.slane %v2945_v24, 6  ;;  %v3751_v10 = vld [vmem:[#allocation2 + $0x7c] sm:$0xf] }
 0x25d   : > { %v7576_v1 = vor.u32 %v8244_v63, %v7573_v47  ;;  %v7581_v55 = vld [vmem:[#allocation3 + $0x234] sm:$0xf0]  ;;  %v3488_v35 = vrot.slane %v3487_v3, 4  ;;  %v2953_v32 = vrot.slane %v2951_v0, 5  ;;  %v3752_v7 = vld [vmem:[#allocation2 + $0x80] sm:$0x1] }
 0x25e   : > { %v7584_v19 = vor.u32 %v8245_v34, %v7581_v55  ;;  %v3483_v43 = vsel %vm8852_vm2, %v3478_v41, %v3482_v60  ;;  %v2948_v63 = vor.u32 %v2947_v53, %v2944_v22  ;;  %v4019_v34 = vld [vmem:[#allocation2 + $0x6c] sm:$0xe]  ;;  %v2956_v24 = vrot.slane %v2954_v61, 6  ;;  %v4020_v53 = vld [vmem:[#allocation2 + $0x70] sm:$0xf] }
 0x25f   : > { %v6470_v39 = vpop.f32.mrf.mxu0  ;;  %6518 = vmatmul.bf16.gmra.mxu1 %v7576_v1  ;;  %v3493_v51 = vsel %vm8852_vm2, %v3488_v35, %v3492_v11  ;;  %3710 = vst [vmem:[#allocation3 + $0x258] sm:$0xf] %v3483_v43  ;;  %v2963_v55 = vrot.slane %v2961_v44, 5  ;;  %v7293_v3 = vrot.slane %v3750_v6, 9  ;;  %v4021_v35 = vld [vmem:[#allocation2 + $0x74] sm:$0x3] }
 0x260   : > { %v9743_v59 = vadd.f32 %v6470_v39, %v6382_v9  ;;  %6696 = vmatmul.bf16.gmra.mxu3 %v7584_v19  ;;  %v7551_v47 = vld [vmem:[#allocation3 + $0x1d0] sm:$0xf]  ;;  %v2964_v9 = vshll.u32 %v2695_v14, 16  ;;  %3711 = vst [vmem:[#allocation3 + $0x27c] sm:$0xf] %v3493_v51  ;;  %v2949_v5 = vrot.slane %v2948_v63, 4  ;;  %v2957_v22 = vor.u32 %v2956_v24, %v2953_v32 }
 0x261   : > { %v3880_v19 = vrot.slane %v3751_v10, 5  ;;  %v3883_v39 = vrot.slane %v3752_v7, 5  ;;  %v4243_v61 = vshrl.u32 %v4019_v34, 16  ;;  %v4246_v10 = vshll.u32 %v4019_v34, 16  ;;  %v3257_v6 = vld [vmem:[#allocation2 + $0x84] sm:$0xf]  ;;  %v6575_v24 = vpop.f32.mrf.mxu2 }
 0x262   : > { %10256 = vst [vmem:[#allocation49_spill] sm:$0xff] %v9743_v59  ;;  %v8241_v60 = vld [vmem:[#allocation3 + $0x1f0] sm:$0xf0]  ;;  %v2966_v41 = vrot.slane %v2964_v9, 6  ;;  %v2958_v43 = vsel %vm9062_vm8, %v2949_v5, %v2957_v22  ;;  %v2959_v63 = vrot.slane %v2957_v22, 4  ;;  %v4255_v51 = vshll.u32 %v4020_v53, 16 }
 0x263   : > { %v9749_v1 = vpop.f32.mrf.mxu3  ;;  %v7552_v0 = vor.u32 %v8241_v60, %v7551_v47  ;;  %v3881_v59 = vsel %vm9071_vm11, %v7293_v3, %v3880_v19  ;;  %v3882_v11 = vrot.slane %v3880_v19, 4  ;;  %3213 = vst [vmem:[#allocation3 + $0x254] sm:$0xf] %v2958_v43  ;;  %v4245_v7 = vrot.slane %v4243_v61, 5  ;;  %v3753_v27 = vld [vmem:[#allocation2 + $0x84] sm:$0xe] }
 0x264   : > { %10257 = vst [vmem:[#allocation50_spill] sm:$0xff] %v9749_v1  ;;  %v6486_v14 = vpop.f32.mrf.mxu1  ;;  %v2967_v44 = vor.u32 %v2966_v41, %v2963_v55  ;;  %v4252_v47 = vshrl.u32 %v4020_v53, 16  ;;  %v4248_v3 = vrot.slane %v4246_v10, 6  ;;  %v4262_v5 = vshrl.u32 %v4021_v35, 16  ;;  %v3258_v55 = vld [vmem:[#allocation2 + $0x88] sm:$0xf] }
 0x265   : > { %3982 = vst [vmem:[#allocation3 + $0x25c] sm:$0xf] %v3881_v59  ;;  %6780 = vmatmul.bf16.gmra.mxu0 %v7552_v0  ;;  %v3884_v32 = vsel %vm9071_vm11, %v3882_v11, %v3883_v39  ;;  %v4265_v19 = vshll.u32 %v4021_v35, 16  ;;  %v6485_v34 = vadd.f32 %v9739_v57, %v9323_v25  ;;  %v4257_v22 = vrot.slane %v4255_v51, 6  ;;  %v3259_v10 = vld [vmem:[#allocation2 + $0x8c] sm:$0x1] }
 0x266   : > { %v2968_v9 = vsel %vm9062_vm8, %v2959_v63, %v2967_v44  ;;  %3983 = vst [vmem:[#allocation3 + $0x280] sm:$0xf] %v3884_v32  ;;  %v7615_v59 = vld [vmem:[#allocation3 + $0x258] sm:$0xf]  ;;  %v4254_v60 = vrot.slane %v4252_v47, 5  ;;  %v4249_v39 = vor.u32 %v4248_v3, %v4245_v7  ;;  %v4264_v0 = vrot.slane %v4262_v5, 5 }
 0x267   : > { %3214 = vst [vmem:[#allocation3 + $0x278] sm:$0xf] %v2968_v9  ;;  %v8258_v41 = vld [vmem:[#allocation3 + $0x278] sm:$0xf0]  ;;  %v4267_v53 = vrot.slane %v4265_v19, 6  ;;  %v9761_v11 = vpop.f32.mrf.mxu0  ;;  %v3495_v61 = vshrl.u32 %v3257_v6, 16  ;;  %v6487_v25 = vadd.f32 %v6486_v14, %v9338_v42 }
 0x268   : > { %10258 = vst [vmem:[#allocation51_spill] sm:$0xff] %v9761_v11  ;;  %v7616_v43 = vor.u32 %v8258_v41, %v7615_v59  ;;  %v4258_v63 = vor.u32 %v4257_v22, %v4254_v60  ;;  %v3498_v35 = vshll.u32 %v3257_v6, 16  ;;  %v2696_v32 = vld [vmem:[#allocation2 + $0x78] sm:$0xe]  ;;  %v4250_v1 = vrot.slane %v4249_v39, 4 }
 0x269   : > { %v4268_v4 = vor.u32 %v4267_v53, %v4264_v0  ;;  %v3497_v57 = vrot.slane %v3495_v61, 4  ;;  %v3504_v9 = vshll.u32 %v3258_v55, 16  ;;  %v3508_v3 = vshrl.u32 %v3258_v55, 16  ;;  %v2697_v19 = vld [vmem:[#allocation2 + $0x7c] sm:$0xf] }
 0x26a   : > { %6612 = vmatmul.bf16.gmra.mxu2 %v7616_v43  ;;  %v4260_v51 = vrot.slane %v4258_v63, 4  ;;  %v3500_v7 = vrot.slane %v3498_v35, 5  ;;  %v6574_v59 = vadd.f32 %v9741_v48, %v6485_v34  ;;  %v8253_v60 = vld [vmem:[#allocation3 + $0x254] sm:$0xf]  ;;  %v4259_v6 = vsel %vm9062_vm8, %v4250_v1, %v4258_v63  ;;  %v2698_v41 = vld [vmem:[#allocation2 + $0x80] sm:$0x3] }
 0x26b   : > { %v6662_v44 = vpop.f32.mrf.mxu3  ;;  %v3514_v22 = vshll.u32 %v3259_v10, 16  ;;  %v2970_v39 = vshrl.u32 %v2696_v32, 16  ;;  %4540 = vst [vmem:[#allocation3 + $0x218] sm:$0xf] %v4259_v6  ;;  %v3506_v53 = vrot.slane %v3504_v9, 5  ;;  %v3510_v61 = vrot.slane %v3508_v3, 4  ;;  %v6578_v10 = vpop.f32.mrf.mxu2 }
 0x26c   : > { %v8254_v47 = vld [vmem:[#allocation3 + $0x25c] sm:$0xf]  ;;  %v6489_v5 = vpop.f32.mrf.mxu1  ;;  %v4269_v42 = vsel %vm9062_vm8, %v4260_v51, %v4268_v4  ;;  %v3501_v14 = vor.u32 %v3500_v7, %v3497_v57  ;;  %v9769_v35 = vadd.f32 %v6575_v24, %v6487_v25  ;;  %v2973_v30 = vshll.u32 %v2696_v32, 16  ;;  %v3754_v49 = vld [vmem:[#allocation2 + $0x88] sm:$0xf] }
 0x26d   : > { %v7617_v0 = vld [vmem:[#allocation3 + $0x27c] sm:$0xf0]  ;;  %4541 = vst [vmem:[#allocation3 + $0x23c] sm:$0xf] %v4269_v42  ;;  %v3516_v48 = vrot.slane %v3514_v22, 5  ;;  %v2972_v34 = vrot.slane %v2970_v39, 5  ;;  %v3511_v63 = vor.u32 %v3510_v61, %v3506_v53 }
 0x26e   : > { %v7609_v55 = vld [vmem:[#allocation3 + $0x274] sm:$0xf0]  ;;  %v7620_v43 = vor.u32 %v8254_v47, %v7617_v0  ;;  %v3502_v1 = vrot.slane %v3501_v14, 4  ;;  %v2979_v4 = vshrl.u32 %v2697_v19, 16  ;;  %v2982_v51 = vshll.u32 %v2697_v19, 16 }
 0x26f   : > { %v7612_v11 = vor.u32 %v8253_v60, %v7609_v55  ;;  %v2989_v57 = vshrl.u32 %v2698_v41, 16  ;;  %v2992_v7 = vshll.u32 %v2698_v41, 16  ;;  %v3755_v9 = vld [vmem:[#allocation2 + $0x8c] sm:$0x1]  ;;  %v6663_v47 = vadd.f32 %v6662_v44, %v6574_v59  ;;  %v9776_v60 = vld [vmem:[%s10202_s2] ss:$0 sm:$0xff] }
 0x270   : > { %6701 = vmatmul.bf16.gmra.mxu3 %v7620_v43  ;;  %v3507_v24 = vsel %vm8852_vm2, %v3502_v1, %v3506_v53  ;;  %v3512_v25 = vrot.slane %v3511_v63, 4  ;;  %v2975_v32 = vrot.slane %v2973_v30, 6  ;;  %v4022_v6 = vld [vmem:[#allocation2 + $0x78] sm:$0xe]  ;;  %v2981_v19 = vrot.slane %v2979_v4, 5 }
 0x271   : > { %6523 = vmatmul.bf16.gmra.mxu1 %v7612_v11  ;;  %3712 = vst [vmem:[#allocation3 + $0x2a0] sm:$0xf] %v3507_v24  ;;  %v2984_v39 = vrot.slane %v2982_v51, 6  ;;  %v2991_v41 = vrot.slane %v2989_v57, 5  ;;  %v7294_v0 = vrot.slane %v3753_v27, 9  ;;  %v2994_v14 = vrot.slane %v2992_v7, 6 }
 0x272   : > { %v3517_v11 = vsel %vm8852_vm2, %v3512_v25, %v3516_v48  ;;  %v9783_v59 = vld [vmem:[%s10203_s3] ss:$0 sm:$0xff]  ;;  %v2976_v42 = vor.u32 %v2975_v32, %v2972_v34  ;;  %v7587_v53 = vld [vmem:[#allocation3 + $0x218] sm:$0xf]  ;;  %v6490_v30 = vadd.f32 %v6489_v5, %v9350_v17  ;;  %v3887_v55 = vrot.slane %v3754_v49, 5 }
 0x273   : > { %v6664_v3 = vpop.f32.mrf.mxu3  ;;  %v6751_v22 = vpop.f32.mrf.mxu0  ;;  %3713 = vst [vmem:[#allocation3 + $0x2c4] sm:$0xf] %v3517_v11  ;;  %v2985_v61 = vor.u32 %v2984_v39, %v2981_v19  ;;  %v3890_v43 = vrot.slane %v3755_v9, 5  ;;  %v2995_v48 = vor.u32 %v2994_v14, %v2991_v41  ;;  %v4023_v4 = vld [vmem:[#allocation2 + $0x7c] sm:$0xf]  ;;  %v4271_v51 = vshrl.u32 %v4022_v6, 16 }
 0x274   : > { %v6752_v44 = vadd.f32 %v6751_v22, %v6663_v47  ;;  %v8250_v1 = vld [vmem:[#allocation3 + $0x238] sm:$0xf0]  ;;  %v2977_v63 = vrot.slane %v2976_v42, 4  ;;  %v6491_v57 = vpop.f32.mrf.mxu1  ;;  %v3888_v34 = vsel %vm9071_vm11, %v7294_v0, %v3887_v55  ;;  %v3889_v7 = vrot.slane %v3887_v55, 4  ;;  %v4024_v49 = vld [vmem:[#allocation2 + $0x80] sm:$0x3] }
 0x275   : > { %v7588_v47 = vor.u32 %v8250_v1, %v7587_v53  ;;  %v2987_v24 = vrot.slane %v2985_v61, 4  ;;  %3984 = vst [vmem:[#allocation3 + $0x2a4] sm:$0xf] %v3888_v34  ;;  %v4273_v5 = vrot.slane %v4271_v51, 5  ;;  %v4274_v9 = vshll.u32 %v4022_v6, 16  ;;  %v6580_v53 = vpop.f32.mrf.mxu2 }
 0x276   : > { %v6835_v27 = vmul.f32 %v9776_v60, %v6752_v44  ;;  %v2986_v17 = vsel %vm9062_vm8, %v2977_v63, %v2985_v61  ;;  %v3891_v22 = vsel %vm9071_vm11, %v3889_v7, %v3890_v43  ;;  %v4280_v19 = vshrl.u32 %v4023_v4, 16  ;;  %v3260_v41 = vld [vmem:[#allocation2 + $0x90] sm:$0xf]  ;;  %v3262_v34 = vld [vmem:[#allocation2 + $0x98] sm:$0x1] }
 0x277   : > { %6785 = vmatmul.bf16.gmra.mxu0 %v7588_v47  ;;  %v2996_v32 = vsel %vm9062_vm8, %v2987_v24, %v2995_v48  ;;  %3215 = vst [vmem:[#allocation3 + $0x29c] sm:$0xf] %v2986_v17  ;;  %v4283_v39 = vshll.u32 %v4023_v4, 16  ;;  %v6665_v0 = vadd.f32 %v6664_v3, %v9769_v35  ;;  %v6579_v44 = vadd.f32 %v6578_v10, %v6490_v30  ;;  %v3261_v35 = vld [vmem:[#allocation2 + $0x94] sm:$0xf] }
 0x278   : > { %v9790_v25 = vadd.f32 %v9783_v59, %v6835_v27  ;;  %v7651_v11 = vld [vmem:[#allocation3 + $0x2a0] sm:$0xf]  ;;  %3216 = vst [vmem:[#allocation3 + $0x2c0] sm:$0xf] %v2996_v32  ;;  %v4276_v42 = vrot.slane %v4274_v9, 6  ;;  %v6492_v6 = vadd.f32 %v6491_v57, %v9366_v40  ;;  %v4282_v61 = vrot.slane %v4280_v19, 5 }
 0x279   : > { %3985 = vst [vmem:[#allocation3 + $0x2c8] sm:$0xf] %v3891_v22  ;;  %v4285_v55 = vrot.slane %v4283_v39, 6  ;;  %v4290_v1 = vshrl.u32 %v4024_v49, 16  ;;  %v4293_v27 = vshll.u32 %v4024_v49, 16  ;;  %v3519_v3 = vshrl.u32 %v3260_v41, 16 }
 0x27a   : > { %v8267_v43 = vld [vmem:[#allocation3 + $0x2c0] sm:$0xf0]  ;;  %v4277_v4 = vor.u32 %v4276_v42, %v4273_v5  ;;  %v3522_v17 = vshll.u32 %v3260_v41, 16  ;;  %v3528_v32 = vshll.u32 %v3261_v35, 16  ;;  %v3532_v22 = vshrl.u32 %v3261_v35, 16 }
 0x27b   : > { %v6667_v14 = vpop.f32.mrf.mxu3  ;;  %v6753_v63 = vpop.f32.mrf.mxu0  ;;  %v7652_v10 = vor.u32 %v8267_v43, %v7651_v11  ;;  %v4286_v30 = vor.u32 %v4285_v55, %v4282_v61  ;;  %v4292_v47 = vrot.slane %v4290_v1, 5  ;;  %v4295_v24 = vrot.slane %v4293_v27, 6  ;;  %v2699_v19 = vld [vmem:[#allocation2 + $0x84] sm:$0xe]  ;;  %v2700_v5 = vld [vmem:[#allocation2 + $0x88] sm:$0xf] }
 0x27c   : > { %v6754_v51 = vadd.f32 %v6753_v63, %v6665_v0  ;;  %v4278_v40 = vrot.slane %v4277_v4, 4  ;;  %v3521_v7 = vrot.slane %v3519_v3, 4  ;;  %v8263_v0 = vld [vmem:[#allocation3 + $0x2a4] sm:$0xf]  ;;  %v3524_v61 = vrot.slane %v3522_v17, 5 }
 0x27d   : > { %6617 = vmatmul.bf16.gmra.mxu2 %v7652_v10  ;;  %v4288_v49 = vrot.slane %v4286_v30, 4  ;;  %v4296_v9 = vor.u32 %v4295_v24, %v4292_v47  ;;  %v3538_v55 = vshll.u32 %v3262_v34, 16  ;;  %v9807_v1 = vpop.f32.mrf.mxu1  ;;  %v3530_v63 = vrot.slane %v3528_v32, 5  ;;  %v2701_v47 = vld [vmem:[#allocation2 + $0x8c] sm:$0x3] }
 0x27e   : > { %v6836_v57 = vmul.f32 %v9776_v60, %v6754_v51  ;;  %v8262_v39 = vld [vmem:[#allocation3 + $0x29c] sm:$0xf]  ;;  %v4287_v11 = vsel %vm9062_vm8, %v4278_v40, %v4286_v30  ;;  %v3534_v43 = vrot.slane %v3532_v22, 4  ;;  %v6668_v35 = vadd.f32 %v6667_v14, %v6579_v44  ;;  %v9812_v48 = vpop.f32.mrf.mxu2  ;;  %v4026_v34 = vld [vmem:[#allocation2 + $0x88] sm:$0xf] }
 0x27f   : > { %v7645_v41 = vld [vmem:[#allocation3 + $0x2bc] sm:$0xf0]  ;;  %v4297_v27 = vsel %vm9062_vm8, %v4288_v49, %v4296_v9  ;;  %4542 = vst [vmem:[#allocation3 + $0x260] sm:$0xf] %v4287_v11  ;;  %v6581_v3 = vadd.f32 %v6580_v53, %v6492_v6  ;;  %v3525_v30 = vor.u32 %v3524_v61, %v3521_v7  ;;  %v2998_v49 = vshrl.u32 %v2699_v19, 16 }
 0x280   : > { %v9805_v42 = vadd.f32 %v9783_v59, %v6836_v57  ;;  %v7648_v4 = vor.u32 %v8262_v39, %v7645_v41  ;;  %v7653_v51 = vld [vmem:[#allocation3 + $0x2c4] sm:$0xf0]  ;;  %4543 = vst [vmem:[#allocation3 + $0x284] sm:$0xf] %v4297_v27  ;;  %v3535_v40 = vor.u32 %v3534_v43, %v3530_v63  ;;  %v3540_v57 = vrot.slane %v3538_v55, 5 }
 0x281   : > { %v7656_v24 = vor.u32 %v8263_v0, %v7653_v51  ;;  %v3526_v17 = vrot.slane %v3525_v30, 4  ;;  %v3001_v9 = vshll.u32 %v2699_v19, 16  ;;  %v3007_v32 = vshrl.u32 %v2700_v5, 16  ;;  %v3757_v22 = vld [vmem:[#allocation2 + $0x94] sm:$0xf] }
 0x282   : > { %6528 = vmatmul.bf16.gmra.mxu1 %v7648_v4  ;;  %v3536_v39 = vrot.slane %v3535_v40, 4  ;;  %v3010_v44 = vshll.u32 %v2700_v5, 16  ;;  %v3017_v14 = vshrl.u32 %v2701_v47, 16  ;;  %v3020_v6 = vshll.u32 %v2701_v47, 16  ;;  %v3756_v53 = vld [vmem:[#allocation2 + $0x90] sm:$0xe] }
 0x283   : > { %v6669_v10 = vpop.f32.mrf.mxu3  ;;  %6706 = vmatmul.bf16.gmra.mxu3 %v7656_v24  ;;  %v3531_v7 = vsel %vm8852_vm2, %v3526_v17, %v3530_v63  ;;  %v3000_v11 = vrot.slane %v2998_v49, 5  ;;  %v3003_v61 = vrot.slane %v3001_v9, 6  ;;  %v3009_v55 = vrot.slane %v3007_v32, 5  ;;  %v3758_v41 = vld [vmem:[#allocation2 + $0x98] sm:$0x1] }
 0x284   : > { %v3541_v27 = vsel %vm8852_vm2, %v3536_v39, %v3540_v57  ;;  %3714 = vst [vmem:[#allocation3 + $0x2e8] sm:$0xf] %v3531_v7  ;;  %v3012_v43 = vrot.slane %v3010_v44, 6  ;;  %v3019_v4 = vrot.slane %v3017_v14, 5  ;;  %v4025_v51 = vld [vmem:[#allocation2 + $0x84] sm:$0xe]  ;;  %v6670_v30 = vadd.f32 %v6669_v10, %v6581_v3 }
 0x285   : > { %3715 = vst [vmem:[#allocation3 + $0x30c] sm:$0xf] %v3541_v27  ;;  %v3004_v47 = vor.u32 %v3003_v61, %v3000_v11  ;;  %v3022_v24 = vrot.slane %v3020_v6, 6  ;;  %v7295_v40 = vrot.slane %v3756_v53, 9  ;;  %v3894_v9 = vrot.slane %v3757_v22, 5  ;;  %v6496_v14 = vpop.f32.mrf.mxu1 }
 0x286   : > { %v6756_v0 = vpop.f32.mrf.mxu0  ;;  %v7623_v5 = vld [vmem:[#allocation3 + $0x260] sm:$0xf]  ;;  %v3013_v49 = vor.u32 %v3012_v43, %v3009_v55  ;;  %v3897_v32 = vrot.slane %v3758_v41, 5  ;;  %v4027_v7 = vld [vmem:[#allocation2 + $0x8c] sm:$0x3]  ;;  %v4302_v61 = vshll.u32 %v4025_v51, 16 }
 0x287   : > { %v6757_v19 = vadd.f32 %v6756_v0, %v6668_v35  ;;  %v8259_v63 = vld [vmem:[#allocation3 + $0x280] sm:$0xf0]  ;;  %v3005_v57 = vrot.slane %v3004_v47, 4  ;;  %v3023_v39 = vor.u32 %v3022_v24, %v3019_v4  ;;  %v4299_v35 = vshrl.u32 %v4025_v51, 16  ;;  %v3264_v4 = vld [vmem:[#allocation2 + $0xa0] sm:$0xf]  ;;  %v6585_v51 = vpop.f32.mrf.mxu2 }
 0x288   : > { %v7624_v33 = vor.u32 %v8259_v63, %v7623_v5  ;;  %v3015_v10 = vrot.slane %v3013_v49, 4  ;;  %v3895_v6 = vsel %vm9071_vm11, %v7295_v40, %v3894_v9  ;;  %v3896_v53 = vrot.slane %v3894_v9, 4  ;;  %v3263_v0 = vld [vmem:[#allocation2 + $0x9c] sm:$0xf] }
 0x289   : > { %v6837_v17 = vmul.f32 %v9776_v60, %v6757_v19  ;;  %v3014_v22 = vsel %vm9062_vm8, %v3005_v57, %v3013_v49  ;;  %3986 = vst [vmem:[#allocation3 + $0x2ec] sm:$0xf] %v3895_v6  ;;  %v4301_v11 = vrot.slane %v4299_v35, 5  ;;  %v4308_v55 = vshrl.u32 %v4026_v34, 16 }
 0x28a   : > { %6790 = vmatmul.bf16.gmra.mxu0 %v7624_v33  ;;  %v3024_v27 = vsel %vm9062_vm8, %v3015_v10, %v3023_v39  ;;  %3217 = vst [vmem:[#allocation3 + $0x2e4] sm:$0xf] %v3014_v22  ;;  %v3898_v19 = vsel %vm9071_vm11, %v3896_v53, %v3897_v32  ;;  %v4311_v43 = vshll.u32 %v4026_v34, 16  ;;  %v6495_v33 = vadd.f32 %v9807_v1, %v9383_v26 }
 0x28b   : > { %v9819_v44 = vpop.f32.mrf.mxu3  ;;  %v6873_v3 = vadd.f32 %v9783_v59, %v6837_v17  ;;  %v7687_v5 = vld [vmem:[#allocation3 + $0x2e8] sm:$0xf]  ;;  %3218 = vst [vmem:[#allocation3 + $0x308] sm:$0xf] %v3024_v27  ;;  %v4304_v47 = vrot.slane %v4302_v61, 6  ;;  %v4310_v24 = vrot.slane %v4308_v55, 5  ;;  %v6497_v1 = vadd.f32 %v6496_v14, %v9400_v23 }
 0x28c   : > { %v8276_v63 = vld [vmem:[#allocation3 + $0x308] sm:$0xf0]  ;;  %3987 = vst [vmem:[#allocation3 + $0x310] sm:$0xf] %v3898_v19  ;;  %v4313_v17 = vrot.slane %v4311_v43, 6  ;;  %v4318_v49 = vshrl.u32 %v4027_v7, 16 }
 0x28d   : > { %v6905_v41 = vmax.f32 %v6873_v3, 0.0  ;;  %v10259_v57 = vmax.f32 %v9790_v25, 0.0  ;;  %v7688_v34 = vor.u32 %v8276_v63, %v7687_v5  ;;  %v4305_v32 = vor.u32 %v4304_v47, %v4301_v11  ;;  %v3265_v55 = vld [vmem:[#allocation2 + $0xa4] sm:$0x1]  ;;  %v2703_v43 = vld [vmem:[#allocation2 + $0x94] sm:$0xf] }
 0x28e   : > { %v6758_v40 = vpop.f32.mrf.mxu0  ;;  %v4321_v35 = vshll.u32 %v4027_v7, 16  ;;  %v3543_v3 = vshrl.u32 %v3263_v0, 16  ;;  %v4314_v10 = vor.u32 %v4313_v17, %v4310_v24  ;;  %v4320_v26 = vrot.slane %v4318_v49, 5  ;;  %v2702_v7 = vld [vmem:[#allocation2 + $0x90] sm:$0xe] }
 0x28f   : > { %v6759_v9 = vadd.f32 %v6758_v40, %v6670_v30  ;;  %v9834_v39 = vadd.f32 %v6905_v41, %v10259_v57  ;;  %v3546_v6 = vshll.u32 %v3263_v0, 16  ;;  %6622 = vmatmul.bf16.gmra.mxu2 %v7688_v34  ;;  %v4306_v53 = vrot.slane %v4305_v32, 4 }
 0x290   : > { %v4323_v22 = vrot.slane %v4321_v35, 6  ;;  %v3545_v27 = vrot.slane %v3543_v3, 4  ;;  %v3552_v30 = vshll.u32 %v3264_v4, 16  ;;  %v6584_v25 = vadd.f32 %v9812_v48, %v6495_v33  ;;  %v8272_v47 = vld [vmem:[#allocation3 + $0x2ec] sm:$0xf] }
 0x291   : > { %v4316_v41 = vrot.slane %v4314_v10, 4  ;;  %v6838_v19 = vmul.f32 %v9776_v60, %v6759_v9  ;;  %v3548_v11 = vrot.slane %v3546_v6, 5  ;;  %v8271_v5 = vld [vmem:[#allocation3 + $0x2e4] sm:$0xf]  ;;  %v4315_v23 = vsel %vm9062_vm8, %v4306_v53, %v4314_v10  ;;  %v9841_v40 = vpop.f32.mrf.mxu1  ;;  %v2704_v35 = vld [vmem:[#allocation2 + $0x98] sm:$0x3] }
 0x292   : > { %v4324_v14 = vor.u32 %v4323_v22, %v4320_v26  ;;  %v3554_v0 = vrot.slane %v3552_v30, 5  ;;  %v3556_v24 = vshrl.u32 %v3264_v4, 16  ;;  %v7681_v63 = vld [vmem:[#allocation3 + $0x304] sm:$0xf0]  ;;  %4544 = vst [vmem:[#allocation3 + $0x2a8] sm:$0xf] %v4315_v23  ;;  %v6673_v48 = vadd.f32 %v9819_v44, %v6584_v25 }
 0x293   : > { %v6674_v61 = vpop.f32.mrf.mxu3  ;;  %v6586_v33 = vadd.f32 %v6585_v51, %v6497_v1  ;;  %v3549_v17 = vor.u32 %v3548_v11, %v3545_v27  ;;  %v3562_v49 = vshll.u32 %v3265_v55, 16  ;;  %v7684_v9 = vor.u32 %v8271_v5, %v7681_v63  ;;  %v7689_v57 = vld [vmem:[#allocation3 + $0x30c] sm:$0xf0]  ;;  %v3759_v53 = vld [vmem:[#allocation2 + $0x9c] sm:$0xe]  ;;  %v9849_v1 = vpop.f32.mrf.mxu2 }
 0x294   : > { %v4325_v34 = vsel %vm9062_vm8, %v4316_v41, %v4324_v14  ;;  %v3558_v32 = vrot.slane %v3556_v24, 4  ;;  %v3026_v3 = vshrl.u32 %v2702_v7, 16  ;;  %v7692_v10 = vor.u32 %v8272_v47, %v7689_v57  ;;  %v3760_v30 = vld [vmem:[#allocation2 + $0xa0] sm:$0xf]  ;;  %v3761_v5 = vld [vmem:[#allocation2 + $0xa4] sm:$0x1] }
 0x295   : > { %4545 = vst [vmem:[#allocation3 + $0x2cc] sm:$0xf] %v4325_v34  ;;  %v9847_v4 = vadd.f32 %v9783_v59, %v6838_v19  ;;  %v3550_v26 = vrot.slane %v3549_v17, 4  ;;  %v3564_v6 = vrot.slane %v3562_v49, 5  ;;  %6533 = vmatmul.bf16.gmra.mxu1 %v7684_v9  ;;  %v3029_v55 = vshll.u32 %v2702_v7, 16 }
 0x296   : > { %v3559_v44 = vor.u32 %v3558_v32, %v3554_v0  ;;  %v3028_v22 = vrot.slane %v3026_v3, 5  ;;  %v3035_v27 = vshrl.u32 %v2703_v43, 16  ;;  %6711 = vmatmul.bf16.gmra.mxu3 %v7692_v10  ;;  %v9851_v25 = vadd.f32 %v6674_v61, %v6586_v33  ;;  %v4028_v47 = vld [vmem:[#allocation2 + $0x90] sm:$0xe]  ;;  %v4029_v32 = vld [vmem:[#allocation2 + $0x94] sm:$0xf] }
 0x297   : > { %v6761_v51 = vpop.f32.mrf.mxu0  ;;  %v3555_v41 = vsel %vm8852_vm2, %v3550_v26, %v3554_v0  ;;  %v3038_v19 = vshll.u32 %v2703_v43, 16  ;;  %v3045_v11 = vshrl.u32 %v2704_v35, 16  ;;  %v3031_v14 = vrot.slane %v3029_v55, 6 }
 0x298   : > { %v3560_v23 = vrot.slane %v3559_v44, 4  ;;  %3716 = vst [vmem:[#allocation3 + $0x330] sm:$0xf] %v3555_v41  ;;  %v3037_v24 = vrot.slane %v3035_v27, 5  ;;  %v3048_v63 = vshll.u32 %v2704_v35, 16  ;;  %v6762_v7 = vadd.f32 %v6761_v51, %v6673_v48 }
 0x299   : > { %v3040_v49 = vrot.slane %v3038_v19, 6  ;;  %v3047_v9 = vrot.slane %v3045_v11, 5  ;;  %v7296_v57 = vrot.slane %v3759_v53, 9  ;;  %v7659_v61 = vld [vmem:[#allocation3 + $0x2a8] sm:$0xf]  ;;  %v3032_v0 = vor.u32 %v3031_v14, %v3028_v22  ;;  %v6501_v41 = vpop.f32.mrf.mxu1 }
 0x29a   : > { %v3565_v33 = vsel %vm8852_vm2, %v3560_v23, %v3564_v6  ;;  %v3050_v43 = vrot.slane %v3048_v63, 6  ;;  %v3901_v34 = vrot.slane %v3760_v30, 5  ;;  %v6906_v3 = vmax.f32 %v9847_v4, 0.0  ;;  %v4030_v27 = vld [vmem:[#allocation2 + $0x98] sm:$0x3] }
 0x29b   : > { %v9855_v17 = vpop.f32.mrf.mxu3  ;;  %3717 = vst [vmem:[#allocation3 + $0x354] sm:$0xf] %v3565_v33  ;;  %v3041_v10 = vor.u32 %v3040_v49, %v3037_v24  ;;  %v3904_v26 = vrot.slane %v3761_v5, 5  ;;  %v4327_v35 = vshrl.u32 %v4028_v47, 16  ;;  %v3033_v55 = vrot.slane %v3032_v0, 4 }
 0x29c   : > { %v8268_v44 = vld [vmem:[#allocation3 + $0x2c8] sm:$0xf0]  ;;  %v3051_v48 = vor.u32 %v3050_v43, %v3047_v9  ;;  %v3902_v53 = vsel %vm9071_vm11, %v7296_v57, %v3901_v34  ;;  %v3903_v51 = vrot.slane %v3901_v34, 4  ;;  %v6839_v22 = vmul.f32 %v9776_v60, %v6762_v7  ;;  %v3266_v24 = vld [vmem:[#allocation2 + $0xa8] sm:$0xf]  ;;  %v6590_v34 = vpop.f32.mrf.mxu2 }
 0x29d   : > { %v7660_v6 = vor.u32 %v8268_v44, %v7659_v61  ;;  %v3043_v30 = vrot.slane %v3041_v10, 4  ;;  %3988 = vst [vmem:[#allocation3 + $0x334] sm:$0xf] %v3902_v53  ;;  %v4329_v19 = vrot.slane %v4327_v35, 5  ;;  %v3042_v4 = vsel %vm9062_vm8, %v3033_v55, %v3041_v10 }
 0x29e   : > { %v3905_v11 = vsel %vm9071_vm11, %v3903_v51, %v3904_v26  ;;  %v4330_v5 = vshll.u32 %v4028_v47, 16  ;;  %v4336_v23 = vshrl.u32 %v4029_v32, 16  ;;  %3219 = vst [vmem:[#allocation3 + $0x32c] sm:$0xf] %v3042_v4  ;;  %v4339_v7 = vshll.u32 %v4029_v32, 16 }
 0x29f   : > { %v6763_v14 = vpop.f32.mrf.mxu0  ;;  %6795 = vmatmul.bf16.gmra.mxu0 %v7660_v6  ;;  %v7723_v63 = vld [vmem:[#allocation3 + $0x330] sm:$0xf]  ;;  %v3052_v49 = vsel %vm9062_vm8, %v3043_v30, %v3051_v48  ;;  %v4346_v9 = vshrl.u32 %v4030_v27, 16  ;;  %v10260_v57 = vmax.f32 %v9805_v42, 0.0  ;;  %v9873_v33 = vadd.f32 %v9482_v2, %v9465_v15  ;;  %3989 = vst [vmem:[#allocation3 + $0x358] sm:$0xf] %v3905_v11 }
 0x2a0   : > { %3220 = vst [vmem:[#allocation3 + $0x350] sm:$0xf] %v3052_v49  ;;  %v4332_v47 = vrot.slane %v4330_v5, 6  ;;  %v4338_v0 = vrot.slane %v4336_v23, 5  ;;  %v4349_v43 = vshll.u32 %v4030_v27, 16  ;;  %v6500_v10 = vadd.f32 %v9841_v40, %v9412_v28 }
 0x2a1   : > { %v6936_v61 = vadd.f32 %v6906_v3, %v10260_v57  ;;  %v4341_v26 = vrot.slane %v4339_v7, 6  ;;  %v4348_v35 = vrot.slane %v4346_v9, 5  ;;  %v6764_v32 = vadd.f32 %v6763_v14, %v9851_v25  ;;  %v3267_v42 = vld [vmem:[#allocation2 + $0xac] sm:$0xf]  ;;  %v3268_v40 = vld [vmem:[#allocation2 + $0xb0] sm:$0x1] }
 0x2a2   : > { %v8285_v3 = vld [vmem:[#allocation3 + $0x350] sm:$0xf0]  ;;  %v4333_v44 = vor.u32 %v4332_v47, %v4329_v19  ;;  %v4351_v55 = vrot.slane %v4349_v43, 6  ;;  %v3567_v2 = vshrl.u32 %v3266_v24, 16  ;;  %v3570_v48 = vshll.u32 %v3266_v24, 16 }
 0x2a3   : > { %6970 = vmatpush.msrb.mxu2 %v6936_v61  ;;  %v9878_v15 = vpop.f32.mrf.mxu3  ;;  %v7724_v53 = vor.u32 %v8285_v3, %v7723_v63  ;;  %v9881_v51 = vadd.f32 %v9783_v59, %v6839_v22  ;;  %v4342_v27 = vor.u32 %v4341_v26, %v4338_v0  ;;  %v6502_v28 = vadd.f32 %v6501_v41, %v9426_v58  ;;  %v2705_v14 = vld [vmem:[#allocation2 + $0x9c] sm:$0xe]  ;;  %v2706_v7 = vld [vmem:[#allocation2 + $0xa0] sm:$0xf]  ;;  %v2707_v9 = vld [vmem:[#allocation2 + $0xa4] sm:$0x3] }
 0x2a4   : > { %v4334_v6 = vrot.slane %v4333_v44, 4  ;;  %v4352_v25 = vor.u32 %v4351_v55, %v4348_v35  ;;  %v3569_v30 = vrot.slane %v3567_v2, 4  ;;  %v3572_v4 = vrot.slane %v3570_v48, 5  ;;  %v8281_v24 = vld [vmem:[#allocation3 + $0x334] sm:$0xf]  ;;  %v6504_v49 = vpop.f32.mrf.mxu1 }
 0x2a5   : > { %6971 = vmatpush.msrb.mxu2 %v9834_v39  ;;  %v6589_v19 = vadd.f32 %v9849_v1, %v6500_v10  ;;  %v4344_v11 = vrot.slane %v4342_v27, 4  ;;  %v6840_v5 = vmul.f32 %v9776_v60, %v6764_v32  ;;  %v3576_v23 = vshll.u32 %v3267_v42, 16  ;;  %v8280_v22 = vld [vmem:[#allocation3 + $0x32c] sm:$0xf] }
 0x2a6   : > { %6627 = vmatmul.bf16.gmra.mxu2 %v7724_v53  ;;  %v4343_v39 = vsel %vm9062_vm8, %v4334_v6, %v4342_v27  ;;  %v3573_v63 = vor.u32 %v3572_v4, %v3569_v30  ;;  %v3580_v58 = vshrl.u32 %v3267_v42, 16  ;;  %v3586_v41 = vshll.u32 %v3268_v40, 16  ;;  %v7725_v10 = vld [vmem:[#allocation3 + $0x354] sm:$0xf0]  ;;  %v6593_v27 = vpop.f32.mrf.mxu2  ;;  %v3762_v6 = vld [vmem:[#allocation2 + $0xa8] sm:$0xe] }
 0x2a7   : > { %v6907_v57 = vmax.f32 %v9881_v51, 0.0  ;;  %v7717_v61 = vld [vmem:[#allocation3 + $0x34c] sm:$0xf0]  ;;  %v4353_v1 = vsel %vm9062_vm8, %v4344_v11, %v4352_v25  ;;  %4546 = vst [vmem:[#allocation3 + $0x2f0] sm:$0xf] %v4343_v39  ;;  %v6678_v47 = vadd.f32 %v9855_v17, %v6589_v19  ;;  %v3578_v0 = vrot.slane %v3576_v23, 5 }
 0x2a8   : > { %v7720_v43 = vor.u32 %v8280_v22, %v7717_v61  ;;  %4547 = vst [vmem:[#allocation3 + $0x314] sm:$0xf] %v4353_v1  ;;  %v6591_v26 = vadd.f32 %v6590_v34, %v6502_v28  ;;  %v3574_v35 = vrot.slane %v3573_v63, 4  ;;  %v3582_v32 = vrot.slane %v3580_v58, 4  ;;  %v3763_v25 = vld [vmem:[#allocation2 + $0xac] sm:$0xf] }
 0x2a9   : > { %v7728_v42 = vor.u32 %v8281_v24, %v7725_v10  ;;  %v9894_v3 = vadd.f32 %v9783_v59, %v6840_v5  ;;  %v3588_v44 = vrot.slane %v3586_v41, 5  ;;  %v3054_v2 = vshrl.u32 %v2705_v14, 16  ;;  %v3764_v22 = vld [vmem:[#allocation2 + $0xb0] sm:$0x1]  ;;  %v4031_v41 = vld [vmem:[#allocation2 + $0x9c] sm:$0xe] }
 0x2aa   : > { %6538 = vmatmul.bf16.gmra.mxu1 %v7720_v43  ;;  %v3579_v48 = vsel %vm8852_vm2, %v3574_v35, %v3578_v0  ;;  %v3583_v53 = vor.u32 %v3582_v32, %v3578_v0  ;;  %v3057_v40 = vshll.u32 %v2705_v14, 16  ;;  %v3063_v28 = vshrl.u32 %v2706_v7, 16  ;;  %v4032_v43 = vld [vmem:[#allocation2 + $0xa0] sm:$0xf] }
 0x2ab   : > { %6716 = vmatmul.bf16.gmra.mxu3 %v7728_v42  ;;  %3718 = vst [vmem:[#allocation3 + $0x378] sm:$0xf] %v3579_v48  ;;  %v3056_v34 = vrot.slane %v3054_v2, 5  ;;  %v3066_v30 = vshll.u32 %v2706_v7, 16  ;;  %v3073_v4 = vshrl.u32 %v2707_v9, 16  ;;  %v3076_v23 = vshll.u32 %v2707_v9, 16  ;;  %v9899_v24 = vpop.f32.mrf.mxu3 }
 0x2ac   : > { %v6766_v55 = vpop.f32.mrf.mxu0  ;;  %v3584_v19 = vrot.slane %v3583_v53, 4  ;;  %v3059_v5 = vrot.slane %v3057_v40, 6  ;;  %v3065_v39 = vrot.slane %v3063_v28, 5  ;;  %v7297_v14 = vrot.slane %v3762_v6, 9  ;;  %v4033_v40 = vld [vmem:[#allocation2 + $0xa4] sm:$0x3] }
 0x2ad   : > { %v6767_v17 = vadd.f32 %v6766_v55, %v6678_v47  ;;  %v3068_v63 = vrot.slane %v3066_v30, 6  ;;  %v3075_v58 = vrot.slane %v3073_v4, 5  ;;  %v6505_v7 = vadd.f32 %v6504_v49, %v9443_v45  ;;  %v3269_v30 = vld [vmem:[#allocation2 + $0xb4] sm:$0xf] }
 0x2ae   : > { %v7695_v61 = vld [vmem:[#allocation3 + $0x2f0] sm:$0xf]  ;;  %v3589_v1 = vsel %vm8852_vm2, %v3584_v19, %v3588_v44  ;;  %v3060_v47 = vor.u32 %v3059_v5, %v3056_v34  ;;  %v3078_v0 = vrot.slane %v3076_v23, 6  ;;  %v6680_v9 = vadd.f32 %v9878_v15, %v6591_v26 }
 0x2af   : > { %v6841_v11 = vmul.f32 %v9776_v60, %v6767_v17  ;;  %v8277_v10 = vld [vmem:[#allocation3 + $0x310] sm:$0xf0]  ;;  %3719 = vst [vmem:[#allocation3 + $0x39c] sm:$0xf] %v3589_v1  ;;  %v3069_v35 = vor.u32 %v3068_v63, %v3065_v39  ;;  %v3908_v32 = vrot.slane %v3763_v25, 5  ;;  %v3911_v42 = vrot.slane %v3764_v22, 5  ;;  %v6506_v17 = vpop.f32.mrf.mxu1 }
 0x2b0   : > { %v7696_v55 = vor.u32 %v8277_v10, %v7695_v61  ;;  %v3061_v48 = vrot.slane %v3060_v47, 4  ;;  %v3079_v53 = vor.u32 %v3078_v0, %v3075_v58  ;;  %v4355_v6 = vshrl.u32 %v4031_v41, 16  ;;  %v6595_v58 = vpop.f32.mrf.mxu2 }
 0x2b1   : > { %v9906_v2 = vadd.f32 %v9783_v59, %v6841_v11  ;;  %v3071_v44 = vrot.slane %v3069_v35, 4  ;;  %v3909_v45 = vsel %vm9071_vm11, %v7297_v14, %v3908_v32  ;;  %v3910_v49 = vrot.slane %v3908_v32, 4  ;;  %v3270_v14 = vld [vmem:[#allocation2 + $0xb8] sm:$0xf] }
 0x2b2   : > { %6800 = vmatmul.bf16.gmra.mxu0 %v7696_v55  ;;  %v6594_v15 = vadd.f32 %v6593_v27, %v6505_v7  ;;  %v3070_v26 = vsel %vm9062_vm8, %v3061_v48, %v3069_v35  ;;  %3990 = vst [vmem:[#allocation3 + $0x37c] sm:$0xf] %v3909_v45  ;;  %v4358_v25 = vshll.u32 %v4031_v41, 16  ;;  %v4364_v34 = vshrl.u32 %v4032_v43, 16  ;;  %v7759_v4 = vld [vmem:[#allocation3 + $0x378] sm:$0xf] }
 0x2b3   : > { %v3080_v19 = vsel %vm9062_vm8, %v3071_v44, %v3079_v53  ;;  %3221 = vst [vmem:[#allocation3 + $0x374] sm:$0xf] %v3070_v26  ;;  %v3912_v11 = vsel %vm9071_vm11, %v3910_v49, %v3911_v42  ;;  %v4357_v5 = vrot.slane %v4355_v6, 5  ;;  %v4367_v23 = vshll.u32 %v4032_v43, 16  ;;  %v9917_v32 = vpop.f32.mrf.mxu3  ;;  %v3271_v44 = vld [vmem:[#allocation2 + $0xbc] sm:$0x1] }
 0x2b4   : > { %v6768_v28 = vpop.f32.mrf.mxu0  ;;  %3222 = vst [vmem:[#allocation3 + $0x398] sm:$0xf] %v3080_v19  ;;  %v4360_v27 = vrot.slane %v4358_v25, 6  ;;  %v4366_v22 = vrot.slane %v4364_v34, 5  ;;  %v4374_v39 = vshrl.u32 %v4033_v40, 16  ;;  %v4377_v63 = vshll.u32 %v4033_v40, 16 }
 0x2b5   : > { %v6909_v41 = vmax.f32 %v9906_v2, 0.0  ;;  %3991 = vst [vmem:[#allocation3 + $0x3a0] sm:$0xf] %v3912_v11  ;;  %v4369_v61 = vrot.slane %v4367_v23, 6  ;;  %v6769_v1 = vadd.f32 %v6768_v28, %v6680_v9  ;;  %v3591_v7 = vshrl.u32 %v3269_v30, 16 }
 0x2b6   : > { %v8294_v47 = vld [vmem:[#allocation3 + $0x398] sm:$0xf0]  ;;  %v4361_v0 = vor.u32 %v4360_v27, %v4357_v5  ;;  %v4376_v10 = vrot.slane %v4374_v39, 5  ;;  %v4379_v35 = vrot.slane %v4377_v63, 6  ;;  %v3594_v43 = vshll.u32 %v3269_v30, 16 }
 0x2b7   : > { %v7760_v42 = vor.u32 %v8294_v47, %v7759_v4  ;;  %v4370_v55 = vor.u32 %v4369_v61, %v4366_v22  ;;  %v6507_v48 = vadd.f32 %v6506_v17, %v9459_v54  ;;  %v6842_v53 = vmul.f32 %v9776_v60, %v6769_v1  ;;  %v2708_v9 = vld [vmem:[#allocation2 + $0xa8] sm:$0xe]  ;;  %v2709_v28 = vld [vmem:[#allocation2 + $0xac] sm:$0xf]  ;;  %v9927_v5 = vpop.f32.mrf.mxu1  ;;  %v2710_v23 = vld [vmem:[#allocation2 + $0xb0] sm:$0x3] }
 0x2b8   : > { %v4362_v45 = vrot.slane %v4361_v0, 4  ;;  %v4380_v2 = vor.u32 %v4379_v35, %v4376_v10  ;;  %v3593_v49 = vrot.slane %v3591_v7, 4  ;;  %v3596_v40 = vrot.slane %v3594_v43, 5  ;;  %v9939_v51 = vpop.f32.mrf.mxu2 }
 0x2b9   : > { %6632 = vmatmul.bf16.gmra.mxu2 %v7760_v42  ;;  %v4372_v6 = vrot.slane %v4370_v55, 4  ;;  %v9922_v26 = vadd.f32 %v9783_v59, %v6842_v53  ;;  %v3600_v25 = vshll.u32 %v3270_v14, 16  ;;  %v3604_v34 = vshrl.u32 %v3270_v14, 16  ;;  %v8290_v54 = vld [vmem:[#allocation3 + $0x37c] sm:$0xf] }
 0x2ba   : > { %v6908_v30 = vmax.f32 %v9894_v3, 0.0  ;;  %v8289_v4 = vld [vmem:[#allocation3 + $0x374] sm:$0xf]  ;;  %v4371_v17 = vsel %vm9062_vm8, %v4362_v45, %v4370_v55  ;;  %v3597_v19 = vor.u32 %v3596_v40, %v3593_v49  ;;  %v3610_v11 = vshll.u32 %v3271_v44, 16  ;;  %v3765_v42 = vld [vmem:[#allocation2 + $0xb4] sm:$0xe] }
 0x2bb   : > { %v7753_v27 = vld [vmem:[#allocation3 + $0x394] sm:$0xf0]  ;;  %v4381_v59 = vsel %vm9062_vm8, %v4372_v6, %v4380_v2  ;;  %4548 = vst [vmem:[#allocation3 + $0x338] sm:$0xf] %v4371_v17  ;;  %v6683_v22 = vadd.f32 %v9899_v24, %v6594_v15  ;;  %v3602_v39 = vrot.slane %v3600_v25, 5  ;;  %v9934_v3 = vadd.f32 %v6909_v41, %v6907_v57 }
 0x2bc   : > { %v7756_v63 = vor.u32 %v8289_v4, %v7753_v27  ;;  %v7761_v14 = vld [vmem:[#allocation3 + $0x39c] sm:$0xf0]  ;;  %4549 = vst [vmem:[#allocation3 + $0x35c] sm:$0xf] %v4381_v59  ;;  %v6596_v61 = vadd.f32 %v6595_v58, %v6507_v48  ;;  %v3598_v1 = vrot.slane %v3597_v19, 4  ;;  %v3606_v7 = vrot.slane %v3604_v34, 4 }
 0x2bd   : > { %v6771_v47 = vpop.f32.mrf.mxu0  ;;  %v7764_v0 = vor.u32 %v8290_v54, %v7761_v14  ;;  %v6910_v10 = vmax.f32 %v9922_v26, 0.0  ;;  %v3612_v35 = vrot.slane %v3610_v11, 5  ;;  %v3082_v43 = vshrl.u32 %v2708_v9, 16  ;;  %v3766_v55 = vld [vmem:[#allocation2 + $0xb8] sm:$0xf]  ;;  %v9941_v25 = vpop.f32.mrf.mxu3 }
 0x2be   : > { %6543 = vmatmul.bf16.gmra.mxu1 %v7756_v63  ;;  %v3603_v24 = vsel %vm8852_vm2, %v3598_v1, %v3602_v39  ;;  %v3607_v15 = vor.u32 %v3606_v7, %v3602_v39  ;;  %v3085_v57 = vshll.u32 %v2708_v9, 16  ;;  %v3091_v41 = vshrl.u32 %v2709_v28, 16  ;;  %v3767_v6 = vld [vmem:[#allocation2 + $0xbc] sm:$0x1]  ;;  %v4034_v26 = vld [vmem:[#allocation2 + $0xa8] sm:$0xe] }
 0x2bf   : > { %6721 = vmatmul.bf16.gmra.mxu3 %v7764_v0  ;;  %3720 = vst [vmem:[#allocation3 + $0x3c0] sm:$0xf] %v3603_v24  ;;  %v6772_v58 = vadd.f32 %v6771_v47, %v6683_v22  ;;  %v3084_v48 = vrot.slane %v3082_v43, 5  ;;  %v3094_v53 = vshll.u32 %v2709_v28, 16  ;;  %v3101_v44 = vshrl.u32 %v2710_v23, 16  ;;  %v6511_v0 = vpop.f32.mrf.mxu1 }
 0x2c0   : > { %v3608_v45 = vrot.slane %v3607_v15, 4  ;;  %v3087_v2 = vrot.slane %v3085_v57, 6  ;;  %v3093_v49 = vrot.slane %v3091_v41, 5  ;;  %v3104_v40 = vshll.u32 %v2710_v23, 16  ;;  %v4035_v17 = vld [vmem:[#allocation2 + $0xac] sm:$0xf] }
 0x2c1   : > { %v6685_v34 = vadd.f32 %v9917_v32, %v6596_v61  ;;  %v3096_v9 = vrot.slane %v3094_v53, 6  ;;  %v3103_v4 = vrot.slane %v3101_v44, 5  ;;  %v7298_v54 = vrot.slane %v3765_v42, 9  ;;  %v4036_v22 = vld [vmem:[#allocation2 + $0xb0] sm:$0x3] }
 0x2c2   : > { %v7731_v19 = vld [vmem:[#allocation3 + $0x338] sm:$0xf]  ;;  %v3613_v11 = vsel %vm8852_vm2, %v3608_v45, %v3612_v35  ;;  %v3088_v28 = vor.u32 %v3087_v2, %v3084_v48  ;;  %v3106_v27 = vrot.slane %v3104_v40, 6  ;;  %v3915_v59 = vrot.slane %v3766_v55, 5  ;;  %v3272_v42 = vld [vmem:[#allocation2 + $0xc0] sm:$0xf] }
 0x2c3   : > { %v8286_v39 = vld [vmem:[#allocation3 + $0x358] sm:$0xf0]  ;;  %3721 = vst [vmem:[#allocation3 + $0x3e4] sm:$0xf] %v3613_v11  ;;  %v6843_v23 = vmul.f32 %v9776_v60, %v6772_v58  ;;  %v3097_v63 = vor.u32 %v3096_v9, %v3093_v49  ;;  %v3918_v14 = vrot.slane %v3767_v6, 5  ;;  %v6938_v1 = vadd.f32 %v6910_v10, %v6908_v30  ;;  %v6600_v6 = vpop.f32.mrf.mxu2 }
 0x2c4   : > { %v7732_v32 = vor.u32 %v8286_v39, %v7731_v19  ;;  %v3089_v61 = vrot.slane %v3088_v28, 4  ;;  %v3107_v7 = vor.u32 %v3106_v27, %v3103_v4  ;;  %v3916_v47 = vsel %vm9071_vm11, %v7298_v54, %v3915_v59  ;;  %v9961_v9 = vld [vmem:[%s10203_s3] ss:$0 sm:$0xff] }
 0x2c5   : > { %v3099_v43 = vrot.slane %v3097_v63, 4  ;;  %v3917_v35 = vrot.slane %v3915_v59, 4  ;;  %3992 = vst [vmem:[#allocation3 + $0x3c4] sm:$0xf] %v3916_v47  ;;  %v4383_v24 = vshrl.u32 %v4034_v26, 16  ;;  %v4386_v15 = vshll.u32 %v4034_v26, 16  ;;  %6990 = vmatpush.msra.mxu2 %v6938_v1  ;;  %v6773_v57 = vpop.f32.mrf.mxu0  ;;  %v6689_v27 = vpop.f32.mrf.mxu3 }
 0x2c6   : > { %6805 = vmatmul.bf16.gmra.mxu0 %v7732_v32  ;;  %v3098_v60 = vsel %vm9062_vm8, %v3089_v61, %v3097_v63  ;;  %v4392_v41 = vshrl.u32 %v4035_v17, 16  ;;  %v4395_v30 = vshll.u32 %v4035_v17, 16  ;;  %v4402_v10 = vshrl.u32 %v4036_v22, 16  ;;  %v7795_v55 = vld [vmem:[#allocation3 + $0x3c0] sm:$0xf] }
 0x2c7   : > { %v3108_v58 = vsel %vm9062_vm8, %v3099_v43, %v3107_v7  ;;  %3223 = vst [vmem:[#allocation3 + $0x3bc] sm:$0xf] %v3098_v60  ;;  %v3919_v48 = vsel %vm9071_vm11, %v3917_v35, %v3918_v14  ;;  %v4385_v53 = vrot.slane %v4383_v24, 5  ;;  %v4388_v44 = vrot.slane %v4386_v15, 6  ;;  %6991 = vmatpush.msra.mxu2 %v9934_v3  ;;  %v3273_v17 = vld [vmem:[#allocation2 + $0xc4] sm:$0xf] }
 0x2c8   : > { %3224 = vst [vmem:[#allocation3 + $0x3e0] sm:$0xf] %v3108_v58  ;;  %v4394_v45 = vrot.slane %v4392_v41, 5  ;;  %v4397_v2 = vrot.slane %v4395_v30, 6  ;;  %v4404_v49 = vrot.slane %v4402_v10, 5  ;;  %v4405_v40 = vshll.u32 %v4036_v22, 16  ;;  %v6514_v30 = vpop.f32.mrf.mxu1 }
 0x2c9   : > { %v6510_v26 = vadd.f32 %v9927_v5, %v9474_v37  ;;  %v9964_v4 = vadd.f32 %v9961_v9, %v6843_v23  ;;  %3993 = vst [vmem:[#allocation3 + $0x3e8] sm:$0xf] %v3919_v48  ;;  %v4389_v54 = vor.u32 %v4388_v44, %v4385_v53  ;;  %v6774_v3 = vadd.f32 %v6773_v57, %v6685_v34  ;;  %v9970_v63 = vld [vmem:[%s10202_s2] ss:$0 sm:$0xff]  ;;  %v3274_v14 = vld [vmem:[#allocation2 + $0xc8] sm:$0x1] }
 0x2ca   : > { %v8303_v19 = vld [vmem:[#allocation3 + $0x3e0] sm:$0xf0]  ;;  %v4398_v11 = vor.u32 %v4397_v2, %v4394_v45  ;;  %v4407_v28 = vrot.slane %v4405_v40, 6  ;;  %v3615_v59 = vshrl.u32 %v3272_v42, 16  ;;  %v3618_v22 = vshll.u32 %v3272_v42, 16 }
 0x2cb   : > { %v7796_v39 = vor.u32 %v8303_v19, %v7795_v55  ;;  %v4390_v37 = vrot.slane %v4389_v54, 4  ;;  %v6512_v5 = vadd.f32 %v6511_v0, %v9873_v33  ;;  %v6844_v23 = vmul.f32 %v9970_v63, %v6774_v3  ;;  %v2711_v7 = vld [vmem:[#allocation2 + $0xb4] sm:$0xe]  ;;  %v2712_v35 = vld [vmem:[#allocation2 + $0xb8] sm:$0xf]  ;;  %v9987_v19 = vpop.f32.mrf.mxu2 }
 0x2cc   : > { %v4400_v34 = vrot.slane %v4398_v11, 4  ;;  %v4408_v1 = vor.u32 %v4407_v28, %v4404_v49  ;;  %v3617_v32 = vrot.slane %v3615_v59, 4  ;;  %v3620_v61 = vrot.slane %v3618_v22, 5  ;;  %v8299_v43 = vld [vmem:[#allocation3 + $0x3c4] sm:$0xf] }
 0x2cd   : > { %6637 = vmatmul.bf16.gmra.mxu2 %v7796_v39  ;;  %v6599_v47 = vadd.f32 %v9939_v51, %v6510_v26  ;;  %v4399_v33 = vsel %vm9062_vm8, %v4390_v37, %v4398_v11  ;;  %v3624_v0 = vshll.u32 %v3273_v17, 16  ;;  %v3628_v60 = vshrl.u32 %v3273_v17, 16  ;;  %v2713_v40 = vld [vmem:[#allocation2 + $0xbc] sm:$0x3]  ;;  %v3768_v59 = vld [vmem:[#allocation2 + $0xc0] sm:$0xe] }
 0x2ce   : > { %v8298_v24 = vld [vmem:[#allocation3 + $0x3bc] sm:$0xf]  ;;  %v4409_v15 = vsel %vm9062_vm8, %v4400_v34, %v4408_v1  ;;  %4550 = vst [vmem:[#allocation3 + $0x380] sm:$0xf] %v4399_v33  ;;  %v3621_v57 = vor.u32 %v3620_v61, %v3617_v32  ;;  %v3634_v41 = vshll.u32 %v3274_v14, 16  ;;  %v6911_v10 = vmax.f32 %v9964_v4, 0.0 }
 0x2cf   : > { %v7789_v42 = vld [vmem:[#allocation3 + $0x3dc] sm:$0xf0]  ;;  %4551 = vst [vmem:[#allocation3 + $0x3a4] sm:$0xf] %v4409_v15  ;;  %v6688_v51 = vadd.f32 %v9941_v25, %v6599_v47  ;;  %v6601_v55 = vadd.f32 %v6600_v6, %v6512_v5  ;;  %v3626_v58 = vrot.slane %v3624_v0, 5  ;;  %v9981_v45 = vadd.f32 %v9961_v9, %v6844_v23  ;;  %v9989_v47 = vpop.f32.mrf.mxu3 }
 0x2d0   : > { %v6776_v48 = vpop.f32.mrf.mxu0  ;;  %v7792_v53 = vor.u32 %v8298_v24, %v7789_v42  ;;  %v7797_v44 = vld [vmem:[#allocation3 + $0x3e4] sm:$0xf0]  ;;  %v3622_v2 = vrot.slane %v3621_v57, 4  ;;  %v3630_v49 = vrot.slane %v3628_v60, 4  ;;  %v3636_v3 = vrot.slane %v3634_v41, 5 }
 0x2d1   : > { %v7800_v26 = vor.u32 %v8299_v43, %v7797_v44  ;;  %v9983_v54 = vadd.f32 %v6689_v27, %v6601_v55  ;;  %v3110_v17 = vshrl.u32 %v2711_v7, 16  ;;  %v3113_v11 = vshll.u32 %v2711_v7, 16  ;;  %v3769_v22 = vld [vmem:[#allocation2 + $0xc4] sm:$0xf]  ;;  %v3770_v32 = vld [vmem:[#allocation2 + $0xc8] sm:$0x1] }
 0x2d2   : > { %6548 = vmatmul.bf16.gmra.mxu1 %v7792_v53  ;;  %v3627_v25 = vsel %vm8852_vm2, %v3622_v2, %v3626_v58  ;;  %v3631_v6 = vor.u32 %v3630_v49, %v3626_v58  ;;  %v3119_v28 = vshrl.u32 %v2712_v35, 16  ;;  %v6777_v39 = vadd.f32 %v6776_v48, %v6688_v51  ;;  %v4037_v61 = vld [vmem:[#allocation2 + $0xb4] sm:$0xe]  ;;  %v4038_v42 = vld [vmem:[#allocation2 + $0xb8] sm:$0xf] }
 0x2d3   : > { %6726 = vmatmul.bf16.gmra.mxu3 %v7800_v26  ;;  %3722 = vst [vmem:[#allocation3 + $0x408] sm:$0xf] %v3627_v25  ;;  %v3112_v37 = vrot.slane %v3110_v17, 5  ;;  %v3122_v5 = vshll.u32 %v2712_v35, 16  ;;  %v3129_v27 = vshrl.u32 %v2713_v40, 16  ;;  %v3115_v14 = vrot.slane %v3113_v11, 6 }
 0x2d4   : > { %v3632_v23 = vrot.slane %v3631_v6, 4  ;;  %v3121_v34 = vrot.slane %v3119_v28, 5  ;;  %v3132_v1 = vshll.u32 %v2713_v40, 16  ;;  %v6515_v7 = vadd.f32 %v6514_v30, %v9499_v8  ;;  %v4039_v53 = vld [vmem:[#allocation2 + $0xbc] sm:$0x3]  ;;  %v9997_v40 = vpop.f32.mrf.mxu1 }
 0x2d5   : > { %v7767_v43 = vld [vmem:[#allocation3 + $0x380] sm:$0xf]  ;;  %v3124_v33 = vrot.slane %v3122_v5, 6  ;;  %v3131_v0 = vrot.slane %v3129_v27, 5  ;;  %v7299_v24 = vrot.slane %v3768_v59, 9  ;;  %v3116_v35 = vor.u32 %v3115_v14, %v3112_v37 }
 0x2d6   : > { %v8295_v15 = vld [vmem:[#allocation3 + $0x3a0] sm:$0xf0]  ;;  %v3637_v57 = vsel %vm8852_vm2, %v3632_v23, %v3636_v3  ;;  %v3134_v60 = vrot.slane %v3132_v1, 6  ;;  %v3922_v41 = vrot.slane %v3769_v22, 5  ;;  %v6845_v55 = vmul.f32 %v9970_v63, %v6777_v39  ;;  %v3275_v26 = vld [vmem:[#allocation2 + $0xcc] sm:$0xf] }
 0x2d7   : > { %v7768_v51 = vor.u32 %v8295_v15, %v7767_v43  ;;  %3723 = vst [vmem:[#allocation3 + $0x42c] sm:$0xf] %v3637_v57  ;;  %v3125_v58 = vor.u32 %v3124_v33, %v3121_v34  ;;  %v3925_v48 = vrot.slane %v3770_v32, 5  ;;  %v3117_v8 = vrot.slane %v3116_v35, 4  ;;  %v3276_v37 = vld [vmem:[#allocation2 + $0xd0] sm:$0xf]  ;;  %v10006_v43 = vpop.f32.mrf.mxu2 }
 0x2d8   : > { %v6778_v44 = vpop.f32.mrf.mxu0  ;;  %v3135_v30 = vor.u32 %v3134_v60, %v3131_v0  ;;  %v3923_v2 = vsel %vm9071_vm11, %v7299_v24, %v3922_v41  ;;  %v3924_v49 = vrot.slane %v3922_v41, 4  ;;  %v4411_v17 = vshrl.u32 %v4037_v61, 16  ;;  %v10012_v41 = vpop.f32.mrf.mxu3 }
 0x2d9   : > { %6810 = vmatmul.bf16.gmra.mxu0 %v7768_v51  ;;  %v3127_v3 = vrot.slane %v3125_v58, 4  ;;  %3994 = vst [vmem:[#allocation3 + $0x40c] sm:$0xf] %v3923_v2  ;;  %v4414_v25 = vshll.u32 %v4037_v61, 16  ;;  %v4420_v6 = vshrl.u32 %v4038_v42, 16  ;;  %v3126_v28 = vsel %vm9062_vm8, %v3117_v8, %v3125_v58 }
 0x2da   : > { %v7831_v11 = vld [vmem:[#allocation3 + $0x408] sm:$0xf]  ;;  %v3926_v59 = vsel %vm9071_vm11, %v3924_v49, %v3925_v48  ;;  %v4423_v22 = vshll.u32 %v4038_v42, 16  ;;  %v4430_v39 = vshrl.u32 %v4039_v53, 16  ;;  %3225 = vst [vmem:[#allocation3 + $0x404] sm:$0xf] %v3126_v28  ;;  %v10009_v33 = vadd.f32 %v9961_v9, %v6845_v55 }
 0x2db   : > { %v3136_v5 = vsel %vm9062_vm8, %v3127_v3, %v3135_v30  ;;  %v4413_v27 = vrot.slane %v4411_v17, 5  ;;  %v4416_v23 = vrot.slane %v4414_v25, 6  ;;  %v4422_v14 = vrot.slane %v4420_v6, 5  ;;  %3995 = vst [vmem:[#allocation3 + $0x430] sm:$0xf] %v3926_v59 }
 0x2dc   : > { %v6912_v34 = vmax.f32 %v9981_v45, 0.0  ;;  %3226 = vst [vmem:[#allocation3 + $0x428] sm:$0xf] %v3136_v5  ;;  %v4425_v1 = vrot.slane %v4423_v22, 6  ;;  %v4432_v32 = vrot.slane %v4430_v39, 5  ;;  %v4433_v61 = vshll.u32 %v4039_v53, 16  ;;  %v6519_v22 = vpop.f32.mrf.mxu1 }
 0x2dd   : > { %v4417_v0 = vor.u32 %v4416_v23, %v4413_v27  ;;  %v6779_v24 = vadd.f32 %v6778_v44, %v9983_v54  ;;  %v3639_v15 = vshrl.u32 %v3275_v26, 16  ;;  %v3642_v45 = vshll.u32 %v3275_v26, 16  ;;  %v3277_v55 = vld [vmem:[#allocation2 + $0xd4] sm:$0x1]  ;;  %v2714_v54 = vld [vmem:[#allocation2 + $0xc0] sm:$0xe] }
 0x2de   : > { %v8312_v57 = vld [vmem:[#allocation3 + $0x428] sm:$0xf0]  ;;  %v4426_v35 = vor.u32 %v4425_v1, %v4422_v14  ;;  %v4435_v60 = vrot.slane %v4433_v61, 6  ;;  %v3648_v42 = vshll.u32 %v3276_v37, 16  ;;  %v6604_v58 = vadd.f32 %v9987_v19, %v6515_v7 }
 0x2df   : > { %v7832_v51 = vor.u32 %v8312_v57, %v7831_v11  ;;  %v4418_v48 = vrot.slane %v4417_v0, 4  ;;  %v6846_v53 = vmul.f32 %v9970_v63, %v6779_v24  ;;  %v3641_v2 = vrot.slane %v3639_v15, 4  ;;  %v2715_v39 = vld [vmem:[#allocation2 + $0xc4] sm:$0xf]  ;;  %v2716_v15 = vld [vmem:[#allocation2 + $0xc8] sm:$0x3] }
 0x2e0   : > { %v4428_v8 = vrot.slane %v4426_v35, 4  ;;  %v4436_v30 = vor.u32 %v4435_v60, %v4432_v32  ;;  %v3644_v49 = vrot.slane %v3642_v45, 5  ;;  %v6913_v44 = vmax.f32 %v10009_v33, 0.0  ;;  %v8308_v3 = vld [vmem:[#allocation3 + $0x40c] sm:$0xf]  ;;  %v6608_v45 = vpop.f32.mrf.mxu2 }
 0x2e1   : > { %6642 = vmatmul.bf16.gmra.mxu2 %v7832_v51  ;;  %v4427_v26 = vsel %vm9062_vm8, %v4418_v48, %v4426_v35  ;;  %v6882_v17 = vadd.f32 %v9961_v9, %v6846_v53  ;;  %v3650_v25 = vrot.slane %v3648_v42, 5  ;;  %v8307_v7 = vld [vmem:[#allocation3 + $0x404] sm:$0xf]  ;;  %v3652_v28 = vshrl.u32 %v3276_v37, 16  ;;  %v3771_v60 = vld [vmem:[#allocation2 + $0xcc] sm:$0xe] }
 0x2e2   : > { %v6781_v19 = vpop.f32.mrf.mxu0  ;;  %v4437_v6 = vsel %vm9062_vm8, %v4428_v8, %v4436_v30  ;;  %4552 = vst [vmem:[#allocation3 + $0x3c8] sm:$0xf] %v4427_v26  ;;  %v3645_v11 = vor.u32 %v3644_v49, %v3641_v2  ;;  %v3658_v59 = vshll.u32 %v3277_v55, 16  ;;  %v6428_v5 = vadd.f32 %v9513_v16, %v9486_v13  ;;  %v7833_v61 = vld [vmem:[#allocation3 + $0x42c] sm:$0xf0] }
 0x2e3   : > { %v10026_v27 = vadd.f32 %v9536_v36, %v9515_v62  ;;  %v7825_v23 = vld [vmem:[#allocation3 + $0x424] sm:$0xf0]  ;;  %4553 = vst [vmem:[#allocation3 + $0x3ec] sm:$0xf] %v4437_v6  ;;  %v6914_v14 = vmax.f32 %v6882_v17, 0.0  ;;  %v3138_v1 = vshrl.u32 %v2714_v54, 16  ;;  %v6693_v0 = vadd.f32 %v9989_v47, %v6604_v58 }
 0x2e4   : > { %v7828_v32 = vor.u32 %v8307_v7, %v7825_v23  ;;  %v3646_v24 = vrot.slane %v3645_v11, 4  ;;  %v3654_v37 = vrot.slane %v3652_v28, 4  ;;  %v7836_v57 = vor.u32 %v8308_v3, %v7833_v61  ;;  %v3772_v48 = vld [vmem:[#allocation2 + $0xd0] sm:$0xf]  ;;  %v3773_v47 = vld [vmem:[#allocation2 + $0xd4] sm:$0x1]  ;;  %v6697_v3 = vpop.f32.mrf.mxu3  ;;  %v6521_v18 = vpop.f32.mrf.mxu1 }
 0x2e5   : > { %v10030_v35 = vadd.f32 %v9997_v40, %v6428_v5  ;;  %v6940_v13 = vadd.f32 %v6914_v14, %v6912_v34  ;;  %v3660_v16 = vrot.slane %v3658_v59, 5  ;;  %v3140_v42 = vrot.slane %v3138_v1, 5  ;;  %v4040_v49 = vld [vmem:[#allocation2 + $0xc0] sm:$0xe]  ;;  %v4042_v1 = vld [vmem:[#allocation2 + $0xc8] sm:$0x3] }
 0x2e6   : > { %6553 = vmatmul.bf16.gmra.mxu1 %v7828_v32  ;;  %v3651_v62 = vsel %vm8852_vm2, %v3646_v24, %v3650_v25  ;;  %v3655_v36 = vor.u32 %v3654_v37, %v3650_v25  ;;  %v3141_v51 = vshll.u32 %v2714_v54, 16  ;;  %6731 = vmatmul.bf16.gmra.mxu3 %v7836_v57  ;;  %v6520_v58 = vadd.f32 %v6519_v22, %v9524_v56  ;;  %v4041_v22 = vld [vmem:[#allocation2 + $0xc4] sm:$0xf] }
 0x2e7   : > { %3724 = vst [vmem:[#allocation3 + $0x450] sm:$0xf] %v3651_v62  ;;  %v3147_v53 = vshrl.u32 %v2715_v39, 16  ;;  %v3150_v40 = vshll.u32 %v2715_v39, 16  ;;  %v3157_v55 = vshrl.u32 %v2716_v15, 16  ;;  %v3160_v30 = vshll.u32 %v2716_v15, 16  ;;  %7010 = vmatpush.msrb.mxu3 %v6940_v13 }
 0x2e8   : > { %v3656_v34 = vrot.slane %v3655_v36, 4  ;;  %v3143_v8 = vrot.slane %v3141_v51, 6  ;;  %v7300_v2 = vrot.slane %v3771_v60, 9  ;;  %v6782_v17 = vadd.f32 %v6781_v19, %v6693_v0 }
 0x2e9   : > { %v7803_v26 = vld [vmem:[#allocation3 + $0x3c8] sm:$0xf]  ;;  %v3149_v25 = vrot.slane %v3147_v53, 5  ;;  %v3152_v54 = vrot.slane %v3150_v40, 6  ;;  %v3159_v7 = vrot.slane %v3157_v55, 5  ;;  %v3162_v28 = vrot.slane %v3160_v30, 6  ;;  %v6610_v30 = vpop.f32.mrf.mxu2 }
 0x2ea   : > { %v8304_v6 = vld [vmem:[#allocation3 + $0x3e8] sm:$0xf0]  ;;  %v3661_v11 = vsel %vm8852_vm2, %v3656_v34, %v3660_v16  ;;  %v3144_v56 = vor.u32 %v3143_v8, %v3140_v42  ;;  %v3929_v59 = vrot.slane %v3772_v48, 5  ;;  %v10037_v39 = vpop.f32.mrf.mxu0  ;;  %v3932_v14 = vrot.slane %v3773_v47, 5  ;;  %v4043_v42 = vld [vmem:[#allocation2 + $0xcc] sm:$0xe] }
 0x2eb   : > { %v7804_v5 = vor.u32 %v8304_v6, %v7803_v26  ;;  %3725 = vst [vmem:[#allocation3 + $0x474] sm:$0xf] %v3661_v11  ;;  %v3153_v23 = vor.u32 %v3152_v54, %v3149_v25  ;;  %v4439_v32 = vshrl.u32 %v4040_v49, 16  ;;  %v3163_v61 = vor.u32 %v3162_v28, %v3159_v7  ;;  %v4045_v28 = vld [vmem:[#allocation2 + $0xd4] sm:$0x3] }
 0x2ec   : > { %v3145_v19 = vrot.slane %v3144_v56, 4  ;;  %v3930_v0 = vsel %vm9071_vm11, %v7300_v2, %v3929_v59  ;;  %v3931_v24 = vrot.slane %v3929_v59, 4  ;;  %v4442_v57 = vshll.u32 %v4040_v49, 16 }
 0x2ed   : > { %6815 = vmatmul.bf16.gmra.mxu0 %v7804_v5  ;;  %v3155_v37 = vrot.slane %v3153_v23, 4  ;;  %3996 = vst [vmem:[#allocation3 + $0x454] sm:$0xf] %v3930_v0  ;;  %v4441_v15 = vrot.slane %v4439_v32, 5  ;;  %v4448_v13 = vshrl.u32 %v4041_v22, 16  ;;  %v4451_v62 = vshll.u32 %v4041_v22, 16 }
 0x2ee   : > { %v3154_v16 = vsel %vm9062_vm8, %v3145_v19, %v3153_v23  ;;  %v3933_v60 = vsel %vm9071_vm11, %v3931_v24, %v3932_v14  ;;  %v4458_v36 = vshrl.u32 %v4042_v1, 16  ;;  %v4444_v48 = vrot.slane %v4442_v57, 6  ;;  %v7867_v40 = vld [vmem:[#allocation3 + $0x450] sm:$0xf]  ;;  %v6524_v32 = vpop.f32.mrf.mxu1 }
 0x2ef   : > { %v3164_v51 = vsel %vm9062_vm8, %v3155_v37, %v3163_v61  ;;  %3227 = vst [vmem:[#allocation3 + $0x44c] sm:$0xf] %v3154_v16  ;;  %v4450_v47 = vrot.slane %v4448_v13, 5  ;;  %v4461_v53 = vshll.u32 %v4042_v1, 16  ;;  %v6609_v55 = vadd.f32 %v6608_v45, %v6520_v58  ;;  %v6699_v58 = vpop.f32.mrf.mxu3 }
 0x2f0   : > { %3228 = vst [vmem:[#allocation3 + $0x470] sm:$0xf] %v3164_v51  ;;  %v4453_v34 = vrot.slane %v4451_v62, 6  ;;  %v4460_v8 = vrot.slane %v4458_v36, 5  ;;  %v6939_v12 = vadd.f32 %v6913_v44, %v6911_v10  ;;  %v6606_v2 = vadd.f32 %v10006_v43, %v10030_v35  ;;  %v4044_v44 = vld [vmem:[#allocation2 + $0xd0] sm:$0xf] }
 0x2f1   : > { %v6847_v49 = vmul.f32 %v9970_v63, %v6782_v17  ;;  %3997 = vst [vmem:[#allocation3 + $0x478] sm:$0xf] %v3933_v60  ;;  %v4445_v26 = vor.u32 %v4444_v48, %v4441_v15  ;;  %v4463_v25 = vrot.slane %v4461_v53, 6  ;;  %v6698_v45 = vadd.f32 %v6697_v3, %v6609_v55  ;;  %v6613_v48 = vpop.f32.mrf.mxu2 }
 0x2f2   : > { %v8321_v54 = vld [vmem:[#allocation3 + $0x470] sm:$0xf0]  ;;  %v4454_v7 = vor.u32 %v4453_v34, %v4450_v47  ;;  %7011 = vmatpush.msrb.mxu3 %v6939_v12  ;;  %v4467_v6 = vshrl.u32 %v4043_v42, 16  ;;  %v4470_v11 = vshll.u32 %v4043_v42, 16  ;;  %v6522_v10 = vadd.f32 %v6521_v18, %v10026_v27 }
 0x2f3   : > { %v7868_v4 = vor.u32 %v8321_v54, %v7867_v40  ;;  %v4446_v56 = vrot.slane %v4445_v26, 4  ;;  %v4464_v33 = vor.u32 %v4463_v25, %v4460_v8  ;;  %v6695_v43 = vadd.f32 %v10012_v41, %v6606_v2 }
 0x2f4   : > { %v4456_v35 = vrot.slane %v4454_v7, 4  ;;  %v6786_v17 = vpop.f32.mrf.mxu0  ;;  %v4469_v59 = vrot.slane %v4467_v6, 5  ;;  %v6883_v22 = vadd.f32 %v9961_v9, %v6847_v49  ;;  %v8317_v5 = vld [vmem:[#allocation3 + $0x454] sm:$0xf]  ;;  %v4472_v14 = vrot.slane %v4470_v11, 6 }
 0x2f5   : > { %6647 = vmatmul.bf16.gmra.mxu2 %v7868_v4  ;;  %v4455_v3 = vsel %vm9062_vm8, %v4446_v56, %v4454_v7  ;;  %v6787_v23 = vadd.f32 %v6786_v17, %v6698_v45  ;;  %v6784_v41 = vadd.f32 %v10037_v39, %v6695_v43  ;;  %v4476_v19 = vshrl.u32 %v4044_v44, 16 }
 0x2f6   : > { %v8316_v1 = vld [vmem:[#allocation3 + $0x44c] sm:$0xf]  ;;  %v4465_v27 = vsel %vm9062_vm8, %v4456_v35, %v4464_v33  ;;  %4554 = vst [vmem:[#allocation3 + $0x410] sm:$0xf] %v4455_v3  ;;  %v4479_v61 = vshll.u32 %v4044_v44, 16  ;;  %v6611_v24 = vadd.f32 %v6610_v30, %v6522_v10  ;;  %v4473_v37 = vor.u32 %v4472_v14, %v4469_v59  ;;  %v6526_v56 = vpop.f32.mrf.mxu1 }
 0x2f7   : > { %v7861_v0 = vld [vmem:[#allocation3 + $0x46c] sm:$0xf0]  ;;  %4555 = vst [vmem:[#allocation3 + $0x434] sm:$0xf] %v4465_v27  ;;  %v6849_v18 = vmul.f32 %v9970_v63, %v6787_v23  ;;  %v4486_v15 = vshrl.u32 %v4045_v28, 16  ;;  %v4478_v16 = vrot.slane %v4476_v19, 5  ;;  %v6848_v55 = vmul.f32 %v9970_v63, %v6784_v41  ;;  %v6702_v49 = vpop.f32.mrf.mxu3 }
 0x2f8   : > { %v7864_v57 = vor.u32 %v8316_v1, %v7861_v0  ;;  %v7869_v13 = vld [vmem:[#allocation3 + $0x474] sm:$0xf0]  ;;  %v4481_v60 = vrot.slane %v4479_v61, 6  ;;  %v4489_v62 = vshll.u32 %v4045_v28, 16  ;;  %v4474_v51 = vrot.slane %v4473_v37, 4  ;;  %v10078_v37 = vld [vmem:[#allocation9] sm:$0xff] }
 0x2f9   : > { %v7872_v36 = vor.u32 %v8317_v5, %v7869_v13  ;;  %v6885_v42 = vadd.f32 %v9961_v9, %v6849_v18  ;;  %v4488_v39 = vrot.slane %v4486_v15, 5  ;;  %v6915_v40 = vmax.f32 %v6883_v22, 0.0  ;;  %v6615_v43 = vpop.f32.mrf.mxu2  ;;  %v10261_v61 = vld [vmem:[#allocation20_spill] sm:$0xff]  ;;  %v10262_v15 = vld [vmem:[#allocation21_spill] sm:$0xff] }
 0x2fa   : > { %6558 = vmatmul.bf16.gmra.mxu1 %v7864_v57  ;;  %v4482_v47 = vor.u32 %v4481_v60, %v4478_v16  ;;  %v4491_v53 = vrot.slane %v4489_v62, 6  ;;  %v6700_v34 = vadd.f32 %v6699_v58, %v6611_v24  ;;  %v6884_v4 = vadd.f32 %v9961_v9, %v6848_v55  ;;  %v10264_v16 = vld [vmem:[#allocation25_spill] sm:$0xff] }
 0x2fb   : > { %6736 = vmatmul.bf16.gmra.mxu3 %v7872_v36  ;;  %v6917_v8 = vmax.f32 %v6885_v42, 0.0  ;;  %v6525_v23 = vadd.f32 %v6524_v32, %v9551_v52  ;;  %v6176_v27 = vadd.f32 %v9546_v20, %v9187_v31  ;;  %v6438_v0 = vadd.f32 %v9569_v29, %v10261_v61  ;;  %v10263_v20 = vld [vmem:[#allocation22_spill] sm:$0xff] }
 0x2fc   : > { %v4483_v12 = vsel %vm9062_vm8, %v4474_v51, %v4482_v47  ;;  %v4484_v30 = vrot.slane %v4482_v47, 4  ;;  %v4492_v2 = vor.u32 %v4491_v53, %v4488_v39  ;;  %v6788_v26 = vpop.f32.mrf.mxu0  ;;  %v6916_v10 = vmax.f32 %v6884_v4, 0.0 }
 0x2fd   : > { %v7839_v25 = vld [vmem:[#allocation3 + $0x410] sm:$0xf]  ;;  %4556 = vst [vmem:[#allocation3 + $0x458] sm:$0xf] %v4483_v12  ;;  %v6789_v54 = vadd.f32 %v6788_v26, %v6700_v34  ;;  %v6941_v7 = vadd.f32 %v6917_v8, %v6915_v40  ;;  %v6614_v41 = vadd.f32 %v6613_v48, %v6525_v23  ;;  %v6265_v57 = vadd.f32 %v10262_v15, %v6176_v27 }
 0x2fe   : > { %v8313_v45 = vld [vmem:[#allocation3 + $0x430] sm:$0xf0]  ;;  %v4493_v6 = vsel %vm9062_vm8, %v4484_v30, %v4492_v2  ;;  %v6527_v52 = vadd.f32 %v6526_v56, %v6438_v0  ;;  %v10270_v0 = vld [vmem:[#allocation18_spill] sm:$0xff] }
 0x2ff   : > { %v7840_v11 = vor.u32 %v8313_v45, %v7839_v25  ;;  %4557 = vst [vmem:[#allocation3 + $0x47c] sm:$0xf] %v4493_v6  ;;  %v6850_v58 = vmul.f32 %v9970_v63, %v6789_v54  ;;  %v6704_v17 = vpop.f32.mrf.mxu3  ;;  %v6529_v22 = vpop.f32.mrf.mxu1  ;;  %v6703_v24 = vadd.f32 %v6702_v49, %v6614_v41  ;;  %v6354_v29 = vadd.f32 %v10263_v20, %v6265_v57  ;;  %v10272_v57 = vld [vmem:[#allocation30_spill] sm:$0xff] }
 0x300   : > { %v6530_v18 = vadd.f32 %v6529_v22, %v9580_v46  ;;  %v6616_v62 = vadd.f32 %v6615_v43, %v6527_v52 }
 0x301   : > { %6820 = vmatmul.bf16.gmra.mxu0 %v7840_v11  ;;  %v6886_v33 = vadd.f32 %v9961_v9, %v6850_v58  ;;  %v6618_v3 = vpop.f32.mrf.mxu2  ;;  %v6443_v60 = vadd.f32 %v10264_v16, %v6354_v29 }
 0x302   : > { %v6619_v46 = vadd.f32 %v6618_v3, %v6530_v18  ;;  %v6705_v39 = vadd.f32 %v6704_v17, %v6616_v62  ;;  %v10275_v62 = vld [vmem:[#allocation31_spill] sm:$0xff] }
 0x303   : > { %v6918_v44 = vmax.f32 %v6886_v33, 0.0 }
 0x304   : > { %v7875_v50 = vld [vmem:[#allocation3 + $0x458] sm:$0xf] }
 0x305   : > { %v6942_v35 = vadd.f32 %v6918_v44, %v6916_v10  ;;  %8165 = vmatmul.msk.f32.vlgmr.msrb.gmra.mxu2 %vm6952_vm12, %v10078_v37 }
 0x306   : > { %v8322_v59 = vld [vmem:[#allocation3 + $0x478] sm:$0xf0] }
 0x307   : > { %7030 = vmatpush.msrb.mxu1 %v6942_v35  ;;  %v6791_v28 = vpop.f32.mrf.mxu0  ;;  %v7876_v5 = vor.u32 %v8322_v59, %v7875_v50  ;;  %v6707_v14 = vpop.f32.mrf.mxu3  ;;  %v10265_v50 = vld [vmem:[#allocation16_spill] sm:$0xff]  ;;  %v10266_v59 = vld [vmem:[#allocation23_spill] sm:$0xff] }
 0x308   : > { %v6531_v19 = vpop.f32.mrf.mxu1  ;;  %v6792_v32 = vadd.f32 %v6791_v28, %v6703_v24  ;;  %v6708_v42 = vadd.f32 %v6707_v14, %v6619_v46  ;;  %v6181_v22 = vadd.f32 %v10266_v59, %v10265_v50  ;;  %v10268_v14 = vld [vmem:[#allocation24_spill] sm:$0xff]  ;;  %v10271_v24 = vld [vmem:[#allocation27_spill] sm:$0xff]  ;;  %v10274_v46 = vld [vmem:[#allocation29_spill] sm:$0xff] }
 0x309   : > { %7031 = vmatpush.msrb.mxu1 %v6941_v7  ;;  %v6620_v31 = vpop.f32.mrf.mxu2  ;;  %v6532_v48 = vadd.f32 %v6531_v19, %v6443_v60  ;;  %v10269_v19 = vld [vmem:[#allocation26_spill] sm:$0xff]  ;;  %v6186_v18 = vadd.f32 %v10271_v24, %v10270_v0 }
 0x30a   : > { %8168 = vmatmul.msk.f32.vlgmr.msrb.gmra.mxu1 %vm6952_vm12, %v10078_v37  ;;  %v6851_v36 = vmul.f32 %v9970_v63, %v6792_v32  ;;  %v10279_v0 = vld [vmem:[#allocation34_spill] sm:$0xff] }
 0x30b   : > { %8167 = vmatmul.msk.f32.vlgmr.msrb.gmra.mxu3 %vm6952_vm12, %v10078_v37  ;;  %v6621_v8 = vadd.f32 %v6620_v31, %v6532_v48  ;;  %v10273_v31 = vld [vmem:[#allocation33_spill] sm:$0xff] }
 0x30c   : > { %v6887_v40 = vadd.f32 %v9961_v9, %v6851_v36 }
 0x30d   : > { %8166 = vmatmul.msk.f32.vlgmr.msra.gmra.mxu2 %vm6952_vm12, %v10078_v37 }
 0x30e   : > { %v6919_v2 = vmax.f32 %v6887_v40, 0.0 }
 0x30f   : > { %v6793_v1 = vpop.f32.mrf.mxu0  ;;  %v6709_v13 = vpop.f32.mrf.mxu3 }
 0x310   : > { %v6794_v55 = vadd.f32 %v6793_v1, %v6705_v39  ;;  %v6710_v26 = vadd.f32 %v6709_v13, %v6621_v8  ;;  %v6270_v1 = vadd.f32 %v10268_v14, %v6181_v22  ;;  %v6275_v13 = vadd.f32 %v10274_v46, %v6186_v18  ;;  %v10276_v39 = vld [vmem:[#allocation35_spill] sm:$0xff] }
 0x311   : > { %6825 = vmatmul.bf16.gmra.mxu0 %v7876_v5  ;;  %v10267_v5 = vld [vmem:[#allocation28_spill] sm:$0xff] }
 0x312   : > { %v6534_v53 = vpop.f32.mrf.mxu1  ;;  %v6623_v30 = vpop.f32.mrf.mxu2  ;;  %v6852_v49 = vmul.f32 %v9970_v63, %v6794_v55  ;;  %v6359_v61 = vadd.f32 %v10269_v19, %v6270_v1  ;;  %v6364_v36 = vadd.f32 %v10275_v62, %v6275_v13  ;;  %v10277_v1 = vld [vmem:[#allocation14_spill] sm:$0xff] }
 0x313   : > { %v6535_v3 = vadd.f32 %v6534_v53, %v10267_v5 }
 0x314   : > { %v6888_v11 = vadd.f32 %v9961_v9, %v6852_v49  ;;  %v6448_v52 = vadd.f32 %v10272_v57, %v6359_v61  ;;  %v6453_v48 = vadd.f32 %v10276_v39, %v6364_v36  ;;  %v10280_v57 = vld [vmem:[#allocation36_spill] sm:$0xff]  ;;  %v10284_v36 = vld [vmem:[#allocation37_spill] sm:$0xff]  ;;  %v10285_v39 = vld [vmem:[#allocation39_spill] sm:$0xff] }
 0x315   : > { %v6624_v15 = vadd.f32 %v6623_v30, %v6535_v3 }
 0x316   : > { %v6920_v33 = vmax.f32 %v6888_v11, 0.0 }
 0x319   : > { %v6712_v54 = vpop.f32.mrf.mxu3 }
 0x31a   : > { %v6536_v58 = vpop.f32.mrf.mxu1  ;;  %v6625_v44 = vpop.f32.mrf.mxu2  ;;  %v6713_v32 = vadd.f32 %v6712_v54, %v6624_v15 }
 0x31b   : > { %v6537_v16 = vadd.f32 %v6536_v58, %v6448_v52 }
 0x31c   : > { %v6796_v51 = vpop.f32.mrf.mxu0 }
 0x31d   : > { %v6797_v47 = vadd.f32 %v6796_v51, %v6708_v42 }
 0x31f   : > { %v6853_v34 = vmul.f32 %v9970_v63, %v6797_v47  ;;  %v6626_v47 = vadd.f32 %v6625_v44, %v6537_v16  ;;  %v10283_v16 = vld [vmem:[#allocation41_spill] sm:$0xff] }
 0x321   : > { %v6889_v12 = vadd.f32 %v9961_v9, %v6853_v34  ;;  %v6714_v35 = vpop.f32.mrf.mxu3 }
 0x322   : > { %v6715_v8 = vadd.f32 %v6714_v35, %v6626_v47 }
 0x323   : > { %v6921_v25 = vmax.f32 %v6889_v12, 0.0 }
 0x324   : > { %v6798_v7 = vpop.f32.mrf.mxu0 }
 0x325   : > { %v6799_v45 = vadd.f32 %v6798_v7, %v6710_v26  ;;  %v6943_v6 = vadd.f32 %v6921_v25, %v6919_v2 }
 0x327   : > { %v6854_v4 = vmul.f32 %v9970_v63, %v6799_v45  ;;  %v6539_v28 = vpop.f32.mrf.mxu1 }
 0x328   : > { %v6540_v20 = vadd.f32 %v6539_v28, %v10273_v31 }
 0x329   : > { %v6890_v56 = vadd.f32 %v9961_v9, %v6854_v4  ;;  %v6628_v23 = vpop.f32.mrf.mxu2 }
 0x32a   : > { %v6629_v42 = vadd.f32 %v6628_v23, %v6540_v20 }
 0x32b   : > { %v6922_v10 = vmax.f32 %v6890_v56, 0.0 }
 0x32d   : > { %v6944_v43 = vadd.f32 %v6922_v10, %v6920_v33 }
 0x32e   : > { %v6717_v27 = vpop.f32.mrf.mxu3 }
 0x32f   : > { %v6801_v17 = vpop.f32.mrf.mxu0  ;;  %7050 = vmatpush.msrb.mxu2 %v6944_v43  ;;  %v6541_v29 = vpop.f32.mrf.mxu1  ;;  %v6718_v40 = vadd.f32 %v6717_v27, %v6629_v42  ;;  %v10278_v27 = vld [vmem:[#allocation32_spill] sm:$0xff] }
 0x330   : > { %v6802_v60 = vadd.f32 %v6801_v17, %v6713_v32  ;;  %v6542_v12 = vadd.f32 %v6541_v29, %v6453_v48  ;;  %v10281_v32 = vld [vmem:[#allocation15_spill] sm:$0xff]  ;;  %v10282_v29 = vld [vmem:[#allocation38_spill] sm:$0xff] }
 0x331   : > { %7051 = vmatpush.msrb.mxu2 %v6943_v6  ;;  %v6630_v51 = vpop.f32.mrf.mxu2  ;;  %v6196_v31 = vadd.f32 %v9655_v38, %v10281_v32  ;;  %v10292_v32 = vld [vmem:[#allocation19_spill] sm:$0xff] }
 0x332   : > { %8169 = vmatmul.msk.f32.vlgmr.msrb.gmra.mxu2 %vm6952_vm12, %v10078_v37  ;;  %v6855_v53 = vmul.f32 %v9970_v63, %v6802_v60  ;;  %v6631_v54 = vadd.f32 %v6630_v51, %v6542_v12 }
 0x333   : > { %v6285_v42 = vadd.f32 %v10284_v36, %v6196_v31  ;;  %v10293_v31 = vld [vmem:[#allocation46_spill] sm:$0xff]  ;;  %v10295_v36 = vld [vmem:[#allocation49_spill] sm:$0xff] }
 0x334   : > { %v6891_v2 = vadd.f32 %v9961_v9, %v6855_v53 }
 0x335   : > { %v6374_v48 = vadd.f32 %v10285_v39, %v6285_v42 }
 0x336   : > { %v6719_v55 = vpop.f32.mrf.mxu3  ;;  %v6923_v45 = vmax.f32 %v6891_v2, 0.0 }
 0x337   : > { %v6803_v41 = vpop.f32.mrf.mxu0  ;;  %v6720_v11 = vadd.f32 %v6719_v55, %v6631_v54 }
 0x338   : > { %v6804_v49 = vadd.f32 %v6803_v41, %v6715_v8  ;;  %v6191_v41 = vadd.f32 %v10278_v27, %v10277_v1 }
 0x33a   : > { %v6856_v6 = vmul.f32 %v9970_v63, %v6804_v49  ;;  %v6280_v24 = vadd.f32 %v10279_v0, %v6191_v41  ;;  %v10287_v41 = vld [vmem:[#allocation17_spill] sm:$0xff]  ;;  %v10289_v0 = vld [vmem:[#allocation44_spill] sm:$0xff] }
 0x33b   : > { %v6544_v26 = vpop.f32.mrf.mxu1 }
 0x33c   : > { %v6633_v58 = vpop.f32.mrf.mxu2  ;;  %v6892_v43 = vadd.f32 %v9961_v9, %v6856_v6  ;;  %v6545_v19 = vadd.f32 %v6544_v26, %v9664_v21  ;;  %v6369_v52 = vadd.f32 %v10280_v57, %v6280_v24  ;;  %v10291_v57 = vld [vmem:[#allocation45_spill] sm:$0xff] }
 0x33e   : > { %v6924_v50 = vmax.f32 %v6892_v43, 0.0  ;;  %v6634_v20 = vadd.f32 %v6633_v58, %v6545_v19  ;;  %v6458_v46 = vadd.f32 %v10282_v29, %v6369_v52  ;;  %v10288_v19 = vld [vmem:[#allocation40_spill] sm:$0xff] }
 0x342   : > { %v6722_v33 = vpop.f32.mrf.mxu3 }
 0x343   : > { %v6806_v34 = vpop.f32.mrf.mxu0  ;;  %v6546_v17 = vpop.f32.mrf.mxu1  ;;  %v6723_v13 = vadd.f32 %v6722_v33, %v6634_v20  ;;  %v6206_v20 = vadd.f32 %v10293_v31, %v10292_v32 }
 0x344   : > { %v6807_v30 = vadd.f32 %v6806_v34, %v6718_v40  ;;  %v6635_v5 = vpop.f32.mrf.mxu2  ;;  %v6547_v21 = vadd.f32 %v6546_v17, %v6458_v46  ;;  %v10286_v40 = vld [vmem:[#allocation43_spill] sm:$0xff] }
 0x345   : > { %v6463_v55 = vadd.f32 %v10286_v40, %v6374_v48 }
 0x346   : > { %v6857_v25 = vmul.f32 %v9970_v63, %v6807_v30  ;;  %v6636_v34 = vadd.f32 %v6635_v5, %v6547_v21 }
 0x348   : > { %v6893_v7 = vadd.f32 %v9961_v9, %v6857_v25 }
 0x34a   : > { %v6925_v4 = vmax.f32 %v6893_v7, 0.0  ;;  %v6724_v3 = vpop.f32.mrf.mxu3 }
 0x34b   : > { %v6808_v56 = vpop.f32.mrf.mxu0  ;;  %v6725_v2 = vadd.f32 %v6724_v3, %v6636_v34 }
 0x34c   : > { %v6809_v10 = vadd.f32 %v6808_v56, %v6720_v11  ;;  %v6945_v44 = vadd.f32 %v6925_v4, %v6923_v45 }
 0x34e   : > { %v6858_v35 = vmul.f32 %v9970_v63, %v6809_v10 }
 0x34f   : > { %v6549_v14 = vpop.f32.mrf.mxu1 }
 0x350   : > { %v6894_v28 = vadd.f32 %v9961_v9, %v6858_v35  ;;  %v6638_v61 = vpop.f32.mrf.mxu2  ;;  %v6550_v60 = vadd.f32 %v6549_v14, %v10283_v16  ;;  %v10294_v16 = vld [vmem:[#allocation48_spill] sm:$0xff] }
 0x352   : > { %v6926_v59 = vmax.f32 %v6894_v28, 0.0  ;;  %v6639_v47 = vadd.f32 %v6638_v61, %v6550_v60  ;;  %v6201_v61 = vadd.f32 %v10288_v19, %v10287_v41 }
 0x354   : > { %v6946_v22 = vadd.f32 %v6926_v59, %v6924_v50 }
 0x356   : > { %v6811_v23 = vpop.f32.mrf.mxu0  ;;  %7070 = vmatpush.msra.mxu3 %v6946_v22  ;;  %v6727_v18 = vpop.f32.mrf.mxu3 }
 0x357   : > { %v6551_v62 = vpop.f32.mrf.mxu1  ;;  %v6812_v51 = vadd.f32 %v6811_v23, %v6723_v13  ;;  %v6728_v8 = vadd.f32 %v6727_v18, %v6639_v47 }
 0x358   : > { %7071 = vmatpush.msra.mxu3 %v6945_v44  ;;  %v6640_v53 = vpop.f32.mrf.mxu2  ;;  %v6552_v49 = vadd.f32 %v6551_v62, %v6463_v55 }
 0x359   : > { %8170 = vmatmul.msk.f32.vlgmr.msra.gmra.mxu3 %vm6952_vm12, %v10078_v37  ;;  %v6859_v38 = vmul.f32 %v9970_v63, %v6812_v51  ;;  %v10296_v51 = vld [vmem:[#allocation47_spill] sm:$0xff] }
 0x35a   : > { %v6641_v6 = vadd.f32 %v6640_v53, %v6552_v49  ;;  %v6295_v39 = vadd.f32 %v10296_v51, %v6206_v20  ;;  %v10297_v53 = vld [vmem:[#allocation50_spill] sm:$0xff] }
 0x35b   : > { %v6895_v25 = vadd.f32 %v9961_v9, %v6859_v38  ;;  %v10298_v38 = vld [vmem:[#allocation51_spill] sm:$0xff] }
 0x35c   : > { %v6384_v40 = vadd.f32 %v10297_v53, %v6295_v39 }
 0x35d   : > { %v6927_v4 = vmax.f32 %v6895_v25, 0.0 }
 0x35e   : > { %v6813_v15 = vpop.f32.mrf.mxu0  ;;  %v6729_v12 = vpop.f32.mrf.mxu3 }
 0x35f   : > { %v6814_v54 = vadd.f32 %v6813_v15, %v6725_v2  ;;  %v6730_v56 = vadd.f32 %v6729_v12, %v6641_v6  ;;  %v10290_v15 = vld [vmem:[#allocation42_spill] sm:$0xff] }
 0x361   : > { %v6860_v58 = vmul.f32 %v9970_v63, %v6814_v54 }
 0x363   : > { %v6554_v45 = vpop.f32.mrf.mxu1  ;;  %v6896_v28 = vadd.f32 %v9961_v9, %v6860_v58 }
 0x364   : > { %v6643_v10 = vpop.f32.mrf.mxu2  ;;  %v6555_v24 = vadd.f32 %v6554_v45, %v10289_v0  ;;  %v8519_v45 = vld [vmem:[%s10203_s3] ss:$0 sm:$0xff] }
 0x365   : > { %v6928_v5 = vmax.f32 %v6896_v28, 0.0 }
 0x366   : > { %v6644_v29 = vadd.f32 %v6643_v10, %v6555_v24 }
 0x369   : > { %v6732_v17 = vpop.f32.mrf.mxu3 }
 0x36a   : > { %v6816_v30 = vpop.f32.mrf.mxu0  ;;  %v6733_v62 = vadd.f32 %v6732_v17, %v6644_v29 }
 0x36b   : > { %v6817_v26 = vadd.f32 %v6816_v30, %v6728_v8  ;;  %v6556_v22 = vpop.f32.mrf.mxu1  ;;  %v6473_v8 = vadd.f32 %v10298_v38, %v6384_v40 }
 0x36c   : > { %v6645_v14 = vpop.f32.mrf.mxu2 }
 0x36d   : > { %v6861_v7 = vmul.f32 %v9970_v63, %v6817_v26 }
 0x36f   : > { %v6897_v11 = vadd.f32 %v9961_v9, %v6861_v7 }
 0x371   : > { %v6929_v33 = vmax.f32 %v6897_v11, 0.0  ;;  %v6734_v1 = vpop.f32.mrf.mxu3 }
 0x372   : > { %v6818_v44 = vpop.f32.mrf.mxu0 }
 0x373   : > { %v6819_v43 = vadd.f32 %v6818_v44, %v6730_v56  ;;  %v6947_v35 = vadd.f32 %v6929_v33, %v6927_v4  ;;  %v8520_v4 = vld [vmem:[%s10202_s2] ss:$0 sm:$0xff] }
 0x375   : > { %v6862_v50 = vmul.f32 %v9970_v63, %v6819_v43 }
 0x377   : > { %v6898_v59 = vadd.f32 %v9961_v9, %v6862_v50  ;;  %v6559_v18 = vpop.f32.mrf.mxu1  ;;  %v6290_v9 = vadd.f32 %v10290_v15, %v6201_v61 }
 0x378   : > { %v6648_v46 = vpop.f32.mrf.mxu2  ;;  %v6560_v42 = vadd.f32 %v6559_v18, %v10295_v36 }
 0x379   : > { %v6930_v3 = vmax.f32 %v6898_v59, 0.0  ;;  %v6379_v52 = vadd.f32 %v10291_v57, %v6290_v9 }
 0x37a   : > { %v6649_v55 = vadd.f32 %v6648_v46, %v6560_v42 }
 0x37b   : > { %v6948_v23 = vadd.f32 %v6930_v3, %v6928_v5  ;;  %v6468_v60 = vadd.f32 %v10294_v16, %v6379_v52 }
 0x37d   : > { %7090 = vmatpush.msra.mxu1 %v6948_v23  ;;  %v6557_v48 = vadd.f32 %v6556_v22, %v6468_v60 }
 0x37e   : > { %v6821_v27 = vpop.f32.mrf.mxu0  ;;  %v6737_v21 = vpop.f32.mrf.mxu3 }
 0x37f   : > { %7091 = vmatpush.msra.mxu1 %v6947_v35  ;;  %v6822_v47 = vadd.f32 %v6821_v27, %v6733_v62  ;;  %v6561_v34 = vpop.f32.mrf.mxu1  ;;  %v6646_v12 = vadd.f32 %v6645_v14, %v6557_v48  ;;  %v6738_v2 = vadd.f32 %v6737_v21, %v6649_v55 }
 0x380   : > { %8171 = vmatmul.msk.f32.vlgmr.msra.gmra.mxu1 %vm6952_vm12, %v10078_v37  ;;  %v6562_v25 = vadd.f32 %v6561_v34, %v6473_v8  ;;  %v6650_v7 = vpop.f32.mrf.mxu2 }
 0x381   : > { %v6863_v30 = vmul.f32 %v9970_v63, %v6822_v47  ;;  %v6735_v26 = vadd.f32 %v6734_v1, %v6646_v12 }
 0x382   : > { %v6651_v63 = vadd.f32 %v6650_v7, %v6562_v25 }
 0x383   : > { %v6899_v6 = vadd.f32 %v8519_v45, %v6863_v30 }
 0x385   : > { %v6931_v10 = vmax.f32 %v6899_v6, 0.0 }
 0x386   : > { %v6823_v13 = vpop.f32.mrf.mxu0  ;;  %v6739_v56 = vpop.f32.mrf.mxu3 }
 0x387   : > { %v6824_v11 = vadd.f32 %v6823_v13, %v6735_v26  ;;  %v6740_v43 = vadd.f32 %v6739_v56, %v6651_v63  ;;  %v7033_v59 = vpop.f32.mrf.mxu1 }
 0x388   : > { %v6973_v3 = vpop.f32.mrf.mxu2 }
 0x389   : > { %v6864_v44 = vmul.f32 %v8520_v4, %v6824_v11 }
 0x38b   : > { %v6900_v22 = vadd.f32 %v8519_v45, %v6864_v44 }
 0x38d   : > { %v6932_v27 = vmax.f32 %v6900_v22, 0.0 }
 0x38e   : > { %v6826_v49 = vpop.f32.mrf.mxu0  ;;  %v7013_v23 = vpop.f32.mrf.mxu3 }
 0x38f   : > { %v6827_v54 = vadd.f32 %v6826_v49, %v6738_v2  ;;  %v8404_v1 = vpack.c.bf16 %v7033_v59, %v7013_v23 }
 0x390   : > { %v6993_v61 = vpop.f32.mrf.mxu2 }
 0x391   : > { %v6865_v58 = vmul.f32 %v8520_v4, %v6827_v54  ;;  %8416 = vst [vmem:[%s275_s10 + $0x8] sm:$0xff] %v8404_v1   ;;  %v8399_v0 = vpack.c.bf16 %v6993_v61, %v6973_v3 }
 0x393   : > { %v6901_v33 = vadd.f32 %v8519_v45, %v6865_v58  ;;  %8400 = vst [vmem:[%s275_s10] sm:$0xff] %v8399_v0  }
 0x395   : > { %v6933_v35 = vmax.f32 %v6901_v33, 0.0 }
 0x396   : > { %v6828_v17 = vpop.f32.mrf.mxu0 }
 0x397   : > { %v6829_v28 = vadd.f32 %v6828_v17, %v6740_v43  ;;  %v6949_v50 = vadd.f32 %v6933_v35, %v6931_v10 }
 0x399   : > { %v6866_v5 = vmul.f32 %v8520_v4, %v6829_v28 }
 0x39b   : > { %v6902_v14 = vadd.f32 %v8519_v45, %v6866_v5 }
 0x39d   : > { %v6934_v41 = vmax.f32 %v6902_v14, 0.0 }
 0x39f   : > { %v6950_v19 = vadd.f32 %v6934_v41, %v6932_v27 }
 0x3a1   : > { %7110 = vmatpush.msra.mxu2 %v6950_v19 }
 0x3a3   : > { %7111 = vmatpush.msra.mxu2 %v6949_v50 }
 0x3a4   : > { %8172 = vmatmul.msk.f32.vlgmr.msra.gmra.mxu2 %vm6952_vm12, %v10078_v37 }
 0x3b5   : > { %v7053_v24 = vpop.f32.mrf.mxu2 }
 0x3dc   : > { %v7073_v18 = vpop.f32.mrf.mxu3 }
 0x3dd   : > { %v8409_v15 = vpack.c.bf16 %v7073_v18, %v7053_v24 }
 0x3df   : > { %8417 = vst [vmem:[%s275_s10 + $0x10] sm:$0xff] %v8409_v15  }
 0x3fd   : > { %v7093_v9 = vpop.f32.mrf.mxu1 }
 0x427   : > { %v7113_v57 = vpop.f32.mrf.mxu2 }
 0x428   : > { %v8414_v52 = vpack.c.bf16 %v7113_v57, %v7093_v9 }
 0x42a   : > { %8418 = vst [vmem:[%s275_s10 + $0x18] sm:$0xff] %v8414_v52  }
 0x42b   : > { %8638 = shalt.err (!%p8635_p10)
}
 0x42c   : > { %s8688_s8 = smov 64   ;;  %s8689_s16 = smov 4  }
 0x42d   : > { %8453 = dma.vmem_to_hbm [thread:$0]  (%p8789_p3), %s7146_s9, 512, %s7148_s12, %s7133_s13, %s8688_s8, %s8688_s8, %s8689_s16  }
 0x42e PF: > { %s7162_s10 = sand.u32 1, %s8669_s18   ;;  %p10299_p12 = scmp.ge.s32.totalorder %s8681_s21, 2 }
 0x42f   : > { %s7163_s28 = scalar_lea.sflag [#allocation6], %s7162_s10 }
 0x430   : > { %p8467_p13 = pnand %p10299_p12, %p8755_p6 }
 0x432   : > { %p8468_p0 = pneg %p8467_p13 }
 0x434   : > { %8664 = dma.done.wait (%p8468_p0), %s7163_s28, 512  }
 0x435   : > { %8666 = vsyncadd (%p8468_p0), %s7163_s28, 4294966784  ;;  %p19_p5 = scmp.ge.s32.totalorder %s8779_s14, 4   ;;  %s10300_s18 = smov %s8673_s19 }
 0x436   : > { %s10301_s19 = smov %s8677_s20  ;;  %s10302_s20 = smov %s8795_s23 }
 0x437   : > { %s10303_s21 = smov %s8779_s14  ;;  %21 = sbr.rel (!%p19_p5) target bundleno = 6 (0x6), region = 96 }
 0x43c   :  { %7169 = vsyncpa [#allocation5], 1 }
 0x43d   :  { %7171 = vsyncpa [#allocation5 + $0x1], 1 }
 0x43e   :  { %7172 = vsyncpa [#allocation8], 1 }
 0x43f   :  { %7173 = vsyncpa [#allocation6], 1 }
 0x440   :  { %7175 = vsyncpa [#allocation6 + $0x1], 1 }

</bundles_post_ra>
